<compile_context>
chip_gen: v7x
topology: tpu7x:2x2x1
jax: 0.10.0
libtpu: 0.0.40
codegen_flags: <defaults>
</compile_context>

<pallas_src>
import functools

import jax
import jax.numpy as jnp
import numpy as np
from jax.experimental import pallas as pl
from jax.experimental.pallas import tpu as pltpu

_MIB = 1024 * 1024


def _round_up(x, m):
    return (x + m - 1) // m * m


def _cp(c):
    """Channel count padded to a multiple of 128 (lane-dense)."""
    return _round_up(max(int(c), 1), 128)


def _vmem_cap_bytes():
    """Per-generation VMEM budget: ~96 MiB on v5e/v6e, ~48 MiB on v7x."""
    try:
        info = pltpu.get_tpu_info()
        cap = getattr(info, "vmem_capacity_bytes", None)
        if cap:
            return int(max(40 * _MIB, min(100 * _MIB, (cap * 3) // 4)))
    except Exception:
        pass
    return 48 * _MIB


def _row_target():
    return 2048 if _vmem_cap_bytes() >= 90 * _MIB else 1024


def _apply_act(x, act):
    if act == "gelu":       # exact (erf-based) GELU == torch.nn.GELU() default
        return 0.5 * x * (1.0 + jax.lax.erf(x * 0.7071067811865475))
    if act == "tanh":
        return jnp.tanh(x)
    return x


# ----------------------------------------------------------------------------
# Kernel 1: act(A @ W + b)   (used for the Linear layer)
# ----------------------------------------------------------------------------
def _matmul_bias_act_kernel(a_ref, w_ref, b_ref, o_ref, *, act):
    x = jnp.dot(a_ref[...], w_ref[...], preferred_element_type=jnp.float32)
    o_ref[...] = _apply_act(x + b_ref[...], act).astype(o_ref.dtype)


def _pick_tile_n(N, tile_n):
    divs = [d for d in range(128, N + 1, 128) if N % d == 0]
    fit = [d for d in divs if d <= tile_n]
    tn = max(fit) if fit else min(divs)
    if N // tn < 2:                       # >=2 N blocks -> v7x dual-TC split
        smaller = [d for d in divs if d <= N // 2]
        if smaller:
            tn = max(smaller)
    return tn


def matmul_bias_act(a, w, b, act="none", out_dtype=jnp.bfloat16, tile_n=512):
    """a: (M, K); w: (K, N) bf16, N % 128 == 0; b: (1, N) f32."""
    M, K = a.shape
    Kw, N = w.shape
    assert K == Kw and N % 128 == 0
    a = a.astype(jnp.bfloat16)
    tn = _pick_tile_n(N, tile_n)
    osize = jnp.dtype(out_dtype).itemsize
    need = 2 * (M * K * 2 + K * tn * 2 + tn * 4 + M * tn * osize) + M * tn * 4
    vmem_limit = int(min(_vmem_cap_bytes(), max(32 * _MIB, 2 * need)))
    cost = pl.CostEstimate(
        flops=2 * M * K * N,
        transcendentals=M * N if act in ("gelu", "tanh") else 0,
        bytes_accessed=M * K * 2 + K * N * 2 + N * 4 + M * N * osize)
    return pl.pallas_call(
        functools.partial(_matmul_bias_act_kernel, act=act),
        out_shape=jax.ShapeDtypeStruct((M, N), out_dtype),
        grid=(N // tn,),
        in_specs=[
            pl.BlockSpec((M, K), lambda j: (0, 0)),
            pl.BlockSpec((K, tn), lambda j: (0, j)),
            pl.BlockSpec((1, tn), lambda j: (0, j)),
        ],
        out_specs=pl.BlockSpec((M, tn), lambda j: (0, j)),
        compiler_params=pltpu.CompilerParams(
            dimension_semantics=("parallel",),
            vmem_limit_bytes=vmem_limit),
        cost_estimate=cost,
    )(a, w, b)


# ----------------------------------------------------------------------------
# Kernel 2: fused 3x3 "same" conv on NHWC-flattened (B*H*W, Cpad) activations
# ----------------------------------------------------------------------------
def _conv3x3_kernel(a_ref, hh_ref, ww_ref, w_ref, b_ref, o_ref, acc_ref, *,
                    H, W, cout_p, act):
    TM = a_ref.shape[0]                      # whole images per block
    acc_ref[...] = jnp.zeros_like(acc_ref)
    for kh in range(3):
        for kw in range(3):
            dh, dw = kh - 1, kw - 1
            k = kh * 3 + kw
            wk = w_ref[:, k * cout_p:(k + 1) * cout_p]     # (Cin_p, Cout_p)
            d = dh * W + dw                  # source-row offset for this tap
            dst0, dst1 = max(0, -d), min(TM, TM - d)
            if dst1 <= dst0:
                continue
            part = jnp.dot(a_ref[dst0 + d:dst1 + d, :], wk,
                           preferred_element_type=jnp.float32)
            if dh == 0 and dw == 0:
                acc_ref[dst0:dst1, :] = acc_ref[dst0:dst1, :] + part
            else:
                hh = hh_ref[dst0:dst1, :]
                ww = ww_ref[dst0:dst1, :]
                valid = ((hh + dh >= 0) & (hh + dh < H)
                         & (ww + dw >= 0) & (ww + dw < W)).astype(jnp.float32)
                acc_ref[dst0:dst1, :] = acc_ref[dst0:dst1, :] + part * valid
    o_ref[...] = _apply_act(acc_ref[...] + b_ref[...], act).astype(o_ref.dtype)


# ----------------------------------------------------------------------------
# Kernel 3: fused ConvTranspose2d(k=3, stride=2, pad=1, out_pad=1)
# 4-output-phase decomposition; output columns = phase blocks (pr, pc).
# ----------------------------------------------------------------------------
_CONVT_CONTRIBS = (
    # ((dr, dc) input tap, (pr, pc) output phase, (kh, kw) kernel index)
    ((0, 0), (0, 0), (1, 1)),
    ((0, 0), (0, 1), (1, 2)),
    ((0, 0), (1, 0), (2, 1)),
    ((0, 0), (1, 1), (2, 2)),
    ((0, 1), (0, 1), (1, 0)),
    ((0, 1), (1, 1), (2, 0)),
    ((1, 0), (1, 0), (0, 1)),
    ((1, 0), (1, 1), (0, 2)),
    ((1, 1), (1, 1), (0, 0)),
)


def _convT3x3_s2_kernel(a_ref, hh_ref, ww_ref, w_ref, b_ref, o_ref, acc_ref,
                        *, H, W, cout_p, act):
    TM = a_ref.shape[0]
    acc_ref[...] = jnp.zeros_like(acc_ref)
    for i, ((dr, dc), (pr, pc), _) in enumerate(_CONVT_CONTRIBS):
        wk = w_ref[:, i * cout_p:(i + 1) * cout_p]
        d = dr * W + dc
        dst0, dst1 = 0, TM - d
        if dst1 <= dst0:
            continue
        part = jnp.dot(a_ref[dst0 + d:dst1 + d, :], wk,
                       preferred_element_type=jnp.float32)
        c0 = (pr * 2 + pc) * cout_p
        if dr == 0 and dc == 0:
            acc_ref[dst0:dst1, c0:c0 + cout_p] = (
                acc_ref[dst0:dst1, c0:c0 + cout_p] + part)
        else:
            hh = hh_ref[dst0:dst1, :]
            ww = ww_ref[dst0:dst1, :]
            valid = ((hh + dr < H) & (ww + dc < W)).astype(jnp.float32)
            acc_ref[dst0:dst1, c0:c0 + cout_p] = (
                acc_ref[dst0:dst1, c0:c0 + cout_p] + part * valid)
    o_ref[...] = _apply_act(acc_ref[...] + b_ref[...], act).astype(o_ref.dtype)


# ----------------------------------------------------------------------------
# Shared pallas_call wrapper for both conv kernels
# ----------------------------------------------------------------------------
def _pick_rows_per_block(B, HW, target_rows):
    legal = [g for g in range(1, B + 1)
             if B % g == 0 and ((g * HW) % 8 == 0 or g == B)]
    fitting = [g for g in legal if g * HW <= target_rows]
    multi = [g for g in fitting if B // g >= 2]      # keep v7x dual-TC busy
    if multi:
        return max(multi)
    if fitting:
        return max(fitting)
    return min(legal)


def _spatial_coords(B, H, W):
    hw = jnp.arange(H * W, dtype=jnp.int32)
    hh = jnp.tile(hw // W, B).reshape(B * H * W, 1)
    ww = jnp.tile(hw % W, B).reshape(B * H * W, 1)
    return hh, ww


def _conv_pallas_call(kernel, x2d, wmat, bias, *, B, H, W, cout_p, out_cols,
                      act, out_dtype):
    R, cin_p = x2d.shape
    HW = H * W
    assert R == B * HW and cin_p % 128 == 0 and out_cols % 128 == 0
    g = _pick_rows_per_block(B, HW, _row_target())
    TM = g * HW
    grid = (R // TM,)
    hh_idx, ww_idx = _spatial_coords(B, H, W)

    wcols = wmat.shape[1]
    osize = jnp.dtype(out_dtype).itemsize
    need = (2 * (TM * cin_p * 2 + cin_p * wcols * 2 + TM * out_cols * osize
                 + 2 * TM * 4 + out_cols * 4)
            + TM * out_cols * 4                 # f32 accumulator scratch
            + 4 * TM * cout_p * 4)              # live temporaries headroom
    vmem_limit = int(min(_vmem_cap_bytes(), max(32 * _MIB, 2 * need)))
    cost = pl.CostEstimate(
        flops=2 * R * cin_p * wcols,
        transcendentals=R * out_cols,
        bytes_accessed=(R * cin_p * 2 + cin_p * wcols * 2 + out_cols * 4
                        + R * out_cols * osize + 2 * R * 4))
    return pl.pallas_call(
        functools.partial(kernel, H=H, W=W, cout_p=cout_p, act=act),
        out_shape=jax.ShapeDtypeStruct((R, out_cols), out_dtype),
        grid=grid,
        in_specs=[
            pl.BlockSpec((TM, cin_p), lambda i: (i, 0)),
            pl.BlockSpec((TM, 1), lambda i: (i, 0)),
            pl.BlockSpec((TM, 1), lambda i: (i, 0)),
            pl.BlockSpec((cin_p, wcols), lambda i: (0, 0)),   # weights resident
            pl.BlockSpec((1, out_cols), lambda i: (0, 0)),
        ],
        out_specs=pl.BlockSpec((TM, out_cols), lambda i: (i, 0)),
        scratch_shapes=[pltpu.VMEM((TM, out_cols), jnp.float32)],
        compiler_params=pltpu.CompilerParams(
            dimension_semantics=("parallel",),
            vmem_limit_bytes=vmem_limit),
        cost_estimate=cost,
    )(x2d, hh_idx, ww_idx, wmat, bias)


def conv3x3_same(x2d, wmat, bias, *, B, H, W, cout_p, act):
    return _conv_pallas_call(_conv3x3_kernel, x2d, wmat, bias, B=B, H=H, W=W,
                             cout_p=cout_p, out_cols=cout_p, act=act,
                             out_dtype=jnp.bfloat16)


def convT3x3_s2(x2d, wmat, bias, *, B, H, W, cout_p, act,
                out_dtype=jnp.bfloat16):
    y = _conv_pallas_call(_convT3x3_s2_kernel, x2d, wmat, bias, B=B, H=H, W=W,
                          cout_p=cout_p, out_cols=4 * cout_p, act=act,
                          out_dtype=out_dtype)
    # De-interleave the 4 phase column-blocks into row-major (b, 2h+pr, 2w+pc).
    # TODO(synk): fold this de-interleave into the kernel's out_specs (write
    # phase rows into an output array whose raw layout already equals the
    # row-major (B*2H*2W, C) slab) to save one HBM round trip per convT layer.
    y = y.reshape(B, H, W, 2, 2, cout_p).transpose(0, 1, 3, 2, 4, 5)
    return y.reshape(B * 2 * H * 2 * W, cout_p)


# ----------------------------------------------------------------------------
# One-time weight packing
# ----------------------------------------------------------------------------
def _pack_conv3x3_weight(w, cin_p, cout_p):
    """torch Conv2d weight (C_out, C_in, 3, 3) -> bf16 (cin_p, 9*cout_p)."""
    co, ci = int(w.shape[0]), int(w.shape[1])
    blocks = []
    for kh in range(3):
        for kw in range(3):
            wk = jnp.transpose(w[:, :, kh, kw])                 # (ci, co)
            blocks.append(jnp.pad(wk, ((0, cin_p - ci), (0, cout_p - co))))
    return jnp.concatenate(blocks, axis=1).astype(jnp.bfloat16)


def _pack_convT3x3_s2_weight(w, cin_p, cout_p):
    """torch ConvTranspose2d weight (C_in, C_out, 3, 3) -> bf16
    (cin_p, 9*cout_p), one column block per _CONVT_CONTRIBS entry."""
    ci, co = int(w.shape[0]), int(w.shape[1])
    blocks = []
    for (_, _, (kh, kw)) in _CONVT_CONTRIBS:
        blocks.append(jnp.pad(w[:, :, kh, kw],
                              ((0, cin_p - ci), (0, cout_p - co))))
    return jnp.concatenate(blocks, axis=1).astype(jnp.bfloat16)


def _pack_bias(b, cout_p, reps=1):
    c = int(b.shape[0])
    bp = jnp.pad(b, (0, cout_p - c)).astype(jnp.float32)
    return jnp.tile(bp, reps).reshape(1, reps * cout_p)


def _pack_linear(w, b, s, c_out, cout_p):
    """torch Linear (c_out*s*s, latent) -> bf16 (latent, s*s*cout_p) so the
    output is directly the NHWC-flattened, channel-padded activation."""
    latent = int(w.shape[1])
    wt = w.reshape(c_out, s, s, latent).transpose(1, 2, 0, 3)
    wt = jnp.pad(wt, ((0, 0), (0, 0), (0, cout_p - c_out), (0, 0)))
    wt = wt.reshape(s * s * cout_p, latent).T
    bt = b.reshape(c_out, s, s).transpose(1, 2, 0)
    bt = jnp.pad(bt, ((0, 0), (0, 0), (0, cout_p - c_out)))
    return (wt.astype(jnp.bfloat16),
            bt.reshape(1, s * s * cout_p).astype(jnp.float32))


# ----------------------------------------------------------------------------
# Decoder parameters, packing, forward
# ----------------------------------------------------------------------------
def init_decoder_params(key, img_size, num_input_channels, base_channel_size,
                        latent_dim):
    c_hid = base_channel_size
    lin_out = 2 * (img_size * img_size // 64) * c_hid
    ks = jax.random.split(key, 12)

    def u(k, shape, fan_in):
        s = 1.0 / np.sqrt(fan_in)
        return jax.random.uniform(k, shape, jnp.float32, -s, s)

    return {
        "lin_w": u(ks[0], (lin_out, latent_dim), latent_dim),
        "lin_b": u(ks[1], (lin_out,), latent_dim),
        "ct1_w": u(ks[2], (2 * c_hid, 2 * c_hid, 3, 3), 2 * c_hid * 9),
        "ct1_b": u(ks[3], (2 * c_hid,), 2 * c_hid * 9),
        "c1_w": u(ks[4], (2 * c_hid, 2 * c_hid, 3, 3), 2 * c_hid * 9),
        "c1_b": u(ks[5], (2 * c_hid,), 2 * c_hid * 9),
        "ct2_w": u(ks[6], (2 * c_hid, c_hid, 3, 3), 2 * c_hid * 9),
        "ct2_b": u(ks[7], (c_hid,), 2 * c_hid * 9),
        "c2_w": u(ks[8], (c_hid, c_hid, 3, 3), c_hid * 9),
        "c2_b": u(ks[9], (c_hid,), c_hid * 9),
        "ct3_w": u(ks[10], (c_hid, num_input_channels, 3, 3), c_hid * 9),
        "ct3_b": u(ks[11], (num_input_channels,), c_hid * 9),
    }


def prepare_decoder_params(params, img_size, base_channel_size,
                           num_input_channels):
    c_hid = base_channel_size
    s = img_size // 8
    c1, c2, c3 = 2 * c_hid, c_hid, num_input_channels
    c1p, c2p, c3p = _cp(c1), _cp(c2), _cp(c3)
    prep = {}
    prep["lin_w"], prep["lin_b"] = _pack_linear(params["lin_w"],
                                                params["lin_b"], s, c1, c1p)
    prep["ct1_w"] = _pack_convT3x3_s2_weight(params["ct1_w"], c1p, c1p)
    prep["ct1_b"] = _pack_bias(params["ct1_b"], c1p, reps=4)
    prep["c1_w"] = _pack_conv3x3_weight(params["c1_w"], c1p, c1p)
    prep["c1_b"] = _pack_bias(params["c1_b"], c1p)
    prep["ct2_w"] = _pack_convT3x3_s2_weight(params["ct2_w"], c1p, c2p)
    prep["ct2_b"] = _pack_bias(params["ct2_b"], c2p, reps=4)
    prep["c2_w"] = _pack_conv3x3_weight(params["c2_w"], c2p, c2p)
    prep["c2_b"] = _pack_bias(params["c2_b"], c2p)
    prep["ct3_w"] = _pack_convT3x3_s2_weight(params["ct3_w"], c2p, c3p)
    prep["ct3_b"] = _pack_bias(params["ct3_b"], c3p, reps=4)
    return prep


def decoder_forward(prep, x, img_size, base_channel_size, num_input_channels):
    c_hid = base_channel_size
    s = img_size // 8
    B = x.shape[0]
    c1p, c2p, c3p = _cp(2 * c_hid), _cp(c_hid), _cp(num_input_channels)

    # Linear + GELU; columns are pre-permuted/padded so the result reshapes
    # for free into the NHWC-flattened, channel-padded activation slab.
    y = matmul_bias_act(x, prep["lin_w"], prep["lin_b"], act="gelu")
    y = y.reshape(B * s * s, c1p)

    y = convT3x3_s2(y, prep["ct1_w"], prep["ct1_b"], B=B, H=s, W=s,
                    cout_p=c1p, act="gelu")
    y = conv3x3_same(y, prep["c1_w"], prep["c1_b"], B=B, H=2 * s, W=2 * s,
                     cout_p=c1p, act="gelu")
    y = convT3x3_s2(y, prep["ct2_w"], prep["ct2_b"], B=B, H=2 * s, W=2 * s,
                    cout_p=c2p, act="gelu")
    y = conv3x3_same(y, prep["c2_w"], prep["c2_b"], B=B, H=4 * s, W=4 * s,
                     cout_p=c2p, act="gelu")
    y = convT3x3_s2(y, prep["ct3_w"], prep["ct3_b"], B=B, H=4 * s, W=4 * s,
                    cout_p=c3p, act="tanh")        # bf16: tanh output in [-1,1]

    # Single epilogue: drop channel padding, NHWC -> NCHW, upcast to f32.
    y = y.reshape(B, img_size, img_size, c3p)[:, :, :, :num_input_channels]
    return jnp.transpose(y, (0, 3, 1, 2)).astype(jnp.float32)


# ----------------------------------------------------------------------------
# Pure-JAX f32 reference using real conv / conv-transpose math (validation)
# ----------------------------------------------------------------------------
def decoder_reference(params, x, img_size, base_channel_size,
                      num_input_channels):
    c_hid = base_channel_size
    s = img_size // 8
    B = x.shape[0]

    def gelu(v):
        return 0.5 * v * (1.0 + jax.lax.erf(v * 0.7071067811865475))

    def conv(y, w, b):
        out = jax.lax.conv_general_dilated(
            y, w, window_strides=(1, 1), padding=((1, 1), (1, 1)),
            dimension_numbers=("NCHW", "OIHW", "NCHW"))
        return out + b.reshape(1, -1, 1, 1)

    def convT(y, w, b):
        wc = jnp.transpose(jnp.flip(w, (2, 3)), (1, 0, 2, 3))  # (Cout,Cin,k,k)
        out = jax.lax.conv_general_dilated(
            y, wc, window_strides=(1, 1), padding=((1, 2), (1, 2)),
            lhs_dilation=(2, 2),
            dimension_numbers=("NCHW", "OIHW", "NCHW"))
        return out + b.reshape(1, -1, 1, 1)

    y = gelu(x @ params["lin_w"].T + params["lin_b"])
    y = y.reshape(B, 2 * c_hid, s, s)
    y = gelu(convT(y, params["ct1_w"], params["ct1_b"]))
    y = gelu(conv(y, params["c1_w"], params["c1_b"]))
    y = gelu(convT(y, params["ct2_w"], params["ct2_b"]))
    y = gelu(conv(y, params["c2_w"], params["c2_b"]))
    y = jnp.tanh(convT(y, params["ct3_w"], params["ct3_b"]))
    return y


if __name__ == "__main__":
    # Small CIFAR-like decoder config.
    img_size = 16
    num_input_channels = 3
    base_channel_size = 4          # c_hid
    latent_dim = 8
    batch = 2

    key = jax.random.PRNGKey(0)
    pkey, xkey = jax.random.split(key)
    params = init_decoder_params(pkey, img_size, num_input_channels,
                                 base_channel_size, latent_dim)
    prep = prepare_decoder_params(params, img_size, base_channel_size,
                                  num_input_channels)
    x = jax.random.normal(xkey, (batch, latent_dim), jnp.float32)

    fwd = jax.jit(functools.partial(decoder_forward, img_size=img_size,
                                    base_channel_size=base_channel_size,
                                    num_input_channels=num_input_channels))
    out = jax.block_until_ready(fwd(prep, x))
    assert out.shape == (batch, num_input_channels, img_size, img_size), out.shape

    ref = jax.block_until_ready(
        decoder_reference(params, x, img_size, base_channel_size,
                          num_input_channels))
    np.testing.assert_allclose(np.asarray(out), np.asarray(ref),
                               rtol=8e-2, atol=8e-2)

    print("KERNEL_OK")
</pallas_src>

<mosaic_0001>
module attributes {stable_mosaic.version = 11 : i64} {
  func.func @_matmul_bias_act_kernel(%arg0: i32, %arg1: memref<2x8xbf16, #tpu.memory_space<vmem>>, %arg2: memref<8x256xbf16, #tpu.memory_space<vmem>>, %arg3: memref<1x256xf32, #tpu.memory_space<vmem>>, %arg4: memref<2x256xbf16, #tpu.memory_space<vmem>>) attributes {dimension_semantics = [#tpu.dimension_semantics<parallel>], iteration_bounds = array<i64: 2>, scalar_prefetch = 0 : i64, scratch_operands = 0 : i64, tpu.core_type = #tpu.core_type<tc>, window_params = [{pipeline_mode = #tpu.pipeline_mode<synchronous>, transform_indices = @transform_0, window_bounds = array<i64: 2, 8>}, {transform_indices = @transform_1, window_bounds = array<i64: 8, 256>}, {transform_indices = @transform_2, window_bounds = array<i64: 1, 256>}, {transform_indices = @transform_3, window_bounds = array<i64: 2, 256>}]} {
    %c0 = arith.constant 0 : index
    %c0_0 = arith.constant 0 : index
    %0 = vector.load %arg1[%c0, %c0_0] : memref<2x8xbf16, #tpu.memory_space<vmem>>, vector<2x8xbf16>
    %c0_1 = arith.constant 0 : index
    %c0_2 = arith.constant 0 : index
    %1 = vector.load %arg2[%c0_1, %c0_2] : memref<8x256xbf16, #tpu.memory_space<vmem>>, vector<8x256xbf16>
    %cst = arith.constant dense<0.000000e+00> : vector<2x256xf32>
    %2 = tpu.matmul %0, %1, %cst {dimension_numbers = #tpu.dot_dimension_numbers<[1], [0], [0], [1], [0, 0, 1, 1], [], []>} : vector<2x8xbf16>, vector<8x256xbf16>, vector<2x256xf32> -> vector<2x256xf32>
    %c0_3 = arith.constant 0 : index
    %c0_4 = arith.constant 0 : index
    %3 = vector.load %arg3[%c0_3, %c0_4] : memref<1x256xf32, #tpu.memory_space<vmem>>, vector<1x256xf32>
    %4 = vector.broadcast %3 : vector<1x256xf32> to vector<2x256xf32>
    %5 = arith.addf %2, %4 : vector<2x256xf32>
    %cst_5 = arith.constant 5.000000e-01 : f32
    %6 = vector.broadcast %cst_5 : f32 to vector<2x256xf32>
    %7 = arith.mulf %6, %5 : vector<2x256xf32>
    %cst_6 = arith.constant 0.707106769 : f32
    %8 = vector.broadcast %cst_6 : f32 to vector<2x256xf32>
    %9 = arith.mulf %5, %8 : vector<2x256xf32>
    %10 = math.erf %9 : vector<2x256xf32>
    %cst_7 = arith.constant 1.000000e+00 : f32
    %11 = vector.broadcast %cst_7 : f32 to vector<2x256xf32>
    %12 = arith.addf %11, %10 : vector<2x256xf32>
    %13 = arith.mulf %7, %12 : vector<2x256xf32>
    %14 = arith.truncf %13 : vector<2x256xf32> to vector<2x256xbf16>
    %c0_8 = arith.constant 0 : index
    %c0_9 = arith.constant 0 : index
    %15 = vector.load %arg4[%c0_8, %c0_9] : memref<2x256xbf16, #tpu.memory_space<vmem>>, vector<2x256xbf16>
    tpu.vector_store %arg4[%c0_8, %c0_9], %14 {strides = array<i32>} : memref<2x256xbf16, #tpu.memory_space<vmem>>, vector<2x256xbf16>,
    return
  }
  func.func @transform_0(%arg0: i32) -> (i32, i32) {
    %c0_i32 = arith.constant 0 : i32
    %c0_i32_0 = arith.constant 0 : i32
    %c0_i32_1 = arith.constant 0 : i32
    return %c0_i32, %c0_i32_0 : i32, i32
  }
  func.func @transform_1(%arg0: i32) -> (i32, i32) {
    %c0_i32 = arith.constant 0 : i32
    %c0_i32_0 = arith.constant 0 : i32
    return %c0_i32, %arg0 : i32, i32
  }
  func.func @transform_2(%arg0: i32) -> (i32, i32) {
    %c0_i32 = arith.constant 0 : i32
    %c0_i32_0 = arith.constant 0 : i32
    return %c0_i32, %arg0 : i32, i32
  }
  func.func @transform_3(%arg0: i32) -> (i32, i32) {
    %c0_i32 = arith.constant 0 : i32
    %c0_i32_0 = arith.constant 0 : i32
    return %c0_i32, %arg0 : i32, i32
  }
}

module attributes {stable_mosaic.version = 11 : i64} {
  func.func @_convT3x3_s2_kernel(%arg0: i32, %arg1: memref<16x128xbf16, #tpu.memory_space<vmem>>, %arg2: memref<16x1xi32, #tpu.memory_space<vmem>>, %arg3: memref<16x1xi32, #tpu.memory_space<vmem>>, %arg4: memref<128x1152xbf16, #tpu.memory_space<vmem>>, %arg5: memref<1x512xf32, #tpu.memory_space<vmem>>, %arg6: memref<16x512xbf16, #tpu.memory_space<vmem>>, %arg7: memref<16x512xf32, #tpu.memory_space<vmem>>) attributes {dimension_semantics = [#tpu.dimension_semantics<parallel>], iteration_bounds = array<i64: 2>, scalar_prefetch = 0 : i64, scratch_operands = 1 : i64, tpu.core_type = #tpu.core_type<tc>, window_params = [{transform_indices = @transform_0, window_bounds = array<i64: 16, 128>}, {transform_indices = @transform_1, window_bounds = array<i64: 16, 1>}, {transform_indices = @transform_2, window_bounds = array<i64: 16, 1>}, {pipeline_mode = #tpu.pipeline_mode<synchronous>, transform_indices = @transform_3, window_bounds = array<i64: 128, 1152>}, {pipeline_mode = #tpu.pipeline_mode<synchronous>, transform_indices = @transform_4, window_bounds = array<i64: 1, 512>}, {transform_indices = @transform_5, window_bounds = array<i64: 16, 512>}]} {
    %cst = arith.constant 0.000000e+00 : f32
    %0 = vector.broadcast %cst : f32 to vector<16x512xf32>
    %c0 = arith.constant 0 : index
    %c0_0 = arith.constant 0 : index
    %1 = vector.load %arg7[%c0, %c0_0] : memref<16x512xf32, #tpu.memory_space<vmem>>, vector<16x512xf32>
    tpu.vector_store %arg7[%c0, %c0_0], %0 {strides = array<i32>} : memref<16x512xf32, #tpu.memory_space<vmem>>, vector<16x512xf32>,
    %c0_1 = arith.constant 0 : index
    %c0_2 = arith.constant 0 : index
    %2 = vector.load %arg4[%c0_1, %c0_2] : memref<128x1152xbf16, #tpu.memory_space<vmem>>, vector<128x128xbf16>
    %c0_3 = arith.constant 0 : index
    %c0_4 = arith.constant 0 : index
    %3 = vector.load %arg1[%c0_3, %c0_4] : memref<16x128xbf16, #tpu.memory_space<vmem>>, vector<16x128xbf16>
    %cst_5 = arith.constant dense<0.000000e+00> : vector<16x128xf32>
    %4 = tpu.matmul %3, %2, %cst_5 {dimension_numbers = #tpu.dot_dimension_numbers<[1], [0], [0], [1], [0, 0, 1, 1], [], []>} : vector<16x128xbf16>, vector<128x128xbf16>, vector<16x128xf32> -> vector<16x128xf32>
    %c0_6 = arith.constant 0 : index
    %c0_7 = arith.constant 0 : index
    %5 = vector.load %arg7[%c0_6, %c0_7] : memref<16x512xf32, #tpu.memory_space<vmem>>, vector<16x128xf32>
    %6 = arith.addf %5, %4 : vector<16x128xf32>
    %c0_8 = arith.constant 0 : index
    %c0_9 = arith.constant 0 : index
    %7 = vector.load %arg7[%c0_8, %c0_9] : memref<16x512xf32, #tpu.memory_space<vmem>>, vector<16x128xf32>
    tpu.vector_store %arg7[%c0_8, %c0_9], %6 {strides = array<i32>} : memref<16x512xf32, #tpu.memory_space<vmem>>, vector<16x128xf32>,
    %c0_10 = arith.constant 0 : index
    %c128 = arith.constant 128 : index
    %8 = vector.load %arg4[%c0_10, %c128] : memref<128x1152xbf16, #tpu.memory_space<vmem>>, vector<128x128xbf16>
    %c0_11 = arith.constant 0 : index
    %c0_12 = arith.constant 0 : index
    %9 = vector.load %arg1[%c0_11, %c0_12] : memref<16x128xbf16, #tpu.memory_space<vmem>>, vector<16x128xbf16>
    %cst_13 = arith.constant dense<0.000000e+00> : vector<16x128xf32>
    %10 = tpu.matmul %9, %8, %cst_13 {dimension_numbers = #tpu.dot_dimension_numbers<[1], [0], [0], [1], [0, 0, 1, 1], [], []>} : vector<16x128xbf16>, vector<128x128xbf16>, vector<16x128xf32> -> vector<16x128xf32>
    %c0_14 = arith.constant 0 : index
    %c128_15 = arith.constant 128 : index
    %11 = vector.load %arg7[%c0_14, %c128_15] : memref<16x512xf32, #tpu.memory_space<vmem>>, vector<16x128xf32>
    %12 = arith.addf %11, %10 : vector<16x128xf32>
    %c0_16 = arith.constant 0 : index
    %c128_17 = arith.constant 128 : index
    %13 = vector.load %arg7[%c0_16, %c128_17] : memref<16x512xf32, #tpu.memory_space<vmem>>, vector<16x128xf32>
    tpu.vector_store %arg7[%c0_16, %c128_17], %12 {strides = array<i32>} : memref<16x512xf32, #tpu.memory_space<vmem>>, vector<16x128xf32>,
    %c0_18 = arith.constant 0 : index
    %c256 = arith.constant 256 : index
    %14 = vector.load %arg4[%c0_18, %c256] : memref<128x1152xbf16, #tpu.memory_space<vmem>>, vector<128x128xbf16>
    %c0_19 = arith.constant 0 : index
    %c0_20 = arith.constant 0 : index
    %15 = vector.load %arg1[%c0_19, %c0_20] : memref<16x128xbf16, #tpu.memory_space<vmem>>, vector<16x128xbf16>
    %cst_21 = arith.constant dense<0.000000e+00> : vector<16x128xf32>
    %16 = tpu.matmul %15, %14, %cst_21 {dimension_numbers = #tpu.dot_dimension_numbers<[1], [0], [0], [1], [0, 0, 1, 1], [], []>} : vector<16x128xbf16>, vector<128x128xbf16>, vector<16x128xf32> -> vector<16x128xf32>
    %c0_22 = arith.constant 0 : index
    %c256_23 = arith.constant 256 : index
    %17 = vector.load %arg7[%c0_22, %c256_23] : memref<16x512xf32, #tpu.memory_space<vmem>>, vector<16x128xf32>
    %18 = arith.addf %17, %16 : vector<16x128xf32>
    %c0_24 = arith.constant 0 : index
    %c256_25 = arith.constant 256 : index
    %19 = vector.load %arg7[%c0_24, %c256_25] : memref<16x512xf32, #tpu.memory_space<vmem>>, vector<16x128xf32>
    tpu.vector_store %arg7[%c0_24, %c256_25], %18 {strides = array<i32>} : memref<16x512xf32, #tpu.memory_space<vmem>>, vector<16x128xf32>,
    %c0_26 = arith.constant 0 : index
    %c384 = arith.constant 384 : index
    %20 = vector.load %arg4[%c0_26, %c384] : memref<128x1152xbf16, #tpu.memory_space<vmem>>, vector<128x128xbf16>
    %c0_27 = arith.constant 0 : index
    %c0_28 = arith.constant 0 : index
    %21 = vector.load %arg1[%c0_27, %c0_28] : memref<16x128xbf16, #tpu.memory_space<vmem>>, vector<16x128xbf16>
    %cst_29 = arith.constant dense<0.000000e+00> : vector<16x128xf32>
    %22 = tpu.matmul %21, %20, %cst_29 {dimension_numbers = #tpu.dot_dimension_numbers<[1], [0], [0], [1], [0, 0, 1, 1], [], []>} : vector<16x128xbf16>, vector<128x128xbf16>, vector<16x128xf32> -> vector<16x128xf32>
    %c0_30 = arith.constant 0 : index
    %c384_31 = arith.constant 384 : index
    %23 = vector.load %arg7[%c0_30, %c384_31] : memref<16x512xf32, #tpu.memory_space<vmem>>, vector<16x128xf32>
    %24 = arith.addf %23, %22 : vector<16x128xf32>
    %c0_32 = arith.constant 0 : index
    %c384_33 = arith.constant 384 : index
    %25 = vector.load %arg7[%c0_32, %c384_33] : memref<16x512xf32, #tpu.memory_space<vmem>>, vector<16x128xf32>
    tpu.vector_store %arg7[%c0_32, %c384_33], %24 {strides = array<i32>} : memref<16x512xf32, #tpu.memory_space<vmem>>, vector<16x128xf32>,
    %c0_34 = arith.constant 0 : index
    %c512 = arith.constant 512 : index
    %26 = vector.load %arg4[%c0_34, %c512] : memref<128x1152xbf16, #tpu.memory_space<vmem>>, vector<128x128xbf16>
    %c1 = arith.constant 1 : index
    %c0_35 = arith.constant 0 : index
    %27 = vector.load %arg1[%c1, %c0_35] : memref<16x128xbf16, #tpu.memory_space<vmem>>, vector<15x128xbf16>
    %cst_36 = arith.constant dense<0.000000e+00> : vector<15x128xf32>
    %28 = tpu.matmul %27, %26, %cst_36 {dimension_numbers = #tpu.dot_dimension_numbers<[1], [0], [0], [1], [0, 0, 1, 1], [], []>} : vector<15x128xbf16>, vector<128x128xbf16>, vector<15x128xf32> -> vector<15x128xf32>
    %c0_37 = arith.constant 0 : index
    %c0_38 = arith.constant 0 : index
    %29 = vector.load %arg2[%c0_37, %c0_38] : memref<16x1xi32, #tpu.memory_space<vmem>>, vector<15x1xi32>
    %c0_39 = arith.constant 0 : index
    %c0_40 = arith.constant 0 : index
    %30 = vector.load %arg3[%c0_39, %c0_40] : memref<16x1xi32, #tpu.memory_space<vmem>>, vector<15x1xi32>
    %c0_i32 = arith.constant 0 : i32
    %31 = vector.broadcast %c0_i32 : i32 to vector<15x1xi32>
    %32 = arith.addi %29, %31 : vector<15x1xi32>
    %c4_i32 = arith.constant 4 : i32
    %33 = vector.broadcast %c4_i32 : i32 to vector<15x1xi32>
    %34 = arith.cmpi slt, %32, %33 : vector<15x1xi32>
    %c1_i32 = arith.constant 1 : i32
    %35 = vector.broadcast %c1_i32 : i32 to vector<15x1xi32>
    %36 = arith.addi %30, %35 : vector<15x1xi32>
    %c4_i32_41 = arith.constant 4 : i32
    %37 = vector.broadcast %c4_i32_41 : i32 to vector<15x1xi32>
    %38 = arith.cmpi slt, %36, %37 : vector<15x1xi32>
    %39 = arith.andi %34, %38 : vector<15x1xi1>
    %40 = arith.extui %39 : vector<15x1xi1> to vector<15x1xi32>
    %41 = arith.sitofp %40 : vector<15x1xi32> to vector<15x1xf32>
    %c0_42 = arith.constant 0 : index
    %c128_43 = arith.constant 128 : index
    %42 = vector.load %arg7[%c0_42, %c128_43] : memref<16x512xf32, #tpu.memory_space<vmem>>, vector<15x128xf32>
    %43 = vector.broadcast %41 : vector<15x1xf32> to vector<15x128xf32>
    %44 = arith.mulf %28, %43 : vector<15x128xf32>
    %45 = arith.addf %42, %44 : vector<15x128xf32>
    %c0_44 = arith.constant 0 : index
    %c128_45 = arith.constant 128 : index
    %46 = vector.load %arg7[%c0_44, %c128_45] : memref<16x512xf32, #tpu.memory_space<vmem>>, vector<15x128xf32>
    tpu.vector_store %arg7[%c0_44, %c128_45], %45 {strides = array<i32>} : memref<16x512xf32, #tpu.memory_space<vmem>>, vector<15x128xf32>,
    %c0_46 = arith.constant 0 : index
    %c640 = arith.constant 640 : index
    %47 = vector.load %arg4[%c0_46, %c640] : memref<128x1152xbf16, #tpu.memory_space<vmem>>, vector<128x128xbf16>
    %c1_47 = arith.constant 1 : index
    %c0_48 = arith.constant 0 : index
    %48 = vector.load %arg1[%c1_47, %c0_48] : memref<16x128xbf16, #tpu.memory_space<vmem>>, vector<15x128xbf16>
    %cst_49 = arith.constant dense<0.000000e+00> : vector<15x128xf32>
    %49 = tpu.matmul %48, %47, %cst_49 {dimension_numbers = #tpu.dot_dimension_numbers<[1], [0], [0], [1], [0, 0, 1, 1], [], []>} : vector<15x128xbf16>, vector<128x128xbf16>, vector<15x128xf32> -> vector<15x128xf32>
    %c0_50 = arith.constant 0 : index
    %c0_51 = arith.constant 0 : index
    %50 = vector.load %arg2[%c0_50, %c0_51] : memref<16x1xi32, #tpu.memory_space<vmem>>, vector<15x1xi32>
    %c0_52 = arith.constant 0 : index
    %c0_53 = arith.constant 0 : index
    %51 = vector.load %arg3[%c0_52, %c0_53] : memref<16x1xi32, #tpu.memory_space<vmem>>, vector<15x1xi32>
    %c0_i32_54 = arith.constant 0 : i32
    %52 = vector.broadcast %c0_i32_54 : i32 to vector<15x1xi32>
    %53 = arith.addi %50, %52 : vector<15x1xi32>
    %c4_i32_55 = arith.constant 4 : i32
    %54 = vector.broadcast %c4_i32_55 : i32 to vector<15x1xi32>
    %55 = arith.cmpi slt, %53, %54 : vector<15x1xi32>
    %c1_i32_56 = arith.constant 1 : i32
    %56 = vector.broadcast %c1_i32_56 : i32 to vector<15x1xi32>
    %57 = arith.addi %51, %56 : vector<15x1xi32>
    %c4_i32_57 = arith.constant 4 : i32
    %58 = vector.broadcast %c4_i32_57 : i32 to vector<15x1xi32>
    %59 = arith.cmpi slt, %57, %58 : vector<15x1xi32>
    %60 = arith.andi %55, %59 : vector<15x1xi1>
    %61 = arith.extui %60 : vector<15x1xi1> to vector<15x1xi32>
    %62 = arith.sitofp %61 : vector<15x1xi32> to vector<15x1xf32>
    %c0_58 = arith.constant 0 : index
    %c384_59 = arith.constant 384 : index
    %63 = vector.load %arg7[%c0_58, %c384_59] : memref<16x512xf32, #tpu.memory_space<vmem>>, vector<15x128xf32>
    %64 = vector.broadcast %62 : vector<15x1xf32> to vector<15x128xf32>
    %65 = arith.mulf %49, %64 : vector<15x128xf32>
    %66 = arith.addf %63, %65 : vector<15x128xf32>
    %c0_60 = arith.constant 0 : index
    %c384_61 = arith.constant 384 : index
    %67 = vector.load %arg7[%c0_60, %c384_61] : memref<16x512xf32, #tpu.memory_space<vmem>>, vector<15x128xf32>
    tpu.vector_store %arg7[%c0_60, %c384_61], %66 {strides = array<i32>} : memref<16x512xf32, #tpu.memory_space<vmem>>, vector<15x128xf32>,
    %c0_62 = arith.constant 0 : index
    %c768 = arith.constant 768 : index
    %68 = vector.load %arg4[%c0_62, %c768] : memref<128x1152xbf16, #tpu.memory_space<vmem>>, vector<128x128xbf16>
    %c4 = arith.constant 4 : index
    %c0_63 = arith.constant 0 : index
    %69 = vector.load %arg1[%c4, %c0_63] : memref<16x128xbf16, #tpu.memory_space<vmem>>, vector<12x128xbf16>
    %cst_64 = arith.constant dense<0.000000e+00> : vector<12x128xf32>
    %70 = tpu.matmul %69, %68, %cst_64 {dimension_numbers = #tpu.dot_dimension_numbers<[1], [0], [0], [1], [0, 0, 1, 1], [], []>} : vector<12x128xbf16>, vector<128x128xbf16>, vector<12x128xf32> -> vector<12x128xf32>
    %c0_65 = arith.constant 0 : index
    %c0_66 = arith.constant 0 : index
    %71 = vector.load %arg2[%c0_65, %c0_66] : memref<16x1xi32, #tpu.memory_space<vmem>>, vector<12x1xi32>
    %c0_67 = arith.constant 0 : index
    %c0_68 = arith.constant 0 : index
    %72 = vector.load %arg3[%c0_67, %c0_68] : memref<16x1xi32, #tpu.memory_space<vmem>>, vector<12x1xi32>
    %c1_i32_69 = arith.constant 1 : i32
    %73 = vector.broadcast %c1_i32_69 : i32 to vector<12x1xi32>
    %74 = arith.addi %71, %73 : vector<12x1xi32>
    %c4_i32_70 = arith.constant 4 : i32
    %75 = vector.broadcast %c4_i32_70 : i32 to vector<12x1xi32>
    %76 = arith.cmpi slt, %74, %75 : vector<12x1xi32>
    %c0_i32_71 = arith.constant 0 : i32
    %77 = vector.broadcast %c0_i32_71 : i32 to vector<12x1xi32>
    %78 = arith.addi %72, %77 : vector<12x1xi32>
    %c4_i32_72 = arith.constant 4 : i32
    %79 = vector.broadcast %c4_i32_72 : i32 to vector<12x1xi32>
    %80 = arith.cmpi slt, %78, %79 : vector<12x1xi32>
    %81 = arith.andi %76, %80 : vector<12x1xi1>
    %82 = arith.extui %81 : vector<12x1xi1> to vector<12x1xi32>
    %83 = arith.sitofp %82 : vector<12x1xi32> to vector<12x1xf32>
    %c0_73 = arith.constant 0 : index
    %c256_74 = arith.constant 256 : index
    %84 = vector.load %arg7[%c0_73, %c256_74] : memref<16x512xf32, #tpu.memory_space<vmem>>, vector<12x128xf32>
    %85 = vector.broadcast %83 : vector<12x1xf32> to vector<12x128xf32>
    %86 = arith.mulf %70, %85 : vector<12x128xf32>
    %87 = arith.addf %84, %86 : vector<12x128xf32>
    %c0_75 = arith.constant 0 : index
    %c256_76 = arith.constant 256 : index
    %88 = vector.load %arg7[%c0_75, %c256_76] : memref<16x512xf32, #tpu.memory_space<vmem>>, vector<12x128xf32>
    tpu.vector_store %arg7[%c0_75, %c256_76], %87 {strides = array<i32>} : memref<16x512xf32, #tpu.memory_space<vmem>>, vector<12x128xf32>,
    %c0_77 = arith.constant 0 : index
    %c896 = arith.constant 896 : index
    %89 = vector.load %arg4[%c0_77, %c896] : memref<128x1152xbf16, #tpu.memory_space<vmem>>, vector<128x128xbf16>
    %c4_78 = arith.constant 4 : index
    %c0_79 = arith.constant 0 : index
    %90 = vector.load %arg1[%c4_78, %c0_79] : memref<16x128xbf16, #tpu.memory_space<vmem>>, vector<12x128xbf16>
    %cst_80 = arith.constant dense<0.000000e+00> : vector<12x128xf32>
    %91 = tpu.matmul %90, %89, %cst_80 {dimension_numbers = #tpu.dot_dimension_numbers<[1], [0], [0], [1], [0, 0, 1, 1], [], []>} : vector<12x128xbf16>, vector<128x128xbf16>, vector<12x128xf32> -> vector<12x128xf32>
    %c0_81 = arith.constant 0 : index
    %c0_82 = arith.constant 0 : index
    %92 = vector.load %arg2[%c0_81, %c0_82] : memref<16x1xi32, #tpu.memory_space<vmem>>, vector<12x1xi32>
    %c0_83 = arith.constant 0 : index
    %c0_84 = arith.constant 0 : index
    %93 = vector.load %arg3[%c0_83, %c0_84] : memref<16x1xi32, #tpu.memory_space<vmem>>, vector<12x1xi32>
    %c1_i32_85 = arith.constant 1 : i32
    %94 = vector.broadcast %c1_i32_85 : i32 to vector<12x1xi32>
    %95 = arith.addi %92, %94 : vector<12x1xi32>
    %c4_i32_86 = arith.constant 4 : i32
    %96 = vector.broadcast %c4_i32_86 : i32 to vector<12x1xi32>
    %97 = arith.cmpi slt, %95, %96 : vector<12x1xi32>
    %c0_i32_87 = arith.constant 0 : i32
    %98 = vector.broadcast %c0_i32_87 : i32 to vector<12x1xi32>
    %99 = arith.addi %93, %98 : vector<12x1xi32>
    %c4_i32_88 = arith.constant 4 : i32
    %100 = vector.broadcast %c4_i32_88 : i32 to vector<12x1xi32>
    %101 = arith.cmpi slt, %99, %100 : vector<12x1xi32>
    %102 = arith.andi %97, %101 : vector<12x1xi1>
    %103 = arith.extui %102 : vector<12x1xi1> to vector<12x1xi32>
    %104 = arith.sitofp %103 : vector<12x1xi32> to vector<12x1xf32>
    %c0_89 = arith.constant 0 : index
    %c384_90 = arith.constant 384 : index
    %105 = vector.load %arg7[%c0_89, %c384_90] : memref<16x512xf32, #tpu.memory_space<vmem>>, vector<12x128xf32>
    %106 = vector.broadcast %104 : vector<12x1xf32> to vector<12x128xf32>
    %107 = arith.mulf %91, %106 : vector<12x128xf32>
    %108 = arith.addf %105, %107 : vector<12x128xf32>
    %c0_91 = arith.constant 0 : index
    %c384_92 = arith.constant 384 : index
    %109 = vector.load %arg7[%c0_91, %c384_92] : memref<16x512xf32, #tpu.memory_space<vmem>>, vector<12x128xf32>
    tpu.vector_store %arg7[%c0_91, %c384_92], %108 {strides = array<i32>} : memref<16x512xf32, #tpu.memory_space<vmem>>, vector<12x128xf32>,
    %c0_93 = arith.constant 0 : index
    %c1024 = arith.constant 1024 : index
    %110 = vector.load %arg4[%c0_93, %c1024] : memref<128x1152xbf16, #tpu.memory_space<vmem>>, vector<128x128xbf16>
    %c5 = arith.constant 5 : index
    %c0_94 = arith.constant 0 : index
    %111 = vector.load %arg1[%c5, %c0_94] : memref<16x128xbf16, #tpu.memory_space<vmem>>, vector<11x128xbf16>
    %cst_95 = arith.constant dense<0.000000e+00> : vector<11x128xf32>
    %112 = tpu.matmul %111, %110, %cst_95 {dimension_numbers = #tpu.dot_dimension_numbers<[1], [0], [0], [1], [0, 0, 1, 1], [], []>} : vector<11x128xbf16>, vector<128x128xbf16>, vector<11x128xf32> -> vector<11x128xf32>
    %c0_96 = arith.constant 0 : index
    %c0_97 = arith.constant 0 : index
    %113 = vector.load %arg2[%c0_96, %c0_97] : memref<16x1xi32, #tpu.memory_space<vmem>>, vector<11x1xi32>
    %c0_98 = arith.constant 0 : index
    %c0_99 = arith.constant 0 : index
    %114 = vector.load %arg3[%c0_98, %c0_99] : memref<16x1xi32, #tpu.memory_space<vmem>>, vector<11x1xi32>
    %c1_i32_100 = arith.constant 1 : i32
    %115 = vector.broadcast %c1_i32_100 : i32 to vector<11x1xi32>
    %116 = arith.addi %113, %115 : vector<11x1xi32>
    %c4_i32_101 = arith.constant 4 : i32
    %117 = vector.broadcast %c4_i32_101 : i32 to vector<11x1xi32>
    %118 = arith.cmpi slt, %116, %117 : vector<11x1xi32>
    %c1_i32_102 = arith.constant 1 : i32
    %119 = vector.broadcast %c1_i32_102 : i32 to vector<11x1xi32>
    %120 = arith.addi %114, %119 : vector<11x1xi32>
    %c4_i32_103 = arith.constant 4 : i32
    %121 = vector.broadcast %c4_i32_103 : i32 to vector<11x1xi32>
    %122 = arith.cmpi slt, %120, %121 : vector<11x1xi32>
    %123 = arith.andi %118, %122 : vector<11x1xi1>
    %124 = arith.extui %123 : vector<11x1xi1> to vector<11x1xi32>
    %125 = arith.sitofp %124 : vector<11x1xi32> to vector<11x1xf32>
    %c0_104 = arith.constant 0 : index
    %c384_105 = arith.constant 384 : index
    %126 = vector.load %arg7[%c0_104, %c384_105] : memref<16x512xf32, #tpu.memory_space<vmem>>, vector<11x128xf32>
    %127 = vector.broadcast %125 : vector<11x1xf32> to vector<11x128xf32>
    %128 = arith.mulf %112, %127 : vector<11x128xf32>
    %129 = arith.addf %126, %128 : vector<11x128xf32>
    %c0_106 = arith.constant 0 : index
    %c384_107 = arith.constant 384 : index
    %130 = vector.load %arg7[%c0_106, %c384_107] : memref<16x512xf32, #tpu.memory_space<vmem>>, vector<11x128xf32>
    tpu.vector_store %arg7[%c0_106, %c384_107], %129 {strides = array<i32>} : memref<16x512xf32, #tpu.memory_space<vmem>>, vector<11x128xf32>,
    %c0_108 = arith.constant 0 : index
    %c0_109 = arith.constant 0 : index
    %131 = vector.load %arg7[%c0_108, %c0_109] : memref<16x512xf32, #tpu.memory_space<vmem>>, vector<16x512xf32>
    %c0_110 = arith.constant 0 : index
    %c0_111 = arith.constant 0 : index
    %132 = vector.load %arg5[%c0_110, %c0_111] : memref<1x512xf32, #tpu.memory_space<vmem>>, vector<1x512xf32>
    %133 = vector.broadcast %132 : vector<1x512xf32> to vector<16x512xf32>
    %134 = arith.addf %131, %133 : vector<16x512xf32>
    %cst_112 = arith.constant 5.000000e-01 : f32
    %135 = vector.broadcast %cst_112 : f32 to vector<16x512xf32>
    %136 = arith.mulf %135, %134 : vector<16x512xf32>
    %cst_113 = arith.constant 0.707106769 : f32
    %137 = vector.broadcast %cst_113 : f32 to vector<16x512xf32>
    %138 = arith.mulf %134, %137 : vector<16x512xf32>
    %139 = math.erf %138 : vector<16x512xf32>
    %cst_114 = arith.constant 1.000000e+00 : f32
    %140 = vector.broadcast %cst_114 : f32 to vector<16x512xf32>
    %141 = arith.addf %140, %139 : vector<16x512xf32>
    %142 = arith.mulf %136, %141 : vector<16x512xf32>
    %143 = arith.truncf %142 : vector<16x512xf32> to vector<16x512xbf16>
    %c0_115 = arith.constant 0 : index
    %c0_116 = arith.constant 0 : index
    %144 = vector.load %arg6[%c0_115, %c0_116] : memref<16x512xbf16, #tpu.memory_space<vmem>>, vector<16x512xbf16>
    tpu.vector_store %arg6[%c0_115, %c0_116], %143 {strides = array<i32>} : memref<16x512xbf16, #tpu.memory_space<vmem>>, vector<16x512xbf16>,
    return
  }
  func.func @transform_0(%arg0: i32) -> (i32, i32) {
    %c0_i32 = arith.constant 0 : i32
    %c0_i32_0 = arith.constant 0 : i32
    return %arg0, %c0_i32 : i32, i32
  }
  func.func @transform_1(%arg0: i32) -> (i32, i32) {
    %c0_i32 = arith.constant 0 : i32
    %c0_i32_0 = arith.constant 0 : i32
    return %arg0, %c0_i32 : i32, i32
  }
  func.func @transform_2(%arg0: i32) -> (i32, i32) {
    %c0_i32 = arith.constant 0 : i32
    %c0_i32_0 = arith.constant 0 : i32
    return %arg0, %c0_i32 : i32, i32
  }
  func.func @transform_3(%arg0: i32) -> (i32, i32) {
    %c0_i32 = arith.constant 0 : i32
    %c0_i32_0 = arith.constant 0 : i32
    %c0_i32_1 = arith.constant 0 : i32
    return %c0_i32, %c0_i32_0 : i32, i32
  }
  func.func @transform_4(%arg0: i32) -> (i32, i32) {
    %c0_i32 = arith.constant 0 : i32
    %c0_i32_0 = arith.constant 0 : i32
    %c0_i32_1 = arith.constant 0 : i32
    return %c0_i32, %c0_i32_0 : i32, i32
  }
  func.func @transform_5(%arg0: i32) -> (i32, i32) {
    %c0_i32 = arith.constant 0 : i32
    %c0_i32_0 = arith.constant 0 : i32
    return %arg0, %c0_i32 : i32, i32
  }
}

module attributes {stable_mosaic.version = 11 : i64} {
  func.func @_convT3x3_s2_kernel(%arg0: i32, %arg1: memref<8x128xbf16, #tpu.memory_space<vmem>>, %arg2: memref<8x1xi32, #tpu.memory_space<vmem>>, %arg3: memref<8x1xi32, #tpu.memory_space<vmem>>, %arg4: memref<128x1152xbf16, #tpu.memory_space<vmem>>, %arg5: memref<1x512xf32, #tpu.memory_space<vmem>>, %arg6: memref<8x512xbf16, #tpu.memory_space<vmem>>, %arg7: memref<8x512xf32, #tpu.memory_space<vmem>>) attributes {dimension_semantics = [#tpu.dimension_semantics<parallel>], iteration_bounds = array<i64: 1>, scalar_prefetch = 0 : i64, scratch_operands = 1 : i64, tpu.core_type = #tpu.core_type<tc>, window_params = [{transform_indices = @transform_0, window_bounds = array<i64: 8, 128>}, {transform_indices = @transform_1, window_bounds = array<i64: 8, 1>}, {transform_indices = @transform_2, window_bounds = array<i64: 8, 1>}, {pipeline_mode = #tpu.pipeline_mode<synchronous>, transform_indices = @transform_3, window_bounds = array<i64: 128, 1152>}, {pipeline_mode = #tpu.pipeline_mode<synchronous>, transform_indices = @transform_4, window_bounds = array<i64: 1, 512>}, {transform_indices = @transform_5, window_bounds = array<i64: 8, 512>}]} {
    %cst = arith.constant 0.000000e+00 : f32
    %0 = vector.broadcast %cst : f32 to vector<8x512xf32>
    %c0 = arith.constant 0 : index
    %c0_0 = arith.constant 0 : index
    %1 = vector.load %arg7[%c0, %c0_0] : memref<8x512xf32, #tpu.memory_space<vmem>>, vector<8x512xf32>
    tpu.vector_store %arg7[%c0, %c0_0], %0 {strides = array<i32>} : memref<8x512xf32, #tpu.memory_space<vmem>>, vector<8x512xf32>,
    %c0_1 = arith.constant 0 : index
    %c0_2 = arith.constant 0 : index
    %2 = vector.load %arg4[%c0_1, %c0_2] : memref<128x1152xbf16, #tpu.memory_space<vmem>>, vector<128x128xbf16>
    %c0_3 = arith.constant 0 : index
    %c0_4 = arith.constant 0 : index
    %3 = vector.load %arg1[%c0_3, %c0_4] : memref<8x128xbf16, #tpu.memory_space<vmem>>, vector<8x128xbf16>
    %cst_5 = arith.constant dense<0.000000e+00> : vector<8x128xf32>
    %4 = tpu.matmul %3, %2, %cst_5 {dimension_numbers = #tpu.dot_dimension_numbers<[1], [0], [0], [1], [0, 0, 1, 1], [], []>} : vector<8x128xbf16>, vector<128x128xbf16>, vector<8x128xf32> -> vector<8x128xf32>
    %c0_6 = arith.constant 0 : index
    %c0_7 = arith.constant 0 : index
    %5 = vector.load %arg7[%c0_6, %c0_7] : memref<8x512xf32, #tpu.memory_space<vmem>>, vector<8x128xf32>
    %6 = arith.addf %5, %4 : vector<8x128xf32>
    %c0_8 = arith.constant 0 : index
    %c0_9 = arith.constant 0 : index
    %7 = vector.load %arg7[%c0_8, %c0_9] : memref<8x512xf32, #tpu.memory_space<vmem>>, vector<8x128xf32>
    tpu.vector_store %arg7[%c0_8, %c0_9], %6 {strides = array<i32>} : memref<8x512xf32, #tpu.memory_space<vmem>>, vector<8x128xf32>,
    %c0_10 = arith.constant 0 : index
    %c128 = arith.constant 128 : index
    %8 = vector.load %arg4[%c0_10, %c128] : memref<128x1152xbf16, #tpu.memory_space<vmem>>, vector<128x128xbf16>
    %c0_11 = arith.constant 0 : index
    %c0_12 = arith.constant 0 : index
    %9 = vector.load %arg1[%c0_11, %c0_12] : memref<8x128xbf16, #tpu.memory_space<vmem>>, vector<8x128xbf16>
    %cst_13 = arith.constant dense<0.000000e+00> : vector<8x128xf32>
    %10 = tpu.matmul %9, %8, %cst_13 {dimension_numbers = #tpu.dot_dimension_numbers<[1], [0], [0], [1], [0, 0, 1, 1], [], []>} : vector<8x128xbf16>, vector<128x128xbf16>, vector<8x128xf32> -> vector<8x128xf32>
    %c0_14 = arith.constant 0 : index
    %c128_15 = arith.constant 128 : index
    %11 = vector.load %arg7[%c0_14, %c128_15] : memref<8x512xf32, #tpu.memory_space<vmem>>, vector<8x128xf32>
    %12 = arith.addf %11, %10 : vector<8x128xf32>
    %c0_16 = arith.constant 0 : index
    %c128_17 = arith.constant 128 : index
    %13 = vector.load %arg7[%c0_16, %c128_17] : memref<8x512xf32, #tpu.memory_space<vmem>>, vector<8x128xf32>
    tpu.vector_store %arg7[%c0_16, %c128_17], %12 {strides = array<i32>} : memref<8x512xf32, #tpu.memory_space<vmem>>, vector<8x128xf32>,
    %c0_18 = arith.constant 0 : index
    %c256 = arith.constant 256 : index
    %14 = vector.load %arg4[%c0_18, %c256] : memref<128x1152xbf16, #tpu.memory_space<vmem>>, vector<128x128xbf16>
    %c0_19 = arith.constant 0 : index
    %c0_20 = arith.constant 0 : index
    %15 = vector.load %arg1[%c0_19, %c0_20] : memref<8x128xbf16, #tpu.memory_space<vmem>>, vector<8x128xbf16>
    %cst_21 = arith.constant dense<0.000000e+00> : vector<8x128xf32>
    %16 = tpu.matmul %15, %14, %cst_21 {dimension_numbers = #tpu.dot_dimension_numbers<[1], [0], [0], [1], [0, 0, 1, 1], [], []>} : vector<8x128xbf16>, vector<128x128xbf16>, vector<8x128xf32> -> vector<8x128xf32>
    %c0_22 = arith.constant 0 : index
    %c256_23 = arith.constant 256 : index
    %17 = vector.load %arg7[%c0_22, %c256_23] : memref<8x512xf32, #tpu.memory_space<vmem>>, vector<8x128xf32>
    %18 = arith.addf %17, %16 : vector<8x128xf32>
    %c0_24 = arith.constant 0 : index
    %c256_25 = arith.constant 256 : index
    %19 = vector.load %arg7[%c0_24, %c256_25] : memref<8x512xf32, #tpu.memory_space<vmem>>, vector<8x128xf32>
    tpu.vector_store %arg7[%c0_24, %c256_25], %18 {strides = array<i32>} : memref<8x512xf32, #tpu.memory_space<vmem>>, vector<8x128xf32>,
    %c0_26 = arith.constant 0 : index
    %c384 = arith.constant 384 : index
    %20 = vector.load %arg4[%c0_26, %c384] : memref<128x1152xbf16, #tpu.memory_space<vmem>>, vector<128x128xbf16>
    %c0_27 = arith.constant 0 : index
    %c0_28 = arith.constant 0 : index
    %21 = vector.load %arg1[%c0_27, %c0_28] : memref<8x128xbf16, #tpu.memory_space<vmem>>, vector<8x128xbf16>
    %cst_29 = arith.constant dense<0.000000e+00> : vector<8x128xf32>
    %22 = tpu.matmul %21, %20, %cst_29 {dimension_numbers = #tpu.dot_dimension_numbers<[1], [0], [0], [1], [0, 0, 1, 1], [], []>} : vector<8x128xbf16>, vector<128x128xbf16>, vector<8x128xf32> -> vector<8x128xf32>
    %c0_30 = arith.constant 0 : index
    %c384_31 = arith.constant 384 : index
    %23 = vector.load %arg7[%c0_30, %c384_31] : memref<8x512xf32, #tpu.memory_space<vmem>>, vector<8x128xf32>
    %24 = arith.addf %23, %22 : vector<8x128xf32>
    %c0_32 = arith.constant 0 : index
    %c384_33 = arith.constant 384 : index
    %25 = vector.load %arg7[%c0_32, %c384_33] : memref<8x512xf32, #tpu.memory_space<vmem>>, vector<8x128xf32>
    tpu.vector_store %arg7[%c0_32, %c384_33], %24 {strides = array<i32>} : memref<8x512xf32, #tpu.memory_space<vmem>>, vector<8x128xf32>,
    %c0_34 = arith.constant 0 : index
    %c512 = arith.constant 512 : index
    %26 = vector.load %arg4[%c0_34, %c512] : memref<128x1152xbf16, #tpu.memory_space<vmem>>, vector<128x128xbf16>
    %c1 = arith.constant 1 : index
    %c0_35 = arith.constant 0 : index
    %27 = vector.load %arg1[%c1, %c0_35] : memref<8x128xbf16, #tpu.memory_space<vmem>>, vector<7x128xbf16>
    %cst_36 = arith.constant dense<0.000000e+00> : vector<7x128xf32>
    %28 = tpu.matmul %27, %26, %cst_36 {dimension_numbers = #tpu.dot_dimension_numbers<[1], [0], [0], [1], [0, 0, 1, 1], [], []>} : vector<7x128xbf16>, vector<128x128xbf16>, vector<7x128xf32> -> vector<7x128xf32>
    %c0_37 = arith.constant 0 : index
    %c0_38 = arith.constant 0 : index
    %29 = vector.load %arg2[%c0_37, %c0_38] : memref<8x1xi32, #tpu.memory_space<vmem>>, vector<7x1xi32>
    %c0_39 = arith.constant 0 : index
    %c0_40 = arith.constant 0 : index
    %30 = vector.load %arg3[%c0_39, %c0_40] : memref<8x1xi32, #tpu.memory_space<vmem>>, vector<7x1xi32>
    %c0_i32 = arith.constant 0 : i32
    %31 = vector.broadcast %c0_i32 : i32 to vector<7x1xi32>
    %32 = arith.addi %29, %31 : vector<7x1xi32>
    %c2_i32 = arith.constant 2 : i32
    %33 = vector.broadcast %c2_i32 : i32 to vector<7x1xi32>
    %34 = arith.cmpi slt, %32, %33 : vector<7x1xi32>
    %c1_i32 = arith.constant 1 : i32
    %35 = vector.broadcast %c1_i32 : i32 to vector<7x1xi32>
    %36 = arith.addi %30, %35 : vector<7x1xi32>
    %c2_i32_41 = arith.constant 2 : i32
    %37 = vector.broadcast %c2_i32_41 : i32 to vector<7x1xi32>
    %38 = arith.cmpi slt, %36, %37 : vector<7x1xi32>
    %39 = arith.andi %34, %38 : vector<7x1xi1>
    %40 = arith.extui %39 : vector<7x1xi1> to vector<7x1xi32>
    %41 = arith.sitofp %40 : vector<7x1xi32> to vector<7x1xf32>
    %c0_42 = arith.constant 0 : index
    %c128_43 = arith.constant 128 : index
    %42 = vector.load %arg7[%c0_42, %c128_43] : memref<8x512xf32, #tpu.memory_space<vmem>>, vector<7x128xf32>
    %43 = vector.broadcast %41 : vector<7x1xf32> to vector<7x128xf32>
    %44 = arith.mulf %28, %43 : vector<7x128xf32>
    %45 = arith.addf %42, %44 : vector<7x128xf32>
    %c0_44 = arith.constant 0 : index
    %c128_45 = arith.constant 128 : index
    %46 = vector.load %arg7[%c0_44, %c128_45] : memref<8x512xf32, #tpu.memory_space<vmem>>, vector<7x128xf32>
    tpu.vector_store %arg7[%c0_44, %c128_45], %45 {strides = array<i32>} : memref<8x512xf32, #tpu.memory_space<vmem>>, vector<7x128xf32>,
    %c0_46 = arith.constant 0 : index
    %c640 = arith.constant 640 : index
    %47 = vector.load %arg4[%c0_46, %c640] : memref<128x1152xbf16, #tpu.memory_space<vmem>>, vector<128x128xbf16>
    %c1_47 = arith.constant 1 : index
    %c0_48 = arith.constant 0 : index
    %48 = vector.load %arg1[%c1_47, %c0_48] : memref<8x128xbf16, #tpu.memory_space<vmem>>, vector<7x128xbf16>
    %cst_49 = arith.constant dense<0.000000e+00> : vector<7x128xf32>
    %49 = tpu.matmul %48, %47, %cst_49 {dimension_numbers = #tpu.dot_dimension_numbers<[1], [0], [0], [1], [0, 0, 1, 1], [], []>} : vector<7x128xbf16>, vector<128x128xbf16>, vector<7x128xf32> -> vector<7x128xf32>
    %c0_50 = arith.constant 0 : index
    %c0_51 = arith.constant 0 : index
    %50 = vector.load %arg2[%c0_50, %c0_51] : memref<8x1xi32, #tpu.memory_space<vmem>>, vector<7x1xi32>
    %c0_52 = arith.constant 0 : index
    %c0_53 = arith.constant 0 : index
    %51 = vector.load %arg3[%c0_52, %c0_53] : memref<8x1xi32, #tpu.memory_space<vmem>>, vector<7x1xi32>
    %c0_i32_54 = arith.constant 0 : i32
    %52 = vector.broadcast %c0_i32_54 : i32 to vector<7x1xi32>
    %53 = arith.addi %50, %52 : vector<7x1xi32>
    %c2_i32_55 = arith.constant 2 : i32
    %54 = vector.broadcast %c2_i32_55 : i32 to vector<7x1xi32>
    %55 = arith.cmpi slt, %53, %54 : vector<7x1xi32>
    %c1_i32_56 = arith.constant 1 : i32
    %56 = vector.broadcast %c1_i32_56 : i32 to vector<7x1xi32>
    %57 = arith.addi %51, %56 : vector<7x1xi32>
    %c2_i32_57 = arith.constant 2 : i32
    %58 = vector.broadcast %c2_i32_57 : i32 to vector<7x1xi32>
    %59 = arith.cmpi slt, %57, %58 : vector<7x1xi32>
    %60 = arith.andi %55, %59 : vector<7x1xi1>
    %61 = arith.extui %60 : vector<7x1xi1> to vector<7x1xi32>
    %62 = arith.sitofp %61 : vector<7x1xi32> to vector<7x1xf32>
    %c0_58 = arith.constant 0 : index
    %c384_59 = arith.constant 384 : index
    %63 = vector.load %arg7[%c0_58, %c384_59] : memref<8x512xf32, #tpu.memory_space<vmem>>, vector<7x128xf32>
    %64 = vector.broadcast %62 : vector<7x1xf32> to vector<7x128xf32>
    %65 = arith.mulf %49, %64 : vector<7x128xf32>
    %66 = arith.addf %63, %65 : vector<7x128xf32>
    %c0_60 = arith.constant 0 : index
    %c384_61 = arith.constant 384 : index
    %67 = vector.load %arg7[%c0_60, %c384_61] : memref<8x512xf32, #tpu.memory_space<vmem>>, vector<7x128xf32>
    tpu.vector_store %arg7[%c0_60, %c384_61], %66 {strides = array<i32>} : memref<8x512xf32, #tpu.memory_space<vmem>>, vector<7x128xf32>,
    %c0_62 = arith.constant 0 : index
    %c768 = arith.constant 768 : index
    %68 = vector.load %arg4[%c0_62, %c768] : memref<128x1152xbf16, #tpu.memory_space<vmem>>, vector<128x128xbf16>
    %c2 = arith.constant 2 : index
    %c0_63 = arith.constant 0 : index
    %69 = vector.load %arg1[%c2, %c0_63] : memref<8x128xbf16, #tpu.memory_space<vmem>>, vector<6x128xbf16>
    %cst_64 = arith.constant dense<0.000000e+00> : vector<6x128xf32>
    %70 = tpu.matmul %69, %68, %cst_64 {dimension_numbers = #tpu.dot_dimension_numbers<[1], [0], [0], [1], [0, 0, 1, 1], [], []>} : vector<6x128xbf16>, vector<128x128xbf16>, vector<6x128xf32> -> vector<6x128xf32>
    %c0_65 = arith.constant 0 : index
    %c0_66 = arith.constant 0 : index
    %71 = vector.load %arg2[%c0_65, %c0_66] : memref<8x1xi32, #tpu.memory_space<vmem>>, vector<6x1xi32>
    %c0_67 = arith.constant 0 : index
    %c0_68 = arith.constant 0 : index
    %72 = vector.load %arg3[%c0_67, %c0_68] : memref<8x1xi32, #tpu.memory_space<vmem>>, vector<6x1xi32>
    %c1_i32_69 = arith.constant 1 : i32
    %73 = vector.broadcast %c1_i32_69 : i32 to vector<6x1xi32>
    %74 = arith.addi %71, %73 : vector<6x1xi32>
    %c2_i32_70 = arith.constant 2 : i32
    %75 = vector.broadcast %c2_i32_70 : i32 to vector<6x1xi32>
    %76 = arith.cmpi slt, %74, %75 : vector<6x1xi32>
    %c0_i32_71 = arith.constant 0 : i32
    %77 = vector.broadcast %c0_i32_71 : i32 to vector<6x1xi32>
    %78 = arith.addi %72, %77 : vector<6x1xi32>
    %c2_i32_72 = arith.constant 2 : i32
    %79 = vector.broadcast %c2_i32_72 : i32 to vector<6x1xi32>
    %80 = arith.cmpi slt, %78, %79 : vector<6x1xi32>
    %81 = arith.andi %76, %80 : vector<6x1xi1>
    %82 = arith.extui %81 : vector<6x1xi1> to vector<6x1xi32>
    %83 = arith.sitofp %82 : vector<6x1xi32> to vector<6x1xf32>
    %c0_73 = arith.constant 0 : index
    %c256_74 = arith.constant 256 : index
    %84 = vector.load %arg7[%c0_73, %c256_74] : memref<8x512xf32, #tpu.memory_space<vmem>>, vector<6x128xf32>
    %85 = vector.broadcast %83 : vector<6x1xf32> to vector<6x128xf32>
    %86 = arith.mulf %70, %85 : vector<6x128xf32>
    %87 = arith.addf %84, %86 : vector<6x128xf32>
    %c0_75 = arith.constant 0 : index
    %c256_76 = arith.constant 256 : index
    %88 = vector.load %arg7[%c0_75, %c256_76] : memref<8x512xf32, #tpu.memory_space<vmem>>, vector<6x128xf32>
    tpu.vector_store %arg7[%c0_75, %c256_76], %87 {strides = array<i32>} : memref<8x512xf32, #tpu.memory_space<vmem>>, vector<6x128xf32>,
    %c0_77 = arith.constant 0 : index
    %c896 = arith.constant 896 : index
    %89 = vector.load %arg4[%c0_77, %c896] : memref<128x1152xbf16, #tpu.memory_space<vmem>>, vector<128x128xbf16>
    %c2_78 = arith.constant 2 : index
    %c0_79 = arith.constant 0 : index
    %90 = vector.load %arg1[%c2_78, %c0_79] : memref<8x128xbf16, #tpu.memory_space<vmem>>, vector<6x128xbf16>
    %cst_80 = arith.constant dense<0.000000e+00> : vector<6x128xf32>
    %91 = tpu.matmul %90, %89, %cst_80 {dimension_numbers = #tpu.dot_dimension_numbers<[1], [0], [0], [1], [0, 0, 1, 1], [], []>} : vector<6x128xbf16>, vector<128x128xbf16>, vector<6x128xf32> -> vector<6x128xf32>
    %c0_81 = arith.constant 0 : index
    %c0_82 = arith.constant 0 : index
    %92 = vector.load %arg2[%c0_81, %c0_82] : memref<8x1xi32, #tpu.memory_space<vmem>>, vector<6x1xi32>
    %c0_83 = arith.constant 0 : index
    %c0_84 = arith.constant 0 : index
    %93 = vector.load %arg3[%c0_83, %c0_84] : memref<8x1xi32, #tpu.memory_space<vmem>>, vector<6x1xi32>
    %c1_i32_85 = arith.constant 1 : i32
    %94 = vector.broadcast %c1_i32_85 : i32 to vector<6x1xi32>
    %95 = arith.addi %92, %94 : vector<6x1xi32>
    %c2_i32_86 = arith.constant 2 : i32
    %96 = vector.broadcast %c2_i32_86 : i32 to vector<6x1xi32>
    %97 = arith.cmpi slt, %95, %96 : vector<6x1xi32>
    %c0_i32_87 = arith.constant 0 : i32
    %98 = vector.broadcast %c0_i32_87 : i32 to vector<6x1xi32>
    %99 = arith.addi %93, %98 : vector<6x1xi32>
    %c2_i32_88 = arith.constant 2 : i32
    %100 = vector.broadcast %c2_i32_88 : i32 to vector<6x1xi32>
    %101 = arith.cmpi slt, %99, %100 : vector<6x1xi32>
    %102 = arith.andi %97, %101 : vector<6x1xi1>
    %103 = arith.extui %102 : vector<6x1xi1> to vector<6x1xi32>
    %104 = arith.sitofp %103 : vector<6x1xi32> to vector<6x1xf32>
    %c0_89 = arith.constant 0 : index
    %c384_90 = arith.constant 384 : index
    %105 = vector.load %arg7[%c0_89, %c384_90] : memref<8x512xf32, #tpu.memory_space<vmem>>, vector<6x128xf32>
    %106 = vector.broadcast %104 : vector<6x1xf32> to vector<6x128xf32>
    %107 = arith.mulf %91, %106 : vector<6x128xf32>
    %108 = arith.addf %105, %107 : vector<6x128xf32>
    %c0_91 = arith.constant 0 : index
    %c384_92 = arith.constant 384 : index
    %109 = vector.load %arg7[%c0_91, %c384_92] : memref<8x512xf32, #tpu.memory_space<vmem>>, vector<6x128xf32>
    tpu.vector_store %arg7[%c0_91, %c384_92], %108 {strides = array<i32>} : memref<8x512xf32, #tpu.memory_space<vmem>>, vector<6x128xf32>,
    %c0_93 = arith.constant 0 : index
    %c1024 = arith.constant 1024 : index
    %110 = vector.load %arg4[%c0_93, %c1024] : memref<128x1152xbf16, #tpu.memory_space<vmem>>, vector<128x128xbf16>
    %c3 = arith.constant 3 : index
    %c0_94 = arith.constant 0 : index
    %111 = vector.load %arg1[%c3, %c0_94] : memref<8x128xbf16, #tpu.memory_space<vmem>>, vector<5x128xbf16>
    %cst_95 = arith.constant dense<0.000000e+00> : vector<5x128xf32>
    %112 = tpu.matmul %111, %110, %cst_95 {dimension_numbers = #tpu.dot_dimension_numbers<[1], [0], [0], [1], [0, 0, 1, 1], [], []>} : vector<5x128xbf16>, vector<128x128xbf16>, vector<5x128xf32> -> vector<5x128xf32>
    %c0_96 = arith.constant 0 : index
    %c0_97 = arith.constant 0 : index
    %113 = vector.load %arg2[%c0_96, %c0_97] : memref<8x1xi32, #tpu.memory_space<vmem>>, vector<5x1xi32>
    %c0_98 = arith.constant 0 : index
    %c0_99 = arith.constant 0 : index
    %114 = vector.load %arg3[%c0_98, %c0_99] : memref<8x1xi32, #tpu.memory_space<vmem>>, vector<5x1xi32>
    %c1_i32_100 = arith.constant 1 : i32
    %115 = vector.broadcast %c1_i32_100 : i32 to vector<5x1xi32>
    %116 = arith.addi %113, %115 : vector<5x1xi32>
    %c2_i32_101 = arith.constant 2 : i32
    %117 = vector.broadcast %c2_i32_101 : i32 to vector<5x1xi32>
    %118 = arith.cmpi slt, %116, %117 : vector<5x1xi32>
    %c1_i32_102 = arith.constant 1 : i32
    %119 = vector.broadcast %c1_i32_102 : i32 to vector<5x1xi32>
    %120 = arith.addi %114, %119 : vector<5x1xi32>
    %c2_i32_103 = arith.constant 2 : i32
    %121 = vector.broadcast %c2_i32_103 : i32 to vector<5x1xi32>
    %122 = arith.cmpi slt, %120, %121 : vector<5x1xi32>
    %123 = arith.andi %118, %122 : vector<5x1xi1>
    %124 = arith.extui %123 : vector<5x1xi1> to vector<5x1xi32>
    %125 = arith.sitofp %124 : vector<5x1xi32> to vector<5x1xf32>
    %c0_104 = arith.constant 0 : index
    %c384_105 = arith.constant 384 : index
    %126 = vector.load %arg7[%c0_104, %c384_105] : memref<8x512xf32, #tpu.memory_space<vmem>>, vector<5x128xf32>
    %127 = vector.broadcast %125 : vector<5x1xf32> to vector<5x128xf32>
    %128 = arith.mulf %112, %127 : vector<5x128xf32>
    %129 = arith.addf %126, %128 : vector<5x128xf32>
    %c0_106 = arith.constant 0 : index
    %c384_107 = arith.constant 384 : index
    %130 = vector.load %arg7[%c0_106, %c384_107] : memref<8x512xf32, #tpu.memory_space<vmem>>, vector<5x128xf32>
    tpu.vector_store %arg7[%c0_106, %c384_107], %129 {strides = array<i32>} : memref<8x512xf32, #tpu.memory_space<vmem>>, vector<5x128xf32>,
    %c0_108 = arith.constant 0 : index
    %c0_109 = arith.constant 0 : index
    %131 = vector.load %arg7[%c0_108, %c0_109] : memref<8x512xf32, #tpu.memory_space<vmem>>, vector<8x512xf32>
    %c0_110 = arith.constant 0 : index
    %c0_111 = arith.constant 0 : index
    %132 = vector.load %arg5[%c0_110, %c0_111] : memref<1x512xf32, #tpu.memory_space<vmem>>, vector<1x512xf32>
    %133 = vector.broadcast %132 : vector<1x512xf32> to vector<8x512xf32>
    %134 = arith.addf %131, %133 : vector<8x512xf32>
    %cst_112 = arith.constant 5.000000e-01 : f32
    %135 = vector.broadcast %cst_112 : f32 to vector<8x512xf32>
    %136 = arith.mulf %135, %134 : vector<8x512xf32>
    %cst_113 = arith.constant 0.707106769 : f32
    %137 = vector.broadcast %cst_113 : f32 to vector<8x512xf32>
    %138 = arith.mulf %134, %137 : vector<8x512xf32>
    %139 = math.erf %138 : vector<8x512xf32>
    %cst_114 = arith.constant 1.000000e+00 : f32
    %140 = vector.broadcast %cst_114 : f32 to vector<8x512xf32>
    %141 = arith.addf %140, %139 : vector<8x512xf32>
    %142 = arith.mulf %136, %141 : vector<8x512xf32>
    %143 = arith.truncf %142 : vector<8x512xf32> to vector<8x512xbf16>
    %c0_115 = arith.constant 0 : index
    %c0_116 = arith.constant 0 : index
    %144 = vector.load %arg6[%c0_115, %c0_116] : memref<8x512xbf16, #tpu.memory_space<vmem>>, vector<8x512xbf16>
    tpu.vector_store %arg6[%c0_115, %c0_116], %143 {strides = array<i32>} : memref<8x512xbf16, #tpu.memory_space<vmem>>, vector<8x512xbf16>,
    return
  }
  func.func @transform_0(%arg0: i32) -> (i32, i32) {
    %c0_i32 = arith.constant 0 : i32
    %c0_i32_0 = arith.constant 0 : i32
    return %arg0, %c0_i32 : i32, i32
  }
  func.func @transform_1(%arg0: i32) -> (i32, i32) {
    %c0_i32 = arith.constant 0 : i32
    %c0_i32_0 = arith.constant 0 : i32
    return %arg0, %c0_i32 : i32, i32
  }
  func.func @transform_2(%arg0: i32) -> (i32, i32) {
    %c0_i32 = arith.constant 0 : i32
    %c0_i32_0 = arith.constant 0 : i32
    return %arg0, %c0_i32 : i32, i32
  }
  func.func @transform_3(%arg0: i32) -> (i32, i32) {
    %c0_i32 = arith.constant 0 : i32
    %c0_i32_0 = arith.constant 0 : i32
    %c0_i32_1 = arith.constant 0 : i32
    return %c0_i32, %c0_i32_0 : i32, i32
  }
  func.func @transform_4(%arg0: i32) -> (i32, i32) {
    %c0_i32 = arith.constant 0 : i32
    %c0_i32_0 = arith.constant 0 : i32
    %c0_i32_1 = arith.constant 0 : i32
    return %c0_i32, %c0_i32_0 : i32, i32
  }
  func.func @transform_5(%arg0: i32) -> (i32, i32) {
    %c0_i32 = arith.constant 0 : i32
    %c0_i32_0 = arith.constant 0 : i32
    return %arg0, %c0_i32 : i32, i32
  }
}

module attributes {stable_mosaic.version = 11 : i64} {
  func.func @_conv3x3_kernel(%arg0: i32, %arg1: memref<16x128xbf16, #tpu.memory_space<vmem>>, %arg2: memref<16x1xi32, #tpu.memory_space<vmem>>, %arg3: memref<16x1xi32, #tpu.memory_space<vmem>>, %arg4: memref<128x1152xbf16, #tpu.memory_space<vmem>>, %arg5: memref<1x128xf32, #tpu.memory_space<vmem>>, %arg6: memref<16x128xbf16, #tpu.memory_space<vmem>>, %arg7: memref<16x128xf32, #tpu.memory_space<vmem>>) attributes {dimension_semantics = [#tpu.dimension_semantics<parallel>], iteration_bounds = array<i64: 2>, scalar_prefetch = 0 : i64, scratch_operands = 1 : i64, tpu.core_type = #tpu.core_type<tc>, window_params = [{transform_indices = @transform_0, window_bounds = array<i64: 16, 128>}, {transform_indices = @transform_1, window_bounds = array<i64: 16, 1>}, {transform_indices = @transform_2, window_bounds = array<i64: 16, 1>}, {pipeline_mode = #tpu.pipeline_mode<synchronous>, transform_indices = @transform_3, window_bounds = array<i64: 128, 1152>}, {pipeline_mode = #tpu.pipeline_mode<synchronous>, transform_indices = @transform_4, window_bounds = array<i64: 1, 128>}, {transform_indices = @transform_5, window_bounds = array<i64: 16, 128>}]} {
    %cst = arith.constant 0.000000e+00 : f32
    %0 = vector.broadcast %cst : f32 to vector<16x128xf32>
    %c0 = arith.constant 0 : index
    %c0_0 = arith.constant 0 : index
    %1 = vector.load %arg7[%c0, %c0_0] : memref<16x128xf32, #tpu.memory_space<vmem>>, vector<16x128xf32>
    tpu.vector_store %arg7[%c0, %c0_0], %0 {strides = array<i32>} : memref<16x128xf32, #tpu.memory_space<vmem>>, vector<16x128xf32>,
    %c0_1 = arith.constant 0 : index
    %c0_2 = arith.constant 0 : index
    %2 = vector.load %arg4[%c0_1, %c0_2] : memref<128x1152xbf16, #tpu.memory_space<vmem>>, vector<128x128xbf16>
    %c0_3 = arith.constant 0 : index
    %c0_4 = arith.constant 0 : index
    %3 = vector.load %arg1[%c0_3, %c0_4] : memref<16x128xbf16, #tpu.memory_space<vmem>>, vector<11x128xbf16>
    %cst_5 = arith.constant dense<0.000000e+00> : vector<11x128xf32>
    %4 = tpu.matmul %3, %2, %cst_5 {dimension_numbers = #tpu.dot_dimension_numbers<[1], [0], [0], [1], [0, 0, 1, 1], [], []>} : vector<11x128xbf16>, vector<128x128xbf16>, vector<11x128xf32> -> vector<11x128xf32>
    %c5 = arith.constant 5 : index
    %c0_6 = arith.constant 0 : index
    %5 = vector.load %arg2[%c5, %c0_6] : memref<16x1xi32, #tpu.memory_space<vmem>>, vector<11x1xi32>
    %c5_7 = arith.constant 5 : index
    %c0_8 = arith.constant 0 : index
    %6 = vector.load %arg3[%c5_7, %c0_8] : memref<16x1xi32, #tpu.memory_space<vmem>>, vector<11x1xi32>
    %c-1_i32 = arith.constant -1 : i32
    %7 = vector.broadcast %c-1_i32 : i32 to vector<11x1xi32>
    %8 = arith.addi %5, %7 : vector<11x1xi32>
    %c0_i32 = arith.constant 0 : i32
    %9 = vector.broadcast %c0_i32 : i32 to vector<11x1xi32>
    %10 = arith.cmpi sge, %8, %9 : vector<11x1xi32>
    %c-1_i32_9 = arith.constant -1 : i32
    %11 = vector.broadcast %c-1_i32_9 : i32 to vector<11x1xi32>
    %12 = arith.addi %5, %11 : vector<11x1xi32>
    %c4_i32 = arith.constant 4 : i32
    %13 = vector.broadcast %c4_i32 : i32 to vector<11x1xi32>
    %14 = arith.cmpi slt, %12, %13 : vector<11x1xi32>
    %15 = arith.andi %10, %14 : vector<11x1xi1>
    %c-1_i32_10 = arith.constant -1 : i32
    %16 = vector.broadcast %c-1_i32_10 : i32 to vector<11x1xi32>
    %17 = arith.addi %6, %16 : vector<11x1xi32>
    %c0_i32_11 = arith.constant 0 : i32
    %18 = vector.broadcast %c0_i32_11 : i32 to vector<11x1xi32>
    %19 = arith.cmpi sge, %17, %18 : vector<11x1xi32>
    %20 = arith.andi %15, %19 : vector<11x1xi1>
    %c-1_i32_12 = arith.constant -1 : i32
    %21 = vector.broadcast %c-1_i32_12 : i32 to vector<11x1xi32>
    %22 = arith.addi %6, %21 : vector<11x1xi32>
    %c4_i32_13 = arith.constant 4 : i32
    %23 = vector.broadcast %c4_i32_13 : i32 to vector<11x1xi32>
    %24 = arith.cmpi slt, %22, %23 : vector<11x1xi32>
    %25 = arith.andi %20, %24 : vector<11x1xi1>
    %26 = arith.extui %25 : vector<11x1xi1> to vector<11x1xi32>
    %27 = arith.sitofp %26 : vector<11x1xi32> to vector<11x1xf32>
    %c5_14 = arith.constant 5 : index
    %c0_15 = arith.constant 0 : index
    %28 = vector.load %arg7[%c5_14, %c0_15] : memref<16x128xf32, #tpu.memory_space<vmem>>, vector<11x128xf32>
    %29 = vector.broadcast %27 : vector<11x1xf32> to vector<11x128xf32>
    %30 = arith.mulf %4, %29 : vector<11x128xf32>
    %31 = arith.addf %28, %30 : vector<11x128xf32>
    %c5_16 = arith.constant 5 : index
    %c0_17 = arith.constant 0 : index
    %32 = vector.load %arg7[%c5_16, %c0_17] : memref<16x128xf32, #tpu.memory_space<vmem>>, vector<11x128xf32>
    tpu.vector_store %arg7[%c5_16, %c0_17], %31 {strides = array<i32>} : memref<16x128xf32, #tpu.memory_space<vmem>>, vector<11x128xf32>,
    %c0_18 = arith.constant 0 : index
    %c128 = arith.constant 128 : index
    %33 = vector.load %arg4[%c0_18, %c128] : memref<128x1152xbf16, #tpu.memory_space<vmem>>, vector<128x128xbf16>
    %c0_19 = arith.constant 0 : index
    %c0_20 = arith.constant 0 : index
    %34 = vector.load %arg1[%c0_19, %c0_20] : memref<16x128xbf16, #tpu.memory_space<vmem>>, vector<12x128xbf16>
    %cst_21 = arith.constant dense<0.000000e+00> : vector<12x128xf32>
    %35 = tpu.matmul %34, %33, %cst_21 {dimension_numbers = #tpu.dot_dimension_numbers<[1], [0], [0], [1], [0, 0, 1, 1], [], []>} : vector<12x128xbf16>, vector<128x128xbf16>, vector<12x128xf32> -> vector<12x128xf32>
    %c4 = arith.constant 4 : index
    %c0_22 = arith.constant 0 : index
    %36 = vector.load %arg2[%c4, %c0_22] : memref<16x1xi32, #tpu.memory_space<vmem>>, vector<12x1xi32>
    %c4_23 = arith.constant 4 : index
    %c0_24 = arith.constant 0 : index
    %37 = vector.load %arg3[%c4_23, %c0_24] : memref<16x1xi32, #tpu.memory_space<vmem>>, vector<12x1xi32>
    %c-1_i32_25 = arith.constant -1 : i32
    %38 = vector.broadcast %c-1_i32_25 : i32 to vector<12x1xi32>
    %39 = arith.addi %36, %38 : vector<12x1xi32>
    %c0_i32_26 = arith.constant 0 : i32
    %40 = vector.broadcast %c0_i32_26 : i32 to vector<12x1xi32>
    %41 = arith.cmpi sge, %39, %40 : vector<12x1xi32>
    %c-1_i32_27 = arith.constant -1 : i32
    %42 = vector.broadcast %c-1_i32_27 : i32 to vector<12x1xi32>
    %43 = arith.addi %36, %42 : vector<12x1xi32>
    %c4_i32_28 = arith.constant 4 : i32
    %44 = vector.broadcast %c4_i32_28 : i32 to vector<12x1xi32>
    %45 = arith.cmpi slt, %43, %44 : vector<12x1xi32>
    %46 = arith.andi %41, %45 : vector<12x1xi1>
    %c0_i32_29 = arith.constant 0 : i32
    %47 = vector.broadcast %c0_i32_29 : i32 to vector<12x1xi32>
    %48 = arith.addi %37, %47 : vector<12x1xi32>
    %c0_i32_30 = arith.constant 0 : i32
    %49 = vector.broadcast %c0_i32_30 : i32 to vector<12x1xi32>
    %50 = arith.cmpi sge, %48, %49 : vector<12x1xi32>
    %51 = arith.andi %46, %50 : vector<12x1xi1>
    %c0_i32_31 = arith.constant 0 : i32
    %52 = vector.broadcast %c0_i32_31 : i32 to vector<12x1xi32>
    %53 = arith.addi %37, %52 : vector<12x1xi32>
    %c4_i32_32 = arith.constant 4 : i32
    %54 = vector.broadcast %c4_i32_32 : i32 to vector<12x1xi32>
    %55 = arith.cmpi slt, %53, %54 : vector<12x1xi32>
    %56 = arith.andi %51, %55 : vector<12x1xi1>
    %57 = arith.extui %56 : vector<12x1xi1> to vector<12x1xi32>
    %58 = arith.sitofp %57 : vector<12x1xi32> to vector<12x1xf32>
    %c4_33 = arith.constant 4 : index
    %c0_34 = arith.constant 0 : index
    %59 = vector.load %arg7[%c4_33, %c0_34] : memref<16x128xf32, #tpu.memory_space<vmem>>, vector<12x128xf32>
    %60 = vector.broadcast %58 : vector<12x1xf32> to vector<12x128xf32>
    %61 = arith.mulf %35, %60 : vector<12x128xf32>
    %62 = arith.addf %59, %61 : vector<12x128xf32>
    %c4_35 = arith.constant 4 : index
    %c0_36 = arith.constant 0 : index
    %63 = vector.load %arg7[%c4_35, %c0_36] : memref<16x128xf32, #tpu.memory_space<vmem>>, vector<12x128xf32>
    tpu.vector_store %arg7[%c4_35, %c0_36], %62 {strides = array<i32>} : memref<16x128xf32, #tpu.memory_space<vmem>>, vector<12x128xf32>,
    %c0_37 = arith.constant 0 : index
    %c256 = arith.constant 256 : index
    %64 = vector.load %arg4[%c0_37, %c256] : memref<128x1152xbf16, #tpu.memory_space<vmem>>, vector<128x128xbf16>
    %c0_38 = arith.constant 0 : index
    %c0_39 = arith.constant 0 : index
    %65 = vector.load %arg1[%c0_38, %c0_39] : memref<16x128xbf16, #tpu.memory_space<vmem>>, vector<13x128xbf16>
    %cst_40 = arith.constant dense<0.000000e+00> : vector<13x128xf32>
    %66 = tpu.matmul %65, %64, %cst_40 {dimension_numbers = #tpu.dot_dimension_numbers<[1], [0], [0], [1], [0, 0, 1, 1], [], []>} : vector<13x128xbf16>, vector<128x128xbf16>, vector<13x128xf32> -> vector<13x128xf32>
    %c3 = arith.constant 3 : index
    %c0_41 = arith.constant 0 : index
    %67 = vector.load %arg2[%c3, %c0_41] : memref<16x1xi32, #tpu.memory_space<vmem>>, vector<13x1xi32>
    %c3_42 = arith.constant 3 : index
    %c0_43 = arith.constant 0 : index
    %68 = vector.load %arg3[%c3_42, %c0_43] : memref<16x1xi32, #tpu.memory_space<vmem>>, vector<13x1xi32>
    %c-1_i32_44 = arith.constant -1 : i32
    %69 = vector.broadcast %c-1_i32_44 : i32 to vector<13x1xi32>
    %70 = arith.addi %67, %69 : vector<13x1xi32>
    %c0_i32_45 = arith.constant 0 : i32
    %71 = vector.broadcast %c0_i32_45 : i32 to vector<13x1xi32>
    %72 = arith.cmpi sge, %70, %71 : vector<13x1xi32>
    %c-1_i32_46 = arith.constant -1 : i32
    %73 = vector.broadcast %c-1_i32_46 : i32 to vector<13x1xi32>
    %74 = arith.addi %67, %73 : vector<13x1xi32>
    %c4_i32_47 = arith.constant 4 : i32
    %75 = vector.broadcast %c4_i32_47 : i32 to vector<13x1xi32>
    %76 = arith.cmpi slt, %74, %75 : vector<13x1xi32>
    %77 = arith.andi %72, %76 : vector<13x1xi1>
    %c1_i32 = arith.constant 1 : i32
    %78 = vector.broadcast %c1_i32 : i32 to vector<13x1xi32>
    %79 = arith.addi %68, %78 : vector<13x1xi32>
    %c0_i32_48 = arith.constant 0 : i32
    %80 = vector.broadcast %c0_i32_48 : i32 to vector<13x1xi32>
    %81 = arith.cmpi sge, %79, %80 : vector<13x1xi32>
    %82 = arith.andi %77, %81 : vector<13x1xi1>
    %c1_i32_49 = arith.constant 1 : i32
    %83 = vector.broadcast %c1_i32_49 : i32 to vector<13x1xi32>
    %84 = arith.addi %68, %83 : vector<13x1xi32>
    %c4_i32_50 = arith.constant 4 : i32
    %85 = vector.broadcast %c4_i32_50 : i32 to vector<13x1xi32>
    %86 = arith.cmpi slt, %84, %85 : vector<13x1xi32>
    %87 = arith.andi %82, %86 : vector<13x1xi1>
    %88 = arith.extui %87 : vector<13x1xi1> to vector<13x1xi32>
    %89 = arith.sitofp %88 : vector<13x1xi32> to vector<13x1xf32>
    %c3_51 = arith.constant 3 : index
    %c0_52 = arith.constant 0 : index
    %90 = vector.load %arg7[%c3_51, %c0_52] : memref<16x128xf32, #tpu.memory_space<vmem>>, vector<13x128xf32>
    %91 = vector.broadcast %89 : vector<13x1xf32> to vector<13x128xf32>
    %92 = arith.mulf %66, %91 : vector<13x128xf32>
    %93 = arith.addf %90, %92 : vector<13x128xf32>
    %c3_53 = arith.constant 3 : index
    %c0_54 = arith.constant 0 : index
    %94 = vector.load %arg7[%c3_53, %c0_54] : memref<16x128xf32, #tpu.memory_space<vmem>>, vector<13x128xf32>
    tpu.vector_store %arg7[%c3_53, %c0_54], %93 {strides = array<i32>} : memref<16x128xf32, #tpu.memory_space<vmem>>, vector<13x128xf32>,
    %c0_55 = arith.constant 0 : index
    %c384 = arith.constant 384 : index
    %95 = vector.load %arg4[%c0_55, %c384] : memref<128x1152xbf16, #tpu.memory_space<vmem>>, vector<128x128xbf16>
    %c0_56 = arith.constant 0 : index
    %c0_57 = arith.constant 0 : index
    %96 = vector.load %arg1[%c0_56, %c0_57] : memref<16x128xbf16, #tpu.memory_space<vmem>>, vector<15x128xbf16>
    %cst_58 = arith.constant dense<0.000000e+00> : vector<15x128xf32>
    %97 = tpu.matmul %96, %95, %cst_58 {dimension_numbers = #tpu.dot_dimension_numbers<[1], [0], [0], [1], [0, 0, 1, 1], [], []>} : vector<15x128xbf16>, vector<128x128xbf16>, vector<15x128xf32> -> vector<15x128xf32>
    %c1 = arith.constant 1 : index
    %c0_59 = arith.constant 0 : index
    %98 = vector.load %arg2[%c1, %c0_59] : memref<16x1xi32, #tpu.memory_space<vmem>>, vector<15x1xi32>
    %c1_60 = arith.constant 1 : index
    %c0_61 = arith.constant 0 : index
    %99 = vector.load %arg3[%c1_60, %c0_61] : memref<16x1xi32, #tpu.memory_space<vmem>>, vector<15x1xi32>
    %c0_i32_62 = arith.constant 0 : i32
    %100 = vector.broadcast %c0_i32_62 : i32 to vector<15x1xi32>
    %101 = arith.addi %98, %100 : vector<15x1xi32>
    %c0_i32_63 = arith.constant 0 : i32
    %102 = vector.broadcast %c0_i32_63 : i32 to vector<15x1xi32>
    %103 = arith.cmpi sge, %101, %102 : vector<15x1xi32>
    %c0_i32_64 = arith.constant 0 : i32
    %104 = vector.broadcast %c0_i32_64 : i32 to vector<15x1xi32>
    %105 = arith.addi %98, %104 : vector<15x1xi32>
    %c4_i32_65 = arith.constant 4 : i32
    %106 = vector.broadcast %c4_i32_65 : i32 to vector<15x1xi32>
    %107 = arith.cmpi slt, %105, %106 : vector<15x1xi32>
    %108 = arith.andi %103, %107 : vector<15x1xi1>
    %c-1_i32_66 = arith.constant -1 : i32
    %109 = vector.broadcast %c-1_i32_66 : i32 to vector<15x1xi32>
    %110 = arith.addi %99, %109 : vector<15x1xi32>
    %c0_i32_67 = arith.constant 0 : i32
    %111 = vector.broadcast %c0_i32_67 : i32 to vector<15x1xi32>
    %112 = arith.cmpi sge, %110, %111 : vector<15x1xi32>
    %113 = arith.andi %108, %112 : vector<15x1xi1>
    %c-1_i32_68 = arith.constant -1 : i32
    %114 = vector.broadcast %c-1_i32_68 : i32 to vector<15x1xi32>
    %115 = arith.addi %99, %114 : vector<15x1xi32>
    %c4_i32_69 = arith.constant 4 : i32
    %116 = vector.broadcast %c4_i32_69 : i32 to vector<15x1xi32>
    %117 = arith.cmpi slt, %115, %116 : vector<15x1xi32>
    %118 = arith.andi %113, %117 : vector<15x1xi1>
    %119 = arith.extui %118 : vector<15x1xi1> to vector<15x1xi32>
    %120 = arith.sitofp %119 : vector<15x1xi32> to vector<15x1xf32>
    %c1_70 = arith.constant 1 : index
    %c0_71 = arith.constant 0 : index
    %121 = vector.load %arg7[%c1_70, %c0_71] : memref<16x128xf32, #tpu.memory_space<vmem>>, vector<15x128xf32>
    %122 = vector.broadcast %120 : vector<15x1xf32> to vector<15x128xf32>
    %123 = arith.mulf %97, %122 : vector<15x128xf32>
    %124 = arith.addf %121, %123 : vector<15x128xf32>
    %c1_72 = arith.constant 1 : index
    %c0_73 = arith.constant 0 : index
    %125 = vector.load %arg7[%c1_72, %c0_73] : memref<16x128xf32, #tpu.memory_space<vmem>>, vector<15x128xf32>
    tpu.vector_store %arg7[%c1_72, %c0_73], %124 {strides = array<i32>} : memref<16x128xf32, #tpu.memory_space<vmem>>, vector<15x128xf32>,
    %c0_74 = arith.constant 0 : index
    %c512 = arith.constant 512 : index
    %126 = vector.load %arg4[%c0_74, %c512] : memref<128x1152xbf16, #tpu.memory_space<vmem>>, vector<128x128xbf16>
    %c0_75 = arith.constant 0 : index
    %c0_76 = arith.constant 0 : index
    %127 = vector.load %arg1[%c0_75, %c0_76] : memref<16x128xbf16, #tpu.memory_space<vmem>>, vector<16x128xbf16>
    %cst_77 = arith.constant dense<0.000000e+00> : vector<16x128xf32>
    %128 = tpu.matmul %127, %126, %cst_77 {dimension_numbers = #tpu.dot_dimension_numbers<[1], [0], [0], [1], [0, 0, 1, 1], [], []>} : vector<16x128xbf16>, vector<128x128xbf16>, vector<16x128xf32> -> vector<16x128xf32>
    %c0_78 = arith.constant 0 : index
    %c0_79 = arith.constant 0 : index
    %129 = vector.load %arg7[%c0_78, %c0_79] : memref<16x128xf32, #tpu.memory_space<vmem>>, vector<16x128xf32>
    %130 = arith.addf %129, %128 : vector<16x128xf32>
    %c0_80 = arith.constant 0 : index
    %c0_81 = arith.constant 0 : index
    %131 = vector.load %arg7[%c0_80, %c0_81] : memref<16x128xf32, #tpu.memory_space<vmem>>, vector<16x128xf32>
    tpu.vector_store %arg7[%c0_80, %c0_81], %130 {strides = array<i32>} : memref<16x128xf32, #tpu.memory_space<vmem>>, vector<16x128xf32>,
    %c0_82 = arith.constant 0 : index
    %c640 = arith.constant 640 : index
    %132 = vector.load %arg4[%c0_82, %c640] : memref<128x1152xbf16, #tpu.memory_space<vmem>>, vector<128x128xbf16>
    %c1_83 = arith.constant 1 : index
    %c0_84 = arith.constant 0 : index
    %133 = vector.load %arg1[%c1_83, %c0_84] : memref<16x128xbf16, #tpu.memory_space<vmem>>, vector<15x128xbf16>
    %cst_85 = arith.constant dense<0.000000e+00> : vector<15x128xf32>
    %134 = tpu.matmul %133, %132, %cst_85 {dimension_numbers = #tpu.dot_dimension_numbers<[1], [0], [0], [1], [0, 0, 1, 1], [], []>} : vector<15x128xbf16>, vector<128x128xbf16>, vector<15x128xf32> -> vector<15x128xf32>
    %c0_86 = arith.constant 0 : index
    %c0_87 = arith.constant 0 : index
    %135 = vector.load %arg2[%c0_86, %c0_87] : memref<16x1xi32, #tpu.memory_space<vmem>>, vector<15x1xi32>
    %c0_88 = arith.constant 0 : index
    %c0_89 = arith.constant 0 : index
    %136 = vector.load %arg3[%c0_88, %c0_89] : memref<16x1xi32, #tpu.memory_space<vmem>>, vector<15x1xi32>
    %c0_i32_90 = arith.constant 0 : i32
    %137 = vector.broadcast %c0_i32_90 : i32 to vector<15x1xi32>
    %138 = arith.addi %135, %137 : vector<15x1xi32>
    %c0_i32_91 = arith.constant 0 : i32
    %139 = vector.broadcast %c0_i32_91 : i32 to vector<15x1xi32>
    %140 = arith.cmpi sge, %138, %139 : vector<15x1xi32>
    %c0_i32_92 = arith.constant 0 : i32
    %141 = vector.broadcast %c0_i32_92 : i32 to vector<15x1xi32>
    %142 = arith.addi %135, %141 : vector<15x1xi32>
    %c4_i32_93 = arith.constant 4 : i32
    %143 = vector.broadcast %c4_i32_93 : i32 to vector<15x1xi32>
    %144 = arith.cmpi slt, %142, %143 : vector<15x1xi32>
    %145 = arith.andi %140, %144 : vector<15x1xi1>
    %c1_i32_94 = arith.constant 1 : i32
    %146 = vector.broadcast %c1_i32_94 : i32 to vector<15x1xi32>
    %147 = arith.addi %136, %146 : vector<15x1xi32>
    %c0_i32_95 = arith.constant 0 : i32
    %148 = vector.broadcast %c0_i32_95 : i32 to vector<15x1xi32>
    %149 = arith.cmpi sge, %147, %148 : vector<15x1xi32>
    %150 = arith.andi %145, %149 : vector<15x1xi1>
    %c1_i32_96 = arith.constant 1 : i32
    %151 = vector.broadcast %c1_i32_96 : i32 to vector<15x1xi32>
    %152 = arith.addi %136, %151 : vector<15x1xi32>
    %c4_i32_97 = arith.constant 4 : i32
    %153 = vector.broadcast %c4_i32_97 : i32 to vector<15x1xi32>
    %154 = arith.cmpi slt, %152, %153 : vector<15x1xi32>
    %155 = arith.andi %150, %154 : vector<15x1xi1>
    %156 = arith.extui %155 : vector<15x1xi1> to vector<15x1xi32>
    %157 = arith.sitofp %156 : vector<15x1xi32> to vector<15x1xf32>
    %c0_98 = arith.constant 0 : index
    %c0_99 = arith.constant 0 : index
    %158 = vector.load %arg7[%c0_98, %c0_99] : memref<16x128xf32, #tpu.memory_space<vmem>>, vector<15x128xf32>
    %159 = vector.broadcast %157 : vector<15x1xf32> to vector<15x128xf32>
    %160 = arith.mulf %134, %159 : vector<15x128xf32>
    %161 = arith.addf %158, %160 : vector<15x128xf32>
    %c0_100 = arith.constant 0 : index
    %c0_101 = arith.constant 0 : index
    %162 = vector.load %arg7[%c0_100, %c0_101] : memref<16x128xf32, #tpu.memory_space<vmem>>, vector<15x128xf32>
    tpu.vector_store %arg7[%c0_100, %c0_101], %161 {strides = array<i32>} : memref<16x128xf32, #tpu.memory_space<vmem>>, vector<15x128xf32>,
    %c0_102 = arith.constant 0 : index
    %c768 = arith.constant 768 : index
    %163 = vector.load %arg4[%c0_102, %c768] : memref<128x1152xbf16, #tpu.memory_space<vmem>>, vector<128x128xbf16>
    %c3_103 = arith.constant 3 : index
    %c0_104 = arith.constant 0 : index
    %164 = vector.load %arg1[%c3_103, %c0_104] : memref<16x128xbf16, #tpu.memory_space<vmem>>, vector<13x128xbf16>
    %cst_105 = arith.constant dense<0.000000e+00> : vector<13x128xf32>
    %165 = tpu.matmul %164, %163, %cst_105 {dimension_numbers = #tpu.dot_dimension_numbers<[1], [0], [0], [1], [0, 0, 1, 1], [], []>} : vector<13x128xbf16>, vector<128x128xbf16>, vector<13x128xf32> -> vector<13x128xf32>
    %c0_106 = arith.constant 0 : index
    %c0_107 = arith.constant 0 : index
    %166 = vector.load %arg2[%c0_106, %c0_107] : memref<16x1xi32, #tpu.memory_space<vmem>>, vector<13x1xi32>
    %c0_108 = arith.constant 0 : index
    %c0_109 = arith.constant 0 : index
    %167 = vector.load %arg3[%c0_108, %c0_109] : memref<16x1xi32, #tpu.memory_space<vmem>>, vector<13x1xi32>
    %c1_i32_110 = arith.constant 1 : i32
    %168 = vector.broadcast %c1_i32_110 : i32 to vector<13x1xi32>
    %169 = arith.addi %166, %168 : vector<13x1xi32>
    %c0_i32_111 = arith.constant 0 : i32
    %170 = vector.broadcast %c0_i32_111 : i32 to vector<13x1xi32>
    %171 = arith.cmpi sge, %169, %170 : vector<13x1xi32>
    %c1_i32_112 = arith.constant 1 : i32
    %172 = vector.broadcast %c1_i32_112 : i32 to vector<13x1xi32>
    %173 = arith.addi %166, %172 : vector<13x1xi32>
    %c4_i32_113 = arith.constant 4 : i32
    %174 = vector.broadcast %c4_i32_113 : i32 to vector<13x1xi32>
    %175 = arith.cmpi slt, %173, %174 : vector<13x1xi32>
    %176 = arith.andi %171, %175 : vector<13x1xi1>
    %c-1_i32_114 = arith.constant -1 : i32
    %177 = vector.broadcast %c-1_i32_114 : i32 to vector<13x1xi32>
    %178 = arith.addi %167, %177 : vector<13x1xi32>
    %c0_i32_115 = arith.constant 0 : i32
    %179 = vector.broadcast %c0_i32_115 : i32 to vector<13x1xi32>
    %180 = arith.cmpi sge, %178, %179 : vector<13x1xi32>
    %181 = arith.andi %176, %180 : vector<13x1xi1>
    %c-1_i32_116 = arith.constant -1 : i32
    %182 = vector.broadcast %c-1_i32_116 : i32 to vector<13x1xi32>
    %183 = arith.addi %167, %182 : vector<13x1xi32>
    %c4_i32_117 = arith.constant 4 : i32
    %184 = vector.broadcast %c4_i32_117 : i32 to vector<13x1xi32>
    %185 = arith.cmpi slt, %183, %184 : vector<13x1xi32>
    %186 = arith.andi %181, %185 : vector<13x1xi1>
    %187 = arith.extui %186 : vector<13x1xi1> to vector<13x1xi32>
    %188 = arith.sitofp %187 : vector<13x1xi32> to vector<13x1xf32>
    %c0_118 = arith.constant 0 : index
    %c0_119 = arith.constant 0 : index
    %189 = vector.load %arg7[%c0_118, %c0_119] : memref<16x128xf32, #tpu.memory_space<vmem>>, vector<13x128xf32>
    %190 = vector.broadcast %188 : vector<13x1xf32> to vector<13x128xf32>
    %191 = arith.mulf %165, %190 : vector<13x128xf32>
    %192 = arith.addf %189, %191 : vector<13x128xf32>
    %c0_120 = arith.constant 0 : index
    %c0_121 = arith.constant 0 : index
    %193 = vector.load %arg7[%c0_120, %c0_121] : memref<16x128xf32, #tpu.memory_space<vmem>>, vector<13x128xf32>
    tpu.vector_store %arg7[%c0_120, %c0_121], %192 {strides = array<i32>} : memref<16x128xf32, #tpu.memory_space<vmem>>, vector<13x128xf32>,
    %c0_122 = arith.constant 0 : index
    %c896 = arith.constant 896 : index
    %194 = vector.load %arg4[%c0_122, %c896] : memref<128x1152xbf16, #tpu.memory_space<vmem>>, vector<128x128xbf16>
    %c4_123 = arith.constant 4 : index
    %c0_124 = arith.constant 0 : index
    %195 = vector.load %arg1[%c4_123, %c0_124] : memref<16x128xbf16, #tpu.memory_space<vmem>>, vector<12x128xbf16>
    %cst_125 = arith.constant dense<0.000000e+00> : vector<12x128xf32>
    %196 = tpu.matmul %195, %194, %cst_125 {dimension_numbers = #tpu.dot_dimension_numbers<[1], [0], [0], [1], [0, 0, 1, 1], [], []>} : vector<12x128xbf16>, vector<128x128xbf16>, vector<12x128xf32> -> vector<12x128xf32>
    %c0_126 = arith.constant 0 : index
    %c0_127 = arith.constant 0 : index
    %197 = vector.load %arg2[%c0_126, %c0_127] : memref<16x1xi32, #tpu.memory_space<vmem>>, vector<12x1xi32>
    %c0_128 = arith.constant 0 : index
    %c0_129 = arith.constant 0 : index
    %198 = vector.load %arg3[%c0_128, %c0_129] : memref<16x1xi32, #tpu.memory_space<vmem>>, vector<12x1xi32>
    %c1_i32_130 = arith.constant 1 : i32
    %199 = vector.broadcast %c1_i32_130 : i32 to vector<12x1xi32>
    %200 = arith.addi %197, %199 : vector<12x1xi32>
    %c0_i32_131 = arith.constant 0 : i32
    %201 = vector.broadcast %c0_i32_131 : i32 to vector<12x1xi32>
    %202 = arith.cmpi sge, %200, %201 : vector<12x1xi32>
    %c1_i32_132 = arith.constant 1 : i32
    %203 = vector.broadcast %c1_i32_132 : i32 to vector<12x1xi32>
    %204 = arith.addi %197, %203 : vector<12x1xi32>
    %c4_i32_133 = arith.constant 4 : i32
    %205 = vector.broadcast %c4_i32_133 : i32 to vector<12x1xi32>
    %206 = arith.cmpi slt, %204, %205 : vector<12x1xi32>
    %207 = arith.andi %202, %206 : vector<12x1xi1>
    %c0_i32_134 = arith.constant 0 : i32
    %208 = vector.broadcast %c0_i32_134 : i32 to vector<12x1xi32>
    %209 = arith.addi %198, %208 : vector<12x1xi32>
    %c0_i32_135 = arith.constant 0 : i32
    %210 = vector.broadcast %c0_i32_135 : i32 to vector<12x1xi32>
    %211 = arith.cmpi sge, %209, %210 : vector<12x1xi32>
    %212 = arith.andi %207, %211 : vector<12x1xi1>
    %c0_i32_136 = arith.constant 0 : i32
    %213 = vector.broadcast %c0_i32_136 : i32 to vector<12x1xi32>
    %214 = arith.addi %198, %213 : vector<12x1xi32>
    %c4_i32_137 = arith.constant 4 : i32
    %215 = vector.broadcast %c4_i32_137 : i32 to vector<12x1xi32>
    %216 = arith.cmpi slt, %214, %215 : vector<12x1xi32>
    %217 = arith.andi %212, %216 : vector<12x1xi1>
    %218 = arith.extui %217 : vector<12x1xi1> to vector<12x1xi32>
    %219 = arith.sitofp %218 : vector<12x1xi32> to vector<12x1xf32>
    %c0_138 = arith.constant 0 : index
    %c0_139 = arith.constant 0 : index
    %220 = vector.load %arg7[%c0_138, %c0_139] : memref<16x128xf32, #tpu.memory_space<vmem>>, vector<12x128xf32>
    %221 = vector.broadcast %219 : vector<12x1xf32> to vector<12x128xf32>
    %222 = arith.mulf %196, %221 : vector<12x128xf32>
    %223 = arith.addf %220, %222 : vector<12x128xf32>
    %c0_140 = arith.constant 0 : index
    %c0_141 = arith.constant 0 : index
    %224 = vector.load %arg7[%c0_140, %c0_141] : memref<16x128xf32, #tpu.memory_space<vmem>>, vector<12x128xf32>
    tpu.vector_store %arg7[%c0_140, %c0_141], %223 {strides = array<i32>} : memref<16x128xf32, #tpu.memory_space<vmem>>, vector<12x128xf32>,
    %c0_142 = arith.constant 0 : index
    %c1024 = arith.constant 1024 : index
    %225 = vector.load %arg4[%c0_142, %c1024] : memref<128x1152xbf16, #tpu.memory_space<vmem>>, vector<128x128xbf16>
    %c5_143 = arith.constant 5 : index
    %c0_144 = arith.constant 0 : index
    %226 = vector.load %arg1[%c5_143, %c0_144] : memref<16x128xbf16, #tpu.memory_space<vmem>>, vector<11x128xbf16>
    %cst_145 = arith.constant dense<0.000000e+00> : vector<11x128xf32>
    %227 = tpu.matmul %226, %225, %cst_145 {dimension_numbers = #tpu.dot_dimension_numbers<[1], [0], [0], [1], [0, 0, 1, 1], [], []>} : vector<11x128xbf16>, vector<128x128xbf16>, vector<11x128xf32> -> vector<11x128xf32>
    %c0_146 = arith.constant 0 : index
    %c0_147 = arith.constant 0 : index
    %228 = vector.load %arg2[%c0_146, %c0_147] : memref<16x1xi32, #tpu.memory_space<vmem>>, vector<11x1xi32>
    %c0_148 = arith.constant 0 : index
    %c0_149 = arith.constant 0 : index
    %229 = vector.load %arg3[%c0_148, %c0_149] : memref<16x1xi32, #tpu.memory_space<vmem>>, vector<11x1xi32>
    %c1_i32_150 = arith.constant 1 : i32
    %230 = vector.broadcast %c1_i32_150 : i32 to vector<11x1xi32>
    %231 = arith.addi %228, %230 : vector<11x1xi32>
    %c0_i32_151 = arith.constant 0 : i32
    %232 = vector.broadcast %c0_i32_151 : i32 to vector<11x1xi32>
    %233 = arith.cmpi sge, %231, %232 : vector<11x1xi32>
    %c1_i32_152 = arith.constant 1 : i32
    %234 = vector.broadcast %c1_i32_152 : i32 to vector<11x1xi32>
    %235 = arith.addi %228, %234 : vector<11x1xi32>
    %c4_i32_153 = arith.constant 4 : i32
    %236 = vector.broadcast %c4_i32_153 : i32 to vector<11x1xi32>
    %237 = arith.cmpi slt, %235, %236 : vector<11x1xi32>
    %238 = arith.andi %233, %237 : vector<11x1xi1>
    %c1_i32_154 = arith.constant 1 : i32
    %239 = vector.broadcast %c1_i32_154 : i32 to vector<11x1xi32>
    %240 = arith.addi %229, %239 : vector<11x1xi32>
    %c0_i32_155 = arith.constant 0 : i32
    %241 = vector.broadcast %c0_i32_155 : i32 to vector<11x1xi32>
    %242 = arith.cmpi sge, %240, %241 : vector<11x1xi32>
    %243 = arith.andi %238, %242 : vector<11x1xi1>
    %c1_i32_156 = arith.constant 1 : i32
    %244 = vector.broadcast %c1_i32_156 : i32 to vector<11x1xi32>
    %245 = arith.addi %229, %244 : vector<11x1xi32>
    %c4_i32_157 = arith.constant 4 : i32
    %246 = vector.broadcast %c4_i32_157 : i32 to vector<11x1xi32>
    %247 = arith.cmpi slt, %245, %246 : vector<11x1xi32>
    %248 = arith.andi %243, %247 : vector<11x1xi1>
    %249 = arith.extui %248 : vector<11x1xi1> to vector<11x1xi32>
    %250 = arith.sitofp %249 : vector<11x1xi32> to vector<11x1xf32>
    %c0_158 = arith.constant 0 : index
    %c0_159 = arith.constant 0 : index
    %251 = vector.load %arg7[%c0_158, %c0_159] : memref<16x128xf32, #tpu.memory_space<vmem>>, vector<11x128xf32>
    %252 = vector.broadcast %250 : vector<11x1xf32> to vector<11x128xf32>
    %253 = arith.mulf %227, %252 : vector<11x128xf32>
    %254 = arith.addf %251, %253 : vector<11x128xf32>
    %c0_160 = arith.constant 0 : index
    %c0_161 = arith.constant 0 : index
    %255 = vector.load %arg7[%c0_160, %c0_161] : memref<16x128xf32, #tpu.memory_space<vmem>>, vector<11x128xf32>
    tpu.vector_store %arg7[%c0_160, %c0_161], %254 {strides = array<i32>} : memref<16x128xf32, #tpu.memory_space<vmem>>, vector<11x128xf32>,
    %c0_162 = arith.constant 0 : index
    %c0_163 = arith.constant 0 : index
    %256 = vector.load %arg7[%c0_162, %c0_163] : memref<16x128xf32, #tpu.memory_space<vmem>>, vector<16x128xf32>
    %c0_164 = arith.constant 0 : index
    %c0_165 = arith.constant 0 : index
    %257 = vector.load %arg5[%c0_164, %c0_165] : memref<1x128xf32, #tpu.memory_space<vmem>>, vector<1x128xf32>
    %258 = vector.broadcast %257 : vector<1x128xf32> to vector<16x128xf32>
    %259 = arith.addf %256, %258 : vector<16x128xf32>
    %cst_166 = arith.constant 5.000000e-01 : f32
    %260 = vector.broadcast %cst_166 : f32 to vector<16x128xf32>
    %261 = arith.mulf %260, %259 : vector<16x128xf32>
    %cst_167 = arith.constant 0.707106769 : f32
    %262 = vector.broadcast %cst_167 : f32 to vector<16x128xf32>
    %263 = arith.mulf %259, %262 : vector<16x128xf32>
    %264 = math.erf %263 : vector<16x128xf32>
    %cst_168 = arith.constant 1.000000e+00 : f32
    %265 = vector.broadcast %cst_168 : f32 to vector<16x128xf32>
    %266 = arith.addf %265, %264 : vector<16x128xf32>
    %267 = arith.mulf %261, %266 : vector<16x128xf32>
    %268 = arith.truncf %267 : vector<16x128xf32> to vector<16x128xbf16>
    %c0_169 = arith.constant 0 : index
    %c0_170 = arith.constant 0 : index
    %269 = vector.load %arg6[%c0_169, %c0_170] : memref<16x128xbf16, #tpu.memory_space<vmem>>, vector<16x128xbf16>
    tpu.vector_store %arg6[%c0_169, %c0_170], %268 {strides = array<i32>} : memref<16x128xbf16, #tpu.memory_space<vmem>>, vector<16x128xbf16>,
    return
  }
  func.func @transform_0(%arg0: i32) -> (i32, i32) {
    %c0_i32 = arith.constant 0 : i32
    %c0_i32_0 = arith.constant 0 : i32
    return %arg0, %c0_i32 : i32, i32
  }
  func.func @transform_1(%arg0: i32) -> (i32, i32) {
    %c0_i32 = arith.constant 0 : i32
    %c0_i32_0 = arith.constant 0 : i32
    return %arg0, %c0_i32 : i32, i32
  }
  func.func @transform_2(%arg0: i32) -> (i32, i32) {
    %c0_i32 = arith.constant 0 : i32
    %c0_i32_0 = arith.constant 0 : i32
    return %arg0, %c0_i32 : i32, i32
  }
  func.func @transform_3(%arg0: i32) -> (i32, i32) {
    %c0_i32 = arith.constant 0 : i32
    %c0_i32_0 = arith.constant 0 : i32
    %c0_i32_1 = arith.constant 0 : i32
    return %c0_i32, %c0_i32_0 : i32, i32
  }
  func.func @transform_4(%arg0: i32) -> (i32, i32) {
    %c0_i32 = arith.constant 0 : i32
    %c0_i32_0 = arith.constant 0 : i32
    %c0_i32_1 = arith.constant 0 : i32
    return %c0_i32, %c0_i32_0 : i32, i32
  }
  func.func @transform_5(%arg0: i32) -> (i32, i32) {
    %c0_i32 = arith.constant 0 : i32
    %c0_i32_0 = arith.constant 0 : i32
    return %arg0, %c0_i32 : i32, i32
  }
}

module attributes {stable_mosaic.version = 11 : i64} {
  func.func @_conv3x3_kernel(%arg0: i32, %arg1: memref<64x128xbf16, #tpu.memory_space<vmem>>, %arg2: memref<64x1xi32, #tpu.memory_space<vmem>>, %arg3: memref<64x1xi32, #tpu.memory_space<vmem>>, %arg4: memref<128x1152xbf16, #tpu.memory_space<vmem>>, %arg5: memref<1x128xf32, #tpu.memory_space<vmem>>, %arg6: memref<64x128xbf16, #tpu.memory_space<vmem>>, %arg7: memref<64x128xf32, #tpu.memory_space<vmem>>) attributes {dimension_semantics = [#tpu.dimension_semantics<parallel>], iteration_bounds = array<i64: 2>, scalar_prefetch = 0 : i64, scratch_operands = 1 : i64, tpu.core_type = #tpu.core_type<tc>, window_params = [{transform_indices = @transform_0, window_bounds = array<i64: 64, 128>}, {transform_indices = @transform_1, window_bounds = array<i64: 64, 1>}, {transform_indices = @transform_2, window_bounds = array<i64: 64, 1>}, {pipeline_mode = #tpu.pipeline_mode<synchronous>, transform_indices = @transform_3, window_bounds = array<i64: 128, 1152>}, {pipeline_mode = #tpu.pipeline_mode<synchronous>, transform_indices = @transform_4, window_bounds = array<i64: 1, 128>}, {transform_indices = @transform_5, window_bounds = array<i64: 64, 128>}]} {
    %cst = arith.constant 0.000000e+00 : f32
    %0 = vector.broadcast %cst : f32 to vector<64x128xf32>
    %c0 = arith.constant 0 : index
    %c0_0 = arith.constant 0 : index
    %1 = vector.load %arg7[%c0, %c0_0] : memref<64x128xf32, #tpu.memory_space<vmem>>, vector<64x128xf32>
    tpu.vector_store %arg7[%c0, %c0_0], %0 {strides = array<i32>} : memref<64x128xf32, #tpu.memory_space<vmem>>, vector<64x128xf32>,
    %c0_1 = arith.constant 0 : index
    %c0_2 = arith.constant 0 : index
    %2 = vector.load %arg4[%c0_1, %c0_2] : memref<128x1152xbf16, #tpu.memory_space<vmem>>, vector<128x128xbf16>
    %c0_3 = arith.constant 0 : index
    %c0_4 = arith.constant 0 : index
    %3 = vector.load %arg1[%c0_3, %c0_4] : memref<64x128xbf16, #tpu.memory_space<vmem>>, vector<55x128xbf16>
    %cst_5 = arith.constant dense<0.000000e+00> : vector<55x128xf32>
    %4 = tpu.matmul %3, %2, %cst_5 {dimension_numbers = #tpu.dot_dimension_numbers<[1], [0], [0], [1], [0, 0, 1, 1], [], []>} : vector<55x128xbf16>, vector<128x128xbf16>, vector<55x128xf32> -> vector<55x128xf32>
    %c9 = arith.constant 9 : index
    %c0_6 = arith.constant 0 : index
    %5 = vector.load %arg2[%c9, %c0_6] : memref<64x1xi32, #tpu.memory_space<vmem>>, vector<55x1xi32>
    %c9_7 = arith.constant 9 : index
    %c0_8 = arith.constant 0 : index
    %6 = vector.load %arg3[%c9_7, %c0_8] : memref<64x1xi32, #tpu.memory_space<vmem>>, vector<55x1xi32>
    %c-1_i32 = arith.constant -1 : i32
    %7 = vector.broadcast %c-1_i32 : i32 to vector<55x1xi32>
    %8 = arith.addi %5, %7 : vector<55x1xi32>
    %c0_i32 = arith.constant 0 : i32
    %9 = vector.broadcast %c0_i32 : i32 to vector<55x1xi32>
    %10 = arith.cmpi sge, %8, %9 : vector<55x1xi32>
    %c-1_i32_9 = arith.constant -1 : i32
    %11 = vector.broadcast %c-1_i32_9 : i32 to vector<55x1xi32>
    %12 = arith.addi %5, %11 : vector<55x1xi32>
    %c8_i32 = arith.constant 8 : i32
    %13 = vector.broadcast %c8_i32 : i32 to vector<55x1xi32>
    %14 = arith.cmpi slt, %12, %13 : vector<55x1xi32>
    %15 = arith.andi %10, %14 : vector<55x1xi1>
    %c-1_i32_10 = arith.constant -1 : i32
    %16 = vector.broadcast %c-1_i32_10 : i32 to vector<55x1xi32>
    %17 = arith.addi %6, %16 : vector<55x1xi32>
    %c0_i32_11 = arith.constant 0 : i32
    %18 = vector.broadcast %c0_i32_11 : i32 to vector<55x1xi32>
    %19 = arith.cmpi sge, %17, %18 : vector<55x1xi32>
    %20 = arith.andi %15, %19 : vector<55x1xi1>
    %c-1_i32_12 = arith.constant -1 : i32
    %21 = vector.broadcast %c-1_i32_12 : i32 to vector<55x1xi32>
    %22 = arith.addi %6, %21 : vector<55x1xi32>
    %c8_i32_13 = arith.constant 8 : i32
    %23 = vector.broadcast %c8_i32_13 : i32 to vector<55x1xi32>
    %24 = arith.cmpi slt, %22, %23 : vector<55x1xi32>
    %25 = arith.andi %20, %24 : vector<55x1xi1>
    %26 = arith.extui %25 : vector<55x1xi1> to vector<55x1xi32>
    %27 = arith.sitofp %26 : vector<55x1xi32> to vector<55x1xf32>
    %c9_14 = arith.constant 9 : index
    %c0_15 = arith.constant 0 : index
    %28 = vector.load %arg7[%c9_14, %c0_15] : memref<64x128xf32, #tpu.memory_space<vmem>>, vector<55x128xf32>
    %29 = vector.broadcast %27 : vector<55x1xf32> to vector<55x128xf32>
    %30 = arith.mulf %4, %29 : vector<55x128xf32>
    %31 = arith.addf %28, %30 : vector<55x128xf32>
    %c9_16 = arith.constant 9 : index
    %c0_17 = arith.constant 0 : index
    %32 = vector.load %arg7[%c9_16, %c0_17] : memref<64x128xf32, #tpu.memory_space<vmem>>, vector<55x128xf32>
    tpu.vector_store %arg7[%c9_16, %c0_17], %31 {strides = array<i32>} : memref<64x128xf32, #tpu.memory_space<vmem>>, vector<55x128xf32>,
    %c0_18 = arith.constant 0 : index
    %c128 = arith.constant 128 : index
    %33 = vector.load %arg4[%c0_18, %c128] : memref<128x1152xbf16, #tpu.memory_space<vmem>>, vector<128x128xbf16>
    %c0_19 = arith.constant 0 : index
    %c0_20 = arith.constant 0 : index
    %34 = vector.load %arg1[%c0_19, %c0_20] : memref<64x128xbf16, #tpu.memory_space<vmem>>, vector<56x128xbf16>
    %cst_21 = arith.constant dense<0.000000e+00> : vector<56x128xf32>
    %35 = tpu.matmul %34, %33, %cst_21 {dimension_numbers = #tpu.dot_dimension_numbers<[1], [0], [0], [1], [0, 0, 1, 1], [], []>} : vector<56x128xbf16>, vector<128x128xbf16>, vector<56x128xf32> -> vector<56x128xf32>
    %c8 = arith.constant 8 : index
    %c0_22 = arith.constant 0 : index
    %36 = vector.load %arg2[%c8, %c0_22] : memref<64x1xi32, #tpu.memory_space<vmem>>, vector<56x1xi32>
    %c8_23 = arith.constant 8 : index
    %c0_24 = arith.constant 0 : index
    %37 = vector.load %arg3[%c8_23, %c0_24] : memref<64x1xi32, #tpu.memory_space<vmem>>, vector<56x1xi32>
    %c-1_i32_25 = arith.constant -1 : i32
    %38 = vector.broadcast %c-1_i32_25 : i32 to vector<56x1xi32>
    %39 = arith.addi %36, %38 : vector<56x1xi32>
    %c0_i32_26 = arith.constant 0 : i32
    %40 = vector.broadcast %c0_i32_26 : i32 to vector<56x1xi32>
    %41 = arith.cmpi sge, %39, %40 : vector<56x1xi32>
    %c-1_i32_27 = arith.constant -1 : i32
    %42 = vector.broadcast %c-1_i32_27 : i32 to vector<56x1xi32>
    %43 = arith.addi %36, %42 : vector<56x1xi32>
    %c8_i32_28 = arith.constant 8 : i32
    %44 = vector.broadcast %c8_i32_28 : i32 to vector<56x1xi32>
    %45 = arith.cmpi slt, %43, %44 : vector<56x1xi32>
    %46 = arith.andi %41, %45 : vector<56x1xi1>
    %c0_i32_29 = arith.constant 0 : i32
    %47 = vector.broadcast %c0_i32_29 : i32 to vector<56x1xi32>
    %48 = arith.addi %37, %47 : vector<56x1xi32>
    %c0_i32_30 = arith.constant 0 : i32
    %49 = vector.broadcast %c0_i32_30 : i32 to vector<56x1xi32>
    %50 = arith.cmpi sge, %48, %49 : vector<56x1xi32>
    %51 = arith.andi %46, %50 : vector<56x1xi1>
    %c0_i32_31 = arith.constant 0 : i32
    %52 = vector.broadcast %c0_i32_31 : i32 to vector<56x1xi32>
    %53 = arith.addi %37, %52 : vector<56x1xi32>
    %c8_i32_32 = arith.constant 8 : i32
    %54 = vector.broadcast %c8_i32_32 : i32 to vector<56x1xi32>
    %55 = arith.cmpi slt, %53, %54 : vector<56x1xi32>
    %56 = arith.andi %51, %55 : vector<56x1xi1>
    %57 = arith.extui %56 : vector<56x1xi1> to vector<56x1xi32>
    %58 = arith.sitofp %57 : vector<56x1xi32> to vector<56x1xf32>
    %c8_33 = arith.constant 8 : index
    %c0_34 = arith.constant 0 : index
    %59 = vector.load %arg7[%c8_33, %c0_34] : memref<64x128xf32, #tpu.memory_space<vmem>>, vector<56x128xf32>
    %60 = vector.broadcast %58 : vector<56x1xf32> to vector<56x128xf32>
    %61 = arith.mulf %35, %60 : vector<56x128xf32>
    %62 = arith.addf %59, %61 : vector<56x128xf32>
    %c8_35 = arith.constant 8 : index
    %c0_36 = arith.constant 0 : index
    %63 = vector.load %arg7[%c8_35, %c0_36] : memref<64x128xf32, #tpu.memory_space<vmem>>, vector<56x128xf32>
    tpu.vector_store %arg7[%c8_35, %c0_36], %62 {strides = array<i32>} : memref<64x128xf32, #tpu.memory_space<vmem>>, vector<56x128xf32>,
    %c0_37 = arith.constant 0 : index
    %c256 = arith.constant 256 : index
    %64 = vector.load %arg4[%c0_37, %c256] : memref<128x1152xbf16, #tpu.memory_space<vmem>>, vector<128x128xbf16>
    %c0_38 = arith.constant 0 : index
    %c0_39 = arith.constant 0 : index
    %65 = vector.load %arg1[%c0_38, %c0_39] : memref<64x128xbf16, #tpu.memory_space<vmem>>, vector<57x128xbf16>
    %cst_40 = arith.constant dense<0.000000e+00> : vector<57x128xf32>
    %66 = tpu.matmul %65, %64, %cst_40 {dimension_numbers = #tpu.dot_dimension_numbers<[1], [0], [0], [1], [0, 0, 1, 1], [], []>} : vector<57x128xbf16>, vector<128x128xbf16>, vector<57x128xf32> -> vector<57x128xf32>
    %c7 = arith.constant 7 : index
    %c0_41 = arith.constant 0 : index
    %67 = vector.load %arg2[%c7, %c0_41] : memref<64x1xi32, #tpu.memory_space<vmem>>, vector<57x1xi32>
    %c7_42 = arith.constant 7 : index
    %c0_43 = arith.constant 0 : index
    %68 = vector.load %arg3[%c7_42, %c0_43] : memref<64x1xi32, #tpu.memory_space<vmem>>, vector<57x1xi32>
    %c-1_i32_44 = arith.constant -1 : i32
    %69 = vector.broadcast %c-1_i32_44 : i32 to vector<57x1xi32>
    %70 = arith.addi %67, %69 : vector<57x1xi32>
    %c0_i32_45 = arith.constant 0 : i32
    %71 = vector.broadcast %c0_i32_45 : i32 to vector<57x1xi32>
    %72 = arith.cmpi sge, %70, %71 : vector<57x1xi32>
    %c-1_i32_46 = arith.constant -1 : i32
    %73 = vector.broadcast %c-1_i32_46 : i32 to vector<57x1xi32>
    %74 = arith.addi %67, %73 : vector<57x1xi32>
    %c8_i32_47 = arith.constant 8 : i32
    %75 = vector.broadcast %c8_i32_47 : i32 to vector<57x1xi32>
    %76 = arith.cmpi slt, %74, %75 : vector<57x1xi32>
    %77 = arith.andi %72, %76 : vector<57x1xi1>
    %c1_i32 = arith.constant 1 : i32
    %78 = vector.broadcast %c1_i32 : i32 to vector<57x1xi32>
    %79 = arith.addi %68, %78 : vector<57x1xi32>
    %c0_i32_48 = arith.constant 0 : i32
    %80 = vector.broadcast %c0_i32_48 : i32 to vector<57x1xi32>
    %81 = arith.cmpi sge, %79, %80 : vector<57x1xi32>
    %82 = arith.andi %77, %81 : vector<57x1xi1>
    %c1_i32_49 = arith.constant 1 : i32
    %83 = vector.broadcast %c1_i32_49 : i32 to vector<57x1xi32>
    %84 = arith.addi %68, %83 : vector<57x1xi32>
    %c8_i32_50 = arith.constant 8 : i32
    %85 = vector.broadcast %c8_i32_50 : i32 to vector<57x1xi32>
    %86 = arith.cmpi slt, %84, %85 : vector<57x1xi32>
    %87 = arith.andi %82, %86 : vector<57x1xi1>
    %88 = arith.extui %87 : vector<57x1xi1> to vector<57x1xi32>
    %89 = arith.sitofp %88 : vector<57x1xi32> to vector<57x1xf32>
    %c7_51 = arith.constant 7 : index
    %c0_52 = arith.constant 0 : index
    %90 = vector.load %arg7[%c7_51, %c0_52] : memref<64x128xf32, #tpu.memory_space<vmem>>, vector<57x128xf32>
    %91 = vector.broadcast %89 : vector<57x1xf32> to vector<57x128xf32>
    %92 = arith.mulf %66, %91 : vector<57x128xf32>
    %93 = arith.addf %90, %92 : vector<57x128xf32>
    %c7_53 = arith.constant 7 : index
    %c0_54 = arith.constant 0 : index
    %94 = vector.load %arg7[%c7_53, %c0_54] : memref<64x128xf32, #tpu.memory_space<vmem>>, vector<57x128xf32>
    tpu.vector_store %arg7[%c7_53, %c0_54], %93 {strides = array<i32>} : memref<64x128xf32, #tpu.memory_space<vmem>>, vector<57x128xf32>,
    %c0_55 = arith.constant 0 : index
    %c384 = arith.constant 384 : index
    %95 = vector.load %arg4[%c0_55, %c384] : memref<128x1152xbf16, #tpu.memory_space<vmem>>, vector<128x128xbf16>
    %c0_56 = arith.constant 0 : index
    %c0_57 = arith.constant 0 : index
    %96 = vector.load %arg1[%c0_56, %c0_57] : memref<64x128xbf16, #tpu.memory_space<vmem>>, vector<63x128xbf16>
    %cst_58 = arith.constant dense<0.000000e+00> : vector<63x128xf32>
    %97 = tpu.matmul %96, %95, %cst_58 {dimension_numbers = #tpu.dot_dimension_numbers<[1], [0], [0], [1], [0, 0, 1, 1], [], []>} : vector<63x128xbf16>, vector<128x128xbf16>, vector<63x128xf32> -> vector<63x128xf32>
    %c1 = arith.constant 1 : index
    %c0_59 = arith.constant 0 : index
    %98 = vector.load %arg2[%c1, %c0_59] : memref<64x1xi32, #tpu.memory_space<vmem>>, vector<63x1xi32>
    %c1_60 = arith.constant 1 : index
    %c0_61 = arith.constant 0 : index
    %99 = vector.load %arg3[%c1_60, %c0_61] : memref<64x1xi32, #tpu.memory_space<vmem>>, vector<63x1xi32>
    %c0_i32_62 = arith.constant 0 : i32
    %100 = vector.broadcast %c0_i32_62 : i32 to vector<63x1xi32>
    %101 = arith.addi %98, %100 : vector<63x1xi32>
    %c0_i32_63 = arith.constant 0 : i32
    %102 = vector.broadcast %c0_i32_63 : i32 to vector<63x1xi32>
    %103 = arith.cmpi sge, %101, %102 : vector<63x1xi32>
    %c0_i32_64 = arith.constant 0 : i32
    %104 = vector.broadcast %c0_i32_64 : i32 to vector<63x1xi32>
    %105 = arith.addi %98, %104 : vector<63x1xi32>
    %c8_i32_65 = arith.constant 8 : i32
    %106 = vector.broadcast %c8_i32_65 : i32 to vector<63x1xi32>
    %107 = arith.cmpi slt, %105, %106 : vector<63x1xi32>
    %108 = arith.andi %103, %107 : vector<63x1xi1>
    %c-1_i32_66 = arith.constant -1 : i32
    %109 = vector.broadcast %c-1_i32_66 : i32 to vector<63x1xi32>
    %110 = arith.addi %99, %109 : vector<63x1xi32>
    %c0_i32_67 = arith.constant 0 : i32
    %111 = vector.broadcast %c0_i32_67 : i32 to vector<63x1xi32>
    %112 = arith.cmpi sge, %110, %111 : vector<63x1xi32>
    %113 = arith.andi %108, %112 : vector<63x1xi1>
    %c-1_i32_68 = arith.constant -1 : i32
    %114 = vector.broadcast %c-1_i32_68 : i32 to vector<63x1xi32>
    %115 = arith.addi %99, %114 : vector<63x1xi32>
    %c8_i32_69 = arith.constant 8 : i32
    %116 = vector.broadcast %c8_i32_69 : i32 to vector<63x1xi32>
    %117 = arith.cmpi slt, %115, %116 : vector<63x1xi32>
    %118 = arith.andi %113, %117 : vector<63x1xi1>
    %119 = arith.extui %118 : vector<63x1xi1> to vector<63x1xi32>
    %120 = arith.sitofp %119 : vector<63x1xi32> to vector<63x1xf32>
    %c1_70 = arith.constant 1 : index
    %c0_71 = arith.constant 0 : index
    %121 = vector.load %arg7[%c1_70, %c0_71] : memref<64x128xf32, #tpu.memory_space<vmem>>, vector<63x128xf32>
    %122 = vector.broadcast %120 : vector<63x1xf32> to vector<63x128xf32>
    %123 = arith.mulf %97, %122 : vector<63x128xf32>
    %124 = arith.addf %121, %123 : vector<63x128xf32>
    %c1_72 = arith.constant 1 : index
    %c0_73 = arith.constant 0 : index
    %125 = vector.load %arg7[%c1_72, %c0_73] : memref<64x128xf32, #tpu.memory_space<vmem>>, vector<63x128xf32>
    tpu.vector_store %arg7[%c1_72, %c0_73], %124 {strides = array<i32>} : memref<64x128xf32, #tpu.memory_space<vmem>>, vector<63x128xf32>,
    %c0_74 = arith.constant 0 : index
    %c512 = arith.constant 512 : index
    %126 = vector.load %arg4[%c0_74, %c512] : memref<128x1152xbf16, #tpu.memory_space<vmem>>, vector<128x128xbf16>
    %c0_75 = arith.constant 0 : index
    %c0_76 = arith.constant 0 : index
    %127 = vector.load %arg1[%c0_75, %c0_76] : memref<64x128xbf16, #tpu.memory_space<vmem>>, vector<64x128xbf16>
    %cst_77 = arith.constant dense<0.000000e+00> : vector<64x128xf32>
    %128 = tpu.matmul %127, %126, %cst_77 {dimension_numbers = #tpu.dot_dimension_numbers<[1], [0], [0], [1], [0, 0, 1, 1], [], []>} : vector<64x128xbf16>, vector<128x128xbf16>, vector<64x128xf32> -> vector<64x128xf32>
    %c0_78 = arith.constant 0 : index
    %c0_79 = arith.constant 0 : index
    %129 = vector.load %arg7[%c0_78, %c0_79] : memref<64x128xf32, #tpu.memory_space<vmem>>, vector<64x128xf32>
    %130 = arith.addf %129, %128 : vector<64x128xf32>
    %c0_80 = arith.constant 0 : index
    %c0_81 = arith.constant 0 : index
    %131 = vector.load %arg7[%c0_80, %c0_81] : memref<64x128xf32, #tpu.memory_space<vmem>>, vector<64x128xf32>
    tpu.vector_store %arg7[%c0_80, %c0_81], %130 {strides = array<i32>} : memref<64x128xf32, #tpu.memory_space<vmem>>, vector<64x128xf32>,
    %c0_82 = arith.constant 0 : index
    %c640 = arith.constant 640 : index
    %132 = vector.load %arg4[%c0_82, %c640] : memref<128x1152xbf16, #tpu.memory_space<vmem>>, vector<128x128xbf16>
    %c1_83 = arith.constant 1 : index
    %c0_84 = arith.constant 0 : index
    %133 = vector.load %arg1[%c1_83, %c0_84] : memref<64x128xbf16, #tpu.memory_space<vmem>>, vector<63x128xbf16>
    %cst_85 = arith.constant dense<0.000000e+00> : vector<63x128xf32>
    %134 = tpu.matmul %133, %132, %cst_85 {dimension_numbers = #tpu.dot_dimension_numbers<[1], [0], [0], [1], [0, 0, 1, 1], [], []>} : vector<63x128xbf16>, vector<128x128xbf16>, vector<63x128xf32> -> vector<63x128xf32>
    %c0_86 = arith.constant 0 : index
    %c0_87 = arith.constant 0 : index
    %135 = vector.load %arg2[%c0_86, %c0_87] : memref<64x1xi32, #tpu.memory_space<vmem>>, vector<63x1xi32>
    %c0_88 = arith.constant 0 : index
    %c0_89 = arith.constant 0 : index
    %136 = vector.load %arg3[%c0_88, %c0_89] : memref<64x1xi32, #tpu.memory_space<vmem>>, vector<63x1xi32>
    %c0_i32_90 = arith.constant 0 : i32
    %137 = vector.broadcast %c0_i32_90 : i32 to vector<63x1xi32>
    %138 = arith.addi %135, %137 : vector<63x1xi32>
    %c0_i32_91 = arith.constant 0 : i32
    %139 = vector.broadcast %c0_i32_91 : i32 to vector<63x1xi32>
    %140 = arith.cmpi sge, %138, %139 : vector<63x1xi32>
    %c0_i32_92 = arith.constant 0 : i32
    %141 = vector.broadcast %c0_i32_92 : i32 to vector<63x1xi32>
    %142 = arith.addi %135, %141 : vector<63x1xi32>
    %c8_i32_93 = arith.constant 8 : i32
    %143 = vector.broadcast %c8_i32_93 : i32 to vector<63x1xi32>
    %144 = arith.cmpi slt, %142, %143 : vector<63x1xi32>
    %145 = arith.andi %140, %144 : vector<63x1xi1>
    %c1_i32_94 = arith.constant 1 : i32
    %146 = vector.broadcast %c1_i32_94 : i32 to vector<63x1xi32>
    %147 = arith.addi %136, %146 : vector<63x1xi32>
    %c0_i32_95 = arith.constant 0 : i32
    %148 = vector.broadcast %c0_i32_95 : i32 to vector<63x1xi32>
    %149 = arith.cmpi sge, %147, %148 : vector<63x1xi32>
    %150 = arith.andi %145, %149 : vector<63x1xi1>
    %c1_i32_96 = arith.constant 1 : i32
    %151 = vector.broadcast %c1_i32_96 : i32 to vector<63x1xi32>
    %152 = arith.addi %136, %151 : vector<63x1xi32>
    %c8_i32_97 = arith.constant 8 : i32
    %153 = vector.broadcast %c8_i32_97 : i32 to vector<63x1xi32>
    %154 = arith.cmpi slt, %152, %153 : vector<63x1xi32>
    %155 = arith.andi %150, %154 : vector<63x1xi1>
    %156 = arith.extui %155 : vector<63x1xi1> to vector<63x1xi32>
    %157 = arith.sitofp %156 : vector<63x1xi32> to vector<63x1xf32>
    %c0_98 = arith.constant 0 : index
    %c0_99 = arith.constant 0 : index
    %158 = vector.load %arg7[%c0_98, %c0_99] : memref<64x128xf32, #tpu.memory_space<vmem>>, vector<63x128xf32>
    %159 = vector.broadcast %157 : vector<63x1xf32> to vector<63x128xf32>
    %160 = arith.mulf %134, %159 : vector<63x128xf32>
    %161 = arith.addf %158, %160 : vector<63x128xf32>
    %c0_100 = arith.constant 0 : index
    %c0_101 = arith.constant 0 : index
    %162 = vector.load %arg7[%c0_100, %c0_101] : memref<64x128xf32, #tpu.memory_space<vmem>>, vector<63x128xf32>
    tpu.vector_store %arg7[%c0_100, %c0_101], %161 {strides = array<i32>} : memref<64x128xf32, #tpu.memory_space<vmem>>, vector<63x128xf32>,
    %c0_102 = arith.constant 0 : index
    %c768 = arith.constant 768 : index
    %163 = vector.load %arg4[%c0_102, %c768] : memref<128x1152xbf16, #tpu.memory_space<vmem>>, vector<128x128xbf16>
    %c7_103 = arith.constant 7 : index
    %c0_104 = arith.constant 0 : index
    %164 = vector.load %arg1[%c7_103, %c0_104] : memref<64x128xbf16, #tpu.memory_space<vmem>>, vector<57x128xbf16>
    %cst_105 = arith.constant dense<0.000000e+00> : vector<57x128xf32>
    %165 = tpu.matmul %164, %163, %cst_105 {dimension_numbers = #tpu.dot_dimension_numbers<[1], [0], [0], [1], [0, 0, 1, 1], [], []>} : vector<57x128xbf16>, vector<128x128xbf16>, vector<57x128xf32> -> vector<57x128xf32>
    %c0_106 = arith.constant 0 : index
    %c0_107 = arith.constant 0 : index
    %166 = vector.load %arg2[%c0_106, %c0_107] : memref<64x1xi32, #tpu.memory_space<vmem>>, vector<57x1xi32>
    %c0_108 = arith.constant 0 : index
    %c0_109 = arith.constant 0 : index
    %167 = vector.load %arg3[%c0_108, %c0_109] : memref<64x1xi32, #tpu.memory_space<vmem>>, vector<57x1xi32>
    %c1_i32_110 = arith.constant 1 : i32
    %168 = vector.broadcast %c1_i32_110 : i32 to vector<57x1xi32>
    %169 = arith.addi %166, %168 : vector<57x1xi32>
    %c0_i32_111 = arith.constant 0 : i32
    %170 = vector.broadcast %c0_i32_111 : i32 to vector<57x1xi32>
    %171 = arith.cmpi sge, %169, %170 : vector<57x1xi32>
    %c1_i32_112 = arith.constant 1 : i32
    %172 = vector.broadcast %c1_i32_112 : i32 to vector<57x1xi32>
    %173 = arith.addi %166, %172 : vector<57x1xi32>
    %c8_i32_113 = arith.constant 8 : i32
    %174 = vector.broadcast %c8_i32_113 : i32 to vector<57x1xi32>
    %175 = arith.cmpi slt, %173, %174 : vector<57x1xi32>
    %176 = arith.andi %171, %175 : vector<57x1xi1>
    %c-1_i32_114 = arith.constant -1 : i32
    %177 = vector.broadcast %c-1_i32_114 : i32 to vector<57x1xi32>
    %178 = arith.addi %167, %177 : vector<57x1xi32>
    %c0_i32_115 = arith.constant 0 : i32
    %179 = vector.broadcast %c0_i32_115 : i32 to vector<57x1xi32>
    %180 = arith.cmpi sge, %178, %179 : vector<57x1xi32>
    %181 = arith.andi %176, %180 : vector<57x1xi1>
    %c-1_i32_116 = arith.constant -1 : i32
    %182 = vector.broadcast %c-1_i32_116 : i32 to vector<57x1xi32>
    %183 = arith.addi %167, %182 : vector<57x1xi32>
    %c8_i32_117 = arith.constant 8 : i32
    %184 = vector.broadcast %c8_i32_117 : i32 to vector<57x1xi32>
    %185 = arith.cmpi slt, %183, %184 : vector<57x1xi32>
    %186 = arith.andi %181, %185 : vector<57x1xi1>
    %187 = arith.extui %186 : vector<57x1xi1> to vector<57x1xi32>
    %188 = arith.sitofp %187 : vector<57x1xi32> to vector<57x1xf32>
    %c0_118 = arith.constant 0 : index
    %c0_119 = arith.constant 0 : index
    %189 = vector.load %arg7[%c0_118, %c0_119] : memref<64x128xf32, #tpu.memory_space<vmem>>, vector<57x128xf32>
    %190 = vector.broadcast %188 : vector<57x1xf32> to vector<57x128xf32>
    %191 = arith.mulf %165, %190 : vector<57x128xf32>
    %192 = arith.addf %189, %191 : vector<57x128xf32>
    %c0_120 = arith.constant 0 : index
    %c0_121 = arith.constant 0 : index
    %193 = vector.load %arg7[%c0_120, %c0_121] : memref<64x128xf32, #tpu.memory_space<vmem>>, vector<57x128xf32>
    tpu.vector_store %arg7[%c0_120, %c0_121], %192 {strides = array<i32>} : memref<64x128xf32, #tpu.memory_space<vmem>>, vector<57x128xf32>,
    %c0_122 = arith.constant 0 : index
    %c896 = arith.constant 896 : index
    %194 = vector.load %arg4[%c0_122, %c896] : memref<128x1152xbf16, #tpu.memory_space<vmem>>, vector<128x128xbf16>
    %c8_123 = arith.constant 8 : index
    %c0_124 = arith.constant 0 : index
    %195 = vector.load %arg1[%c8_123, %c0_124] : memref<64x128xbf16, #tpu.memory_space<vmem>>, vector<56x128xbf16>
    %cst_125 = arith.constant dense<0.000000e+00> : vector<56x128xf32>
    %196 = tpu.matmul %195, %194, %cst_125 {dimension_numbers = #tpu.dot_dimension_numbers<[1], [0], [0], [1], [0, 0, 1, 1], [], []>} : vector<56x128xbf16>, vector<128x128xbf16>, vector<56x128xf32> -> vector<56x128xf32>
    %c0_126 = arith.constant 0 : index
    %c0_127 = arith.constant 0 : index
    %197 = vector.load %arg2[%c0_126, %c0_127] : memref<64x1xi32, #tpu.memory_space<vmem>>, vector<56x1xi32>
    %c0_128 = arith.constant 0 : index
    %c0_129 = arith.constant 0 : index
    %198 = vector.load %arg3[%c0_128, %c0_129] : memref<64x1xi32, #tpu.memory_space<vmem>>, vector<56x1xi32>
    %c1_i32_130 = arith.constant 1 : i32
    %199 = vector.broadcast %c1_i32_130 : i32 to vector<56x1xi32>
    %200 = arith.addi %197, %199 : vector<56x1xi32>
    %c0_i32_131 = arith.constant 0 : i32
    %201 = vector.broadcast %c0_i32_131 : i32 to vector<56x1xi32>
    %202 = arith.cmpi sge, %200, %201 : vector<56x1xi32>
    %c1_i32_132 = arith.constant 1 : i32
    %203 = vector.broadcast %c1_i32_132 : i32 to vector<56x1xi32>
    %204 = arith.addi %197, %203 : vector<56x1xi32>
    %c8_i32_133 = arith.constant 8 : i32
    %205 = vector.broadcast %c8_i32_133 : i32 to vector<56x1xi32>
    %206 = arith.cmpi slt, %204, %205 : vector<56x1xi32>
    %207 = arith.andi %202, %206 : vector<56x1xi1>
    %c0_i32_134 = arith.constant 0 : i32
    %208 = vector.broadcast %c0_i32_134 : i32 to vector<56x1xi32>
    %209 = arith.addi %198, %208 : vector<56x1xi32>
    %c0_i32_135 = arith.constant 0 : i32
    %210 = vector.broadcast %c0_i32_135 : i32 to vector<56x1xi32>
    %211 = arith.cmpi sge, %209, %210 : vector<56x1xi32>
    %212 = arith.andi %207, %211 : vector<56x1xi1>
    %c0_i32_136 = arith.constant 0 : i32
    %213 = vector.broadcast %c0_i32_136 : i32 to vector<56x1xi32>
    %214 = arith.addi %198, %213 : vector<56x1xi32>
    %c8_i32_137 = arith.constant 8 : i32
    %215 = vector.broadcast %c8_i32_137 : i32 to vector<56x1xi32>
    %216 = arith.cmpi slt, %214, %215 : vector<56x1xi32>
    %217 = arith.andi %212, %216 : vector<56x1xi1>
    %218 = arith.extui %217 : vector<56x1xi1> to vector<56x1xi32>
    %219 = arith.sitofp %218 : vector<56x1xi32> to vector<56x1xf32>
    %c0_138 = arith.constant 0 : index
    %c0_139 = arith.constant 0 : index
    %220 = vector.load %arg7[%c0_138, %c0_139] : memref<64x128xf32, #tpu.memory_space<vmem>>, vector<56x128xf32>
    %221 = vector.broadcast %219 : vector<56x1xf32> to vector<56x128xf32>
    %222 = arith.mulf %196, %221 : vector<56x128xf32>
    %223 = arith.addf %220, %222 : vector<56x128xf32>
    %c0_140 = arith.constant 0 : index
    %c0_141 = arith.constant 0 : index
    %224 = vector.load %arg7[%c0_140, %c0_141] : memref<64x128xf32, #tpu.memory_space<vmem>>, vector<56x128xf32>
    tpu.vector_store %arg7[%c0_140, %c0_141], %223 {strides = array<i32>} : memref<64x128xf32, #tpu.memory_space<vmem>>, vector<56x128xf32>,
    %c0_142 = arith.constant 0 : index
    %c1024 = arith.constant 1024 : index
    %225 = vector.load %arg4[%c0_142, %c1024] : memref<128x1152xbf16, #tpu.memory_space<vmem>>, vector<128x128xbf16>
    %c9_143 = arith.constant 9 : index
    %c0_144 = arith.constant 0 : index
    %226 = vector.load %arg1[%c9_143, %c0_144] : memref<64x128xbf16, #tpu.memory_space<vmem>>, vector<55x128xbf16>
    %cst_145 = arith.constant dense<0.000000e+00> : vector<55x128xf32>
    %227 = tpu.matmul %226, %225, %cst_145 {dimension_numbers = #tpu.dot_dimension_numbers<[1], [0], [0], [1], [0, 0, 1, 1], [], []>} : vector<55x128xbf16>, vector<128x128xbf16>, vector<55x128xf32> -> vector<55x128xf32>
    %c0_146 = arith.constant 0 : index
    %c0_147 = arith.constant 0 : index
    %228 = vector.load %arg2[%c0_146, %c0_147] : memref<64x1xi32, #tpu.memory_space<vmem>>, vector<55x1xi32>
    %c0_148 = arith.constant 0 : index
    %c0_149 = arith.constant 0 : index
    %229 = vector.load %arg3[%c0_148, %c0_149] : memref<64x1xi32, #tpu.memory_space<vmem>>, vector<55x1xi32>
    %c1_i32_150 = arith.constant 1 : i32
    %230 = vector.broadcast %c1_i32_150 : i32 to vector<55x1xi32>
    %231 = arith.addi %228, %230 : vector<55x1xi32>
    %c0_i32_151 = arith.constant 0 : i32
    %232 = vector.broadcast %c0_i32_151 : i32 to vector<55x1xi32>
    %233 = arith.cmpi sge, %231, %232 : vector<55x1xi32>
    %c1_i32_152 = arith.constant 1 : i32
    %234 = vector.broadcast %c1_i32_152 : i32 to vector<55x1xi32>
    %235 = arith.addi %228, %234 : vector<55x1xi32>
    %c8_i32_153 = arith.constant 8 : i32
    %236 = vector.broadcast %c8_i32_153 : i32 to vector<55x1xi32>
    %237 = arith.cmpi slt, %235, %236 : vector<55x1xi32>
    %238 = arith.andi %233, %237 : vector<55x1xi1>
    %c1_i32_154 = arith.constant 1 : i32
    %239 = vector.broadcast %c1_i32_154 : i32 to vector<55x1xi32>
    %240 = arith.addi %229, %239 : vector<55x1xi32>
    %c0_i32_155 = arith.constant 0 : i32
    %241 = vector.broadcast %c0_i32_155 : i32 to vector<55x1xi32>
    %242 = arith.cmpi sge, %240, %241 : vector<55x1xi32>
    %243 = arith.andi %238, %242 : vector<55x1xi1>
    %c1_i32_156 = arith.constant 1 : i32
    %244 = vector.broadcast %c1_i32_156 : i32 to vector<55x1xi32>
    %245 = arith.addi %229, %244 : vector<55x1xi32>
    %c8_i32_157 = arith.constant 8 : i32
    %246 = vector.broadcast %c8_i32_157 : i32 to vector<55x1xi32>
    %247 = arith.cmpi slt, %245, %246 : vector<55x1xi32>
    %248 = arith.andi %243, %247 : vector<55x1xi1>
    %249 = arith.extui %248 : vector<55x1xi1> to vector<55x1xi32>
    %250 = arith.sitofp %249 : vector<55x1xi32> to vector<55x1xf32>
    %c0_158 = arith.constant 0 : index
    %c0_159 = arith.constant 0 : index
    %251 = vector.load %arg7[%c0_158, %c0_159] : memref<64x128xf32, #tpu.memory_space<vmem>>, vector<55x128xf32>
    %252 = vector.broadcast %250 : vector<55x1xf32> to vector<55x128xf32>
    %253 = arith.mulf %227, %252 : vector<55x128xf32>
    %254 = arith.addf %251, %253 : vector<55x128xf32>
    %c0_160 = arith.constant 0 : index
    %c0_161 = arith.constant 0 : index
    %255 = vector.load %arg7[%c0_160, %c0_161] : memref<64x128xf32, #tpu.memory_space<vmem>>, vector<55x128xf32>
    tpu.vector_store %arg7[%c0_160, %c0_161], %254 {strides = array<i32>} : memref<64x128xf32, #tpu.memory_space<vmem>>, vector<55x128xf32>,
    %c0_162 = arith.constant 0 : index
    %c0_163 = arith.constant 0 : index
    %256 = vector.load %arg7[%c0_162, %c0_163] : memref<64x128xf32, #tpu.memory_space<vmem>>, vector<64x128xf32>
    %c0_164 = arith.constant 0 : index
    %c0_165 = arith.constant 0 : index
    %257 = vector.load %arg5[%c0_164, %c0_165] : memref<1x128xf32, #tpu.memory_space<vmem>>, vector<1x128xf32>
    %258 = vector.broadcast %257 : vector<1x128xf32> to vector<64x128xf32>
    %259 = arith.addf %256, %258 : vector<64x128xf32>
    %cst_166 = arith.constant 5.000000e-01 : f32
    %260 = vector.broadcast %cst_166 : f32 to vector<64x128xf32>
    %261 = arith.mulf %260, %259 : vector<64x128xf32>
    %cst_167 = arith.constant 0.707106769 : f32
    %262 = vector.broadcast %cst_167 : f32 to vector<64x128xf32>
    %263 = arith.mulf %259, %262 : vector<64x128xf32>
    %264 = math.erf %263 : vector<64x128xf32>
    %cst_168 = arith.constant 1.000000e+00 : f32
    %265 = vector.broadcast %cst_168 : f32 to vector<64x128xf32>
    %266 = arith.addf %265, %264 : vector<64x128xf32>
    %267 = arith.mulf %261, %266 : vector<64x128xf32>
    %268 = arith.truncf %267 : vector<64x128xf32> to vector<64x128xbf16>
    %c0_169 = arith.constant 0 : index
    %c0_170 = arith.constant 0 : index
    %269 = vector.load %arg6[%c0_169, %c0_170] : memref<64x128xbf16, #tpu.memory_space<vmem>>, vector<64x128xbf16>
    tpu.vector_store %arg6[%c0_169, %c0_170], %268 {strides = array<i32>} : memref<64x128xbf16, #tpu.memory_space<vmem>>, vector<64x128xbf16>,
    return
  }
  func.func @transform_0(%arg0: i32) -> (i32, i32) {
    %c0_i32 = arith.constant 0 : i32
    %c0_i32_0 = arith.constant 0 : i32
    return %arg0, %c0_i32 : i32, i32
  }
  func.func @transform_1(%arg0: i32) -> (i32, i32) {
    %c0_i32 = arith.constant 0 : i32
    %c0_i32_0 = arith.constant 0 : i32
    return %arg0, %c0_i32 : i32, i32
  }
  func.func @transform_2(%arg0: i32) -> (i32, i32) {
    %c0_i32 = arith.constant 0 : i32
    %c0_i32_0 = arith.constant 0 : i32
    return %arg0, %c0_i32 : i32, i32
  }
  func.func @transform_3(%arg0: i32) -> (i32, i32) {
    %c0_i32 = arith.constant 0 : i32
    %c0_i32_0 = arith.constant 0 : i32
    %c0_i32_1 = arith.constant 0 : i32
    return %c0_i32, %c0_i32_0 : i32, i32
  }
  func.func @transform_4(%arg0: i32) -> (i32, i32) {
    %c0_i32 = arith.constant 0 : i32
    %c0_i32_0 = arith.constant 0 : i32
    %c0_i32_1 = arith.constant 0 : i32
    return %c0_i32, %c0_i32_0 : i32, i32
  }
  func.func @transform_5(%arg0: i32) -> (i32, i32) {
    %c0_i32 = arith.constant 0 : i32
    %c0_i32_0 = arith.constant 0 : i32
    return %arg0, %c0_i32 : i32, i32
  }
}

module attributes {stable_mosaic.version = 11 : i64} {
  func.func @_convT3x3_s2_kernel(%arg0: i32, %arg1: memref<64x128xbf16, #tpu.memory_space<vmem>>, %arg2: memref<64x1xi32, #tpu.memory_space<vmem>>, %arg3: memref<64x1xi32, #tpu.memory_space<vmem>>, %arg4: memref<128x1152xbf16, #tpu.memory_space<vmem>>, %arg5: memref<1x512xf32, #tpu.memory_space<vmem>>, %arg6: memref<64x512xbf16, #tpu.memory_space<vmem>>, %arg7: memref<64x512xf32, #tpu.memory_space<vmem>>) attributes {dimension_semantics = [#tpu.dimension_semantics<parallel>], iteration_bounds = array<i64: 2>, scalar_prefetch = 0 : i64, scratch_operands = 1 : i64, tpu.core_type = #tpu.core_type<tc>, window_params = [{transform_indices = @transform_0, window_bounds = array<i64: 64, 128>}, {transform_indices = @transform_1, window_bounds = array<i64: 64, 1>}, {transform_indices = @transform_2, window_bounds = array<i64: 64, 1>}, {pipeline_mode = #tpu.pipeline_mode<synchronous>, transform_indices = @transform_3, window_bounds = array<i64: 128, 1152>}, {pipeline_mode = #tpu.pipeline_mode<synchronous>, transform_indices = @transform_4, window_bounds = array<i64: 1, 512>}, {transform_indices = @transform_5, window_bounds = array<i64: 64, 512>}]} {
    %cst = arith.constant 0.000000e+00 : f32
    %0 = vector.broadcast %cst : f32 to vector<64x512xf32>
    %c0 = arith.constant 0 : index
    %c0_0 = arith.constant 0 : index
    %1 = vector.load %arg7[%c0, %c0_0] : memref<64x512xf32, #tpu.memory_space<vmem>>, vector<64x512xf32>
    tpu.vector_store %arg7[%c0, %c0_0], %0 {strides = array<i32>} : memref<64x512xf32, #tpu.memory_space<vmem>>, vector<64x512xf32>,
    %c0_1 = arith.constant 0 : index
    %c0_2 = arith.constant 0 : index
    %2 = vector.load %arg4[%c0_1, %c0_2] : memref<128x1152xbf16, #tpu.memory_space<vmem>>, vector<128x128xbf16>
    %c0_3 = arith.constant 0 : index
    %c0_4 = arith.constant 0 : index
    %3 = vector.load %arg1[%c0_3, %c0_4] : memref<64x128xbf16, #tpu.memory_space<vmem>>, vector<64x128xbf16>
    %cst_5 = arith.constant dense<0.000000e+00> : vector<64x128xf32>
    %4 = tpu.matmul %3, %2, %cst_5 {dimension_numbers = #tpu.dot_dimension_numbers<[1], [0], [0], [1], [0, 0, 1, 1], [], []>} : vector<64x128xbf16>, vector<128x128xbf16>, vector<64x128xf32> -> vector<64x128xf32>
    %c0_6 = arith.constant 0 : index
    %c0_7 = arith.constant 0 : index
    %5 = vector.load %arg7[%c0_6, %c0_7] : memref<64x512xf32, #tpu.memory_space<vmem>>, vector<64x128xf32>
    %6 = arith.addf %5, %4 : vector<64x128xf32>
    %c0_8 = arith.constant 0 : index
    %c0_9 = arith.constant 0 : index
    %7 = vector.load %arg7[%c0_8, %c0_9] : memref<64x512xf32, #tpu.memory_space<vmem>>, vector<64x128xf32>
    tpu.vector_store %arg7[%c0_8, %c0_9], %6 {strides = array<i32>} : memref<64x512xf32, #tpu.memory_space<vmem>>, vector<64x128xf32>,
    %c0_10 = arith.constant 0 : index
    %c128 = arith.constant 128 : index
    %8 = vector.load %arg4[%c0_10, %c128] : memref<128x1152xbf16, #tpu.memory_space<vmem>>, vector<128x128xbf16>
    %c0_11 = arith.constant 0 : index
    %c0_12 = arith.constant 0 : index
    %9 = vector.load %arg1[%c0_11, %c0_12] : memref<64x128xbf16, #tpu.memory_space<vmem>>, vector<64x128xbf16>
    %cst_13 = arith.constant dense<0.000000e+00> : vector<64x128xf32>
    %10 = tpu.matmul %9, %8, %cst_13 {dimension_numbers = #tpu.dot_dimension_numbers<[1], [0], [0], [1], [0, 0, 1, 1], [], []>} : vector<64x128xbf16>, vector<128x128xbf16>, vector<64x128xf32> -> vector<64x128xf32>
    %c0_14 = arith.constant 0 : index
    %c128_15 = arith.constant 128 : index
    %11 = vector.load %arg7[%c0_14, %c128_15] : memref<64x512xf32, #tpu.memory_space<vmem>>, vector<64x128xf32>
    %12 = arith.addf %11, %10 : vector<64x128xf32>
    %c0_16 = arith.constant 0 : index
    %c128_17 = arith.constant 128 : index
    %13 = vector.load %arg7[%c0_16, %c128_17] : memref<64x512xf32, #tpu.memory_space<vmem>>, vector<64x128xf32>
    tpu.vector_store %arg7[%c0_16, %c128_17], %12 {strides = array<i32>} : memref<64x512xf32, #tpu.memory_space<vmem>>, vector<64x128xf32>,
    %c0_18 = arith.constant 0 : index
    %c256 = arith.constant 256 : index
    %14 = vector.load %arg4[%c0_18, %c256] : memref<128x1152xbf16, #tpu.memory_space<vmem>>, vector<128x128xbf16>
    %c0_19 = arith.constant 0 : index
    %c0_20 = arith.constant 0 : index
    %15 = vector.load %arg1[%c0_19, %c0_20] : memref<64x128xbf16, #tpu.memory_space<vmem>>, vector<64x128xbf16>
    %cst_21 = arith.constant dense<0.000000e+00> : vector<64x128xf32>
    %16 = tpu.matmul %15, %14, %cst_21 {dimension_numbers = #tpu.dot_dimension_numbers<[1], [0], [0], [1], [0, 0, 1, 1], [], []>} : vector<64x128xbf16>, vector<128x128xbf16>, vector<64x128xf32> -> vector<64x128xf32>
    %c0_22 = arith.constant 0 : index
    %c256_23 = arith.constant 256 : index
    %17 = vector.load %arg7[%c0_22, %c256_23] : memref<64x512xf32, #tpu.memory_space<vmem>>, vector<64x128xf32>
    %18 = arith.addf %17, %16 : vector<64x128xf32>
    %c0_24 = arith.constant 0 : index
    %c256_25 = arith.constant 256 : index
    %19 = vector.load %arg7[%c0_24, %c256_25] : memref<64x512xf32, #tpu.memory_space<vmem>>, vector<64x128xf32>
    tpu.vector_store %arg7[%c0_24, %c256_25], %18 {strides = array<i32>} : memref<64x512xf32, #tpu.memory_space<vmem>>, vector<64x128xf32>,
    %c0_26 = arith.constant 0 : index
    %c384 = arith.constant 384 : index
    %20 = vector.load %arg4[%c0_26, %c384] : memref<128x1152xbf16, #tpu.memory_space<vmem>>, vector<128x128xbf16>
    %c0_27 = arith.constant 0 : index
    %c0_28 = arith.constant 0 : index
    %21 = vector.load %arg1[%c0_27, %c0_28] : memref<64x128xbf16, #tpu.memory_space<vmem>>, vector<64x128xbf16>
    %cst_29 = arith.constant dense<0.000000e+00> : vector<64x128xf32>
    %22 = tpu.matmul %21, %20, %cst_29 {dimension_numbers = #tpu.dot_dimension_numbers<[1], [0], [0], [1], [0, 0, 1, 1], [], []>} : vector<64x128xbf16>, vector<128x128xbf16>, vector<64x128xf32> -> vector<64x128xf32>
    %c0_30 = arith.constant 0 : index
    %c384_31 = arith.constant 384 : index
    %23 = vector.load %arg7[%c0_30, %c384_31] : memref<64x512xf32, #tpu.memory_space<vmem>>, vector<64x128xf32>
    %24 = arith.addf %23, %22 : vector<64x128xf32>
    %c0_32 = arith.constant 0 : index
    %c384_33 = arith.constant 384 : index
    %25 = vector.load %arg7[%c0_32, %c384_33] : memref<64x512xf32, #tpu.memory_space<vmem>>, vector<64x128xf32>
    tpu.vector_store %arg7[%c0_32, %c384_33], %24 {strides = array<i32>} : memref<64x512xf32, #tpu.memory_space<vmem>>, vector<64x128xf32>,
    %c0_34 = arith.constant 0 : index
    %c512 = arith.constant 512 : index
    %26 = vector.load %arg4[%c0_34, %c512] : memref<128x1152xbf16, #tpu.memory_space<vmem>>, vector<128x128xbf16>
    %c1 = arith.constant 1 : index
    %c0_35 = arith.constant 0 : index
    %27 = vector.load %arg1[%c1, %c0_35] : memref<64x128xbf16, #tpu.memory_space<vmem>>, vector<63x128xbf16>
    %cst_36 = arith.constant dense<0.000000e+00> : vector<63x128xf32>
    %28 = tpu.matmul %27, %26, %cst_36 {dimension_numbers = #tpu.dot_dimension_numbers<[1], [0], [0], [1], [0, 0, 1, 1], [], []>} : vector<63x128xbf16>, vector<128x128xbf16>, vector<63x128xf32> -> vector<63x128xf32>
    %c0_37 = arith.constant 0 : index
    %c0_38 = arith.constant 0 : index
    %29 = vector.load %arg2[%c0_37, %c0_38] : memref<64x1xi32, #tpu.memory_space<vmem>>, vector<63x1xi32>
    %c0_39 = arith.constant 0 : index
    %c0_40 = arith.constant 0 : index
    %30 = vector.load %arg3[%c0_39, %c0_40] : memref<64x1xi32, #tpu.memory_space<vmem>>, vector<63x1xi32>
    %c0_i32 = arith.constant 0 : i32
    %31 = vector.broadcast %c0_i32 : i32 to vector<63x1xi32>
    %32 = arith.addi %29, %31 : vector<63x1xi32>
    %c8_i32 = arith.constant 8 : i32
    %33 = vector.broadcast %c8_i32 : i32 to vector<63x1xi32>
    %34 = arith.cmpi slt, %32, %33 : vector<63x1xi32>
    %c1_i32 = arith.constant 1 : i32
    %35 = vector.broadcast %c1_i32 : i32 to vector<63x1xi32>
    %36 = arith.addi %30, %35 : vector<63x1xi32>
    %c8_i32_41 = arith.constant 8 : i32
    %37 = vector.broadcast %c8_i32_41 : i32 to vector<63x1xi32>
    %38 = arith.cmpi slt, %36, %37 : vector<63x1xi32>
    %39 = arith.andi %34, %38 : vector<63x1xi1>
    %40 = arith.extui %39 : vector<63x1xi1> to vector<63x1xi32>
    %41 = arith.sitofp %40 : vector<63x1xi32> to vector<63x1xf32>
    %c0_42 = arith.constant 0 : index
    %c128_43 = arith.constant 128 : index
    %42 = vector.load %arg7[%c0_42, %c128_43] : memref<64x512xf32, #tpu.memory_space<vmem>>, vector<63x128xf32>
    %43 = vector.broadcast %41 : vector<63x1xf32> to vector<63x128xf32>
    %44 = arith.mulf %28, %43 : vector<63x128xf32>
    %45 = arith.addf %42, %44 : vector<63x128xf32>
    %c0_44 = arith.constant 0 : index
    %c128_45 = arith.constant 128 : index
    %46 = vector.load %arg7[%c0_44, %c128_45] : memref<64x512xf32, #tpu.memory_space<vmem>>, vector<63x128xf32>
    tpu.vector_store %arg7[%c0_44, %c128_45], %45 {strides = array<i32>} : memref<64x512xf32, #tpu.memory_space<vmem>>, vector<63x128xf32>,
    %c0_46 = arith.constant 0 : index
    %c640 = arith.constant 640 : index
    %47 = vector.load %arg4[%c0_46, %c640] : memref<128x1152xbf16, #tpu.memory_space<vmem>>, vector<128x128xbf16>
    %c1_47 = arith.constant 1 : index
    %c0_48 = arith.constant 0 : index
    %48 = vector.load %arg1[%c1_47, %c0_48] : memref<64x128xbf16, #tpu.memory_space<vmem>>, vector<63x128xbf16>
    %cst_49 = arith.constant dense<0.000000e+00> : vector<63x128xf32>
    %49 = tpu.matmul %48, %47, %cst_49 {dimension_numbers = #tpu.dot_dimension_numbers<[1], [0], [0], [1], [0, 0, 1, 1], [], []>} : vector<63x128xbf16>, vector<128x128xbf16>, vector<63x128xf32> -> vector<63x128xf32>
    %c0_50 = arith.constant 0 : index
    %c0_51 = arith.constant 0 : index
    %50 = vector.load %arg2[%c0_50, %c0_51] : memref<64x1xi32, #tpu.memory_space<vmem>>, vector<63x1xi32>
    %c0_52 = arith.constant 0 : index
    %c0_53 = arith.constant 0 : index
    %51 = vector.load %arg3[%c0_52, %c0_53] : memref<64x1xi32, #tpu.memory_space<vmem>>, vector<63x1xi32>
    %c0_i32_54 = arith.constant 0 : i32
    %52 = vector.broadcast %c0_i32_54 : i32 to vector<63x1xi32>
    %53 = arith.addi %50, %52 : vector<63x1xi32>
    %c8_i32_55 = arith.constant 8 : i32
    %54 = vector.broadcast %c8_i32_55 : i32 to vector<63x1xi32>
    %55 = arith.cmpi slt, %53, %54 : vector<63x1xi32>
    %c1_i32_56 = arith.constant 1 : i32
    %56 = vector.broadcast %c1_i32_56 : i32 to vector<63x1xi32>
    %57 = arith.addi %51, %56 : vector<63x1xi32>
    %c8_i32_57 = arith.constant 8 : i32
    %58 = vector.broadcast %c8_i32_57 : i32 to vector<63x1xi32>
    %59 = arith.cmpi slt, %57, %58 : vector<63x1xi32>
    %60 = arith.andi %55, %59 : vector<63x1xi1>
    %61 = arith.extui %60 : vector<63x1xi1> to vector<63x1xi32>
    %62 = arith.sitofp %61 : vector<63x1xi32> to vector<63x1xf32>
    %c0_58 = arith.constant 0 : index
    %c384_59 = arith.constant 384 : index
    %63 = vector.load %arg7[%c0_58, %c384_59] : memref<64x512xf32, #tpu.memory_space<vmem>>, vector<63x128xf32>
    %64 = vector.broadcast %62 : vector<63x1xf32> to vector<63x128xf32>
    %65 = arith.mulf %49, %64 : vector<63x128xf32>
    %66 = arith.addf %63, %65 : vector<63x128xf32>
    %c0_60 = arith.constant 0 : index
    %c384_61 = arith.constant 384 : index
    %67 = vector.load %arg7[%c0_60, %c384_61] : memref<64x512xf32, #tpu.memory_space<vmem>>, vector<63x128xf32>
    tpu.vector_store %arg7[%c0_60, %c384_61], %66 {strides = array<i32>} : memref<64x512xf32, #tpu.memory_space<vmem>>, vector<63x128xf32>,
    %c0_62 = arith.constant 0 : index
    %c768 = arith.constant 768 : index
    %68 = vector.load %arg4[%c0_62, %c768] : memref<128x1152xbf16, #tpu.memory_space<vmem>>, vector<128x128xbf16>
    %c8 = arith.constant 8 : index
    %c0_63 = arith.constant 0 : index
    %69 = vector.load %arg1[%c8, %c0_63] : memref<64x128xbf16, #tpu.memory_space<vmem>>, vector<56x128xbf16>
    %cst_64 = arith.constant dense<0.000000e+00> : vector<56x128xf32>
    %70 = tpu.matmul %69, %68, %cst_64 {dimension_numbers = #tpu.dot_dimension_numbers<[1], [0], [0], [1], [0, 0, 1, 1], [], []>} : vector<56x128xbf16>, vector<128x128xbf16>, vector<56x128xf32> -> vector<56x128xf32>
    %c0_65 = arith.constant 0 : index
    %c0_66 = arith.constant 0 : index
    %71 = vector.load %arg2[%c0_65, %c0_66] : memref<64x1xi32, #tpu.memory_space<vmem>>, vector<56x1xi32>
    %c0_67 = arith.constant 0 : index
    %c0_68 = arith.constant 0 : index
    %72 = vector.load %arg3[%c0_67, %c0_68] : memref<64x1xi32, #tpu.memory_space<vmem>>, vector<56x1xi32>
    %c1_i32_69 = arith.constant 1 : i32
    %73 = vector.broadcast %c1_i32_69 : i32 to vector<56x1xi32>
    %74 = arith.addi %71, %73 : vector<56x1xi32>
    %c8_i32_70 = arith.constant 8 : i32
    %75 = vector.broadcast %c8_i32_70 : i32 to vector<56x1xi32>
    %76 = arith.cmpi slt, %74, %75 : vector<56x1xi32>
    %c0_i32_71 = arith.constant 0 : i32
    %77 = vector.broadcast %c0_i32_71 : i32 to vector<56x1xi32>
    %78 = arith.addi %72, %77 : vector<56x1xi32>
    %c8_i32_72 = arith.constant 8 : i32
    %79 = vector.broadcast %c8_i32_72 : i32 to vector<56x1xi32>
    %80 = arith.cmpi slt, %78, %79 : vector<56x1xi32>
    %81 = arith.andi %76, %80 : vector<56x1xi1>
    %82 = arith.extui %81 : vector<56x1xi1> to vector<56x1xi32>
    %83 = arith.sitofp %82 : vector<56x1xi32> to vector<56x1xf32>
    %c0_73 = arith.constant 0 : index
    %c256_74 = arith.constant 256 : index
    %84 = vector.load %arg7[%c0_73, %c256_74] : memref<64x512xf32, #tpu.memory_space<vmem>>, vector<56x128xf32>
    %85 = vector.broadcast %83 : vector<56x1xf32> to vector<56x128xf32>
    %86 = arith.mulf %70, %85 : vector<56x128xf32>
    %87 = arith.addf %84, %86 : vector<56x128xf32>
    %c0_75 = arith.constant 0 : index
    %c256_76 = arith.constant 256 : index
    %88 = vector.load %arg7[%c0_75, %c256_76] : memref<64x512xf32, #tpu.memory_space<vmem>>, vector<56x128xf32>
    tpu.vector_store %arg7[%c0_75, %c256_76], %87 {strides = array<i32>} : memref<64x512xf32, #tpu.memory_space<vmem>>, vector<56x128xf32>,
    %c0_77 = arith.constant 0 : index
    %c896 = arith.constant 896 : index
    %89 = vector.load %arg4[%c0_77, %c896] : memref<128x1152xbf16, #tpu.memory_space<vmem>>, vector<128x128xbf16>
    %c8_78 = arith.constant 8 : index
    %c0_79 = arith.constant 0 : index
    %90 = vector.load %arg1[%c8_78, %c0_79] : memref<64x128xbf16, #tpu.memory_space<vmem>>, vector<56x128xbf16>
    %cst_80 = arith.constant dense<0.000000e+00> : vector<56x128xf32>
    %91 = tpu.matmul %90, %89, %cst_80 {dimension_numbers = #tpu.dot_dimension_numbers<[1], [0], [0], [1], [0, 0, 1, 1], [], []>} : vector<56x128xbf16>, vector<128x128xbf16>, vector<56x128xf32> -> vector<56x128xf32>
    %c0_81 = arith.constant 0 : index
    %c0_82 = arith.constant 0 : index
    %92 = vector.load %arg2[%c0_81, %c0_82] : memref<64x1xi32, #tpu.memory_space<vmem>>, vector<56x1xi32>
    %c0_83 = arith.constant 0 : index
    %c0_84 = arith.constant 0 : index
    %93 = vector.load %arg3[%c0_83, %c0_84] : memref<64x1xi32, #tpu.memory_space<vmem>>, vector<56x1xi32>
    %c1_i32_85 = arith.constant 1 : i32
    %94 = vector.broadcast %c1_i32_85 : i32 to vector<56x1xi32>
    %95 = arith.addi %92, %94 : vector<56x1xi32>
    %c8_i32_86 = arith.constant 8 : i32
    %96 = vector.broadcast %c8_i32_86 : i32 to vector<56x1xi32>
    %97 = arith.cmpi slt, %95, %96 : vector<56x1xi32>
    %c0_i32_87 = arith.constant 0 : i32
    %98 = vector.broadcast %c0_i32_87 : i32 to vector<56x1xi32>
    %99 = arith.addi %93, %98 : vector<56x1xi32>
    %c8_i32_88 = arith.constant 8 : i32
    %100 = vector.broadcast %c8_i32_88 : i32 to vector<56x1xi32>
    %101 = arith.cmpi slt, %99, %100 : vector<56x1xi32>
    %102 = arith.andi %97, %101 : vector<56x1xi1>
    %103 = arith.extui %102 : vector<56x1xi1> to vector<56x1xi32>
    %104 = arith.sitofp %103 : vector<56x1xi32> to vector<56x1xf32>
    %c0_89 = arith.constant 0 : index
    %c384_90 = arith.constant 384 : index
    %105 = vector.load %arg7[%c0_89, %c384_90] : memref<64x512xf32, #tpu.memory_space<vmem>>, vector<56x128xf32>
    %106 = vector.broadcast %104 : vector<56x1xf32> to vector<56x128xf32>
    %107 = arith.mulf %91, %106 : vector<56x128xf32>
    %108 = arith.addf %105, %107 : vector<56x128xf32>
    %c0_91 = arith.constant 0 : index
    %c384_92 = arith.constant 384 : index
    %109 = vector.load %arg7[%c0_91, %c384_92] : memref<64x512xf32, #tpu.memory_space<vmem>>, vector<56x128xf32>
    tpu.vector_store %arg7[%c0_91, %c384_92], %108 {strides = array<i32>} : memref<64x512xf32, #tpu.memory_space<vmem>>, vector<56x128xf32>,
    %c0_93 = arith.constant 0 : index
    %c1024 = arith.constant 1024 : index
    %110 = vector.load %arg4[%c0_93, %c1024] : memref<128x1152xbf16, #tpu.memory_space<vmem>>, vector<128x128xbf16>
    %c9 = arith.constant 9 : index
    %c0_94 = arith.constant 0 : index
    %111 = vector.load %arg1[%c9, %c0_94] : memref<64x128xbf16, #tpu.memory_space<vmem>>, vector<55x128xbf16>
    %cst_95 = arith.constant dense<0.000000e+00> : vector<55x128xf32>
    %112 = tpu.matmul %111, %110, %cst_95 {dimension_numbers = #tpu.dot_dimension_numbers<[1], [0], [0], [1], [0, 0, 1, 1], [], []>} : vector<55x128xbf16>, vector<128x128xbf16>, vector<55x128xf32> -> vector<55x128xf32>
    %c0_96 = arith.constant 0 : index
    %c0_97 = arith.constant 0 : index
    %113 = vector.load %arg2[%c0_96, %c0_97] : memref<64x1xi32, #tpu.memory_space<vmem>>, vector<55x1xi32>
    %c0_98 = arith.constant 0 : index
    %c0_99 = arith.constant 0 : index
    %114 = vector.load %arg3[%c0_98, %c0_99] : memref<64x1xi32, #tpu.memory_space<vmem>>, vector<55x1xi32>
    %c1_i32_100 = arith.constant 1 : i32
    %115 = vector.broadcast %c1_i32_100 : i32 to vector<55x1xi32>
    %116 = arith.addi %113, %115 : vector<55x1xi32>
    %c8_i32_101 = arith.constant 8 : i32
    %117 = vector.broadcast %c8_i32_101 : i32 to vector<55x1xi32>
    %118 = arith.cmpi slt, %116, %117 : vector<55x1xi32>
    %c1_i32_102 = arith.constant 1 : i32
    %119 = vector.broadcast %c1_i32_102 : i32 to vector<55x1xi32>
    %120 = arith.addi %114, %119 : vector<55x1xi32>
    %c8_i32_103 = arith.constant 8 : i32
    %121 = vector.broadcast %c8_i32_103 : i32 to vector<55x1xi32>
    %122 = arith.cmpi slt, %120, %121 : vector<55x1xi32>
    %123 = arith.andi %118, %122 : vector<55x1xi1>
    %124 = arith.extui %123 : vector<55x1xi1> to vector<55x1xi32>
    %125 = arith.sitofp %124 : vector<55x1xi32> to vector<55x1xf32>
    %c0_104 = arith.constant 0 : index
    %c384_105 = arith.constant 384 : index
    %126 = vector.load %arg7[%c0_104, %c384_105] : memref<64x512xf32, #tpu.memory_space<vmem>>, vector<55x128xf32>
    %127 = vector.broadcast %125 : vector<55x1xf32> to vector<55x128xf32>
    %128 = arith.mulf %112, %127 : vector<55x128xf32>
    %129 = arith.addf %126, %128 : vector<55x128xf32>
    %c0_106 = arith.constant 0 : index
    %c384_107 = arith.constant 384 : index
    %130 = vector.load %arg7[%c0_106, %c384_107] : memref<64x512xf32, #tpu.memory_space<vmem>>, vector<55x128xf32>
    tpu.vector_store %arg7[%c0_106, %c384_107], %129 {strides = array<i32>} : memref<64x512xf32, #tpu.memory_space<vmem>>, vector<55x128xf32>,
    %c0_108 = arith.constant 0 : index
    %c0_109 = arith.constant 0 : index
    %131 = vector.load %arg7[%c0_108, %c0_109] : memref<64x512xf32, #tpu.memory_space<vmem>>, vector<64x512xf32>
    %c0_110 = arith.constant 0 : index
    %c0_111 = arith.constant 0 : index
    %132 = vector.load %arg5[%c0_110, %c0_111] : memref<1x512xf32, #tpu.memory_space<vmem>>, vector<1x512xf32>
    %133 = vector.broadcast %132 : vector<1x512xf32> to vector<64x512xf32>
    %134 = arith.addf %131, %133 : vector<64x512xf32>
    %135 = math.tanh %134 : vector<64x512xf32>
    %136 = arith.truncf %135 : vector<64x512xf32> to vector<64x512xbf16>
    %c0_112 = arith.constant 0 : index
    %c0_113 = arith.constant 0 : index
    %137 = vector.load %arg6[%c0_112, %c0_113] : memref<64x512xbf16, #tpu.memory_space<vmem>>, vector<64x512xbf16>
    tpu.vector_store %arg6[%c0_112, %c0_113], %136 {strides = array<i32>} : memref<64x512xbf16, #tpu.memory_space<vmem>>, vector<64x512xbf16>,
    return
  }
  func.func @transform_0(%arg0: i32) -> (i32, i32) {
    %c0_i32 = arith.constant 0 : i32
    %c0_i32_0 = arith.constant 0 : i32
    return %arg0, %c0_i32 : i32, i32
  }
  func.func @transform_1(%arg0: i32) -> (i32, i32) {
    %c0_i32 = arith.constant 0 : i32
    %c0_i32_0 = arith.constant 0 : i32
    return %arg0, %c0_i32 : i32, i32
  }
  func.func @transform_2(%arg0: i32) -> (i32, i32) {
    %c0_i32 = arith.constant 0 : i32
    %c0_i32_0 = arith.constant 0 : i32
    return %arg0, %c0_i32 : i32, i32
  }
  func.func @transform_3(%arg0: i32) -> (i32, i32) {
    %c0_i32 = arith.constant 0 : i32
    %c0_i32_0 = arith.constant 0 : i32
    %c0_i32_1 = arith.constant 0 : i32
    return %c0_i32, %c0_i32_0 : i32, i32
  }
  func.func @transform_4(%arg0: i32) -> (i32, i32) {
    %c0_i32 = arith.constant 0 : i32
    %c0_i32_0 = arith.constant 0 : i32
    %c0_i32_1 = arith.constant 0 : i32
    return %c0_i32, %c0_i32_0 : i32, i32
  }
  func.func @transform_5(%arg0: i32) -> (i32, i32) {
    %c0_i32 = arith.constant 0 : i32
    %c0_i32_0 = arith.constant 0 : i32
    return %arg0, %c0_i32 : i32, i32
  }
}

</mosaic_0001>

<bundles_post_ra>
// kernel: tile.53
= control target key start
LH: loop header
LB: loop body
LE: loop exit
PB: predicated region body
PF: predicated region fallthrough
CT: control target
= control target key end

     0   :  { %s22_s0 = inlined_call_operand.vmem [shape: s32[4], index: 0, kind: input, shape index: {}]   ;;  %s23_s1 = inlined_call_operand.vmem [shape: s32[2,4], index: 1, kind: output, shape index: {}]  }
   0x1   :  { %v4_v0 = vld [vmem:[%s22_s0] ss:$0 sm:$0xff] }
   0x2   :  { %5 = vst [vmem:[%s23_s1] sm:$0x3] %v4_v0 }

// kernel: tile.63
= control target key start
LH: loop header
LB: loop body
LE: loop exit
PB: predicated region body
PF: predicated region fallthrough
CT: control target
= control target key end

     0   :  { %s22_s0 = inlined_call_operand.vmem [shape: s32[16], index: 0, kind: input, shape index: {}]   ;;  %s23_s1 = inlined_call_operand.vmem [shape: s32[2,16], index: 1, kind: output, shape index: {}]  }
   0x1   :  { %v4_v0 = vld [vmem:[%s22_s0] ss:$0 sm:$0xff] }
   0x2   :  { %5 = vst [vmem:[%s23_s1] sm:$0x3] %v4_v0 }

// kernel: tile.83
= control target key start
LH: loop header
LB: loop body
LE: loop exit
PB: predicated region body
PF: predicated region fallthrough
CT: control target
= control target key end

     0   :  { %s22_s0 = inlined_call_operand.vmem [shape: s32[64], index: 0, kind: input, shape index: {}]   ;;  %s23_s1 = inlined_call_operand.vmem [shape: s32[2,64], index: 1, kind: output, shape index: {}]  }
   0x1   :  { %v4_v0 = vld [vmem:[%s22_s0] ss:$0 sm:$0xff] }
   0x2   :  { %5 = vst [vmem:[%s23_s1] sm:$0x3] %v4_v0 }

// kernel: tile.1
= control target key start
LH: loop header
LB: loop body
LE: loop exit
PB: predicated region body
PF: predicated region fallthrough
CT: control target
= control target key end

     0   :  { %s34_s8 = smov 125   ;;  %vm7_vm0 = vcmask 7168   ;;  %s35_s11 = smov 126   ;;  %s61_s0 = inlined_call_operand.vmem [shape: s32[2,4], index: 0, kind: input, shape index: {}]   ;;  %s62_s1 = inlined_call_operand.vmem [shape: s32[8,1], index: 1, kind: output, shape index: {}]  }
   0x1   :  { %v4_v0 = vld [vmem:[%s61_s0] sm:$0x3]  ;;  %s33_s0 = smov 127  }
   0x2   :  { %5 = vst [vmem:[#allocation0] sm:$0x3] %v4_v0 }
   0x9   :  { %v9_v1 = vld [vmem:[#allocation0] sm:$0x3]  }
   0xa   :  { %v21_v2 = vld [vmem:[#allocation0] sm:$0x3]   ;;  %10 = vrot.lane.b32.xlu0 %v9_v1, %s33_s0 }
   0xb   :  { %22 = vrot.lane.b32.xlu1 %v21_v2, %s34_s8  ;;  %v6_v3 = vld [vmem:[#allocation0] sm:$0x3]  }
   0xc   :  { %v15_v4 = vld [vmem:[#allocation0] sm:$0x3]   ;;  %8 = vst.msk [vmem:[%s62_s1] ss:$4 sm:$0x3] %vm7_vm0, %v6_v3  }
   0xe   :  { %16 = vrot.lane.b32.xlu0 %v15_v4, %s35_s11 }
  0x7c   :  { %v11_v5 = vpop.permute.xlu0 %10  }
  0x7d   :  { %v23_v6 = vpop.permute.xlu1 %22   ;;  %27 = vst.msk [vmem:[%s62_s1 + $0x1] ss:$4 sm:$0x3] %vm7_vm0, %v11_v5  }
  0x7e   :  { %29 = vst.msk [vmem:[%s62_s1 + $0x3] ss:$4 sm:$0x3] %vm7_vm0, %v23_v6  }
  0x80   :  { %v17_v7 = vpop.permute.xlu0 %16  }
  0x81   :  { %28 = vst.msk [vmem:[%s62_s1 + $0x2] ss:$4 sm:$0x3] %vm7_vm0, %v17_v7  }

// kernel: tile.3
= control target key start
LH: loop header
LB: loop body
LE: loop exit
PB: predicated region body
PF: predicated region fallthrough
CT: control target
= control target key end

     0   :  { %s130_s8 = smov 125   ;;  %s131_s9 = smov 126   ;;  %vm7_vm0 = vcmask 7168   ;;  %s221_s0 = inlined_call_operand.vmem [shape: s32[2,16], index: 0, kind: input, shape index: {}]   ;;  %s222_s1 = inlined_call_operand.vmem [shape: s32[32,1], index: 1, kind: output, shape index: {}]  }
   0x1   :  { %v4_v0 = vld [vmem:[%s221_s0] sm:$0x3]  ;;  %s129_s0 = smov 127   ;;  %s132_s10 = smov 124  }
   0x2   :  { %5 = vst [vmem:[#allocation0] sm:$0x3] %v4_v0  ;;  %s133_s11 = smov 123   ;;  %s134_s12 = smov 122  }
   0x3   :  { %s135_s13 = smov 121   ;;  %s136_s14 = smov 120  }
   0x4   :  { %s137_s17 = smov 119   ;;  %s138_s18 = smov 118  }
   0x5   :  { %s139_s19 = smov 117   ;;  %s140_s20 = smov 116  }
   0x6   :  { %s141_s21 = smov 115   ;;  %s142_s22 = smov 114  }
   0x7   :  { %s143_s23 = smov 113  }
   0x9   :  { %v9_v1 = vld [vmem:[#allocation0] sm:$0x3]  }
   0xa   :  { %v21_v2 = vld [vmem:[#allocation0] sm:$0x3]   ;;  %10 = vrot.lane.b32.xlu0 %v9_v1, %s129_s0 }
   0xb   :  { %22 = vrot.lane.b32.xlu1 %v21_v2, %s130_s8  ;;  %v15_v3 = vld [vmem:[#allocation0] sm:$0x3]  }
   0xc   :  { %v27_v4 = vld [vmem:[#allocation0] sm:$0x3]  }
   0xd   :  { %v33_v5 = vld [vmem:[#allocation0] sm:$0x3]  }
   0xe   :  { %16 = vrot.lane.b32.xlu0 %v15_v3, %s131_s9  ;;  %v39_v6 = vld [vmem:[#allocation0] sm:$0x3]  }
   0xf   :  { %28 = vrot.lane.b32.xlu1 %v27_v4, %s132_s10  ;;  %v45_v7 = vld [vmem:[#allocation0] sm:$0x3]  }
  0x10   :  { %v51_v8 = vld [vmem:[#allocation0] sm:$0x3]  }
  0x11   :  { %v57_v9 = vld [vmem:[#allocation0] sm:$0x3]  }
  0x12   :  { %34 = vrot.lane.b32.xlu0 %v33_v5, %s133_s11  ;;  %v63_v10 = vld [vmem:[#allocation0] sm:$0x3]  }
  0x13   :  { %40 = vrot.lane.b32.xlu1 %v39_v6, %s134_s12  ;;  %v6_v11 = vld [vmem:[#allocation0] sm:$0x3]  }
  0x14   :  { %8 = vst.msk [vmem:[%s222_s1] ss:$16 sm:$0x3] %vm7_vm0, %v6_v11   ;;  %v69_v12 = vld [vmem:[#allocation0] sm:$0x3]  }
  0x15   :  { %v75_v13 = vld [vmem:[#allocation0] sm:$0x3]  }
  0x16   :  { %46 = vrot.lane.b32.xlu0 %v45_v7, %s135_s13  ;;  %v81_v14 = vld [vmem:[#allocation0] sm:$0x3]  }
  0x17   :  { %52 = vrot.lane.b32.xlu1 %v51_v8, %s136_s14  ;;  %v87_v15 = vld [vmem:[#allocation0] sm:$0x3]  }
  0x18   :  { %v93_v16 = vld [vmem:[#allocation0] sm:$0x3]  }
  0x1a   :  { %58 = vrot.lane.b32.xlu0 %v57_v9, %s137_s17 }
  0x1b   :  { %64 = vrot.lane.b32.xlu1 %v63_v10, %s138_s18 }
  0x1e   :  { %70 = vrot.lane.b32.xlu0 %v69_v12, %s139_s19 }
  0x1f   :  { %76 = vrot.lane.b32.xlu1 %v75_v13, %s140_s20 }
  0x22   :  { %82 = vrot.lane.b32.xlu0 %v81_v14, %s141_s21 }
  0x23   :  { %88 = vrot.lane.b32.xlu1 %v87_v15, %s142_s22 }
  0x26   :  { %94 = vrot.lane.b32.xlu0 %v93_v16, %s143_s23 }
  0x7c   :  { %v11_v17 = vpop.permute.xlu0 %10  }
  0x7d   :  { %v23_v18 = vpop.permute.xlu1 %22   ;;  %99 = vst.msk [vmem:[%s222_s1 + $0x1] ss:$16 sm:$0x3] %vm7_vm0, %v11_v17  }
  0x7e   :  { %101 = vst.msk [vmem:[%s222_s1 + $0x3] ss:$16 sm:$0x3] %vm7_vm0, %v23_v18  }
  0x80   :  { %v17_v19 = vpop.permute.xlu0 %16  }
  0x81   :  { %v29_v20 = vpop.permute.xlu1 %28   ;;  %100 = vst.msk [vmem:[%s222_s1 + $0x2] ss:$16 sm:$0x3] %vm7_vm0, %v17_v19  }
  0x82   :  { %102 = vst.msk [vmem:[%s222_s1 + $0x4] ss:$16 sm:$0x3] %vm7_vm0, %v29_v20  }
  0x84   :  { %v35_v21 = vpop.permute.xlu0 %34  }
  0x85   :  { %v41_v22 = vpop.permute.xlu1 %40   ;;  %103 = vst.msk [vmem:[%s222_s1 + $0x5] ss:$16 sm:$0x3] %vm7_vm0, %v35_v21  }
  0x86   :  { %104 = vst.msk [vmem:[%s222_s1 + $0x6] ss:$16 sm:$0x3] %vm7_vm0, %v41_v22  }
  0x88   :  { %v47_v23 = vpop.permute.xlu0 %46  }
  0x89   :  { %v53_v24 = vpop.permute.xlu1 %52   ;;  %105 = vst.msk [vmem:[%s222_s1 + $0x7] ss:$16 sm:$0x3] %vm7_vm0, %v47_v23  }
  0x8a   :  { %106 = vst.msk [vmem:[%s222_s1 + $0x8] ss:$16 sm:$0x3] %vm7_vm0, %v53_v24  }
  0x8c   :  { %v59_v25 = vpop.permute.xlu0 %58  }
  0x8d   :  { %v65_v26 = vpop.permute.xlu1 %64   ;;  %107 = vst.msk [vmem:[%s222_s1 + $0x9] ss:$16 sm:$0x3] %vm7_vm0, %v59_v25  }
  0x8e   :  { %108 = vst.msk [vmem:[%s222_s1 + $0xa] ss:$16 sm:$0x3] %vm7_vm0, %v65_v26  }
  0x90   :  { %v71_v27 = vpop.permute.xlu0 %70  }
  0x91   :  { %v77_v28 = vpop.permute.xlu1 %76   ;;  %109 = vst.msk [vmem:[%s222_s1 + $0xb] ss:$16 sm:$0x3] %vm7_vm0, %v71_v27  }
  0x92   :  { %110 = vst.msk [vmem:[%s222_s1 + $0xc] ss:$16 sm:$0x3] %vm7_vm0, %v77_v28  }
  0x94   :  { %v83_v29 = vpop.permute.xlu0 %82  }
  0x95   :  { %v89_v30 = vpop.permute.xlu1 %88   ;;  %111 = vst.msk [vmem:[%s222_s1 + $0xd] ss:$16 sm:$0x3] %vm7_vm0, %v83_v29  }
  0x96   :  { %112 = vst.msk [vmem:[%s222_s1 + $0xe] ss:$16 sm:$0x3] %vm7_vm0, %v89_v30  }
  0x98   :  { %v95_v31 = vpop.permute.xlu0 %94  }
  0x99   :  { %113 = vst.msk [vmem:[%s222_s1 + $0xf] ss:$16 sm:$0x3] %vm7_vm0, %v95_v31  }

// kernel: decoder_forward.6
= control target key start
LH: loop header
LB: loop body
LE: loop exit
PB: predicated region body
PF: predicated region fallthrough
CT: control target
= control target key end

     0   :  { %s416_s12 = smov 0   ;;  %s444_s0 = inlined_call_operand.vmem [shape: bf16[2,8], index: 0, kind: input, shape index: {}]   ;;  %s445_s1 = inlined_call_operand.vmem [shape: bf16[8,512], index: 1, kind: input, shape index: {}]   ;;  %s446_s2 = inlined_call_operand.vmem [shape: f32[1,512], index: 2, kind: input, shape index: {}]   ;;  %s447_s3 = inlined_call_operand.vmem [shape: bf16[2,512], index: 3, kind: output, shape index: {}]  }
   0x1 LB: > { %s353_s13 = sadd.s32 4294967295, %s392_s12   ;;  %p357_p0 = scmp.ge.s32.totalorder %s392_s12, 1  ;;  %s392_s12 = sphi %s416_s12, %s13_s12  }
   0x2   : > { %p148_p1 = scmp.lt.s32.totalorder %s392_s12, 3 }
   0x4   : > { %p149_p2 = pnand %p357_p0, %p148_p1 }
   0x5   : > { %s358_s14 = sshll.u32 (!%p149_p2), %s353_s13, 1  ;;  %v394_v0 = vmov (!%p149_p2), 0   ;;  %vm215_vm0 = vcmask (!%p149_p2), 1043456   ;;  %v192_v5 = vld [vmem:[%s444_s0] sm:$0x1] (!%p149_p2)  ;;  %vm211_vm1 = vcmask (!%p149_p2), 64512   ;;  %v196_v6 = vlaneseq (!%p149_p2) }
   0x6   : > { %152 = sbr.rel (%p149_p2) target bundleno = 260 (0x104), region = 32  ;;  %p176_p3 = scmp.lt.s32.totalorder (!%p149_p2), %s358_s14, 3  ;;  %254 = vmatprep.mubr.bf16.mxu0 (!%p149_p2), %v394_v0  ;;  %v395_v21 = vmov (!%p149_p2), 1966171168  }
   0x7   : > { %v197_v7 = vshrl.u32 (!%p149_p2), %v196_v6, 7  ;;  %v279_v22 = vunpack.c.l.s4 (!%p149_p2), %v395_v21 }
   0x9   : > { %v198_v8 = vsub.s32 (!%p149_p2), 0, %v197_v7  ;;  %v202_v10 = vsub.s32 (!%p149_p2), 1, %v197_v7  ;;  %v280_v24 = vunpack.c.0.s8 (!%p149_p2), %v279_v22 }
   0xb   : > { %v283_v32 = vsub.s32 (!%p149_p2), %v280_v24, %v197_v7 }
   0xd   : > { %s449_s14 = smov (!%p176_p3, %s358_s14), 3 }
   0xe   : > { %s359_s15 = sshll.u32 %s449_s14, 2  ;;  %s184_s23 = scalar_lea.vmem %s446_s2, %s449_s14 }
   0xf   : > { %s179_s18 = scalar_lea.vmem %s445_s1, %s359_s15  ;;  %v194_v9 = vld [vmem:[%s184_s23] sm:$0x3]  ;;  %s189_s26 = scalar_lea.vmem %s447_s3, %s449_s14 }
  0x10   : > { %v193_v1 = vld [vmem:[%s179_s18] sm:$0xff]  ;;  %v199_v11 = vrot.slane %v194_v9, %v198_v8  ;;  %v203_v12 = vrot.slane %v194_v9, %v202_v10 }
  0x11   : > { %v363_v2 = vcombine.high %v193_v1, %v193_v1  ;;  %v362_v3 = vcombine.low %v193_v1, %v193_v1 }
  0x13   : > { %364 = vmatprep.subr.msk.bf16.mxu0 %vm215_vm0, %v363_v2  ;;  %v217_v4 = vsel %vm215_vm0, %v362_v3, 0 }
  0x14   : > { %223 = vmatpush1.bf16.msra.mxu0 %v217_v4 }
  0x17   : > { %365 = vmatmul.mubr.msk.bf16.vlgmr.msra.gmra.mrb[0].mxu0 %vm211_vm1, %v192_v5 }
  0xea   : > { %v256_v13 = vpop.f32.mrb[0].mxu0 }
  0xeb   : > { %v257_v14 = vadd.f32 %v256_v13, %v199_v11  ;;  %v258_v15 = vpop.f32.mrb[1].mxu0 }
  0xec   : > { %v259_v16 = vadd.f32 %v258_v15, %v203_v12  ;;  %v260_v17 = vpop.f32.mrb[2].mxu0 }
  0xed   : > { %v265_v18 = vmul.f32 0.70710677, %v257_v14  ;;  %v261_v19 = vpop.f32.mrb[3].mxu0  ;;  %v263_v26 = vmul.f32 0.5, %v257_v14 }
  0xee   : > { %v266_v20 = vmul.f32 0.70710677, %v259_v16  ;;  %v264_v28 = vmul.f32 0.5, %v259_v16 }
  0xef   : > { %382 = verf.f32 %v265_v18 }
  0xf0   : > { %384 = verf.f32 %v266_v20 }
  0xf9   : > { %v383_v23 = vpop.eup %382 }
  0xfa   : > { %v385_v25 = vpop.eup %384  ;;  %v269_v27 = vadd.f32 1.0, %v383_v23 }
  0xfb   : > { %v270_v29 = vadd.f32 1.0, %v385_v25 }
  0xfc   : > { %v271_v30 = vmul.f32 %v269_v27, %v263_v26 }
  0xfd   : > { %v272_v31 = vmul.f32 %v270_v29, %v264_v28 }
  0xff   : > { %v366_v33 = vpack.c.bf16 %v272_v31, %v271_v30 }
 0x101   : > { %v284_v34 = vrot.slane %v366_v33, %v283_v32 }
 0x103   : > { %367 = vst.sshfl [vmem:[%s189_s26] sm:$0x5 pattern:$0x73625140] %v284_v34 }
 0x104 PF: > { %s13_s12 = sadd.s32 1, %s392_s12  }
 0x105   : > { %p10_p4 = scmp.ge.s32.totalorder %s13_s12, 4  }
 0x107   :  { %12 = sbr.rel (!%p10_p4) target bundleno = 1 (0x1), region = 65 }

// kernel: decoder_forward.7
= control target key start
LH: loop header
LB: loop body
LE: loop exit
PB: predicated region body
PF: predicated region fallthrough
CT: control target
= control target key end

     0   :  { %10 = vsyncpa [#allocation4], 0  ;;  %s1668_s18 = smov [#allocation3]   ;;  %s1895_s0 = inlined_call_operand.vmem [shape: bf16[8,128], index: 0, kind: input, shape index: {}]   ;;  %s1896_s1 = inlined_call_operand.vmem [shape: s32[8,1], index: 1, kind: input, shape index: {}]   ;;  %s1897_s2 = inlined_call_operand.vmem [shape: s32[8,1], index: 2, kind: input, shape index: {}]   ;;  %s1898_s3 = inlined_call_operand.hbm [shape: bf16[128,1152], index: 3, kind: input, shape index: {}]   ;;  %s1899_s4 = inlined_call_operand.vmem [shape: f32[1,512], index: 4, kind: input, shape index: {}]   ;;  %s1900_s5 = inlined_call_operand.vmem [shape: bf16[8,512], index: 5, kind: output, shape index: {}]  }
   0x1   :  { %s22_s19 = sshll.u32 %s1668_s18, 4  ;;  %s1644_s22 = scalar_lea.hbm %s1898_s3, 9216  ;;  %s23_s19 = int_to_ptr.vmem [resolvable:$true] %s22_s19 }
   0x2   :  { %p1645_p0 = scmp.ne.s32.totalorder %s1898_s3, %s1644_s22  ;;  %p1648_p1 = scmp.lt.u32.totalorder %s1644_s22, %s1898_s3 }
   0x4   :  { %p1650_p2 = pnand %p1648_p1, %p1645_p0 }
   0x6   :  { %1653 = shalt.err (!%p1650_p2)
}
   0x7   :  { %s1654_s27 = scalar_lea.vmem %s23_s19, 9216  ;;  %p1659_p4 = scmp.lt.s32.totalorder %s23_s19, %s23_s19 }
   0x8   :  { %p1655_p3 = scmp.ne.s32.totalorder %s23_s19, %s1654_s27  ;;  %p1660_p5 = scmp.lt.s32.totalorder %s1654_s27, %s1654_s27 }
   0xa   :  { %p1661_p6 = por %p1660_p5, %p1659_p4 }
   0xc   :  { %p1662_p7 = pnand %p1661_p6, %p1655_p3 }
   0xe   :  { %1665 = shalt.err (!%p1662_p7)
}
   0xf   :  { %s1669_s28 = smov 576   ;;  %s1670_s29 = smov 36  }
  0x10   :  { %28 = dma.hbm_to_vmem [thread:$0]  %s1898_s3, 9216, %s23_s19, [#allocation4], %s1669_s28, %s1669_s28, %s1670_s29  }
  0x11   :  { %1666 = dma.done.wait [#allocation4], 9216  }
  0x12   :  { %1667 = vsyncadd [#allocation4], 4294958080  ;;  %v1671_v0 = vmov 0.0   ;;  %vm1672_vm0 = vmmov 0   ;;  %v1559_v1 = vld [vmem:[#allocation3] ss:$36 sps:$4 sm:$0xff]  }
  0x13   :  { %1366 = vmatprep.subr.bf16.mxu0 %v1671_v0  ;;  %1386 = vmatprep.subr.bf16.mxu1 %v1671_v0  ;;  %v1560_v2 = vld [vmem:[#allocation3 + $0x4] ss:$36 sps:$4 sm:$0xff]   ;;  %v1562_v4 = vld [vmem:[#allocation3 + $0x4c] ss:$36 sps:$4 sm:$0xff]   ;;  %v1564_v6 = vld [vmem:[#allocation3 + $0x94] ss:$36 sps:$4 sm:$0xff]  }
  0x14   :  { %1382 = vmatprep.mubr.msk.bf16.mxu0 %vm1672_vm0, %v1671_v0  ;;  %1402 = vmatprep.mubr.msk.bf16.mxu1 %vm1672_vm0, %v1671_v0  ;;  %v1561_v3 = vld [vmem:[#allocation3 + $0x48] ss:$36 sps:$4 sm:$0xff]   ;;  %v1563_v5 = vld [vmem:[#allocation3 + $0x90] ss:$36 sps:$4 sm:$0xff]   ;;  %v1565_v7 = vld [vmem:[#allocation3 + $0xd8] ss:$36 sps:$4 sm:$0xff]  }
  0x15   :  { %1367 = vmatpush3.bf16.msra.mxu0 %v1559_v1  ;;  %1387 = vmatpush3.bf16.msra.mxu1 %v1560_v2  ;;  %v1566_v8 = vld [vmem:[#allocation3 + $0xdc] ss:$36 sps:$4 sm:$0xff]   ;;  %v1568_v10 = vld [vmem:[#allocation3 + $0x124] ss:$36 sps:$4 sm:$0xff]   ;;  %v1570_v12 = vld [vmem:[#allocation3 + $0x16c] ss:$36 sps:$4 sm:$0xff]  }
  0x16   :  { %1368 = vmatprep.subr.bf16.mxu0 %v1671_v0  ;;  %1388 = vmatprep.subr.bf16.mxu1 %v1671_v0  ;;  %v1567_v9 = vld [vmem:[#allocation3 + $0x120] ss:$36 sps:$4 sm:$0xff]   ;;  %v1569_v11 = vld [vmem:[#allocation3 + $0x168] ss:$36 sps:$4 sm:$0xff]   ;;  %v1571_v13 = vld [vmem:[#allocation3 + $0x1b0] ss:$36 sps:$4 sm:$0xff]  }
  0x17   :  { %v1572_v14 = vld [vmem:[#allocation3 + $0x1b4] ss:$36 sps:$4 sm:$0xff]   ;;  %v1574_v16 = vld [vmem:[#allocation3 + $0x1fc] ss:$36 sps:$4 sm:$0xff]   ;;  %v1575_v19 = vld [vmem:[#allocation3 + $0x8] ss:$36 sps:$4 sm:$0xff]  }
  0x18   :  { %v1573_v15 = vld [vmem:[#allocation3 + $0x1f8] ss:$36 sps:$4 sm:$0xff]   ;;  %v55_v17 = vld [vmem:[%s1895_s0] sm:$0xf]  ;;  %v1576_v20 = vld [vmem:[#allocation3 + $0xc] ss:$36 sps:$4 sm:$0xff]  }
  0x19   :  { %1369 = vmatpush3.bf16.msra.mxu0 %v1561_v3  ;;  %1389 = vmatpush3.bf16.msra.mxu1 %v1562_v4  ;;  %v163_v18 = vld [vmem:[%s1895_s0] sm:$0xf]  ;;  %v1577_v21 = vld [vmem:[#allocation3 + $0x50] ss:$36 sps:$4 sm:$0xff]   ;;  %v1579_v23 = vld [vmem:[#allocation3 + $0x98] ss:$36 sps:$4 sm:$0xff]  }
  0x1a   :  { %1370 = vmatprep.subr.bf16.mxu0 %v1671_v0  ;;  %1390 = vmatprep.subr.bf16.mxu1 %v1671_v0  ;;  %v1578_v22 = vld [vmem:[#allocation3 + $0x54] ss:$36 sps:$4 sm:$0xff]   ;;  %v1580_v24 = vld [vmem:[#allocation3 + $0x9c] ss:$36 sps:$4 sm:$0xff]   ;;  %v1582_v26 = vld [vmem:[#allocation3 + $0xe4] ss:$36 sps:$4 sm:$0xff]  }
  0x1b   :  { %v1581_v25 = vld [vmem:[#allocation3 + $0xe0] ss:$36 sps:$4 sm:$0xff]   ;;  %v1583_v27 = vld [vmem:[#allocation3 + $0x128] ss:$36 sps:$4 sm:$0xff]   ;;  %v1585_v29 = vld [vmem:[#allocation3 + $0x170] ss:$36 sps:$4 sm:$0xff]  }
  0x1c   :  { %v1584_v28 = vld [vmem:[#allocation3 + $0x12c] ss:$36 sps:$4 sm:$0xff]   ;;  %v1586_v30 = vld [vmem:[#allocation3 + $0x174] ss:$36 sps:$4 sm:$0xff]   ;;  %v1673_v32 = vmov 0  }
  0x1d   :  { %1371 = vmatpush3.bf16.msra.mxu0 %v1563_v5  ;;  %1391 = vmatpush3.bf16.msra.mxu1 %v1564_v6  ;;  %v1587_v31 = vld [vmem:[#allocation3 + $0x1b8] ss:$36 sps:$4 sm:$0xff]   ;;  %v1589_v34 = vld [vmem:[#allocation3 + $0x200] ss:$36 sps:$4 sm:$0xff]   ;;  %v1591_v38 = vld [vmem:[#allocation3 + $0x10] ss:$36 sps:$4 sm:$0xff]  }
  0x1e   :  { %1372 = vmatprep.subr.bf16.mxu0 %v1671_v0  ;;  %1392 = vmatprep.subr.bf16.mxu1 %v1671_v0  ;;  %v1588_v33 = vld [vmem:[#allocation3 + $0x1bc] ss:$36 sps:$4 sm:$0xff]   ;;  %v1590_v35 = vld [vmem:[#allocation3 + $0x204] ss:$36 sps:$4 sm:$0xff]   ;;  %v1592_v39 = vld [vmem:[#allocation3 + $0x14] ss:$36 sps:$4 sm:$0xff]  }
  0x1f   :  { %1553 = vset.pattern.permute.xlu1 %v1673_v32  ;;  %1552 = vset.pattern.permute.xlu0 %v1673_v32  ;;  %v271_v36 = vld [vmem:[%s1895_s0] sm:$0xf]  ;;  %v1593_v40 = vld [vmem:[#allocation3 + $0x58] ss:$36 sps:$4 sm:$0xff]   ;;  %v1596_v43 = vld [vmem:[#allocation3 + $0xa4] ss:$36 sps:$4 sm:$0xff]  }
  0x20   :  { %v379_v37 = vld [vmem:[%s1895_s0] sm:$0xf]  ;;  %v1597_v44 = vld [vmem:[#allocation3 + $0xe8] ss:$36 sps:$4 sm:$0xff]   ;;  %v1599_v46 = vld [vmem:[#allocation3 + $0x130] ss:$36 sps:$4 sm:$0xff]  }
  0x21   :  { %1373 = vmatpush3.bf16.msra.mxu0 %v1565_v7  ;;  %1393 = vmatpush3.bf16.msra.mxu1 %v1566_v8  ;;  %v1594_v41 = vld [vmem:[#allocation3 + $0x5c] ss:$36 sps:$4 sm:$0xff]   ;;  %v1598_v45 = vld [vmem:[#allocation3 + $0xec] ss:$36 sps:$4 sm:$0xff]   ;;  %v1600_v47 = vld [vmem:[#allocation3 + $0x134] ss:$36 sps:$4 sm:$0xff]  }
  0x22   :  { %1374 = vmatprep.subr.bf16.mxu0 %v1671_v0  ;;  %1394 = vmatprep.subr.bf16.mxu1 %v1671_v0  ;;  %v1595_v42 = vld [vmem:[#allocation3 + $0xa0] ss:$36 sps:$4 sm:$0xff]   ;;  %v1601_v50 = vld [vmem:[#allocation3 + $0x178] ss:$36 sps:$4 sm:$0xff]  }
  0x23   :  { %v1784_v48 = vld [vmem:[%s1895_s0] ss:$0 sps:$4 sm:$0xff]  }
  0x24   :  { %v587_v49 = vld [vmem:[%s1896_s1] sm:$0x7f]  ;;  %v494_v60 = vshll.u32 %v1784_v48, 16 }
  0x25   :  { %1375 = vmatpush3.bf16.msra.mxu0 %v1567_v9  ;;  %1395 = vmatpush3.bf16.msra.mxu1 %v1568_v10  ;;  %v1793_v51 = vld [vmem:[%s1895_s0] ss:$0 sps:$4 sm:$0xff]   ;;  %vm589_vm1 = vcmp.lt.s32.totalorder %v587_v49, 2  ;;  %v1604_v9 = vld [vmem:[#allocation3 + $0x1c4] ss:$36 sps:$4 sm:$0xff]  }
  0x26   :  { %1376 = vmatprep.subr.bf16.mxu0 %v1671_v0  ;;  %1396 = vmatprep.subr.bf16.mxu1 %v1671_v0  ;;  %v588_v52 = vld [vmem:[%s1897_s2] sm:$0x7f]  ;;  %v627_v62 = vshll.u32 %v1793_v51, 16  ;;  %v1632_v49 = vld [vmem:[#allocation3 + $0x188] ss:$36 sps:$4 sm:$0xff]  }
  0x27   :  { %v847_v53 = vld [vmem:[%s1896_s1] sm:$0x3f]  ;;  %v590_v55 = vadd.s32 1, %v588_v52  ;;  %v1633_v52 = vld [vmem:[#allocation3 + $0x1d0] ss:$36 sps:$4 sm:$0xff]  }
  0x28   :  { %v1602_v54 = vld [vmem:[#allocation3 + $0x17c] ss:$36 sps:$4 sm:$0xff]   ;;  %v849_v57 = vadd.s32 1, %v847_v53 }
  0x29   :  { %1377 = vmatpush3.bf16.msra.mxu0 %v1569_v11  ;;  %1397 = vmatpush3.bf16.msra.mxu1 %v1570_v12  ;;  %v848_v56 = vld [vmem:[%s1897_s2] sm:$0x3f]  ;;  %vm591_vm3 = vcmp.lt.s32.totalorder %v590_v55, 2  ;;  %v1634_v55 = vld [vmem:[#allocation3 + $0x218] ss:$36 sps:$4 sm:$0xff]  }
  0x2a   :  { %1378 = vmatprep.subr.bf16.mxu0 %v1671_v0  ;;  %1398 = vmatprep.subr.bf16.mxu1 %v1671_v0  ;;  %vm851_vm2 = vcmp.lt.s32.totalorder %v848_v56, 2  ;;  %v720_v58 = vld [vmem:[%s1896_s1] sm:$0x7f]  ;;  %vm850_vm4 = vcmp.lt.s32.totalorder %v849_v57, 2  ;;  %vm592_vm5 = vmand %vm589_vm1, %vm591_vm3  ;;  %v1132_v57 = vlaneseq }
  0x2b   :  { %v721_v59 = vld [vmem:[%s1897_s2] sm:$0x7f]  ;;  %vm722_vm6 = vcmp.lt.s32.totalorder %v720_v58, 2  ;;  %v1240_v3 = vsel %vm592_vm5, 1.0, %v1671_v0  ;;  %vm852_vm7 = vmand %vm850_vm4, %vm851_vm2 }
  0x2c   :  { %v974_v61 = vld [vmem:[%s1896_s1] sm:$0x3f]  ;;  %v723_v63 = vadd.s32 1, %v721_v59  ;;  %v1260_v7 = vsel %vm852_vm7, 1.0, %v1671_v0  ;;  %v1133_v58 = vshrl.u32 %v1132_v57, 7 }
  0x2d   :  { %1379 = vmatpush3.bf16.msra.mxu0 %v1571_v13  ;;  %1399 = vmatpush3.bf16.msra.mxu1 %v1572_v14  ;;  %v975_v1 = vld [vmem:[%s1897_s2] sm:$0x3f]  ;;  %v976_v2 = vadd.s32 1, %v974_v61  ;;  %v1554_v10 = vpack.i.bf16 %v1260_v7, %v1240_v3  ;;  %v492_v13 = vshrl.u32 %v1784_v48, 16  ;;  %v496_v14 = vrot.slane %v494_v60, 1 }
  0x2e   :  { %1380 = vmatprep.subr.bf16.mxu0 %v1671_v0  ;;  %1400 = vmatprep.subr.bf16.mxu1 %v1671_v0  ;;  %vm978_vm8 = vcmp.lt.s32.totalorder %v975_v1, 2  ;;  %v1108_v4 = vld [vmem:[%s1896_s1] sm:$0x1f]  ;;  %vm724_vm9 = vcmp.lt.s32.totalorder %v723_v63, 2  ;;  %v1142_v59 = vsub.s32 2, %v1133_v58 }
  0x2f   :  { %v1109_v5 = vld [vmem:[%s1897_s2] sm:$0x1f]  ;;  %vm977_vm10 = vcmp.lt.s32.totalorder %v976_v2, 2  ;;  %v1110_v8 = vadd.s32 1, %v1108_v4  ;;  %vm725_vm11 = vmand %vm722_vm6, %vm724_vm9  ;;  %1555 = vperm.xlu1 %1553, %v1554_v10  }
  0x30   :  { %v1603_v6 = vld [vmem:[#allocation3 + $0x1c0] ss:$36 sps:$4 sm:$0xff]   ;;  %v1112_v11 = vadd.s32 1, %v1109_v5  ;;  %v1250_v12 = vsel %vm725_vm11, 1.0, %v1671_v0  ;;  %vm979_vm12 = vmand %vm977_vm10, %vm978_vm8 }
  0x31   :  { %1381 = vmatpush3.bf16.msra.mxu0 %v1573_v15  ;;  %1401 = vmatpush3.bf16.msra.mxu1 %v1574_v16  ;;  %vm1111_vm13 = vcmp.lt.s32.totalorder %v1110_v8, 2  ;;  %v1605_v15 = vld [vmem:[#allocation3 + $0x208] ss:$36 sps:$4 sm:$0xff]   ;;  %v625_v16 = vshrl.u32 %v1793_v51, 16  ;;  %v1618_v32 = vld [vmem:[#allocation3 + $0x13c] ss:$36 sps:$4 sm:$0xff]  }
  0x32   :  { %1406 = vmatprep.subr.bf16.mxu0 %v1671_v0  ;;  %1426 = vmatprep.subr.bf16.mxu1 %v1671_v0  ;;  %vm1113_vm14 = vcmp.lt.s32.totalorder %v1112_v11, 2  ;;  %v1635_v48 = vld [vmem:[%s1895_s0] ss:$0 sps:$4 sm:$0xee]  }
  0x33   :  { %731 = vperm.xlu0 %1552, %v1250_v12   ;;  %vm1114_vm15 = vmand %vm1111_vm13, %vm1113_vm14  ;;  %v1015_v51 = vshll.u32 %v1635_v48, 16  ;;  %v1130_v60 = vld [vmem:[%s1899_s4] sm:$0xf] }
  0x34   :  { %1383 = vmatmul.mubr.bf16.vlgmr.msra.gmra.mrb[0].mxu0 %v55_v17  ;;  %1403 = vmatmul.mubr.bf16.vlgmr.msra.gmra.mrb[0].mxu1 %v163_v18  ;;  %v629_v17 = vrot.slane %v627_v62, 1  ;;  %v1270_v18 = vsel %vm979_vm12, 1.0, %v1671_v0  ;;  %v1883_v61 = vrot.slane %v1130_v60, %v1142_v59 }
  0x35   :  { %1407 = vmatpush3.bf16.msra.mxu0 %v1575_v19  ;;  %1427 = vmatpush3.bf16.msra.mxu1 %v1576_v20  ;;  %v1606_v19 = vld [vmem:[#allocation3 + $0x20c] ss:$36 sps:$4 sm:$0xff]   ;;  %v1280_v20 = vsel %vm1114_vm15, 1.0, %v1671_v0 }
  0x36   :  { %1408 = vmatprep.subr.bf16.mxu0 %v1671_v0  ;;  %1428 = vmatprep.subr.bf16.mxu1 %v1671_v0 }
  0x37   :  { %1422 = vmatprep.mubr.msk.bf16.mxu0 %vm1672_vm0, %v1671_v0  ;;  %1442 = vmatprep.mubr.msk.bf16.mxu1 %vm1672_vm0, %v1671_v0 }
  0x38   :  { %985 = vperm.xlu0 %1552, %v1270_v18   ;;  %1120 = vperm.xlu1 %1553, %v1280_v20  }
  0x39   :  { %1409 = vmatpush3.bf16.msra.mxu0 %v1577_v21  ;;  %1429 = vmatpush3.bf16.msra.mxu1 %v1578_v22  ;;  %v497_v21 = vor.u32 %v496_v14, %v492_v13  ;;  %v630_v22 = vor.u32 %v629_v17, %v625_v16  ;;  %v1134_v17 = vsub.s32 0, %v1133_v58 }
  0x3a   :  { %1410 = vmatprep.subr.bf16.mxu0 %v1671_v0  ;;  %1430 = vmatprep.subr.bf16.mxu1 %v1671_v0 }
  0x3d   :  { %1411 = vmatpush3.bf16.msra.mxu0 %v1579_v23  ;;  %1431 = vmatpush3.bf16.msra.mxu1 %v1580_v24  ;;  %v1609_v23 = vld [vmem:[#allocation3 + $0x18] ss:$36 sps:$4 sm:$0xff]  }
  0x3e   :  { %1412 = vmatprep.subr.bf16.mxu0 %v1671_v0  ;;  %1432 = vmatprep.subr.bf16.mxu1 %v1671_v0  ;;  %v1610_v24 = vld [vmem:[#allocation3 + $0x1c] ss:$36 sps:$4 sm:$0xff]  }
  0x41   :  { %1413 = vmatpush3.bf16.msra.mxu0 %v1581_v25  ;;  %1433 = vmatpush3.bf16.msra.mxu1 %v1582_v26  ;;  %v1611_v25 = vld [vmem:[#allocation3 + $0x60] ss:$36 sps:$4 sm:$0xff]  }
  0x42   :  { %1414 = vmatprep.subr.bf16.mxu0 %v1671_v0  ;;  %1434 = vmatprep.subr.bf16.mxu1 %v1671_v0  ;;  %v1612_v26 = vld [vmem:[#allocation3 + $0x64] ss:$36 sps:$4 sm:$0xff]  }
  0x45   :  { %1415 = vmatpush3.bf16.msra.mxu0 %v1583_v27  ;;  %1435 = vmatpush3.bf16.msra.mxu1 %v1584_v28  ;;  %v1613_v27 = vld [vmem:[#allocation3 + $0xa8] ss:$36 sps:$4 sm:$0xff]  }
  0x46   :  { %1416 = vmatprep.subr.bf16.mxu0 %v1671_v0  ;;  %1436 = vmatprep.subr.bf16.mxu1 %v1671_v0  ;;  %v1614_v28 = vld [vmem:[#allocation3 + $0xac] ss:$36 sps:$4 sm:$0xff]  }
  0x49   :  { %1417 = vmatpush3.bf16.msra.mxu0 %v1585_v29  ;;  %1437 = vmatpush3.bf16.msra.mxu1 %v1586_v30  ;;  %v1615_v29 = vld [vmem:[#allocation3 + $0xf0] ss:$36 sps:$4 sm:$0xff]  }
  0x4a   :  { %1418 = vmatprep.subr.bf16.mxu0 %v1671_v0  ;;  %1438 = vmatprep.subr.bf16.mxu1 %v1671_v0  ;;  %v1616_v30 = vld [vmem:[#allocation3 + $0xf4] ss:$36 sps:$4 sm:$0xff]  }
  0x4d   :  { %1419 = vmatpush3.bf16.msra.mxu0 %v1587_v31  ;;  %1439 = vmatpush3.bf16.msra.mxu1 %v1588_v33  ;;  %v1617_v31 = vld [vmem:[#allocation3 + $0x138] ss:$36 sps:$4 sm:$0xff]   ;;  %v1619_v33 = vld [vmem:[#allocation3 + $0x180] ss:$36 sps:$4 sm:$0xff]  }
  0x4e   :  { %1420 = vmatprep.subr.bf16.mxu0 %v1671_v0  ;;  %1440 = vmatprep.subr.bf16.mxu1 %v1671_v0 }
  0x51   :  { %1421 = vmatpush3.bf16.msra.mxu0 %v1589_v34  ;;  %1441 = vmatpush3.bf16.msra.mxu1 %v1590_v35  ;;  %v1620_v34 = vld [vmem:[#allocation3 + $0x184] ss:$36 sps:$4 sm:$0xff]  }
  0x52   :  { %1446 = vmatprep.subr.bf16.mxu0 %v1671_v0  ;;  %1466 = vmatprep.subr.bf16.mxu1 %v1671_v0  ;;  %v1621_v35 = vld [vmem:[#allocation3 + $0x1c8] ss:$36 sps:$4 sm:$0xff]  }
  0x54   :  { %1423 = vmatmul.mubr.bf16.vlgmr.msra.gmra.mrb[4].mxu0 %v271_v36  ;;  %1443 = vmatmul.mubr.bf16.vlgmr.msra.gmra.mrb[4].mxu1 %v379_v37  ;;  %v1622_v36 = vld [vmem:[#allocation3 + $0x1cc] ss:$36 sps:$4 sm:$0xff]   ;;  %v1625_v37 = vld [vmem:[%s1895_s0] ss:$0 sps:$4 sm:$0xee]  }
  0x55   :  { %1447 = vmatpush3.bf16.msra.mxu0 %v1591_v38  ;;  %1467 = vmatpush3.bf16.msra.mxu1 %v1592_v39  ;;  %v1623_v38 = vld [vmem:[#allocation3 + $0x210] ss:$36 sps:$4 sm:$0xff]   ;;  %v1626_v39 = vld [vmem:[%s1895_s0] ss:$0 sps:$4 sm:$0xee]  }
  0x56   :  { %1448 = vmatprep.subr.bf16.mxu0 %v1671_v0  ;;  %1468 = vmatprep.subr.bf16.mxu1 %v1671_v0 }
  0x57   :  { %1462 = vmatprep.mubr.msk.bf16.mxu0 %vm1672_vm0, %v1671_v0  ;;  %1482 = vmatprep.mubr.msk.bf16.mxu1 %vm1672_vm0, %v1671_v0 }
  0x59   :  { %1449 = vmatpush3.bf16.msra.mxu0 %v1593_v40  ;;  %1469 = vmatpush3.bf16.msra.mxu1 %v1594_v41  ;;  %v1624_v40 = vld [vmem:[#allocation3 + $0x214] ss:$36 sps:$4 sm:$0xff]   ;;  %v757_v41 = vrot.slane %v1625_v37, 1 }
  0x5a   :  { %1450 = vmatprep.subr.bf16.mxu0 %v1671_v0  ;;  %1470 = vmatprep.subr.bf16.mxu1 %v1671_v0 }
  0x5d   :  { %1451 = vmatpush3.bf16.msra.mxu0 %v1595_v42  ;;  %1471 = vmatpush3.bf16.msra.mxu1 %v1596_v43  ;;  %v884_v42 = vrot.slane %v1626_v39, 1  ;;  %v1627_v43 = vld [vmem:[#allocation3 + $0x20] ss:$36 sps:$4 sm:$0xff]  }
  0x5e   :  { %1452 = vmatprep.subr.bf16.mxu0 %v1671_v0  ;;  %1472 = vmatprep.subr.bf16.mxu1 %v1671_v0 }
  0x61   :  { %1453 = vmatpush3.bf16.msra.mxu0 %v1597_v44  ;;  %1473 = vmatpush3.bf16.msra.mxu1 %v1598_v45  ;;  %v1628_v44 = vld [vmem:[#allocation3 + $0x68] ss:$36 sps:$4 sm:$0xff]   ;;  %v1629_v45 = vld [vmem:[#allocation3 + $0xb0] ss:$36 sps:$4 sm:$0xff]  }
  0x62   :  { %1454 = vmatprep.subr.bf16.mxu0 %v1671_v0  ;;  %1474 = vmatprep.subr.bf16.mxu1 %v1671_v0 }
  0x65   :  { %1455 = vmatpush3.bf16.msra.mxu0 %v1599_v46  ;;  %1475 = vmatpush3.bf16.msra.mxu1 %v1600_v47  ;;  %v1630_v46 = vld [vmem:[#allocation3 + $0xf8] ss:$36 sps:$4 sm:$0xff]   ;;  %v1631_v47 = vld [vmem:[#allocation3 + $0x140] ss:$36 sps:$4 sm:$0xff]  }
  0x66   :  { %1456 = vmatprep.subr.bf16.mxu0 %v1671_v0  ;;  %1476 = vmatprep.subr.bf16.mxu1 %v1671_v0 }
  0x69   :  { %1457 = vmatpush3.bf16.msra.mxu0 %v1601_v50  ;;  %1477 = vmatpush3.bf16.msra.mxu1 %v1602_v54  ;;  %v1012_v50 = vshrl.u32 %v1635_v48, 16  ;;  %v1017_v54 = vrot.slane %v1015_v51, 2 }
  0x6a   :  { %1458 = vmatprep.subr.bf16.mxu0 %v1671_v0  ;;  %1478 = vmatprep.subr.bf16.mxu1 %v1671_v0 }
  0x6b   :  { %v1014_v53 = vrot.slane %v1012_v50, 1 }
  0x6d   :  { %1459 = vmatpush3.bf16.msra.mxu0 %v1603_v6  ;;  %1479 = vmatpush3.bf16.msra.mxu1 %v1604_v9  ;;  %v1018_v56 = vor.u32 %v1017_v54, %v1014_v53  ;;  %v1146_v6 = vsub.s32 3, %v1133_v58 }
  0x6e   :  { %1460 = vmatprep.subr.bf16.mxu0 %v1671_v0  ;;  %1480 = vmatprep.subr.bf16.mxu1 %v1671_v0 }
  0x6f   :  { %v1885_v7 = vrot.slane %v1130_v60, %v1146_v6 }
  0x71   :  { %1461 = vmatpush3.bf16.msra.mxu0 %v1605_v15  ;;  %1481 = vmatpush3.bf16.msra.mxu1 %v1606_v19 }
  0x72   :  { %1486 = vmatprep.subr.bf16.mxu0 %v1671_v0  ;;  %1506 = vmatprep.subr.bf16.mxu1 %v1671_v0 }
  0x74   :  { %1463 = vmatmul.mubr.bf16.vlgmr.msra.gmra.mrb[8].mxu0 %v497_v21  ;;  %1483 = vmatmul.mubr.bf16.vlgmr.msra.gmra.mrb[8].mxu1 %v630_v22  ;;  %v1135_v21 = vrot.slane %v1130_v60, %v1134_v17 }
  0x75   :  { %1487 = vmatpush3.bf16.msra.mxu0 %v1609_v23  ;;  %1507 = vmatpush3.bf16.msra.mxu1 %v1610_v24 }
  0x76   :  { %1488 = vmatprep.subr.bf16.mxu0 %v1671_v0  ;;  %1508 = vmatprep.subr.bf16.mxu1 %v1671_v0 }
  0x77   :  { %1502 = vmatprep.mubr.msk.bf16.mxu0 %vm1672_vm0, %v1671_v0  ;;  %1522 = vmatprep.mubr.msk.bf16.mxu1 %vm1672_vm0, %v1671_v0 }
  0x79   :  { %1489 = vmatpush3.bf16.msra.mxu0 %v1611_v25  ;;  %1509 = vmatpush3.bf16.msra.mxu1 %v1612_v26 }
  0x7a   :  { %1490 = vmatprep.subr.bf16.mxu0 %v1671_v0  ;;  %1510 = vmatprep.subr.bf16.mxu1 %v1671_v0 }
  0x7d   :  { %1491 = vmatpush3.bf16.msra.mxu0 %v1613_v27  ;;  %1511 = vmatpush3.bf16.msra.mxu1 %v1614_v28 }
  0x7e   :  { %1492 = vmatprep.subr.bf16.mxu0 %v1671_v0  ;;  %1512 = vmatprep.subr.bf16.mxu1 %v1671_v0 }
  0x81   :  { %1493 = vmatpush3.bf16.msra.mxu0 %v1615_v29  ;;  %1513 = vmatpush3.bf16.msra.mxu1 %v1616_v30 }
  0x82   :  { %1494 = vmatprep.subr.bf16.mxu0 %v1671_v0  ;;  %1514 = vmatprep.subr.bf16.mxu1 %v1671_v0 }
  0x85   :  { %1495 = vmatpush3.bf16.msra.mxu0 %v1617_v31  ;;  %1515 = vmatpush3.bf16.msra.mxu1 %v1618_v32 }
  0x86   :  { %1496 = vmatprep.subr.bf16.mxu0 %v1671_v0  ;;  %1516 = vmatprep.subr.bf16.mxu1 %v1671_v0 }
  0x89   :  { %1497 = vmatpush3.bf16.msra.mxu0 %v1619_v33  ;;  %1517 = vmatpush3.bf16.msra.mxu1 %v1620_v34 }
  0x8a   :  { %1498 = vmatprep.subr.bf16.mxu0 %v1671_v0  ;;  %1518 = vmatprep.subr.bf16.mxu1 %v1671_v0 }
  0x8d   :  { %1499 = vmatpush3.bf16.msra.mxu0 %v1621_v35  ;;  %1519 = vmatpush3.bf16.msra.mxu1 %v1622_v36  ;;  %v1138_v36 = vsub.s32 1, %v1133_v58 }
  0x8e   :  { %1500 = vmatprep.subr.bf16.mxu0 %v1671_v0  ;;  %1520 = vmatprep.subr.bf16.mxu1 %v1671_v0 }
  0x91   :  { %1501 = vmatpush3.bf16.msra.mxu0 %v1623_v38  ;;  %1521 = vmatpush3.bf16.msra.mxu1 %v1624_v40  ;;  %v1139_v38 = vrot.slane %v1130_v60, %v1138_v36 }
  0x92   :  { %1526 = vmatprep.subr.bf16.mxu0 %v1671_v0 }
  0x94   :  { %1503 = vmatmul.mubr.bf16.vlgmr.msra.gmra.mrb[12].mxu0 %v757_v41  ;;  %1523 = vmatmul.mubr.bf16.vlgmr.msra.gmra.mrb[12].mxu1 %v884_v42 }
  0x95   :  { %1527 = vmatpush3.bf16.msra.mxu0 %v1627_v43  ;;  %1542 = vmatprep.mubr.msk.bf16.mxu0 %vm1672_vm0, %v1671_v0 }
  0x96   :  { %1528 = vmatprep.subr.bf16.mxu0 %v1671_v0 }
  0x99   :  { %1529 = vmatpush3.bf16.msra.mxu0 %v1628_v44 }
  0x9a   :  { %1530 = vmatprep.subr.bf16.mxu0 %v1671_v0 }
  0x9d   :  { %1531 = vmatpush3.bf16.msra.mxu0 %v1629_v45 }
  0x9e   :  { %1532 = vmatprep.subr.bf16.mxu0 %v1671_v0 }
  0xa1   :  { %1533 = vmatpush3.bf16.msra.mxu0 %v1630_v46 }
  0xa2   :  { %1534 = vmatprep.subr.bf16.mxu0 %v1671_v0 }
  0xa5   :  { %1535 = vmatpush3.bf16.msra.mxu0 %v1631_v47 }
  0xa6   :  { %1536 = vmatprep.subr.bf16.mxu0 %v1671_v0 }
  0xa9   :  { %1537 = vmatpush3.bf16.msra.mxu0 %v1632_v49 }
  0xaa   :  { %1538 = vmatprep.subr.bf16.mxu0 %v1671_v0 }
  0xad   :  { %1539 = vmatpush3.bf16.msra.mxu0 %v1633_v52 }
  0xae   :  { %1540 = vmatprep.subr.bf16.mxu0 %v1671_v0  ;;  %v1556_v16 = vpop.permute.xlu1 %1555 }
  0xaf   :  { %v1557_v18 = vunpack.i.l.bf16 %v1556_v16  ;;  %v1558_v48 = vunpack.i.h.bf16 %v1556_v16 }
  0xb1   :  { %1541 = vmatpush3.bf16.msra.mxu0 %v1634_v55 }
  0xb2   :  { %v732_v19 = vpop.permute.xlu0 %731 }
  0xb4   :  { %1543 = vmatmul.mubr.bf16.vlgmr.msra.gmra.mrb[16].mxu0 %v1018_v56 }
  0xb7   :  { %v986_v51 = vpop.permute.xlu0 %985 }
 0x107   :  { %v138_v62 = vpop.f32.mrb[0].mxu0  ;;  %v246_v1 = vpop.f32.mrb[0].mxu1 }
 0x108   :  { %v1384_v63 = vpop.f32.mrb[1].mxu0  ;;  %v1404_v3 = vpop.f32.mrb[1].mxu1  ;;  %254 = vst [vmem:[#allocation2 + $0x8] sm:$0xff] %v246_v1  ;;  %v1152_v35 = vadd.f32 %v1135_v21, %v138_v62 }
 0x109   :  { %v141_v2 = vpop.f32.mrb[2].mxu0  ;;  %v249_v5 = vpop.f32.mrb[2].mxu1 }
 0x10a   :  { %v1385_v4 = vpop.f32.mrb[3].mxu0  ;;  %v1405_v0 = vpop.f32.mrb[3].mxu1  ;;  %v1160_v37 = vmul.f32 0.70710677, %v1152_v35  ;;  %v1156_v45 = vmul.f32 0.5, %v1152_v35 }
 0x10b   :  { %v1121_v5 = vpop.permute.xlu1 %1120 }
 0x10c   :  { %1636 = verf.f32 %v1160_v37 }
 0x10f   :  { %v595_v26 = vld [vmem:[#allocation2 + $0x8] sm:$0x7f] }
 0x116   :  { %v1637_v42 = vpop.eup %1636 }
 0x117   :  { %v1168_v43 = vadd.f32 1.0, %v1637_v42 }
 0x119   :  { %v1172_v49 = vmul.f32 %v1168_v43, %v1156_v45 }
 0x127   :  { %v354_v8 = vpop.f32.mrb[4].mxu0  ;;  %v462_v10 = vpop.f32.mrb[4].mxu1 }
 0x128   :  { %v1424_v9 = vpop.f32.mrb[5].mxu0  ;;  %v1444_v12 = vpop.f32.mrb[5].mxu1  ;;  %362 = vst [vmem:[#allocation2 + $0x10] sm:$0xff] %v354_v8  ;;  %470 = vst [vmem:[#allocation2 + $0x18] sm:$0xff] %v462_v10 }
 0x129   :  { %v357_v11 = vpop.f32.mrb[6].mxu0  ;;  %v465_v14 = vpop.f32.mrb[6].mxu1 }
 0x12a   :  { %v1425_v13 = vpop.f32.mrb[7].mxu0  ;;  %v1445_v15 = vpop.f32.mrb[7].mxu1 }
 0x12f   :  { %v728_v24 = vld [vmem:[#allocation2 + $0x18] sm:$0x7f]  ;;  %v855_v57 = vld [vmem:[#allocation2 + $0x10] sm:$0x3f] }
 0x147   :  { %v581_v20 = vpop.f32.mrb[8].mxu0  ;;  %v714_v23 = vpop.f32.mrb[8].mxu1 }
 0x148   :  { %v601_v22 = vmul.f32 %v1557_v18, %v581_v20  ;;  %v1464_v25 = vpop.f32.mrb[9].mxu0  ;;  %v734_v27 = vmul.f32 %v732_v19, %v714_v23  ;;  %v1484_v29 = vpop.f32.mrb[9].mxu1 }
 0x149   :  { %v584_v28 = vpop.f32.mrb[10].mxu0  ;;  %v717_v32 = vpop.f32.mrb[10].mxu1 }
 0x14a   :  { %v602_v30 = vadd.f32 %v601_v22, %v595_v26  ;;  %v1465_v31 = vpop.f32.mrb[11].mxu0  ;;  %v735_v33 = vadd.f32 %v734_v27, %v728_v24  ;;  %v1485_v34 = vpop.f32.mrb[11].mxu1 }
 0x14c   :  { %603 = vst [vmem:[#allocation2 + $0x8] sm:$0x7f] %v602_v30  ;;  %736 = vst [vmem:[#allocation2 + $0x18] sm:$0x7f] %v735_v33 }
 0x153   :  { %v1127_v39 = vld [vmem:[#allocation2 + $0x8] sm:$0xff]  ;;  %v982_v63 = vld [vmem:[#allocation2 + $0x18] sm:$0x3f] }
 0x154   :  { %v1153_v40 = vadd.f32 %v1139_v38, %v1127_v39 }
 0x156   :  { %v1161_v41 = vmul.f32 0.70710677, %v1153_v40  ;;  %v1157_v46 = vmul.f32 0.5, %v1153_v40 }
 0x158   :  { %1638 = verf.f32 %v1161_v41 }
 0x162   :  { %v1639_v44 = vpop.eup %1638 }
 0x163   :  { %v1169_v47 = vadd.f32 1.0, %v1639_v44 }
 0x165   :  { %v1173_v50 = vmul.f32 %v1169_v47, %v1157_v46 }
 0x167   :  { %v1283_v52 = vpack.c.bf16 %v1173_v50, %v1172_v49  ;;  %v841_v53 = vpop.f32.mrb[12].mxu0  ;;  %v968_v55 = vpop.f32.mrb[12].mxu1 }
 0x168   :  { %v861_v54 = vmul.f32 %v1558_v48, %v841_v53  ;;  %v1504_v56 = vpop.f32.mrb[13].mxu0  ;;  %v988_v58 = vmul.f32 %v986_v51, %v968_v55  ;;  %v1524_v60 = vpop.f32.mrb[13].mxu1 }
 0x169   :  { %1192 = vst [vmem:[%s1900_s5] sm:$0xff] %v1283_v52  ;;  %v844_v59 = vpop.f32.mrb[14].mxu0  ;;  %v971_v2 = vpop.f32.mrb[14].mxu1 }
 0x16a   :  { %v862_v62 = vadd.f32 %v861_v54, %v855_v57  ;;  %v1505_v1 = vpop.f32.mrb[15].mxu0  ;;  %v989_v3 = vadd.f32 %v988_v58, %v982_v63  ;;  %v1525_v4 = vpop.f32.mrb[15].mxu1 }
 0x16c   :  { %863 = vst [vmem:[#allocation2 + $0x10] sm:$0x3f] %v862_v62  ;;  %990 = vst [vmem:[#allocation2 + $0x18] sm:$0x3f] %v989_v3 }
 0x173   :  { %v1128_v9 = vld [vmem:[#allocation2 + $0x10] sm:$0xff]  ;;  %v1117_v10 = vld [vmem:[#allocation2 + $0x18] sm:$0x1f] }
 0x174   :  { %v1154_v14 = vadd.f32 %v1883_v61, %v1128_v9 }
 0x176   :  { %v1162_v15 = vmul.f32 0.70710677, %v1154_v14  ;;  %v1158_v22 = vmul.f32 0.5, %v1154_v14 }
 0x178   :  { %1640 = verf.f32 %v1162_v15 }
 0x182   :  { %v1641_v19 = vpop.eup %1640 }
 0x183   :  { %v1170_v20 = vadd.f32 1.0, %v1641_v19 }
 0x185   :  { %v1174_v25 = vmul.f32 %v1170_v20, %v1158_v22 }
 0x187   :  { %v1102_v0 = vpop.f32.mrb[16].mxu0 }
 0x188   :  { %v1123_v6 = vmul.f32 %v1121_v5, %v1102_v0  ;;  %v1544_v8 = vpop.f32.mrb[17].mxu0 }
 0x189   :  { %v1105_v11 = vpop.f32.mrb[18].mxu0 }
 0x18a   :  { %v1124_v12 = vadd.f32 %v1123_v6, %v1117_v10  ;;  %v1545_v13 = vpop.f32.mrb[19].mxu0 }
 0x18c   :  { %1125 = vst [vmem:[#allocation2 + $0x18] sm:$0x1f] %v1124_v12 }
 0x193   :  { %v1129_v16 = vld [vmem:[#allocation2 + $0x18] sm:$0xff] }
 0x194   :  { %v1155_v17 = vadd.f32 %v1885_v7, %v1129_v16 }
 0x196   :  { %v1163_v18 = vmul.f32 0.70710677, %v1155_v17  ;;  %v1159_v23 = vmul.f32 0.5, %v1155_v17 }
 0x198   :  { %1642 = verf.f32 %v1163_v18 }
 0x1a2   :  { %v1643_v21 = vpop.eup %1642 }
 0x1a3   :  { %v1171_v24 = vadd.f32 1.0, %v1643_v21 }
 0x1a5   :  { %v1175_v26 = vmul.f32 %v1171_v24, %v1159_v23 }
 0x1a7   :  { %v1284_v27 = vpack.c.bf16 %v1175_v26, %v1174_v25 }
 0x1a9   :  { %1193 = vst [vmem:[%s1900_s5 + $0x8] sm:$0xff] %v1284_v27 }
 0x1aa   :  { %1198 = vsyncpa [#allocation4], 1 }

// kernel: tile.5
= control target key start
LH: loop header
LB: loop body
LE: loop exit
PB: predicated region body
PF: predicated region fallthrough
CT: control target
= control target key end

     0   :  { %s706_s8 = smov 125   ;;  %s707_s9 = smov 126   ;;  %vm7_vm0 = vcmask 7168   ;;  %s1293_s0 = inlined_call_operand.vmem [shape: s32[2,64], index: 0, kind: input, shape index: {}]   ;;  %s1294_s1 = inlined_call_operand.vmem [shape: s32[128,1], index: 1, kind: output, shape index: {}]  }
   0x1   :  { %v4_v0 = vld [vmem:[%s1293_s0] sm:$0x3]  ;;  %s705_s0 = smov 127   ;;  %s708_s10 = smov 124  }
   0x2   :  { %5 = vst [vmem:[#allocation0] sm:$0x3] %v4_v0  ;;  %s709_s11 = smov 123   ;;  %s710_s12 = smov 122  }
   0x3   :  { %s711_s13 = smov 121   ;;  %s712_s14 = smov 120  }
   0x4   :  { %s713_s15 = smov 119   ;;  %s714_s16 = smov 118  }
   0x5   :  { %s715_s17 = smov 117   ;;  %s716_s18 = smov 116  }
   0x6   :  { %s717_s19 = smov 115   ;;  %s718_s20 = smov 114  }
   0x7   :  { %s719_s21 = smov 113   ;;  %s720_s22 = smov 112  }
   0x8   :  { %s721_s23 = smov 111   ;;  %s722_s24 = smov 110  }
   0x9   :  { %v11_v1 = vld [vmem:[#allocation0] sm:$0x3]   ;;  %s723_s25 = smov 109   ;;  %s724_s26 = smov 108  }
   0xa   :  { %v27_v2 = vld [vmem:[#allocation0] sm:$0x3]   ;;  %12 = vrot.lane.b32.xlu0 %v11_v1, %s705_s0  ;;  %s725_s27 = smov 107   ;;  %s726_s28 = smov 106  }
   0xb   :  { %28 = vrot.lane.b32.xlu1 %v27_v2, %s706_s8  ;;  %v19_v3 = vld [vmem:[#allocation0] sm:$0x3]   ;;  %s727_s29 = smov 105   ;;  %s728_s30 = smov 104  }
   0xc   :  { %v35_v4 = vld [vmem:[#allocation0] sm:$0x3]   ;;  %s729_s2 = smov 103   ;;  %s730_s3 = smov 102  }
   0xd   :  { %v43_v5 = vld [vmem:[#allocation0] sm:$0x3]   ;;  %s731_s4 = smov 101   ;;  %s732_s5 = smov 100  }
   0xe   :  { %20 = vrot.lane.b32.xlu0 %v19_v3, %s707_s9  ;;  %v51_v6 = vld [vmem:[#allocation0] sm:$0x3]   ;;  %s733_s6 = smov 99   ;;  %s734_s7 = smov 98  }
   0xf   :  { %36 = vrot.lane.b32.xlu1 %v35_v4, %s708_s10  ;;  %v59_v7 = vld [vmem:[#allocation0] sm:$0x3]   ;;  %s735_s0 = smov 97   ;;  %s736_s8 = smov 96  }
  0x10   :  { %v67_v8 = vld [vmem:[#allocation0] sm:$0x3]   ;;  %s737_s9 = smov 95   ;;  %s738_s10 = smov 94  }
  0x11   :  { %v75_v9 = vld [vmem:[#allocation0] sm:$0x3]  }
  0x12   :  { %44 = vrot.lane.b32.xlu0 %v43_v5, %s709_s11  ;;  %v83_v10 = vld [vmem:[#allocation0] sm:$0x3]   ;;  %s739_s11 = smov 93  }
  0x13   :  { %52 = vrot.lane.b32.xlu1 %v51_v6, %s710_s12  ;;  %v91_v11 = vld [vmem:[#allocation0] sm:$0x3]   ;;  %s740_s12 = smov 92  }
  0x14   :  { %v99_v12 = vld [vmem:[#allocation0] sm:$0x3]  }
  0x15   :  { %v107_v13 = vld [vmem:[#allocation0] sm:$0x3]  }
  0x16   :  { %60 = vrot.lane.b32.xlu0 %v59_v7, %s711_s13  ;;  %v115_v14 = vld [vmem:[#allocation0] sm:$0x3]   ;;  %s741_s13 = smov 91  }
  0x17   :  { %68 = vrot.lane.b32.xlu1 %v67_v8, %s712_s14  ;;  %v123_v15 = vld [vmem:[#allocation0] sm:$0x3]   ;;  %s742_s14 = smov 90  }
  0x18   :  { %v131_v16 = vld [vmem:[#allocation0] sm:$0x3]  }
  0x19   :  { %v139_v17 = vld [vmem:[#allocation0] sm:$0x3]  }
  0x1a   :  { %76 = vrot.lane.b32.xlu0 %v75_v9, %s713_s15  ;;  %v147_v18 = vld [vmem:[#allocation0] sm:$0x3]   ;;  %s743_s15 = smov 89  }
  0x1b   :  { %84 = vrot.lane.b32.xlu1 %v83_v10, %s714_s16  ;;  %v155_v19 = vld [vmem:[#allocation0] sm:$0x3]   ;;  %s744_s16 = smov 88  }
  0x1c   :  { %v163_v20 = vld [vmem:[#allocation0] sm:$0x3]  }
  0x1d   :  { %v171_v21 = vld [vmem:[#allocation0] sm:$0x3]  }
  0x1e   :  { %92 = vrot.lane.b32.xlu0 %v91_v11, %s715_s17  ;;  %v179_v22 = vld [vmem:[#allocation0] sm:$0x3]   ;;  %s745_s17 = smov 87  }
  0x1f   :  { %100 = vrot.lane.b32.xlu1 %v99_v12, %s716_s18  ;;  %v187_v23 = vld [vmem:[#allocation0] sm:$0x3]   ;;  %s746_s18 = smov 86  }
  0x20   :  { %v195_v24 = vld [vmem:[#allocation0] sm:$0x3]  }
  0x21   :  { %v203_v25 = vld [vmem:[#allocation0] sm:$0x3]  }
  0x22   :  { %108 = vrot.lane.b32.xlu0 %v107_v13, %s717_s19  ;;  %v211_v26 = vld [vmem:[#allocation0] sm:$0x3]   ;;  %s747_s19 = smov 85  }
  0x23   :  { %116 = vrot.lane.b32.xlu1 %v115_v14, %s718_s20  ;;  %v219_v27 = vld [vmem:[#allocation0] sm:$0x3]   ;;  %s748_s20 = smov 84  }
  0x24   :  { %v227_v28 = vld [vmem:[#allocation0] sm:$0x3]  }
  0x25   :  { %v235_v29 = vld [vmem:[#allocation0] sm:$0x3]  }
  0x26   :  { %124 = vrot.lane.b32.xlu0 %v123_v15, %s719_s21  ;;  %v243_v30 = vld [vmem:[#allocation0] sm:$0x3]   ;;  %s749_s21 = smov 83  }
  0x27   :  { %132 = vrot.lane.b32.xlu1 %v131_v16, %s720_s22  ;;  %v251_v31 = vld [vmem:[#allocation0] sm:$0x3]   ;;  %s750_s22 = smov 82  }
  0x28   :  { %v259_v32 = vld [vmem:[#allocation0] sm:$0x3]  }
  0x29   :  { %v267_v33 = vld [vmem:[#allocation0] sm:$0x3]  }
  0x2a   :  { %140 = vrot.lane.b32.xlu0 %v139_v17, %s721_s23  ;;  %v275_v34 = vld [vmem:[#allocation0] sm:$0x3]   ;;  %s751_s23 = smov 81  }
  0x2b   :  { %148 = vrot.lane.b32.xlu1 %v147_v18, %s722_s24  ;;  %v283_v35 = vld [vmem:[#allocation0] sm:$0x3]   ;;  %s752_s24 = smov 80  }
  0x2c   :  { %v291_v36 = vld [vmem:[#allocation0] sm:$0x3]  }
  0x2d   :  { %v299_v37 = vld [vmem:[#allocation0] sm:$0x3]  }
  0x2e   :  { %156 = vrot.lane.b32.xlu0 %v155_v19, %s723_s25  ;;  %v307_v38 = vld [vmem:[#allocation0] sm:$0x3]   ;;  %s753_s25 = smov 79  }
  0x2f   :  { %164 = vrot.lane.b32.xlu1 %v163_v20, %s724_s26  ;;  %v315_v39 = vld [vmem:[#allocation0] sm:$0x3]   ;;  %s754_s26 = smov 78  }
  0x30   :  { %v323_v40 = vld [vmem:[#allocation0] sm:$0x3]  }
  0x31   :  { %v331_v41 = vld [vmem:[#allocation0] sm:$0x3]  }
  0x32   :  { %172 = vrot.lane.b32.xlu0 %v171_v21, %s725_s27  ;;  %v339_v42 = vld [vmem:[#allocation0] sm:$0x3]   ;;  %s755_s27 = smov 77  }
  0x33   :  { %180 = vrot.lane.b32.xlu1 %v179_v22, %s726_s28  ;;  %v347_v43 = vld [vmem:[#allocation0] sm:$0x3]   ;;  %s756_s28 = smov 76  }
  0x34   :  { %v355_v44 = vld [vmem:[#allocation0] sm:$0x3]  }
  0x35   :  { %v363_v45 = vld [vmem:[#allocation0] sm:$0x3]  }
  0x36   :  { %188 = vrot.lane.b32.xlu0 %v187_v23, %s727_s29  ;;  %v371_v46 = vld [vmem:[#allocation0] sm:$0x3]   ;;  %s757_s29 = smov 75  }
  0x37   :  { %196 = vrot.lane.b32.xlu1 %v195_v24, %s728_s30  ;;  %v379_v47 = vld [vmem:[#allocation0] sm:$0x3]   ;;  %s758_s30 = smov 74  }
  0x38   :  { %v387_v48 = vld [vmem:[#allocation0] sm:$0x3]  }
  0x39   :  { %v395_v49 = vld [vmem:[#allocation0] sm:$0x3]  }
  0x3a   :  { %204 = vrot.lane.b32.xlu0 %v203_v25, %s729_s2  ;;  %v403_v50 = vld [vmem:[#allocation0] sm:$0x3]   ;;  %s759_s2 = smov 73  }
  0x3b   :  { %212 = vrot.lane.b32.xlu1 %v211_v26, %s730_s3  ;;  %v411_v51 = vld [vmem:[#allocation0] sm:$0x3]   ;;  %s760_s3 = smov 72  }
  0x3c   :  { %v419_v52 = vld [vmem:[#allocation0] sm:$0x3]  }
  0x3d   :  { %v427_v53 = vld [vmem:[#allocation0] sm:$0x3]  }
  0x3e   :  { %220 = vrot.lane.b32.xlu0 %v219_v27, %s731_s4  ;;  %v435_v54 = vld [vmem:[#allocation0] sm:$0x3]  }
  0x3f   :  { %228 = vrot.lane.b32.xlu1 %v227_v28, %s732_s5  ;;  %v443_v55 = vld [vmem:[#allocation0] sm:$0x3]  }
  0x40   :  { %v451_v56 = vld [vmem:[#allocation0] sm:$0x3]  }
  0x41   :  { %v459_v57 = vld [vmem:[#allocation0] sm:$0x3]  }
  0x42   :  { %236 = vrot.lane.b32.xlu0 %v235_v29, %s733_s6  ;;  %v467_v58 = vld [vmem:[#allocation0] sm:$0x3]  }
  0x43   :  { %244 = vrot.lane.b32.xlu1 %v243_v30, %s734_s7  ;;  %v6_v59 = vld [vmem:[#allocation0] sm:$0x3]  }
  0x44   :  { %8 = vst.msk [vmem:[%s1294_s1] sm:$0x1] %vm7_vm0, %v6_v59   ;;  %515 = vst.msk [vmem:[%s1294_s1 + $0x3f] sm:$0x2] %vm7_vm0, %v6_v59   ;;  %v475_v60 = vld [vmem:[#allocation0] sm:$0x3]  }
  0x45   :  { %v483_v61 = vld [vmem:[#allocation0] sm:$0x3]  }
  0x46   :  { %252 = vrot.lane.b32.xlu0 %v251_v31, %s735_s0  ;;  %s761_s0 = smov 71   ;;  %v491_v0 = vld [vmem:[#allocation0] sm:$0x3]  }
  0x47   :  { %260 = vrot.lane.b32.xlu1 %v259_v32, %s736_s8  ;;  %s762_s8 = smov 70   ;;  %v499_v1 = vld [vmem:[#allocation0] sm:$0x3]  }
  0x48   :  { %v507_v4 = vld [vmem:[#allocation0] sm:$0x3]  }
  0x4a   :  { %268 = vrot.lane.b32.xlu0 %v267_v33, %s737_s9 }
  0x4b   :  { %276 = vrot.lane.b32.xlu1 %v275_v34, %s738_s10 }
  0x4e   :  { %284 = vrot.lane.b32.xlu0 %v283_v35, %s739_s11 }
  0x4f   :  { %292 = vrot.lane.b32.xlu1 %v291_v36, %s740_s12 }
  0x52   :  { %300 = vrot.lane.b32.xlu0 %v299_v37, %s741_s13 }
  0x53   :  { %308 = vrot.lane.b32.xlu1 %v307_v38, %s742_s14 }
  0x56   :  { %316 = vrot.lane.b32.xlu0 %v315_v39, %s743_s15 }
  0x57   :  { %324 = vrot.lane.b32.xlu1 %v323_v40, %s744_s16 }
  0x5a   :  { %332 = vrot.lane.b32.xlu0 %v331_v41, %s745_s17  ;;  %s763_s17 = smov 69  }
  0x5b   :  { %340 = vrot.lane.b32.xlu1 %v339_v42, %s746_s18  ;;  %s764_s18 = smov 68  }
  0x5e   :  { %348 = vrot.lane.b32.xlu0 %v347_v43, %s747_s19 }
  0x5f   :  { %356 = vrot.lane.b32.xlu1 %v355_v44, %s748_s20 }
  0x62   :  { %364 = vrot.lane.b32.xlu0 %v363_v45, %s749_s21 }
  0x63   :  { %372 = vrot.lane.b32.xlu1 %v371_v46, %s750_s22 }
  0x66   :  { %380 = vrot.lane.b32.xlu0 %v379_v47, %s751_s23 }
  0x67   :  { %388 = vrot.lane.b32.xlu1 %v387_v48, %s752_s24 }
  0x6a   :  { %396 = vrot.lane.b32.xlu0 %v395_v49, %s753_s25 }
  0x6b   :  { %404 = vrot.lane.b32.xlu1 %v403_v50, %s754_s26 }
  0x6e   :  { %412 = vrot.lane.b32.xlu0 %v411_v51, %s755_s27  ;;  %s765_s27 = smov 67  }
  0x6f   :  { %420 = vrot.lane.b32.xlu1 %v419_v52, %s756_s28  ;;  %s766_s28 = smov 66  }
  0x72   :  { %428 = vrot.lane.b32.xlu0 %v427_v53, %s757_s29 }
  0x73   :  { %436 = vrot.lane.b32.xlu1 %v435_v54, %s758_s30 }
  0x76   :  { %444 = vrot.lane.b32.xlu0 %v443_v55, %s759_s2 }
  0x77   :  { %452 = vrot.lane.b32.xlu1 %v451_v56, %s760_s3 }
  0x7a   :  { %460 = vrot.lane.b32.xlu0 %v459_v57, %s761_s0  ;;  %s767_s0 = smov 65  }
  0x7b   :  { %468 = vrot.lane.b32.xlu1 %v467_v58, %s762_s8 }
  0x7c   :  { %v13_v62 = vpop.permute.xlu0 %12  }
  0x7d   :  { %v29_v63 = vpop.permute.xlu1 %28   ;;  %516 = vst.msk [vmem:[%s1294_s1 + $0x1] sm:$0x1] %vm7_vm0, %v13_v62   ;;  %517 = vst.msk [vmem:[%s1294_s1 + $0x40] sm:$0x2] %vm7_vm0, %v13_v62  }
  0x7e   :  { %520 = vst.msk [vmem:[%s1294_s1 + $0x3] sm:$0x1] %vm7_vm0, %v29_v63   ;;  %521 = vst.msk [vmem:[%s1294_s1 + $0x42] sm:$0x2] %vm7_vm0, %v29_v63   ;;  %476 = vrot.lane.b32.xlu0 %v475_v60, %s763_s17 }
  0x7f   :  { %484 = vrot.lane.b32.xlu1 %v483_v61, %s764_s18 }
  0x80   :  { %v21_v2 = vpop.permute.xlu0 %20  }
  0x81   :  { %v37_v3 = vpop.permute.xlu1 %36   ;;  %518 = vst.msk [vmem:[%s1294_s1 + $0x2] sm:$0x1] %vm7_vm0, %v21_v2   ;;  %519 = vst.msk [vmem:[%s1294_s1 + $0x41] sm:$0x2] %vm7_vm0, %v21_v2  }
  0x82   :  { %522 = vst.msk [vmem:[%s1294_s1 + $0x4] sm:$0x1] %vm7_vm0, %v37_v3   ;;  %523 = vst.msk [vmem:[%s1294_s1 + $0x43] sm:$0x2] %vm7_vm0, %v37_v3   ;;  %492 = vrot.lane.b32.xlu0 %v491_v0, %s765_s27 }
  0x83   :  { %500 = vrot.lane.b32.xlu1 %v499_v1, %s766_s28 }
  0x84   :  { %v45_v5 = vpop.permute.xlu0 %44  }
  0x85   :  { %v53_v6 = vpop.permute.xlu1 %52   ;;  %524 = vst.msk [vmem:[%s1294_s1 + $0x5] sm:$0x1] %vm7_vm0, %v45_v5   ;;  %525 = vst.msk [vmem:[%s1294_s1 + $0x44] sm:$0x2] %vm7_vm0, %v45_v5  }
  0x86   :  { %526 = vst.msk [vmem:[%s1294_s1 + $0x6] sm:$0x1] %vm7_vm0, %v53_v6   ;;  %527 = vst.msk [vmem:[%s1294_s1 + $0x45] sm:$0x2] %vm7_vm0, %v53_v6   ;;  %508 = vrot.lane.b32.xlu0 %v507_v4, %s767_s0 }
  0x88   :  { %v61_v7 = vpop.permute.xlu0 %60  }
  0x89   :  { %v69_v8 = vpop.permute.xlu1 %68   ;;  %528 = vst.msk [vmem:[%s1294_s1 + $0x7] sm:$0x1] %vm7_vm0, %v61_v7   ;;  %529 = vst.msk [vmem:[%s1294_s1 + $0x46] sm:$0x2] %vm7_vm0, %v61_v7  }
  0x8a   :  { %530 = vst.msk [vmem:[%s1294_s1 + $0x8] sm:$0x1] %vm7_vm0, %v69_v8   ;;  %531 = vst.msk [vmem:[%s1294_s1 + $0x47] sm:$0x2] %vm7_vm0, %v69_v8  }
  0x8c   :  { %v77_v9 = vpop.permute.xlu0 %76  }
  0x8d   :  { %v85_v10 = vpop.permute.xlu1 %84   ;;  %532 = vst.msk [vmem:[%s1294_s1 + $0x9] sm:$0x1] %vm7_vm0, %v77_v9   ;;  %533 = vst.msk [vmem:[%s1294_s1 + $0x48] sm:$0x2] %vm7_vm0, %v77_v9  }
  0x8e   :  { %534 = vst.msk [vmem:[%s1294_s1 + $0xa] sm:$0x1] %vm7_vm0, %v85_v10   ;;  %535 = vst.msk [vmem:[%s1294_s1 + $0x49] sm:$0x2] %vm7_vm0, %v85_v10  }
  0x90   :  { %v93_v11 = vpop.permute.xlu0 %92  }
  0x91   :  { %v101_v12 = vpop.permute.xlu1 %100   ;;  %536 = vst.msk [vmem:[%s1294_s1 + $0xb] sm:$0x1] %vm7_vm0, %v93_v11   ;;  %537 = vst.msk [vmem:[%s1294_s1 + $0x4a] sm:$0x2] %vm7_vm0, %v93_v11  }
  0x92   :  { %538 = vst.msk [vmem:[%s1294_s1 + $0xc] sm:$0x1] %vm7_vm0, %v101_v12   ;;  %539 = vst.msk [vmem:[%s1294_s1 + $0x4b] sm:$0x2] %vm7_vm0, %v101_v12  }
  0x94   :  { %v109_v13 = vpop.permute.xlu0 %108  }
  0x95   :  { %v117_v14 = vpop.permute.xlu1 %116   ;;  %540 = vst.msk [vmem:[%s1294_s1 + $0xd] sm:$0x1] %vm7_vm0, %v109_v13   ;;  %541 = vst.msk [vmem:[%s1294_s1 + $0x4c] sm:$0x2] %vm7_vm0, %v109_v13  }
  0x96   :  { %542 = vst.msk [vmem:[%s1294_s1 + $0xe] sm:$0x1] %vm7_vm0, %v117_v14   ;;  %543 = vst.msk [vmem:[%s1294_s1 + $0x4d] sm:$0x2] %vm7_vm0, %v117_v14  }
  0x98   :  { %v125_v15 = vpop.permute.xlu0 %124  }
  0x99   :  { %v133_v16 = vpop.permute.xlu1 %132   ;;  %544 = vst.msk [vmem:[%s1294_s1 + $0xf] sm:$0x1] %vm7_vm0, %v125_v15   ;;  %545 = vst.msk [vmem:[%s1294_s1 + $0x4e] sm:$0x2] %vm7_vm0, %v125_v15  }
  0x9a   :  { %546 = vst.msk [vmem:[%s1294_s1 + $0x10] sm:$0x1] %vm7_vm0, %v133_v16   ;;  %547 = vst.msk [vmem:[%s1294_s1 + $0x4f] sm:$0x2] %vm7_vm0, %v133_v16  }
  0x9c   :  { %v141_v17 = vpop.permute.xlu0 %140  }
  0x9d   :  { %v149_v18 = vpop.permute.xlu1 %148   ;;  %548 = vst.msk [vmem:[%s1294_s1 + $0x11] sm:$0x1] %vm7_vm0, %v141_v17   ;;  %549 = vst.msk [vmem:[%s1294_s1 + $0x50] sm:$0x2] %vm7_vm0, %v141_v17  }
  0x9e   :  { %550 = vst.msk [vmem:[%s1294_s1 + $0x12] sm:$0x1] %vm7_vm0, %v149_v18   ;;  %551 = vst.msk [vmem:[%s1294_s1 + $0x51] sm:$0x2] %vm7_vm0, %v149_v18  }
  0xa0   :  { %v157_v19 = vpop.permute.xlu0 %156  }
  0xa1   :  { %v165_v20 = vpop.permute.xlu1 %164   ;;  %552 = vst.msk [vmem:[%s1294_s1 + $0x13] sm:$0x1] %vm7_vm0, %v157_v19   ;;  %553 = vst.msk [vmem:[%s1294_s1 + $0x52] sm:$0x2] %vm7_vm0, %v157_v19  }
  0xa2   :  { %554 = vst.msk [vmem:[%s1294_s1 + $0x14] sm:$0x1] %vm7_vm0, %v165_v20   ;;  %555 = vst.msk [vmem:[%s1294_s1 + $0x53] sm:$0x2] %vm7_vm0, %v165_v20  }
  0xa4   :  { %v173_v21 = vpop.permute.xlu0 %172  }
  0xa5   :  { %v181_v22 = vpop.permute.xlu1 %180   ;;  %556 = vst.msk [vmem:[%s1294_s1 + $0x15] sm:$0x1] %vm7_vm0, %v173_v21   ;;  %557 = vst.msk [vmem:[%s1294_s1 + $0x54] sm:$0x2] %vm7_vm0, %v173_v21  }
  0xa6   :  { %558 = vst.msk [vmem:[%s1294_s1 + $0x16] sm:$0x1] %vm7_vm0, %v181_v22   ;;  %559 = vst.msk [vmem:[%s1294_s1 + $0x55] sm:$0x2] %vm7_vm0, %v181_v22  }
  0xa8   :  { %v189_v23 = vpop.permute.xlu0 %188  }
  0xa9   :  { %v197_v24 = vpop.permute.xlu1 %196   ;;  %560 = vst.msk [vmem:[%s1294_s1 + $0x17] sm:$0x1] %vm7_vm0, %v189_v23   ;;  %561 = vst.msk [vmem:[%s1294_s1 + $0x56] sm:$0x2] %vm7_vm0, %v189_v23  }
  0xaa   :  { %562 = vst.msk [vmem:[%s1294_s1 + $0x18] sm:$0x1] %vm7_vm0, %v197_v24   ;;  %563 = vst.msk [vmem:[%s1294_s1 + $0x57] sm:$0x2] %vm7_vm0, %v197_v24  }
  0xac   :  { %v205_v25 = vpop.permute.xlu0 %204  }
  0xad   :  { %v213_v26 = vpop.permute.xlu1 %212   ;;  %564 = vst.msk [vmem:[%s1294_s1 + $0x19] sm:$0x1] %vm7_vm0, %v205_v25   ;;  %565 = vst.msk [vmem:[%s1294_s1 + $0x58] sm:$0x2] %vm7_vm0, %v205_v25  }
  0xae   :  { %566 = vst.msk [vmem:[%s1294_s1 + $0x1a] sm:$0x1] %vm7_vm0, %v213_v26   ;;  %567 = vst.msk [vmem:[%s1294_s1 + $0x59] sm:$0x2] %vm7_vm0, %v213_v26  }
  0xb0   :  { %v221_v27 = vpop.permute.xlu0 %220  }
  0xb1   :  { %v229_v28 = vpop.permute.xlu1 %228   ;;  %568 = vst.msk [vmem:[%s1294_s1 + $0x1b] sm:$0x1] %vm7_vm0, %v221_v27   ;;  %569 = vst.msk [vmem:[%s1294_s1 + $0x5a] sm:$0x2] %vm7_vm0, %v221_v27  }
  0xb2   :  { %570 = vst.msk [vmem:[%s1294_s1 + $0x1c] sm:$0x1] %vm7_vm0, %v229_v28   ;;  %571 = vst.msk [vmem:[%s1294_s1 + $0x5b] sm:$0x2] %vm7_vm0, %v229_v28  }
  0xb4   :  { %v237_v29 = vpop.permute.xlu0 %236  }
  0xb5   :  { %v245_v30 = vpop.permute.xlu1 %244   ;;  %572 = vst.msk [vmem:[%s1294_s1 + $0x1d] sm:$0x1] %vm7_vm0, %v237_v29   ;;  %573 = vst.msk [vmem:[%s1294_s1 + $0x5c] sm:$0x2] %vm7_vm0, %v237_v29  }
  0xb6   :  { %574 = vst.msk [vmem:[%s1294_s1 + $0x1e] sm:$0x1] %vm7_vm0, %v245_v30   ;;  %575 = vst.msk [vmem:[%s1294_s1 + $0x5d] sm:$0x2] %vm7_vm0, %v245_v30  }
  0xb8   :  { %v253_v31 = vpop.permute.xlu0 %252  }
  0xb9   :  { %v261_v32 = vpop.permute.xlu1 %260   ;;  %576 = vst.msk [vmem:[%s1294_s1 + $0x1f] sm:$0x1] %vm7_vm0, %v253_v31   ;;  %577 = vst.msk [vmem:[%s1294_s1 + $0x5e] sm:$0x2] %vm7_vm0, %v253_v31  }
  0xba   :  { %578 = vst.msk [vmem:[%s1294_s1 + $0x20] sm:$0x1] %vm7_vm0, %v261_v32   ;;  %579 = vst.msk [vmem:[%s1294_s1 + $0x5f] sm:$0x2] %vm7_vm0, %v261_v32  }
  0xbc   :  { %v269_v33 = vpop.permute.xlu0 %268  }
  0xbd   :  { %v277_v34 = vpop.permute.xlu1 %276   ;;  %580 = vst.msk [vmem:[%s1294_s1 + $0x21] sm:$0x1] %vm7_vm0, %v269_v33   ;;  %581 = vst.msk [vmem:[%s1294_s1 + $0x60] sm:$0x2] %vm7_vm0, %v269_v33  }
  0xbe   :  { %582 = vst.msk [vmem:[%s1294_s1 + $0x22] sm:$0x1] %vm7_vm0, %v277_v34   ;;  %583 = vst.msk [vmem:[%s1294_s1 + $0x61] sm:$0x2] %vm7_vm0, %v277_v34  }
  0xc0   :  { %v285_v35 = vpop.permute.xlu0 %284  }
  0xc1   :  { %v293_v36 = vpop.permute.xlu1 %292   ;;  %584 = vst.msk [vmem:[%s1294_s1 + $0x23] sm:$0x1] %vm7_vm0, %v285_v35   ;;  %585 = vst.msk [vmem:[%s1294_s1 + $0x62] sm:$0x2] %vm7_vm0, %v285_v35  }
  0xc2   :  { %586 = vst.msk [vmem:[%s1294_s1 + $0x24] sm:$0x1] %vm7_vm0, %v293_v36   ;;  %587 = vst.msk [vmem:[%s1294_s1 + $0x63] sm:$0x2] %vm7_vm0, %v293_v36  }
  0xc4   :  { %v301_v37 = vpop.permute.xlu0 %300  }
  0xc5   :  { %v309_v38 = vpop.permute.xlu1 %308   ;;  %588 = vst.msk [vmem:[%s1294_s1 + $0x25] sm:$0x1] %vm7_vm0, %v301_v37   ;;  %589 = vst.msk [vmem:[%s1294_s1 + $0x64] sm:$0x2] %vm7_vm0, %v301_v37  }
  0xc6   :  { %590 = vst.msk [vmem:[%s1294_s1 + $0x26] sm:$0x1] %vm7_vm0, %v309_v38   ;;  %591 = vst.msk [vmem:[%s1294_s1 + $0x65] sm:$0x2] %vm7_vm0, %v309_v38  }
  0xc8   :  { %v317_v39 = vpop.permute.xlu0 %316  }
  0xc9   :  { %v325_v40 = vpop.permute.xlu1 %324   ;;  %592 = vst.msk [vmem:[%s1294_s1 + $0x27] sm:$0x1] %vm7_vm0, %v317_v39   ;;  %593 = vst.msk [vmem:[%s1294_s1 + $0x66] sm:$0x2] %vm7_vm0, %v317_v39  }
  0xca   :  { %594 = vst.msk [vmem:[%s1294_s1 + $0x28] sm:$0x1] %vm7_vm0, %v325_v40   ;;  %595 = vst.msk [vmem:[%s1294_s1 + $0x67] sm:$0x2] %vm7_vm0, %v325_v40  }
  0xcc   :  { %v333_v41 = vpop.permute.xlu0 %332  }
  0xcd   :  { %v341_v42 = vpop.permute.xlu1 %340   ;;  %596 = vst.msk [vmem:[%s1294_s1 + $0x29] sm:$0x1] %vm7_vm0, %v333_v41   ;;  %597 = vst.msk [vmem:[%s1294_s1 + $0x68] sm:$0x2] %vm7_vm0, %v333_v41  }
  0xce   :  { %598 = vst.msk [vmem:[%s1294_s1 + $0x2a] sm:$0x1] %vm7_vm0, %v341_v42   ;;  %599 = vst.msk [vmem:[%s1294_s1 + $0x69] sm:$0x2] %vm7_vm0, %v341_v42  }
  0xd0   :  { %v349_v43 = vpop.permute.xlu0 %348  }
  0xd1   :  { %v357_v44 = vpop.permute.xlu1 %356   ;;  %600 = vst.msk [vmem:[%s1294_s1 + $0x2b] sm:$0x1] %vm7_vm0, %v349_v43   ;;  %601 = vst.msk [vmem:[%s1294_s1 + $0x6a] sm:$0x2] %vm7_vm0, %v349_v43  }
  0xd2   :  { %602 = vst.msk [vmem:[%s1294_s1 + $0x2c] sm:$0x1] %vm7_vm0, %v357_v44   ;;  %603 = vst.msk [vmem:[%s1294_s1 + $0x6b] sm:$0x2] %vm7_vm0, %v357_v44  }
  0xd4   :  { %v365_v45 = vpop.permute.xlu0 %364  }
  0xd5   :  { %v373_v46 = vpop.permute.xlu1 %372   ;;  %604 = vst.msk [vmem:[%s1294_s1 + $0x2d] sm:$0x1] %vm7_vm0, %v365_v45   ;;  %605 = vst.msk [vmem:[%s1294_s1 + $0x6c] sm:$0x2] %vm7_vm0, %v365_v45  }
  0xd6   :  { %606 = vst.msk [vmem:[%s1294_s1 + $0x2e] sm:$0x1] %vm7_vm0, %v373_v46   ;;  %607 = vst.msk [vmem:[%s1294_s1 + $0x6d] sm:$0x2] %vm7_vm0, %v373_v46  }
  0xd8   :  { %v381_v47 = vpop.permute.xlu0 %380  }
  0xd9   :  { %v389_v48 = vpop.permute.xlu1 %388   ;;  %608 = vst.msk [vmem:[%s1294_s1 + $0x2f] sm:$0x1] %vm7_vm0, %v381_v47   ;;  %609 = vst.msk [vmem:[%s1294_s1 + $0x6e] sm:$0x2] %vm7_vm0, %v381_v47  }
  0xda   :  { %610 = vst.msk [vmem:[%s1294_s1 + $0x30] sm:$0x1] %vm7_vm0, %v389_v48   ;;  %611 = vst.msk [vmem:[%s1294_s1 + $0x6f] sm:$0x2] %vm7_vm0, %v389_v48  }
  0xdc   :  { %v397_v49 = vpop.permute.xlu0 %396  }
  0xdd   :  { %v405_v50 = vpop.permute.xlu1 %404   ;;  %612 = vst.msk [vmem:[%s1294_s1 + $0x31] sm:$0x1] %vm7_vm0, %v397_v49   ;;  %613 = vst.msk [vmem:[%s1294_s1 + $0x70] sm:$0x2] %vm7_vm0, %v397_v49  }
  0xde   :  { %614 = vst.msk [vmem:[%s1294_s1 + $0x32] sm:$0x1] %vm7_vm0, %v405_v50   ;;  %615 = vst.msk [vmem:[%s1294_s1 + $0x71] sm:$0x2] %vm7_vm0, %v405_v50  }
  0xe0   :  { %v413_v51 = vpop.permute.xlu0 %412  }
  0xe1   :  { %v421_v52 = vpop.permute.xlu1 %420   ;;  %616 = vst.msk [vmem:[%s1294_s1 + $0x33] sm:$0x1] %vm7_vm0, %v413_v51   ;;  %617 = vst.msk [vmem:[%s1294_s1 + $0x72] sm:$0x2] %vm7_vm0, %v413_v51  }
  0xe2   :  { %618 = vst.msk [vmem:[%s1294_s1 + $0x34] sm:$0x1] %vm7_vm0, %v421_v52   ;;  %619 = vst.msk [vmem:[%s1294_s1 + $0x73] sm:$0x2] %vm7_vm0, %v421_v52  }
  0xe4   :  { %v429_v53 = vpop.permute.xlu0 %428  }
  0xe5   :  { %v437_v54 = vpop.permute.xlu1 %436   ;;  %620 = vst.msk [vmem:[%s1294_s1 + $0x35] sm:$0x1] %vm7_vm0, %v429_v53   ;;  %621 = vst.msk [vmem:[%s1294_s1 + $0x74] sm:$0x2] %vm7_vm0, %v429_v53  }
  0xe6   :  { %622 = vst.msk [vmem:[%s1294_s1 + $0x36] sm:$0x1] %vm7_vm0, %v437_v54   ;;  %623 = vst.msk [vmem:[%s1294_s1 + $0x75] sm:$0x2] %vm7_vm0, %v437_v54  }
  0xe8   :  { %v445_v55 = vpop.permute.xlu0 %444  }
  0xe9   :  { %v453_v56 = vpop.permute.xlu1 %452   ;;  %624 = vst.msk [vmem:[%s1294_s1 + $0x37] sm:$0x1] %vm7_vm0, %v445_v55   ;;  %625 = vst.msk [vmem:[%s1294_s1 + $0x76] sm:$0x2] %vm7_vm0, %v445_v55  }
  0xea   :  { %626 = vst.msk [vmem:[%s1294_s1 + $0x38] sm:$0x1] %vm7_vm0, %v453_v56   ;;  %627 = vst.msk [vmem:[%s1294_s1 + $0x77] sm:$0x2] %vm7_vm0, %v453_v56  }
  0xec   :  { %v461_v57 = vpop.permute.xlu0 %460  }
  0xed   :  { %v469_v58 = vpop.permute.xlu1 %468   ;;  %628 = vst.msk [vmem:[%s1294_s1 + $0x39] sm:$0x1] %vm7_vm0, %v461_v57   ;;  %629 = vst.msk [vmem:[%s1294_s1 + $0x78] sm:$0x2] %vm7_vm0, %v461_v57  }
  0xee   :  { %630 = vst.msk [vmem:[%s1294_s1 + $0x3a] sm:$0x1] %vm7_vm0, %v469_v58   ;;  %631 = vst.msk [vmem:[%s1294_s1 + $0x79] sm:$0x2] %vm7_vm0, %v469_v58  }
  0xf0   :  { %v477_v59 = vpop.permute.xlu0 %476  }
  0xf1   :  { %v485_v60 = vpop.permute.xlu1 %484   ;;  %632 = vst.msk [vmem:[%s1294_s1 + $0x3b] sm:$0x1] %vm7_vm0, %v477_v59   ;;  %633 = vst.msk [vmem:[%s1294_s1 + $0x7a] sm:$0x2] %vm7_vm0, %v477_v59  }
  0xf2   :  { %634 = vst.msk [vmem:[%s1294_s1 + $0x3c] sm:$0x1] %vm7_vm0, %v485_v60   ;;  %635 = vst.msk [vmem:[%s1294_s1 + $0x7b] sm:$0x2] %vm7_vm0, %v485_v60  }
  0xf4   :  { %v493_v61 = vpop.permute.xlu0 %492  }
  0xf5   :  { %v501_v62 = vpop.permute.xlu1 %500   ;;  %636 = vst.msk [vmem:[%s1294_s1 + $0x3d] sm:$0x1] %vm7_vm0, %v493_v61   ;;  %637 = vst.msk [vmem:[%s1294_s1 + $0x7c] sm:$0x2] %vm7_vm0, %v493_v61  }
  0xf6   :  { %638 = vst.msk [vmem:[%s1294_s1 + $0x3e] sm:$0x1] %vm7_vm0, %v501_v62   ;;  %639 = vst.msk [vmem:[%s1294_s1 + $0x7d] sm:$0x2] %vm7_vm0, %v501_v62  }
  0xf8   :  { %v509_v63 = vpop.permute.xlu0 %508  }
  0xf9   :  { %640 = vst.msk [vmem:[%s1294_s1 + $0x3f] sm:$0x1] %vm7_vm0, %v509_v63   ;;  %641 = vst.msk [vmem:[%s1294_s1 + $0x7e] sm:$0x2] %vm7_vm0, %v509_v63  }

// kernel: decoder_forward.9
= control target key start
LH: loop header
LB: loop body
LE: loop exit
PB: predicated region body
PF: predicated region fallthrough
CT: control target
= control target key end

     0   :  { %s2261_s18 = smov 0   ;;  %s2676_s0 = inlined_call_operand.vmem [shape: bf16[32,128], index: 0, kind: input, shape index: {}]   ;;  %s2677_s1 = inlined_call_operand.vmem [shape: s32[32,1], index: 1, kind: input, shape index: {}]   ;;  %s2678_s2 = inlined_call_operand.vmem [shape: s32[32,1], index: 2, kind: input, shape index: {}]   ;;  %s2679_s3 = inlined_call_operand.vmem [shape: bf16[128,1152], index: 3, kind: input, shape index: {}]   ;;  %s2680_s4 = inlined_call_operand.vmem [shape: f32[1,512], index: 4, kind: input, shape index: {}]   ;;  %s2681_s5 = inlined_call_operand.vmem [shape: bf16[32,512], index: 5, kind: output, shape index: {}]  }
   0x1 LB: > { %s1708_s19 = sadd.s32 4294967295, %s2226_s18   ;;  %p1712_p0 = scmp.ge.s32.totalorder %s2226_s18, 1  ;;  %s2226_s18 = sphi %s2261_s18, %s15_s18  }
   0x2   : > { %p210_p1 = scmp.lt.s32.totalorder %s2226_s18, 3 }
   0x4   : > { %p211_p2 = pnand %p1712_p0, %p210_p1 }
   0x5   : > { %v2228_v0 = vmov (!%p211_p2), 0.0   ;;  %v2123_v1 = vld [vmem:[%s2679_s3] ss:$36 sps:$4 sm:$0xff] (!%p211_p2)   ;;  %vm2229_vm0 = vmmov (!%p211_p2), 0   ;;  %v2125_v3 = vld [vmem:[%s2679_s3 + $0x48] ss:$36 sps:$4 sm:$0xff] (!%p211_p2)  }
   0x6   : > { %214 = sbr.rel (%p211_p2) target bundleno = 415 (0x19f), region = 40  ;;  %1905 = vmatprep.subr.bf16.mxu0 (!%p211_p2), %v2228_v0  ;;  %1925 = vmatprep.subr.bf16.mxu1 (!%p211_p2), %v2228_v0  ;;  %v2124_v2 = vld [vmem:[%s2679_s3 + $0x4] ss:$36 sps:$4 sm:$0xff] (!%p211_p2)   ;;  %v2126_v4 = vld [vmem:[%s2679_s3 + $0x4c] ss:$36 sps:$4 sm:$0xff] (!%p211_p2)   ;;  %s1713_s15 = sshll.u32 (!%p211_p2), %s1708_s19, 1 }
   0x7   : > { %1921 = vmatprep.mubr.msk.bf16.mxu0 (!%p211_p2), %vm2229_vm0, %v2228_v0  ;;  %1941 = vmatprep.mubr.msk.bf16.mxu1 (!%p211_p2), %vm2229_vm0, %v2228_v0  ;;  %v2127_v5 = vld [vmem:[%s2679_s3 + $0x90] ss:$36 sps:$4 sm:$0xff] (!%p211_p2)   ;;  %v2129_v7 = vld [vmem:[%s2679_s3 + $0xd8] ss:$36 sps:$4 sm:$0xff] (!%p211_p2)   ;;  %v2131_v9 = vld [vmem:[%s2679_s3 + $0x120] ss:$36 sps:$4 sm:$0xff] (!%p211_p2)  }
   0x8   : > { %1906 = vmatpush3.bf16.msra.mxu0 (!%p211_p2), %v2123_v1  ;;  %1926 = vmatpush3.bf16.msra.mxu1 (!%p211_p2), %v2124_v2  ;;  %v2128_v6 = vld [vmem:[%s2679_s3 + $0x94] ss:$36 sps:$4 sm:$0xff] (!%p211_p2)   ;;  %v2130_v8 = vld [vmem:[%s2679_s3 + $0xdc] ss:$36 sps:$4 sm:$0xff] (!%p211_p2)   ;;  %v2132_v10 = vld [vmem:[%s2679_s3 + $0x124] ss:$36 sps:$4 sm:$0xff] (!%p211_p2)  }
   0x9   : > { %1907 = vmatprep.subr.bf16.mxu0 (!%p211_p2), %v2228_v0  ;;  %1927 = vmatprep.subr.bf16.mxu1 (!%p211_p2), %v2228_v0  ;;  %p250_p3 = scmp.lt.s32.totalorder (!%p211_p2), %s1713_s15, 3  ;;  %v2133_v11 = vld [vmem:[%s2679_s3 + $0x168] ss:$36 sps:$4 sm:$0xff] (!%p211_p2)   ;;  %v2135_v13 = vld [vmem:[%s2679_s3 + $0x1b0] ss:$36 sps:$4 sm:$0xff] (!%p211_p2)   ;;  %v2230_v23 = vmov (!%p211_p2), 0  }
   0xa   : > { %v2134_v12 = vld [vmem:[%s2679_s3 + $0x16c] ss:$36 sps:$4 sm:$0xff] (!%p211_p2)   ;;  %v2136_v14 = vld [vmem:[%s2679_s3 + $0x1b4] ss:$36 sps:$4 sm:$0xff] (!%p211_p2)   ;;  %v2138_v16 = vld [vmem:[%s2679_s3 + $0x1fc] ss:$36 sps:$4 sm:$0xff] (!%p211_p2)   ;;  %2107 = vset.pattern.permute.xlu1 (!%p211_p2), %v2230_v23  ;;  %2096 = vset.pattern.permute.xlu0 (!%p211_p2), %v2230_v23 }
   0xb   : > { %v2137_v15 = vld [vmem:[%s2679_s3 + $0x1f8] ss:$36 sps:$4 sm:$0xff] (!%p211_p2)   ;;  %v2141_v17 = vld [vmem:[%s2679_s3 + $0x8] ss:$36 sps:$4 sm:$0xff] (!%p211_p2)   ;;  %v2143_v21 = vld [vmem:[%s2679_s3 + $0x50] ss:$36 sps:$4 sm:$0xff] (!%p211_p2)  }
   0xc   : > { %1908 = vmatpush3.bf16.msra.mxu0 (!%p211_p2), %v2125_v3  ;;  %1928 = vmatpush3.bf16.msra.mxu1 (!%p211_p2), %v2126_v4  ;;  %v2142_v20 = vld [vmem:[%s2679_s3 + $0xc] ss:$36 sps:$4 sm:$0xff] (!%p211_p2)   ;;  %v2144_v22 = vld [vmem:[%s2679_s3 + $0x54] ss:$36 sps:$4 sm:$0xff] (!%p211_p2)   ;;  %v2146_v25 = vld [vmem:[%s2679_s3 + $0x9c] ss:$36 sps:$4 sm:$0xff] (!%p211_p2)  }
   0xd   : > { %1909 = vmatprep.subr.bf16.mxu0 %v2228_v0  ;;  %1929 = vmatprep.subr.bf16.mxu1 %v2228_v0  ;;  %s2683_s15 = smov (!%p250_p3, %s1713_s15), 3  ;;  %v2145_v24 = vld [vmem:[%s2679_s3 + $0x98] ss:$36 sps:$4 sm:$0xff]   ;;  %v2147_v26 = vld [vmem:[%s2679_s3 + $0xe0] ss:$36 sps:$4 sm:$0xff]  }
   0xe   : > { %s1714_s19 = sshll.u32 %s2683_s15, 2  ;;  %v2148_v27 = vld [vmem:[%s2679_s3 + $0xe4] ss:$36 sps:$4 sm:$0xff]   ;;  %v2150_v29 = vld [vmem:[%s2679_s3 + $0x12c] ss:$36 sps:$4 sm:$0xff]   ;;  %s1716_s29 = sshll.u32 %s2683_s15, 3 }
   0xf   : > { %s2329_s24 = scalar_lea.vmem %s2676_s0, %s1714_s19  ;;  %v2149_v28 = vld [vmem:[%s2679_s3 + $0x128] ss:$36 sps:$4 sm:$0xff]   ;;  %v2151_v30 = vld [vmem:[%s2679_s3 + $0x170] ss:$36 sps:$4 sm:$0xff]   ;;  %v2153_v32 = vld [vmem:[%s2679_s3 + $0x1b8] ss:$36 sps:$4 sm:$0xff]   ;;  %s2451_s11 = scalar_lea.vmem %s2678_s2, %s1716_s29 }
  0x10   : > { %1910 = vmatpush3.bf16.msra.mxu0 %v2127_v5  ;;  %1930 = vmatpush3.bf16.msra.mxu1 %v2128_v6  ;;  %v2139_v18 = vld [vmem:[%s2329_s24] sm:$0xff]   ;;  %v2152_v31 = vld [vmem:[%s2679_s3 + $0x174] ss:$36 sps:$4 sm:$0xff]   ;;  %v2165_v44 = vld [vmem:[%s2679_s3 + $0xe8] ss:$36 sps:$4 sm:$0xff]   ;;  %s2471_s25 = scalar_lea.vmem %s2677_s1, %s1716_s29  ;;  %s1819_s21 = sshll.u32 %s2683_s15, 4 }
  0x11   : > { %1911 = vmatprep.subr.bf16.mxu0 %v2228_v0  ;;  %1931 = vmatprep.subr.bf16.mxu1 %v2228_v0  ;;  %v2140_v19 = vld [vmem:[%s2329_s24] sm:$0xff]   ;;  %v2159_v38 = vld [vmem:[%s2679_s3 + $0x10] ss:$36 sps:$4 sm:$0xff]   ;;  %v2161_v40 = vld [vmem:[%s2679_s3 + $0x58] ss:$36 sps:$4 sm:$0xff]   ;;  %s2660_s23 = scalar_lea.vmem %s2681_s5, %s1819_s21 }
  0x12   : > { %v2154_v33 = vld [vmem:[%s2679_s3 + $0x1bc] ss:$36 sps:$4 sm:$0xff]   ;;  %v2156_v35 = vld [vmem:[%s2679_s3 + $0x204] ss:$36 sps:$4 sm:$0xff]   ;;  %v2160_v39 = vld [vmem:[%s2679_s3 + $0x14] ss:$36 sps:$4 sm:$0xff]  }
  0x13   : > { %v2155_v34 = vld [vmem:[%s2679_s3 + $0x200] ss:$36 sps:$4 sm:$0xff]   ;;  %v2166_v45 = vld [vmem:[%s2679_s3 + $0xec] ss:$36 sps:$4 sm:$0xff]   ;;  %v2168_v48 = vld [vmem:[%s2679_s3 + $0x134] ss:$36 sps:$4 sm:$0xff]  }
  0x14   : > { %1912 = vmatpush3.bf16.msra.mxu0 %v2129_v7  ;;  %1932 = vmatpush3.bf16.msra.mxu1 %v2130_v8  ;;  %v2157_v36 = vld [vmem:[%s2329_s24] sm:$0xff]   ;;  %v2167_v46 = vld [vmem:[%s2679_s3 + $0x130] ss:$36 sps:$4 sm:$0xff]   ;;  %v2169_v52 = vld [vmem:[%s2679_s3 + $0x178] ss:$36 sps:$4 sm:$0xff]  }
  0x15   : > { %1913 = vmatprep.subr.bf16.mxu0 %v2228_v0  ;;  %1933 = vmatprep.subr.bf16.mxu1 %v2228_v0  ;;  %v2158_v37 = vld [vmem:[%s2329_s24] sm:$0xff]   ;;  %v1034_v59 = vld [vmem:[%s2471_s25 + $0x8] sm:$0x7f] }
  0x16   : > { %v2162_v41 = vld [vmem:[%s2679_s3 + $0x5c] ss:$36 sps:$4 sm:$0xff]   ;;  %v2164_v43 = vld [vmem:[%s2679_s3 + $0xa4] ss:$36 sps:$4 sm:$0xff]   ;;  %vm1038_vm7 = vcmp.lt.s32.totalorder %v1034_v59, 4 }
  0x17   : > { %v2163_v42 = vld [vmem:[%s2679_s3 + $0xa0] ss:$36 sps:$4 sm:$0xff]   ;;  %v1036_v60 = vld [vmem:[%s2451_s11 + $0x8] sm:$0x7f] }
  0x18   : > { %1914 = vmatpush3.bf16.msra.mxu0 %v2131_v9  ;;  %1934 = vmatpush3.bf16.msra.mxu1 %v2132_v10  ;;  %v881_v47 = vld [vmem:[%s2451_s11] sm:$0xff]  ;;  %v880_v1 = vld [vmem:[%s2471_s25 + $0x8] sm:$0x7f]  ;;  %v1040_v4 = vadd.s32 1, %v1036_v60 }
  0x19   : > { %1915 = vmatprep.subr.bf16.mxu0 %v2228_v0  ;;  %1935 = vmatprep.subr.bf16.mxu1 %v2228_v0  ;;  %v2474_v49 = vld [vmem:[%s2329_s24] sm:$0xff]   ;;  %v885_v51 = vadd.s32 1, %v881_v47  ;;  %vm1189_vm4 = vcmp.lt.s32.totalorder %v881_v47, 4  ;;  %v882_v5 = vld [vmem:[%s2451_s11 + $0x8] sm:$0x7f]  ;;  %vm884_vm8 = vcmp.lt.s32.totalorder %v880_v1, 4 }
  0x1a   : > { %v2478_v50 = vld [vmem:[%s2329_s24] sm:$0xff]   ;;  %v785_v55 = vshll.u32 %v2474_v49, 16  ;;  %v783_v62 = vshrl.u32 %v2474_v49, 16  ;;  %v886_v8 = vadd.s32 1, %v882_v5  ;;  %v1330_v9 = vld [vmem:[%s2471_s25 + $0x8] sm:$0xf]  ;;  %v1530_v5 = vlaneseq }
  0x1b   : > { %v879_v53 = vld [vmem:[%s2471_s25] sm:$0xff]  ;;  %v939_v56 = vshll.u32 %v2478_v50, 16  ;;  %vm887_vm2 = vcmp.lt.s32.totalorder %v885_v51, 4  ;;  %v937_v3 = vshrl.u32 %v2478_v50, 16  ;;  %v2173_v10 = vld [vmem:[%s2679_s3 + $0x208] ss:$36 sps:$4 sm:$0xff]  }
  0x1c   : > { %1916 = vmatpush3.bf16.msra.mxu0 %v2133_v11  ;;  %1936 = vmatpush3.bf16.msra.mxu1 %v2134_v12  ;;  %v2170_v54 = vld [vmem:[%s2679_s3 + $0x17c] ss:$36 sps:$4 sm:$0xff]   ;;  %vm883_vm1 = vcmp.lt.s32.totalorder %v879_v53, 4  ;;  %v1185_v57 = vadd.s32 1, %v879_v53  ;;  %v2172_v61 = vld [vmem:[%s2679_s3 + $0x1c4] ss:$36 sps:$4 sm:$0xff]  }
  0x1d   : > { %1917 = vmatprep.subr.bf16.mxu0 %v2228_v0  ;;  %1937 = vmatprep.subr.bf16.mxu1 %v2228_v0  ;;  %v2171_v58 = vld [vmem:[%s2679_s3 + $0x1c0] ss:$36 sps:$4 sm:$0xff]   ;;  %vm889_vm3 = vmand %vm883_vm1, %vm887_vm2  ;;  %v787_v2 = vrot.slane %v785_v55, 1  ;;  %v941_v6 = vrot.slane %v939_v56, 1  ;;  %vm1042_vm10 = vcmp.lt.s32.totalorder %v1040_v4, 4  ;;  %vm888_vm12 = vcmp.lt.s32.totalorder %v886_v8, 4 }
  0x1e   : > { %v1767_v63 = vsel %vm889_vm3, 1.0, %v2228_v0  ;;  %vm1187_vm5 = vcmp.lt.s32.totalorder %v1185_v57, 4  ;;  %vm1044_vm11 = vmand %vm1038_vm7, %vm1042_vm10  ;;  %v1487_v23 = vld [vmem:[%s2451_s11 + $0x8] sm:$0x7]  ;;  %v2190_v47 = vld [vmem:[%s2679_s3 + $0x1cc] ss:$36 sps:$4 sm:$0xff]  }
  0x1f   : > { %vm1191_vm6 = vmand %vm1187_vm5, %vm1189_vm4  ;;  %v2191_v49 = vld [vmem:[%s2679_s3 + $0x210] ss:$36 sps:$4 sm:$0xff]   ;;  %v2194_v50 = vld [vmem:[%s2329_s24] sm:$0xfc]  }
  0x20   : > { %1918 = vmatpush3.bf16.msra.mxu0 %v2135_v13  ;;  %1938 = vmatpush3.bf16.msra.mxu1 %v2136_v14  ;;  %v1789_v7 = vsel %vm1191_vm6, 1.0, %v2228_v0  ;;  %vm1496_vm9 = vmand %vm1187_vm5, %vm887_vm2  ;;  %v1332_v13 = vld [vmem:[%s2451_s11 + $0x8] sm:$0xf]  ;;  %v1334_v14 = vadd.s32 1, %v1330_v9  ;;  %v2192_v51 = vld [vmem:[%s2679_s3 + $0x214] ss:$36 sps:$4 sm:$0xff]  }
  0x21   : > { %1919 = vmatprep.subr.bf16.mxu0 %v2228_v0  ;;  %1939 = vmatprep.subr.bf16.mxu1 %v2228_v0  ;;  %v2108_v11 = vpack.i.bf16 %v1789_v7, %v1767_v63  ;;  %v1811_v12 = vsel %vm1496_vm9, 1.0, %v2228_v0  ;;  %vm1338_vm13 = vcmp.lt.s32.totalorder %v1332_v13, 4  ;;  %vm890_vm14 = vmand %vm884_vm8, %vm888_vm12  ;;  %v1238_v53 = vrot.slane %v2194_v50, 2  ;;  %v2196_v55 = vld [vmem:[%s2679_s3 + $0x68] ss:$36 sps:$4 sm:$0xff]  }
  0x22   : > { %vm1336_vm15 = vcmp.lt.s32.totalorder %v1334_v14, 4  ;;  %v2197_v56 = vld [vmem:[%s2679_s3 + $0xb0] ss:$36 sps:$4 sm:$0xff]   ;;  %v2198_v57 = vld [vmem:[%s2679_s3 + $0xf8] ss:$36 sps:$4 sm:$0xff]  }
  0x23   : > { %2109 = vperm.xlu1 %2107, %v2108_v11   ;;  %vm1340_vm2 = vmand %vm1336_vm15, %vm1338_vm13  ;;  %v2203_v59 = vld [vmem:[%s2329_s24] sm:$0xfc]   ;;  %v2200_v60 = vld [vmem:[%s2679_s3 + $0x188] ss:$36 sps:$4 sm:$0xff]  }
  0x24   : > { %1920 = vmatpush3.bf16.msra.mxu0 %v2137_v15  ;;  %1940 = vmatpush3.bf16.msra.mxu1 %v2138_v16  ;;  %v1182_v15 = vld [vmem:[%s2471_s25 + $0x8] sm:$0xf]  ;;  %v1528_v8 = vld [vmem:[%s2680_s4] sm:$0xf] }
  0x25   : > { %1945 = vmatprep.subr.bf16.mxu0 %v2228_v0  ;;  %1965 = vmatprep.subr.bf16.mxu1 %v2228_v0  ;;  %v1184_v16 = vld [vmem:[%s2451_s11 + $0x8] sm:$0xf] }
  0x26   : > { %vm1190_vm1 = vcmp.lt.s32.totalorder %v1184_v16, 4 }
  0x27   : > { %1922 = vmatmul.mubr.bf16.vlgmr.msra.gmra.mrb[0].mxu0 %v2139_v18  ;;  %1942 = vmatmul.mubr.bf16.vlgmr.msra.gmra.mrb[0].mxu1 %v2140_v19  ;;  %v1186_v18 = vadd.s32 1, %v1182_v15  ;;  %v1485_v19 = vld [vmem:[%s2471_s25 + $0x8] sm:$0x7] }
  0x28   : > { %1946 = vmatpush3.bf16.msra.mxu0 %v2141_v17  ;;  %1966 = vmatpush3.bf16.msra.mxu1 %v2142_v20  ;;  %v1779_v17 = vsel %vm1044_vm11, 1.0, %v2228_v0  ;;  %v2174_v20 = vld [vmem:[%s2679_s3 + $0x20c] ss:$36 sps:$4 sm:$0xff]  }
  0x29   : > { %1947 = vmatprep.subr.bf16.mxu0 %v2228_v0  ;;  %1967 = vmatprep.subr.bf16.mxu1 %v2228_v0  ;;  %vm1188_vm3 = vcmp.lt.s32.totalorder %v1186_v18, 4 }
  0x2a   : > { %1961 = vmatprep.mubr.msk.bf16.mxu0 %vm2229_vm0, %v2228_v0  ;;  %1981 = vmatprep.mubr.msk.bf16.mxu1 %vm2229_vm0, %v2228_v0  ;;  %vm1192_vm4 = vmand %vm1188_vm3, %vm1190_vm1 }
  0x2c   : > { %1948 = vmatpush3.bf16.msra.mxu0 %v2143_v21  ;;  %1968 = vmatpush3.bf16.msra.mxu1 %v2144_v22  ;;  %v2097_v21 = vpack.i.bf16 %v1779_v17, %v1767_v63  ;;  %v1768_v22 = vsel %vm890_vm14, 1.0, %v2228_v0  ;;  %v2201_v63 = vld [vmem:[%s2679_s3 + $0x1d0] ss:$36 sps:$4 sm:$0xff]  }
  0x2d   : > { %1949 = vmatprep.subr.bf16.mxu0 %v2228_v0  ;;  %1969 = vmatprep.subr.bf16.mxu1 %v2228_v0 }
  0x2e   : > { %2098 = vperm.xlu0 %2096, %v2097_v21  }
  0x30   : > { %1950 = vmatpush3.bf16.msra.mxu0 %v2145_v24  ;;  %1970 = vmatpush3.bf16.msra.mxu1 %v2146_v25  ;;  %v1489_v24 = vadd.s32 1, %v1485_v19  ;;  %v2113_v25 = vpack.i.bf16 %v1768_v22, %v1811_v12 }
  0x31   : > { %1951 = vmatprep.subr.bf16.mxu0 %v2228_v0  ;;  %1971 = vmatprep.subr.bf16.mxu1 %v2228_v0 }
  0x32   : > { %vm1491_vm5 = vcmp.lt.s32.totalorder %v1489_v24, 4  ;;  %2114 = vperm.xlu1 %2107, %v2113_v25  }
  0x34   : > { %1952 = vmatpush3.bf16.msra.mxu0 %v2147_v26  ;;  %1972 = vmatpush3.bf16.msra.mxu1 %v2148_v27  ;;  %v1801_v26 = vsel %vm1340_vm2, 1.0, %v2228_v0  ;;  %v1493_v27 = vadd.s32 1, %v1487_v23 }
  0x35   : > { %1953 = vmatprep.subr.bf16.mxu0 %v2228_v0  ;;  %1973 = vmatprep.subr.bf16.mxu1 %v2228_v0 }
  0x36   : > { %vm1495_vm6 = vcmp.lt.s32.totalorder %v1493_v27, 4 }
  0x37   : > { %vm1497_vm7 = vmand %vm1491_vm5, %vm1495_vm6 }
  0x38   : > { %1954 = vmatpush3.bf16.msra.mxu0 %v2149_v28  ;;  %1974 = vmatpush3.bf16.msra.mxu1 %v2150_v29  ;;  %v788_v28 = vor.u32 %v787_v2, %v783_v62  ;;  %v2102_v29 = vpack.i.bf16 %v1801_v26, %v1789_v7  ;;  %v1390_v62 = vshll.u32 %v2203_v59, 16 }
  0x39   : > { %1955 = vmatprep.subr.bf16.mxu0 %v2228_v0  ;;  %1975 = vmatprep.subr.bf16.mxu1 %v2228_v0 }
  0x3a   : > { %2103 = vperm.xlu0 %2096, %v2102_v29   ;;  %v1392_v2 = vrot.slane %v1390_v62, 3 }
  0x3c   : > { %1956 = vmatpush3.bf16.msra.mxu0 %v2151_v30  ;;  %1976 = vmatpush3.bf16.msra.mxu1 %v2152_v31  ;;  %v942_v30 = vor.u32 %v941_v6, %v937_v3  ;;  %v2177_v31 = vld [vmem:[%s2679_s3 + $0x18] ss:$36 sps:$4 sm:$0xff]   ;;  %v1531_v6 = vshrl.u32 %v1530_v5, 7 }
  0x3d   : > { %1957 = vmatprep.subr.bf16.mxu0 %v2228_v0  ;;  %1977 = vmatprep.subr.bf16.mxu1 %v2228_v0  ;;  %v2202_v3 = vld [vmem:[%s2679_s3 + $0x218] ss:$36 sps:$4 sm:$0xff]  }
  0x3e   : > { %v1540_v7 = vsub.s32 2, %v1531_v6  ;;  %v1544_v15 = vsub.s32 3, %v1531_v6  ;;  %v1532_v27 = vsub.s32 0, %v1531_v6 }
  0x40   : > { %1958 = vmatpush3.bf16.msra.mxu0 %v2153_v32  ;;  %1978 = vmatpush3.bf16.msra.mxu1 %v2154_v33  ;;  %v1790_v32 = vsel %vm1192_vm4, 1.0, %v2228_v0  ;;  %v2178_v33 = vld [vmem:[%s2679_s3 + $0x1c] ss:$36 sps:$4 sm:$0xff]   ;;  %v2644_v9 = vrot.slane %v1528_v8, %v1540_v7  ;;  %v2646_v18 = vrot.slane %v1528_v8, %v1544_v15  ;;  %v1533_v29 = vrot.slane %v1528_v8, %v1532_v27 }
  0x41   : > { %1959 = vmatprep.subr.bf16.mxu0 %v2228_v0  ;;  %1979 = vmatprep.subr.bf16.mxu1 %v2228_v0 }
  0x44   : > { %1960 = vmatpush3.bf16.msra.mxu0 %v2155_v34  ;;  %1980 = vmatpush3.bf16.msra.mxu1 %v2156_v35  ;;  %v1812_v34 = vsel %vm1497_vm7, 1.0, %v2228_v0 }
  0x45   : > { %1985 = vmatprep.subr.bf16.mxu0 %v2228_v0  ;;  %2005 = vmatprep.subr.bf16.mxu1 %v2228_v0  ;;  %v2118_v35 = vpack.i.bf16 %v1812_v34, %v1790_v32  ;;  %v1536_v34 = vsub.s32 1, %v1531_v6 }
  0x47   : > { %1962 = vmatmul.mubr.bf16.vlgmr.msra.gmra.mrb[4].mxu0 %v2157_v36  ;;  %1982 = vmatmul.mubr.bf16.vlgmr.msra.gmra.mrb[4].mxu1 %v2158_v37  ;;  %v2179_v36 = vld [vmem:[%s2679_s3 + $0x60] ss:$36 sps:$4 sm:$0xff]  }
  0x48   : > { %1986 = vmatpush3.bf16.msra.mxu0 %v2159_v38  ;;  %2006 = vmatpush3.bf16.msra.mxu1 %v2160_v39  ;;  %v2180_v37 = vld [vmem:[%s2679_s3 + $0x64] ss:$36 sps:$4 sm:$0xff]   ;;  %v2182_v39 = vld [vmem:[%s2679_s3 + $0xac] ss:$36 sps:$4 sm:$0xff]  }
  0x49   : > { %1987 = vmatprep.subr.bf16.mxu0 %v2228_v0  ;;  %2007 = vmatprep.subr.bf16.mxu1 %v2228_v0  ;;  %v2181_v38 = vld [vmem:[%s2679_s3 + $0xa8] ss:$36 sps:$4 sm:$0xff]  }
  0x4a   : > { %2001 = vmatprep.mubr.msk.bf16.mxu0 %vm2229_vm0, %v2228_v0  ;;  %2021 = vmatprep.mubr.msk.bf16.mxu1 %vm2229_vm0, %v2228_v0 }
  0x4b   : > { %2119 = vperm.xlu0 %2096, %v2118_v35  }
  0x4c   : > { %1988 = vmatpush3.bf16.msra.mxu0 %v2161_v40  ;;  %2008 = vmatpush3.bf16.msra.mxu1 %v2162_v41  ;;  %v2183_v40 = vld [vmem:[%s2679_s3 + $0xf0] ss:$36 sps:$4 sm:$0xff]  }
  0x4d   : > { %1989 = vmatprep.subr.bf16.mxu0 %v2228_v0  ;;  %2009 = vmatprep.subr.bf16.mxu1 %v2228_v0  ;;  %v2184_v41 = vld [vmem:[%s2679_s3 + $0xf4] ss:$36 sps:$4 sm:$0xff]  }
  0x50   : > { %1990 = vmatpush3.bf16.msra.mxu0 %v2163_v42  ;;  %2010 = vmatpush3.bf16.msra.mxu1 %v2164_v43  ;;  %v2185_v42 = vld [vmem:[%s2679_s3 + $0x138] ss:$36 sps:$4 sm:$0xff]  }
  0x51   : > { %1991 = vmatprep.subr.bf16.mxu0 %v2228_v0  ;;  %2011 = vmatprep.subr.bf16.mxu1 %v2228_v0  ;;  %v2186_v43 = vld [vmem:[%s2679_s3 + $0x13c] ss:$36 sps:$4 sm:$0xff]  }
  0x54   : > { %1992 = vmatpush3.bf16.msra.mxu0 %v2165_v44  ;;  %2012 = vmatpush3.bf16.msra.mxu1 %v2166_v45  ;;  %v2187_v44 = vld [vmem:[%s2679_s3 + $0x180] ss:$36 sps:$4 sm:$0xff]  }
  0x55   : > { %1993 = vmatprep.subr.bf16.mxu0 %v2228_v0  ;;  %2013 = vmatprep.subr.bf16.mxu1 %v2228_v0  ;;  %v2188_v45 = vld [vmem:[%s2679_s3 + $0x184] ss:$36 sps:$4 sm:$0xff]  }
  0x58   : > { %1994 = vmatpush3.bf16.msra.mxu0 %v2167_v46  ;;  %2014 = vmatpush3.bf16.msra.mxu1 %v2168_v48  ;;  %v2189_v46 = vld [vmem:[%s2679_s3 + $0x1c8] ss:$36 sps:$4 sm:$0xff]   ;;  %v2193_v48 = vld [vmem:[%s2329_s24] sm:$0xfc]  }
  0x59   : > { %1995 = vmatprep.subr.bf16.mxu0 %v2228_v0  ;;  %2015 = vmatprep.subr.bf16.mxu1 %v2228_v0 }
  0x5c   : > { %1996 = vmatpush3.bf16.msra.mxu0 %v2169_v52  ;;  %2016 = vmatpush3.bf16.msra.mxu1 %v2170_v54  ;;  %v1090_v52 = vrot.slane %v2193_v48, 2  ;;  %v2195_v54 = vld [vmem:[%s2679_s3 + $0x20] ss:$36 sps:$4 sm:$0xff]  }
  0x5d   : > { %1997 = vmatprep.subr.bf16.mxu0 %v2228_v0  ;;  %2017 = vmatprep.subr.bf16.mxu1 %v2228_v0 }
  0x60   : > { %1998 = vmatpush3.bf16.msra.mxu0 %v2171_v58  ;;  %2018 = vmatpush3.bf16.msra.mxu1 %v2172_v61  ;;  %v2199_v58 = vld [vmem:[%s2679_s3 + $0x140] ss:$36 sps:$4 sm:$0xff]   ;;  %v1387_v61 = vshrl.u32 %v2203_v59, 16 }
  0x61   : > { %1999 = vmatprep.subr.bf16.mxu0 %v2228_v0  ;;  %2019 = vmatprep.subr.bf16.mxu1 %v2228_v0 }
  0x62   : > { %v1389_v1 = vrot.slane %v1387_v61, 2 }
  0x64   : > { %2000 = vmatpush3.bf16.msra.mxu0 %v2173_v10  ;;  %2020 = vmatpush3.bf16.msra.mxu1 %v2174_v20  ;;  %v1393_v4 = vor.u32 %v1392_v2, %v1389_v1 }
  0x65   : > { %2025 = vmatprep.subr.bf16.mxu0 %v2228_v0  ;;  %2045 = vmatprep.subr.bf16.mxu1 %v2228_v0 }
  0x67   : > { %2002 = vmatmul.mubr.bf16.vlgmr.msra.gmra.mrb[8].mxu0 %v788_v28  ;;  %2022 = vmatmul.mubr.bf16.vlgmr.msra.gmra.mrb[8].mxu1 %v942_v30 }
  0x68   : > { %2026 = vmatpush3.bf16.msra.mxu0 %v2177_v31  ;;  %2046 = vmatpush3.bf16.msra.mxu1 %v2178_v33 }
  0x69   : > { %2027 = vmatprep.subr.bf16.mxu0 %v2228_v0  ;;  %2047 = vmatprep.subr.bf16.mxu1 %v2228_v0 }
  0x6a   : > { %2041 = vmatprep.mubr.msk.bf16.mxu0 %vm2229_vm0, %v2228_v0  ;;  %2061 = vmatprep.mubr.msk.bf16.mxu1 %vm2229_vm0, %v2228_v0 }
  0x6c   : > { %2028 = vmatpush3.bf16.msra.mxu0 %v2179_v36  ;;  %2048 = vmatpush3.bf16.msra.mxu1 %v2180_v37 }
  0x6d   : > { %2029 = vmatprep.subr.bf16.mxu0 %v2228_v0  ;;  %2049 = vmatprep.subr.bf16.mxu1 %v2228_v0 }
  0x70   : > { %2030 = vmatpush3.bf16.msra.mxu0 %v2181_v38  ;;  %2050 = vmatpush3.bf16.msra.mxu1 %v2182_v39 }
  0x71   : > { %2031 = vmatprep.subr.bf16.mxu0 %v2228_v0  ;;  %2051 = vmatprep.subr.bf16.mxu1 %v2228_v0 }
  0x74   : > { %2032 = vmatpush3.bf16.msra.mxu0 %v2183_v40  ;;  %2052 = vmatpush3.bf16.msra.mxu1 %v2184_v41  ;;  %v1537_v41 = vrot.slane %v1528_v8, %v1536_v34 }
  0x75   : > { %2033 = vmatprep.subr.bf16.mxu0 %v2228_v0  ;;  %2053 = vmatprep.subr.bf16.mxu1 %v2228_v0 }
  0x78   : > { %2034 = vmatpush3.bf16.msra.mxu0 %v2185_v42  ;;  %2054 = vmatpush3.bf16.msra.mxu1 %v2186_v43 }
  0x79   : > { %2035 = vmatprep.subr.bf16.mxu0 %v2228_v0  ;;  %2055 = vmatprep.subr.bf16.mxu1 %v2228_v0 }
  0x7c   : > { %2036 = vmatpush3.bf16.msra.mxu0 %v2187_v44  ;;  %2056 = vmatpush3.bf16.msra.mxu1 %v2188_v45 }
  0x7d   : > { %2037 = vmatprep.subr.bf16.mxu0 %v2228_v0  ;;  %2057 = vmatprep.subr.bf16.mxu1 %v2228_v0 }
  0x80   : > { %2038 = vmatpush3.bf16.msra.mxu0 %v2189_v46  ;;  %2058 = vmatpush3.bf16.msra.mxu1 %v2190_v47 }
  0x81   : > { %2039 = vmatprep.subr.bf16.mxu0 %v2228_v0  ;;  %2059 = vmatprep.subr.bf16.mxu1 %v2228_v0 }
  0x84   : > { %2040 = vmatpush3.bf16.msra.mxu0 %v2191_v49  ;;  %2060 = vmatpush3.bf16.msra.mxu1 %v2192_v51 }
  0x85   : > { %2065 = vmatprep.subr.bf16.mxu0 %v2228_v0 }
  0x87   : > { %2042 = vmatmul.mubr.bf16.vlgmr.msra.gmra.mrb[12].mxu0 %v1090_v52  ;;  %2062 = vmatmul.mubr.bf16.vlgmr.msra.gmra.mrb[12].mxu1 %v1238_v53 }
  0x88   : > { %2066 = vmatpush3.bf16.msra.mxu0 %v2195_v54  ;;  %2081 = vmatprep.mubr.msk.bf16.mxu0 %vm2229_vm0, %v2228_v0 }
  0x89   : > { %2067 = vmatprep.subr.bf16.mxu0 %v2228_v0 }
  0x8c   : > { %2068 = vmatpush3.bf16.msra.mxu0 %v2196_v55 }
  0x8d   : > { %2069 = vmatprep.subr.bf16.mxu0 %v2228_v0 }
  0x90   : > { %2070 = vmatpush3.bf16.msra.mxu0 %v2197_v56 }
  0x91   : > { %2071 = vmatprep.subr.bf16.mxu0 %v2228_v0 }
  0x94   : > { %2072 = vmatpush3.bf16.msra.mxu0 %v2198_v57 }
  0x95   : > { %2073 = vmatprep.subr.bf16.mxu0 %v2228_v0 }
  0x98   : > { %2074 = vmatpush3.bf16.msra.mxu0 %v2199_v58 }
  0x99   : > { %2075 = vmatprep.subr.bf16.mxu0 %v2228_v0 }
  0x9c   : > { %2076 = vmatpush3.bf16.msra.mxu0 %v2200_v60 }
  0x9d   : > { %2077 = vmatprep.subr.bf16.mxu0 %v2228_v0 }
  0xa0   : > { %2078 = vmatpush3.bf16.msra.mxu0 %v2201_v63 }
  0xa1   : > { %2079 = vmatprep.subr.bf16.mxu0 %v2228_v0 }
  0xa2   : > { %v2650_v28 = vpop.permute.xlu1 %2109 }
  0xa3   : > { %v2111_v33 = vunpack.i.l.bf16 %v2650_v28 }
  0xa4   : > { %2080 = vmatpush3.bf16.msra.mxu0 %v2202_v3 }
  0xa7   : > { %2082 = vmatmul.mubr.bf16.vlgmr.msra.gmra.mrb[16].mxu0 %v1393_v4 }
  0xad   : > { %v2099_v30 = vpop.permute.xlu0 %2098 }
  0xae   : > { %v2100_v35 = vunpack.i.l.bf16 %v2099_v30  ;;  %v2101_v37 = vunpack.i.h.bf16 %v2099_v30 }
  0xb1   : > { %v2652_v31 = vpop.permute.xlu1 %2114 }
  0xb2   : > { %v2117_v36 = vunpack.i.h.bf16 %v2652_v31 }
  0xfa   : > { %v389_v10 = vpop.f32.mrb[0].mxu0  ;;  %v508_v12 = vpop.f32.mrb[0].mxu1 }
  0xfb   : > { %v1923_v11 = vpop.f32.mrb[1].mxu0  ;;  %v1943_v14 = vpop.f32.mrb[1].mxu1  ;;  %v1550_v32 = vadd.f32 %v1533_v29, %v389_v10 }
  0xfc   : > { %v392_v13 = vpop.f32.mrb[2].mxu0  ;;  %v511_v0 = vpop.f32.mrb[2].mxu1 }
  0xfd   : > { %v1924_v16 = vpop.f32.mrb[3].mxu0  ;;  %v1944_v17 = vpop.f32.mrb[3].mxu1  ;;  %520 = vst [vmem:[#allocation2 + $0x28] sm:$0xff] %v511_v0  ;;  %v1566_v39 = vmul.f32 0.70710677, %v1550_v32  ;;  %v1554_v59 = vadd.f32 %v1533_v29, %v392_v13  ;;  %v1558_v5 = vmul.f32 0.5, %v1550_v32  ;;  %v2112_v0 = vunpack.i.h.bf16 %v2650_v28 }
  0xfe   : > { %v2104_v11 = vpop.permute.xlu0 %2103 }
  0xff   : > { %2204 = verf.f32 %v1566_v39  ;;  %v1570_v61 = vmul.f32 0.70710677, %v1554_v59  ;;  %v1562_v17 = vmul.f32 0.5, %v1554_v59 }
 0x102   : > { %v2120_v15 = vpop.permute.xlu0 %2119 }
 0x104   : > { %v896_v52 = vld [vmem:[#allocation2 + $0x28] sm:$0x7f] }
 0x109   : > { %v2205_v63 = vpop.eup %2204 }
 0x10a   : > { %v1582_v3 = vadd.f32 1.0, %v2205_v63 }
 0x10c   : > { %v1590_v8 = vmul.f32 %v1582_v3, %v1558_v5 }
 0x11a   : > { %v2648_v19 = vpop.f32.mrb[4].mxu0  ;;  %v746_v21 = vpop.f32.mrb[4].mxu1 }
 0x11b   : > { %v1963_v20 = vpop.f32.mrb[5].mxu0  ;;  %v1983_v23 = vpop.f32.mrb[5].mxu1 }
 0x11c   : > { %v630_v22 = vpop.f32.mrb[6].mxu0  ;;  %v749_v25 = vpop.f32.mrb[6].mxu1  ;;  %v2121_v23 = vunpack.i.l.bf16 %v2120_v15 }
 0x11d   : > { %v1964_v24 = vpop.f32.mrb[7].mxu0  ;;  %v1984_v26 = vpop.f32.mrb[7].mxu1  ;;  %639 = vst [vmem:[#allocation2 + $0x30] sm:$0xff] %v630_v22  ;;  %758 = vst [vmem:[#allocation2 + $0x38] sm:$0xff] %v749_v25  ;;  %v2105_v22 = vunpack.i.l.bf16 %v2104_v11 }
 0x11e   : > { %v2106_v26 = vunpack.i.h.bf16 %v2104_v11 }
 0x124   : > { %v1050_v57 = vld [vmem:[#allocation2 + $0x38] sm:$0x7f] }
 0x13a   : > { %v872_v38 = vpop.f32.mrb[8].mxu0  ;;  %v1026_v42 = vpop.f32.mrb[8].mxu1 }
 0x13b   : > { %v907_v40 = vmul.f32 %v2111_v33, %v872_v38  ;;  %v2003_v43 = vpop.f32.mrb[9].mxu0  ;;  %v1061_v44 = vmul.f32 %v2100_v35, %v1026_v42  ;;  %v2023_v45 = vpop.f32.mrb[9].mxu1 }
 0x13c   : > { %v875_v46 = vpop.f32.mrb[10].mxu0  ;;  %v1029_v49 = vpop.f32.mrb[10].mxu1 }
 0x13d   : > { %v909_v47 = vadd.f32 %v907_v40, %v508_v12  ;;  %v908_v48 = vmul.f32 %v2117_v36, %v875_v46  ;;  %v2004_v50 = vpop.f32.mrb[11].mxu0  ;;  %v1063_v51 = vadd.f32 %v1061_v44, %v746_v21  ;;  %v1062_v53 = vmul.f32 %v2101_v37, %v1029_v49  ;;  %v2024_v54 = vpop.f32.mrb[11].mxu1 }
 0x13e   : > { %v2122_v50 = vunpack.i.h.bf16 %v2120_v15 }
 0x13f   : > { %v1551_v55 = vadd.f32 %v1537_v41, %v909_v47  ;;  %v910_v56 = vadd.f32 %v908_v48, %v896_v52  ;;  %v1064_v58 = vadd.f32 %v1062_v53, %v1050_v57  ;;  %v2116_v48 = vunpack.i.l.bf16 %v2652_v31 }
 0x141   : > { %v1567_v60 = vmul.f32 0.70710677, %v1551_v55  ;;  %912 = vst [vmem:[#allocation2 + $0x28] sm:$0x7f] %v910_v56  ;;  %1066 = vst [vmem:[#allocation2 + $0x38] sm:$0x7f] %v1064_v58 }
 0x142   : > { %v1559_v6 = vmul.f32 0.5, %v1551_v55 }
 0x143   : > { %2206 = verf.f32 %v1567_v60 }
 0x144   : > { %2208 = verf.f32 %v1570_v61 }
 0x148   : > { %v1525_v62 = vld [vmem:[#allocation2 + $0x28] sm:$0xff]  ;;  %v1346_v46 = vld [vmem:[#allocation2 + $0x38] sm:$0xf] }
 0x149   : > { %v1555_v1 = vadd.f32 %v1537_v41, %v1525_v62  ;;  %v1198_v41 = vld [vmem:[#allocation2 + $0x30] sm:$0xf] }
 0x14b   : > { %v1571_v2 = vmul.f32 0.70710677, %v1555_v1  ;;  %v1563_v20 = vmul.f32 0.5, %v1555_v1 }
 0x14d   : > { %v2207_v4 = vpop.eup %2206  ;;  %2210 = verf.f32 %v1571_v2 }
 0x14e   : > { %v1583_v7 = vadd.f32 1.0, %v2207_v4  ;;  %v2209_v13 = vpop.eup %2208 }
 0x14f   : > { %v1586_v14 = vadd.f32 1.0, %v2209_v13 }
 0x150   : > { %v1591_v10 = vmul.f32 %v1583_v7, %v1559_v6 }
 0x151   : > { %v1594_v24 = vmul.f32 %v1586_v14, %v1562_v17 }
 0x152   : > { %v1820_v12 = vpack.c.bf16 %v1591_v10, %v1590_v8 }
 0x154   : > { %1622 = vst [vmem:[%s2660_s23] sm:$0xff] %v1820_v12 }
 0x157   : > { %v2211_v16 = vpop.eup %2210 }
 0x158   : > { %v1587_v21 = vadd.f32 1.0, %v2211_v16 }
 0x15a   : > { %v1595_v25 = vmul.f32 %v1587_v21, %v1563_v20  ;;  %v1174_v27 = vpop.f32.mrb[12].mxu0  ;;  %v1322_v30 = vpop.f32.mrb[12].mxu1 }
 0x15b   : > { %v1209_v29 = vmul.f32 %v2112_v0, %v1174_v27  ;;  %v2043_v32 = vpop.f32.mrb[13].mxu0  ;;  %v1357_v34 = vmul.f32 %v2105_v22, %v1322_v30  ;;  %v2063_v35 = vpop.f32.mrb[13].mxu1 }
 0x15c   : > { %v1822_v33 = vpack.c.bf16 %v1595_v25, %v1594_v24  ;;  %v1177_v36 = vpop.f32.mrb[14].mxu0  ;;  %v1325_v38 = vpop.f32.mrb[14].mxu1 }
 0x15d   : > { %v1211_v37 = vadd.f32 %v1209_v29, %v2648_v19  ;;  %v1210_v28 = vmul.f32 %v2121_v23, %v1177_v36  ;;  %v2044_v39 = vpop.f32.mrb[15].mxu0  ;;  %v1359_v40 = vadd.f32 %v1357_v34, %v1063_v51  ;;  %v1358_v42 = vmul.f32 %v2106_v26, %v1325_v38  ;;  %v2064_v43 = vpop.f32.mrb[15].mxu1 }
 0x15e   : > { %1624 = vst [vmem:[%s2660_s23 + $0x10] sm:$0xff] %v1822_v33 }
 0x15f   : > { %v1552_v44 = vadd.f32 %v2644_v9, %v1211_v37  ;;  %v1212_v45 = vadd.f32 %v1210_v28, %v1198_v41  ;;  %v1360_v47 = vadd.f32 %v1358_v42, %v1346_v46 }
 0x161   : > { %1214 = vst [vmem:[#allocation2 + $0x30] sm:$0xf] %v1212_v45  ;;  %1362 = vst [vmem:[#allocation2 + $0x38] sm:$0xf] %v1360_v47  ;;  %v1568_v19 = vmul.f32 0.70710677, %v1552_v44 }
 0x162   : > { %v1560_v6 = vmul.f32 0.5, %v1552_v44 }
 0x163   : > { %2212 = verf.f32 %v1568_v19 }
 0x168   : > { %v1526_v57 = vld [vmem:[#allocation2 + $0x30] sm:$0xff]  ;;  %v1503_v58 = vld [vmem:[#allocation2 + $0x38] sm:$0x7] }
 0x169   : > { %v1556_v61 = vadd.f32 %v2644_v9, %v1526_v57 }
 0x16b   : > { %v1572_v31 = vmul.f32 0.70710677, %v1556_v61  ;;  %v1564_v15 = vmul.f32 0.5, %v1556_v61 }
 0x16d   : > { %v2213_v1 = vpop.eup %2212 }
 0x16e   : > { %v1584_v4 = vadd.f32 1.0, %v2213_v1 }
 0x170   : > { %v1592_v10 = vmul.f32 %v1584_v4, %v1560_v6 }
 0x17a   : > { %v1477_v49 = vpop.f32.mrb[16].mxu0 }
 0x17b   : > { %v1514_v52 = vmul.f32 %v2116_v48, %v1477_v49  ;;  %v2083_v53 = vpop.f32.mrb[17].mxu0 }
 0x17c   : > { %v1480_v54 = vpop.f32.mrb[18].mxu0 }
 0x17d   : > { %v1516_v55 = vadd.f32 %v1514_v52, %v1359_v40  ;;  %v1515_v51 = vmul.f32 %v2122_v50, %v1480_v54  ;;  %v2084_v56 = vpop.f32.mrb[19].mxu0 }
 0x17f   : > { %v1553_v59 = vadd.f32 %v2646_v18, %v1516_v55  ;;  %v1517_v60 = vadd.f32 %v1515_v51, %v1503_v58 }
 0x181   : > { %v1569_v62 = vmul.f32 0.70710677, %v1553_v59  ;;  %1519 = vst [vmem:[#allocation2 + $0x38] sm:$0x7] %v1517_v60  ;;  %v1561_v7 = vmul.f32 0.5, %v1553_v59 }
 0x183   : > { %2214 = verf.f32 %v1569_v62 }
 0x184   : > { %2216 = verf.f32 %v1572_v31 }
 0x188   : > { %v1527_v63 = vld [vmem:[#allocation2 + $0x38] sm:$0xff] }
 0x189   : > { %v1557_v2 = vadd.f32 %v2646_v18, %v1527_v63 }
 0x18b   : > { %v1573_v3 = vmul.f32 0.70710677, %v1557_v2  ;;  %v1565_v16 = vmul.f32 0.5, %v1557_v2 }
 0x18d   : > { %v2215_v5 = vpop.eup %2214  ;;  %2218 = verf.f32 %v1573_v3 }
 0x18e   : > { %v1585_v8 = vadd.f32 1.0, %v2215_v5  ;;  %v2217_v12 = vpop.eup %2216 }
 0x18f   : > { %v1588_v13 = vadd.f32 1.0, %v2217_v12 }
 0x190   : > { %v1593_v9 = vmul.f32 %v1585_v8, %v1561_v7 }
 0x191   : > { %v1596_v17 = vmul.f32 %v1588_v13, %v1564_v15 }
 0x192   : > { %v1821_v11 = vpack.c.bf16 %v1593_v9, %v1592_v10 }
 0x194   : > { %1623 = vst [vmem:[%s2660_s23 + $0x8] sm:$0xff] %v1821_v11 }
 0x197   : > { %v2219_v14 = vpop.eup %2218 }
 0x198   : > { %v1589_v0 = vadd.f32 1.0, %v2219_v14 }
 0x19a   : > { %v1597_v18 = vmul.f32 %v1589_v0, %v1565_v16 }
 0x19c   : > { %v1823_v20 = vpack.c.bf16 %v1597_v18, %v1596_v17 }
 0x19e   : > { %1625 = vst [vmem:[%s2660_s23 + $0x18] sm:$0xff] %v1823_v20 }
 0x19f PF: > { %s15_s18 = sadd.s32 1, %s2226_s18  }
 0x1a0   : > { %p12_p4 = scmp.ge.s32.totalorder %s15_s18, 4  }
 0x1a2   :  { %14 = sbr.rel (!%p12_p4) target bundleno = 1 (0x1), region = 76 }

// kernel: decoder_forward.8
= control target key start
LH: loop header
LB: loop body
LE: loop exit
PB: predicated region body
PF: predicated region fallthrough
CT: control target
= control target key end

     0   :  { %s2340_s18 = smov 0   ;;  %s2807_s0 = inlined_call_operand.vmem [shape: bf16[32,128], index: 0, kind: input, shape index: {}]   ;;  %s2808_s1 = inlined_call_operand.vmem [shape: s32[32,1], index: 1, kind: input, shape index: {}]   ;;  %s2809_s2 = inlined_call_operand.vmem [shape: s32[32,1], index: 2, kind: input, shape index: {}]   ;;  %s2810_s3 = inlined_call_operand.vmem [shape: bf16[128,1152], index: 3, kind: input, shape index: {}]   ;;  %s2811_s4 = inlined_call_operand.vmem [shape: f32[1,128], index: 4, kind: input, shape index: {}]   ;;  %s2812_s5 = inlined_call_operand.vmem [shape: bf16[32,128], index: 5, kind: output, shape index: {}]  }
   0x1 LB: > { %s1777_s19 = sadd.s32 4294967295, %s2305_s18   ;;  %p1781_p0 = scmp.ge.s32.totalorder %s2305_s18, 1  ;;  %s2305_s18 = sphi %s2340_s18, %s15_s18  }
   0x2   : > { %p210_p1 = scmp.lt.s32.totalorder %s2305_s18, 3 }
   0x4   : > { %p211_p2 = pnand %p1781_p0, %p210_p1 }
   0x5   : > { %v2307_v0 = vmov (!%p211_p2), 0.0   ;;  %v2213_v1 = vld [vmem:[%s2810_s3] ss:$36 sps:$4 sm:$0xff] (!%p211_p2)   ;;  %vm2308_vm0 = vmmov (!%p211_p2), 0   ;;  %v2215_v3 = vld [vmem:[%s2810_s3 + $0x48] ss:$36 sps:$4 sm:$0xff] (!%p211_p2)  }
   0x6   : > { %214 = sbr.rel (%p211_p2) target bundleno = 415 (0x19f), region = 40  ;;  %1980 = vmatprep.subr.bf16.mxu0 (!%p211_p2), %v2307_v0  ;;  %273 = vst [vmem:[#allocation2] sm:$0xff] (!%p211_p2), %v2307_v0  ;;  %274 = vst [vmem:[#allocation2 + $0x8] sm:$0xff] (!%p211_p2), %v2307_v0  ;;  %2000 = vmatprep.subr.bf16.mxu1 (!%p211_p2), %v2307_v0  ;;  %v2214_v2 = vld [vmem:[%s2810_s3 + $0x4] ss:$36 sps:$4 sm:$0xff] (!%p211_p2)   ;;  %s1782_s15 = sshll.u32 (!%p211_p2), %s1777_s19, 1 }
   0x7   : > { %1996 = vmatprep.mubr.msk.bf16.mxu0 (!%p211_p2), %vm2308_vm0, %v2307_v0  ;;  %2016 = vmatprep.mubr.msk.bf16.mxu1 (!%p211_p2), %vm2308_vm0, %v2307_v0  ;;  %v2216_v4 = vld [vmem:[%s2810_s3 + $0x4c] ss:$36 sps:$4 sm:$0xff] (!%p211_p2)   ;;  %v2218_v6 = vld [vmem:[%s2810_s3 + $0x94] ss:$36 sps:$4 sm:$0xff] (!%p211_p2)   ;;  %v2220_v8 = vld [vmem:[%s2810_s3 + $0xdc] ss:$36 sps:$4 sm:$0xff] (!%p211_p2)  }
   0x8   : > { %1981 = vmatpush3.bf16.msra.mxu0 (!%p211_p2), %v2213_v1  ;;  %2001 = vmatpush3.bf16.msra.mxu1 (!%p211_p2), %v2214_v2  ;;  %v2217_v5 = vld [vmem:[%s2810_s3 + $0x90] ss:$36 sps:$4 sm:$0xff] (!%p211_p2)   ;;  %v2219_v7 = vld [vmem:[%s2810_s3 + $0xd8] ss:$36 sps:$4 sm:$0xff] (!%p211_p2)   ;;  %v2221_v9 = vld [vmem:[%s2810_s3 + $0x120] ss:$36 sps:$4 sm:$0xff] (!%p211_p2)  }
   0x9   : > { %1982 = vmatprep.subr.bf16.mxu0 (!%p211_p2), %v2307_v0  ;;  %2002 = vmatprep.subr.bf16.mxu1 (!%p211_p2), %v2307_v0  ;;  %v2222_v10 = vld [vmem:[%s2810_s3 + $0x124] ss:$36 sps:$4 sm:$0xff] (!%p211_p2)   ;;  %p249_p3 = scmp.lt.s32.totalorder (!%p211_p2), %s1782_s15, 3  ;;  %v2309_v11 = vmov (!%p211_p2), 0   ;;  %v2224_v13 = vld [vmem:[%s2810_s3 + $0x16c] ss:$36 sps:$4 sm:$0xff] (!%p211_p2)  }
   0xa   : > { %2171 = vset.pattern.permute.xlu0 (!%p211_p2), %v2309_v11  ;;  %v2223_v12 = vld [vmem:[%s2810_s3 + $0x168] ss:$36 sps:$4 sm:$0xff] (!%p211_p2)   ;;  %2182 = vset.pattern.permute.xlu1 (!%p211_p2), %v2309_v11  ;;  %v2225_v14 = vld [vmem:[%s2810_s3 + $0x1b0] ss:$36 sps:$4 sm:$0xff] (!%p211_p2)   ;;  %v2227_v16 = vld [vmem:[%s2810_s3 + $0x1f8] ss:$36 sps:$4 sm:$0xff] (!%p211_p2)  }
   0xb   : > { %v2226_v15 = vld [vmem:[%s2810_s3 + $0x1b4] ss:$36 sps:$4 sm:$0xff] (!%p211_p2)   ;;  %v2228_v17 = vld [vmem:[%s2810_s3 + $0x1fc] ss:$36 sps:$4 sm:$0xff] (!%p211_p2)   ;;  %v2231_v18 = vld [vmem:[%s2810_s3 + $0x8] ss:$36 sps:$4 sm:$0xff] (!%p211_p2)  }
   0xc   : > { %1983 = vmatpush3.bf16.msra.mxu0 (!%p211_p2), %v2215_v3  ;;  %2003 = vmatpush3.bf16.msra.mxu1 (!%p211_p2), %v2216_v4  ;;  %v2232_v21 = vld [vmem:[%s2810_s3 + $0xc] ss:$36 sps:$4 sm:$0xff] (!%p211_p2)   ;;  %v2234_v23 = vld [vmem:[%s2810_s3 + $0x54] ss:$36 sps:$4 sm:$0xff] (!%p211_p2)   ;;  %v2236_v25 = vld [vmem:[%s2810_s3 + $0x9c] ss:$36 sps:$4 sm:$0xff] (!%p211_p2)  }
   0xd   : > { %1984 = vmatprep.subr.bf16.mxu0 %v2307_v0  ;;  %2004 = vmatprep.subr.bf16.mxu1 %v2307_v0  ;;  %s2820_s15 = smov (!%p249_p3, %s1782_s15), 3  ;;  %v2233_v22 = vld [vmem:[%s2810_s3 + $0x50] ss:$36 sps:$4 sm:$0xff]   ;;  %v2235_v24 = vld [vmem:[%s2810_s3 + $0x98] ss:$36 sps:$4 sm:$0xff]  }
   0xe   : > { %s1783_s21 = sshll.u32 %s2820_s15, 2  ;;  %v2237_v26 = vld [vmem:[%s2810_s3 + $0xe0] ss:$36 sps:$4 sm:$0xff]   ;;  %v2239_v28 = vld [vmem:[%s2810_s3 + $0x128] ss:$36 sps:$4 sm:$0xff]   ;;  %s1785_s16 = sshll.u32 %s2820_s15, 3 }
   0xf   : > { %s2412_s24 = scalar_lea.vmem %s2807_s0, %s1783_s21  ;;  %v2238_v27 = vld [vmem:[%s2810_s3 + $0xe4] ss:$36 sps:$4 sm:$0xff]   ;;  %v2240_v29 = vld [vmem:[%s2810_s3 + $0x12c] ss:$36 sps:$4 sm:$0xff]   ;;  %v2242_v31 = vld [vmem:[%s2810_s3 + $0x174] ss:$36 sps:$4 sm:$0xff]   ;;  %s2504_s26 = scalar_lea.vmem %s2808_s1, %s1785_s16 }
  0x10   : > { %1985 = vmatpush3.bf16.msra.mxu0 %v2217_v5  ;;  %2005 = vmatpush3.bf16.msra.mxu1 %v2218_v6  ;;  %v2229_v19 = vld [vmem:[%s2412_s24] sm:$0x3f]   ;;  %v2241_v30 = vld [vmem:[%s2810_s3 + $0x170] ss:$36 sps:$4 sm:$0xff]   ;;  %v2243_v32 = vld [vmem:[%s2810_s3 + $0x1b8] ss:$36 sps:$4 sm:$0xff]   ;;  %s2514_s6 = scalar_lea.vmem %s2809_s2, %s1785_s16  ;;  %s270_s8 = scalar_lea.vmem %s2812_s5, %s1783_s21 }
  0x11   : > { %1986 = vmatprep.subr.bf16.mxu0 %v2307_v0  ;;  %2006 = vmatprep.subr.bf16.mxu1 %v2307_v0  ;;  %v2230_v20 = vld [vmem:[%s2412_s24] sm:$0x3f]   ;;  %v2249_v38 = vld [vmem:[%s2810_s3 + $0x10] ss:$36 sps:$4 sm:$0xff]   ;;  %v2251_v41 = vld [vmem:[%s2810_s3 + $0x58] ss:$36 sps:$4 sm:$0xff]  }
  0x12   : > { %v2244_v33 = vld [vmem:[%s2810_s3 + $0x1bc] ss:$36 sps:$4 sm:$0xff]   ;;  %v2246_v35 = vld [vmem:[%s2810_s3 + $0x204] ss:$36 sps:$4 sm:$0xff]   ;;  %v2250_v40 = vld [vmem:[%s2810_s3 + $0x14] ss:$36 sps:$4 sm:$0xff]  }
  0x13   : > { %v2245_v34 = vld [vmem:[%s2810_s3 + $0x200] ss:$36 sps:$4 sm:$0xff]   ;;  %v389_v43 = vld [vmem:[%s2504_s26 + $0xd] sm:$0x7]  ;;  %v2257_v1 = vld [vmem:[%s2810_s3 + $0x130] ss:$36 sps:$4 sm:$0xff]  }
  0x14   : > { %1987 = vmatpush3.bf16.msra.mxu0 %v2219_v7  ;;  %2007 = vmatpush3.bf16.msra.mxu1 %v2220_v8  ;;  %v2247_v36 = vld [vmem:[%s2412_s24] sm:$0x7f]   ;;  %v391_v46 = vld [vmem:[%s2514_s6 + $0xd] sm:$0x7]  ;;  %v393_v47 = vadd.s32 4294967295, %v389_v43 }
  0x15   : > { %1988 = vmatprep.subr.bf16.mxu0 %v2307_v0  ;;  %2008 = vmatprep.subr.bf16.mxu1 %v2307_v0  ;;  %v2248_v37 = vld [vmem:[%s2412_s24] sm:$0xff]   ;;  %v401_v49 = vadd.s32 4294967295, %v391_v46  ;;  %v2255_v54 = vld [vmem:[%s2810_s3 + $0xe8] ss:$36 sps:$4 sm:$0xff]   ;;  %v2258_v4 = vld [vmem:[%s2810_s3 + $0x134] ss:$36 sps:$4 sm:$0xff]  }
  0x16   : > { %v388_v39 = vld [vmem:[%s2504_s26 + $0x5] sm:$0xff]  ;;  %v2252_v42 = vld [vmem:[%s2810_s3 + $0x5c] ss:$36 sps:$4 sm:$0xff]   ;;  %vm395_vm3 = vcmp.ge.s32.totalorder %v393_v47, 0  ;;  %vm397_vm4 = vcmp.lt.s32.totalorder %v393_v47, 4 }
  0x17   : > { %v390_v44 = vld [vmem:[%s2514_s6 + $0x5] sm:$0xff]  ;;  %v392_v45 = vadd.s32 4294967295, %v388_v39  ;;  %vm399_vm7 = vmand %vm395_vm3, %vm397_vm4  ;;  %vm403_vm8 = vcmp.ge.s32.totalorder %v401_v49, 0  ;;  %vm407_vm11 = vcmp.lt.s32.totalorder %v401_v49, 4  ;;  %v2259_v5 = vld [vmem:[%s2810_s3 + $0x178] ss:$36 sps:$4 sm:$0xff]  }
  0x18   : > { %1989 = vmatpush3.bf16.msra.mxu0 %v2221_v9  ;;  %2009 = vmatpush3.bf16.msra.mxu1 %v2222_v10  ;;  %v400_v48 = vadd.s32 4294967295, %v390_v44  ;;  %v545_v50 = vld [vmem:[%s2504_s26 + $0x4] sm:$0xff]  ;;  %vm405_vm12 = vmand %vm399_vm7, %vm403_vm8  ;;  %v2256_v55 = vld [vmem:[%s2810_s3 + $0xec] ss:$36 sps:$4 sm:$0xff]  }
  0x19   : > { %1990 = vmatprep.subr.bf16.mxu0 %v2307_v0  ;;  %2010 = vmatprep.subr.bf16.mxu1 %v2307_v0  ;;  %vm394_vm1 = vcmp.ge.s32.totalorder %v392_v45, 0  ;;  %vm396_vm2 = vcmp.lt.s32.totalorder %v392_v45, 4  ;;  %v2253_v51 = vld [vmem:[%s2810_s3 + $0xa0] ss:$36 sps:$4 sm:$0xff]   ;;  %v549_v52 = vadd.s32 4294967295, %v545_v50 }
  0x1a   : > { %vm398_vm5 = vmand %vm394_vm1, %vm396_vm2  ;;  %vm402_vm6 = vcmp.ge.s32.totalorder %v400_v48, 0  ;;  %vm406_vm9 = vcmp.lt.s32.totalorder %v400_v48, 4  ;;  %v2254_v53 = vld [vmem:[%s2810_s3 + $0xa4] ss:$36 sps:$4 sm:$0xff]   ;;  %v546_v57 = vld [vmem:[%s2504_s26 + $0xc] sm:$0xf] }
  0x1b   : > { %vm404_vm10 = vmand %vm398_vm5, %vm402_vm6  ;;  %vm551_vm14 = vcmp.ge.s32.totalorder %v549_v52, 0  ;;  %vm553_vm15 = vcmp.lt.s32.totalorder %v549_v52, 4  ;;  %v547_v59 = vld [vmem:[%s2514_s6 + $0x4] sm:$0xff]  ;;  %v548_v60 = vld [vmem:[%s2514_s6 + $0xc] sm:$0xf]  ;;  %v550_v61 = vadd.s32 4294967295, %v546_v57 }
  0x1c   : > { %1991 = vmatpush3.bf16.msra.mxu0 %v2223_v12  ;;  %2011 = vmatpush3.bf16.msra.mxu1 %v2224_v13  ;;  %vm408_vm13 = vmand %vm404_vm10, %vm406_vm9  ;;  %vm557_vm3 = vcmp.ge.s32.totalorder %v547_v59, 0  ;;  %vm558_vm4 = vcmp.ge.s32.totalorder %v548_v60, 0  ;;  %v700_v63 = vld [vmem:[%s2504_s26 + $0x3] sm:$0xff]  ;;  %vm561_vm8 = vcmp.lt.s32.totalorder %v547_v59, 4  ;;  %vm562_vm10 = vcmp.lt.s32.totalorder %v548_v60, 4 }
  0x1d   : > { %1992 = vmatprep.subr.bf16.mxu0 %v2307_v0  ;;  %2012 = vmatprep.subr.bf16.mxu1 %v2307_v0  ;;  %vm409_vm1 = vmand %vm405_vm12, %vm407_vm11  ;;  %v1799_v56 = vsel %vm408_vm13, 1.0, %v2307_v0  ;;  %vm552_vm5 = vcmp.ge.s32.totalorder %v550_v61, 0  ;;  %vm554_vm6 = vcmp.lt.s32.totalorder %v550_v61, 4  ;;  %v702_v2 = vld [vmem:[%s2514_s6 + $0x3] sm:$0xff]  ;;  %v704_v3 = vadd.s32 4294967295, %v700_v63 }
  0x1e   : > { %v1800_v58 = vsel %vm409_vm1, 1.0, %v2307_v0  ;;  %vm555_vm2 = vmand %vm551_vm14, %vm553_vm15  ;;  %v712_v7 = vadd.s32 1, %v702_v2  ;;  %v2266_v9 = vld [vmem:[%s2412_s24] sm:$0xff]   ;;  %v1139_v39 = vld [vmem:[%s2504_s26 + $0x8] sm:$0x7f] }
  0x1f   : > { %v2172_v62 = vpack.i.bf16 %v1800_v58, %v1799_v56  ;;  %vm559_vm7 = vmand %vm555_vm2, %vm557_vm3  ;;  %vm706_vm14 = vcmp.ge.s32.totalorder %v704_v3, 0  ;;  %vm708_vm15 = vcmp.lt.s32.totalorder %v704_v3, 4  ;;  %v2260_v11 = vld [vmem:[%s2810_s3 + $0x17c] ss:$36 sps:$4 sm:$0xff]   ;;  %v2262_v13 = vld [vmem:[%s2810_s3 + $0x1c4] ss:$36 sps:$4 sm:$0xff]  }
  0x20   : > { %1993 = vmatpush3.bf16.msra.mxu0 %v2225_v14  ;;  %2013 = vmatpush3.bf16.msra.mxu1 %v2226_v15  ;;  %vm556_vm9 = vmand %vm552_vm5, %vm554_vm6  ;;  %v2261_v12 = vld [vmem:[%s2810_s3 + $0x1c0] ss:$36 sps:$4 sm:$0xff]   ;;  %vm714_vm2 = vcmp.ge.s32.totalorder %v712_v7, 0  ;;  %v1044_v14 = vshll.u32 %v2266_v9, 16  ;;  %v1460_v46 = vld [vmem:[%s2504_s26 + $0x8] sm:$0xf] }
  0x21   : > { %1994 = vmatprep.subr.bf16.mxu0 %v2307_v0  ;;  %2014 = vmatprep.subr.bf16.mxu1 %v2307_v0  ;;  %vm560_vm11 = vmand %vm556_vm9, %vm558_vm4  ;;  %vm718_vm4 = vcmp.lt.s32.totalorder %v712_v7, 4  ;;  %v2270_v45 = vld [vmem:[%s2810_s3 + $0x64] ss:$36 sps:$4 sm:$0xff]   ;;  %v1464_v50 = vadd.s32 1, %v1460_v46  ;;  %v2273_v57 = vld [vmem:[%s2810_s3 + $0xf0] ss:$36 sps:$4 sm:$0xff]  }
  0x22   : > { %2173 = vperm.xlu0 %2171, %v2172_v62   ;;  %vm563_vm12 = vmand %vm559_vm7, %vm561_vm8  ;;  %v1304_v56 = vld [vmem:[%s2514_s6 + $0x8] sm:$0x1f]  ;;  %v2274_v60 = vld [vmem:[%s2810_s3 + $0xf4] ss:$36 sps:$4 sm:$0xff]  }
  0x23   : > { %vm564_vm13 = vmand %vm560_vm11, %vm562_vm10  ;;  %v1810_v6 = vsel %vm563_vm12, 1.0, %v2307_v0  ;;  %v1314_v2 = vadd.s32 4294967295, %v1304_v56  ;;  %v1623_v3 = vld [vmem:[%s2504_s26 + $0x8] sm:$0x7]  ;;  %v415_v56 = vld [vmem:[#allocation2 + $0xd] sm:$0x7] }
  0x24   : > { %1995 = vmatpush3.bf16.msra.mxu0 %v2227_v16  ;;  %2015 = vmatpush3.bf16.msra.mxu1 %v2228_v17  ;;  %v1811_v8 = vsel %vm564_vm13, 1.0, %v2307_v0  ;;  %vm710_vm1 = vmand %vm706_vm14, %vm708_vm15  ;;  %v2263_v16 = vld [vmem:[%s2810_s3 + $0x208] ss:$36 sps:$4 sm:$0xff]   ;;  %v1627_v7 = vadd.s32 1, %v1623_v3 }
  0x25   : > { %2020 = vmatprep.subr.bf16.mxu0 %v2307_v0  ;;  %2040 = vmatprep.subr.bf16.mxu1 %v2307_v0  ;;  %v2177_v10 = vpack.i.bf16 %v1811_v8, %v1810_v6  ;;  %vm2588_vm3 = vmand %vm710_vm1, %vm714_vm2  ;;  %v701_v17 = vld [vmem:[%s2504_s26 + $0xb] sm:$0x1f]  ;;  %v2276_v6 = vld [vmem:[%s2810_s3 + $0x13c] ss:$36 sps:$4 sm:$0xff]  }
  0x26   : > { %vm2605_vm9 = vmand %vm2588_vm3, %vm718_vm4 }
  0x27   : > { %1997 = vmatmul.mubr.bf16.vlgmr.msra.gmra.mrb[0].mxu0 %v2229_v19  ;;  %2017 = vmatmul.mubr.bf16.vlgmr.msra.gmra.mrb[0].mxu1 %v2230_v20  ;;  %v857_v19 = vld [vmem:[%s2504_s26 + $0x1] sm:$0xff]  ;;  %v705_v20 = vadd.s32 4294967295, %v701_v17 }
  0x28   : > { %2021 = vmatpush3.bf16.msra.mxu0 %v2231_v18  ;;  %2041 = vmatpush3.bf16.msra.mxu1 %v2232_v21  ;;  %v703_v18 = vld [vmem:[%s2514_s6 + $0xb] sm:$0x1f]  ;;  %vm861_vm11 = vcmp.ge.s32.totalorder %v857_v19, 0  ;;  %vm863_vm12 = vcmp.lt.s32.totalorder %v857_v19, 4 }
  0x29   : > { %2022 = vmatprep.subr.bf16.mxu0 %v2307_v0  ;;  %2042 = vmatprep.subr.bf16.mxu1 %v2307_v0  ;;  %v713_v21 = vadd.s32 1, %v703_v18  ;;  %vm707_vm5 = vcmp.ge.s32.totalorder %v705_v20, 0  ;;  %vm709_vm6 = vcmp.lt.s32.totalorder %v705_v20, 4  ;;  %vm865_vm2 = vmand %vm861_vm11, %vm863_vm12  ;;  %v2279_v18 = vld [vmem:[%s2810_s3 + $0x1c8] ss:$36 sps:$4 sm:$0xff]  }
  0x2a   : > { %2036 = vmatprep.mubr.msk.bf16.mxu0 %vm2308_vm0, %v2307_v0  ;;  %2056 = vmatprep.mubr.msk.bf16.mxu1 %vm2308_vm0, %v2307_v0  ;;  %vm711_vm10 = vmand %vm707_vm5, %vm709_vm6  ;;  %v2280_v20 = vld [vmem:[%s2810_s3 + $0x1cc] ss:$36 sps:$4 sm:$0xff]  }
  0x2b   : > { %2178 = vperm.xlu0 %2171, %v2177_v10   ;;  %vm715_vm7 = vcmp.ge.s32.totalorder %v713_v21, 0  ;;  %vm719_vm8 = vcmp.lt.s32.totalorder %v713_v21, 4 }
  0x2c   : > { %2023 = vmatpush3.bf16.msra.mxu0 %v2233_v22  ;;  %2043 = vmatpush3.bf16.msra.mxu1 %v2234_v23  ;;  %v1042_v22 = vshrl.u32 %v2266_v9, 16  ;;  %v1046_v23 = vrot.slane %v1044_v14, 1  ;;  %vm717_vm13 = vmand %vm711_vm10, %vm715_vm7  ;;  %v2283_v9 = vld [vmem:[%s2412_s24] sm:$0xfe]  }
  0x2d   : > { %2024 = vmatprep.subr.bf16.mxu0 %v2307_v0  ;;  %2044 = vmatprep.subr.bf16.mxu1 %v2307_v0  ;;  %vm721_vm1 = vmand %vm717_vm13, %vm719_vm8  ;;  %vm1143_vm13 = vcmp.ge.s32.totalorder %v1139_v39, 0  ;;  %v2278_v14 = vld [vmem:[%s2810_s3 + $0x184] ss:$36 sps:$4 sm:$0xff]   ;;  %v1204_v15 = vshrl.u32 %v2283_v9, 16 }
  0x30   : > { %2025 = vmatpush3.bf16.msra.mxu0 %v2235_v24  ;;  %2045 = vmatpush3.bf16.msra.mxu1 %v2236_v25  ;;  %v2264_v24 = vld [vmem:[%s2810_s3 + $0x20c] ss:$36 sps:$4 sm:$0xff]   ;;  %v2284_v25 = vld [vmem:[%s2412_s24] sm:$0xfc]  }
  0x31   : > { %2026 = vmatprep.subr.bf16.mxu0 %v2307_v0  ;;  %2046 = vmatprep.subr.bf16.mxu1 %v2307_v0 }
  0x34   : > { %2027 = vmatpush3.bf16.msra.mxu0 %v2237_v26  ;;  %2047 = vmatpush3.bf16.msra.mxu1 %v2238_v27  ;;  %v2267_v26 = vld [vmem:[%s2810_s3 + $0x18] ss:$36 sps:$4 sm:$0xff]   ;;  %v858_v27 = vld [vmem:[%s2504_s26 + $0x9] sm:$0x7f] }
  0x35   : > { %2028 = vmatprep.subr.bf16.mxu0 %v2307_v0  ;;  %2048 = vmatprep.subr.bf16.mxu1 %v2307_v0  ;;  %vm862_vm14 = vcmp.ge.s32.totalorder %v858_v27, 0  ;;  %vm864_vm15 = vcmp.lt.s32.totalorder %v858_v27, 4  ;;  %v2282_v27 = vld [vmem:[%s2810_s3 + $0x214] ss:$36 sps:$4 sm:$0xff]  }
  0x36   : > { %vm866_vm4 = vmand %vm862_vm14, %vm864_vm15  ;;  %vm1145_vm14 = vcmp.lt.s32.totalorder %v1139_v39, 4 }
  0x38   : > { %2029 = vmatpush3.bf16.msra.mxu0 %v2239_v28  ;;  %2049 = vmatpush3.bf16.msra.mxu1 %v2240_v29  ;;  %v859_v28 = vld [vmem:[%s2514_s6 + $0x1] sm:$0xff] }
  0x39   : > { %2030 = vmatprep.subr.bf16.mxu0 %v2307_v0  ;;  %2050 = vmatprep.subr.bf16.mxu1 %v2307_v0  ;;  %v2265_v29 = vld [vmem:[%s2412_s24] sm:$0xff]  }
  0x3c   : > { %2031 = vmatpush3.bf16.msra.mxu0 %v2241_v30  ;;  %2051 = vmatpush3.bf16.msra.mxu1 %v2242_v31  ;;  %v2268_v30 = vld [vmem:[%s2810_s3 + $0x1c] ss:$36 sps:$4 sm:$0xff]   ;;  %v860_v31 = vld [vmem:[%s2514_s6 + $0x9] sm:$0x7f] }
  0x3d   : > { %2032 = vmatprep.subr.bf16.mxu0 %v2307_v0  ;;  %2052 = vmatprep.subr.bf16.mxu1 %v2307_v0 }
  0x40   : > { %2033 = vmatpush3.bf16.msra.mxu0 %v2243_v32  ;;  %2053 = vmatpush3.bf16.msra.mxu1 %v2244_v33  ;;  %v867_v32 = vadd.s32 4294967295, %v859_v28  ;;  %v1047_v33 = vor.u32 %v1046_v23, %v1042_v22  ;;  %v1206_v22 = vrot.slane %v1204_v15, 1 }
  0x41   : > { %2034 = vmatprep.subr.bf16.mxu0 %v2307_v0  ;;  %2054 = vmatprep.subr.bf16.mxu1 %v2307_v0 }
  0x42   : > { %vm869_vm3 = vcmp.ge.s32.totalorder %v867_v32, 0  ;;  %vm873_vm6 = vcmp.lt.s32.totalorder %v867_v32, 4  ;;  %v2285_v32 = vld [vmem:[%s2810_s3 + $0x20] ss:$36 sps:$4 sm:$0xff]  }
  0x43   : > { %vm871_vm7 = vmand %vm865_vm2, %vm869_vm3 }
  0x44   : > { %2035 = vmatpush3.bf16.msra.mxu0 %v2245_v34  ;;  %2055 = vmatpush3.bf16.msra.mxu1 %v2246_v35  ;;  %v1821_v34 = vsel %vm2605_vm9, 1.0, %v2307_v0  ;;  %v868_v35 = vadd.s32 4294967295, %v860_v31  ;;  %vm875_vm12 = vmand %vm871_vm7, %vm873_vm6  ;;  %v1368_v31 = vrot.slane %v2284_v25, 2 }
  0x45   : > { %2060 = vmatprep.subr.bf16.mxu0 %v2307_v0  ;;  %2080 = vmatprep.subr.bf16.mxu1 %v2307_v0  ;;  %v1832_v47 = vsel %vm875_vm12, 1.0, %v2307_v0  ;;  %vm1466_vm12 = vcmp.ge.s32.totalorder %v1464_v50, 0 }
  0x46   : > { %vm870_vm5 = vcmp.ge.s32.totalorder %v868_v35, 0  ;;  %vm874_vm8 = vcmp.lt.s32.totalorder %v868_v35, 4  ;;  %v2288_v35 = vld [vmem:[%s2810_s3 + $0xf8] ss:$36 sps:$4 sm:$0xff]  }
  0x47   : > { %2037 = vmatmul.mubr.bf16.vlgmr.msra.gmra.mrb[4].mxu0 %v2247_v36  ;;  %2057 = vmatmul.mubr.bf16.vlgmr.msra.gmra.mrb[4].mxu1 %v2248_v37  ;;  %v1822_v36 = vsel %vm721_vm1, 1.0, %v2307_v0  ;;  %v1138_v37 = vld [vmem:[%s2504_s26] sm:$0xff]  ;;  %vm872_vm9 = vmand %vm866_vm4, %vm870_vm5 }
  0x48   : > { %2061 = vmatpush3.bf16.msra.mxu0 %v2249_v38  ;;  %2081 = vmatpush3.bf16.msra.mxu1 %v2250_v40  ;;  %v2630_v38 = vld [vmem:[%s2514_s6] sm:$0xff]  ;;  %v1141_v40 = vld [vmem:[%s2514_s6 + $0x8] sm:$0x7f]  ;;  %vm1142_vm10 = vcmp.ge.s32.totalorder %v1138_v37, 0  ;;  %vm1144_vm11 = vcmp.lt.s32.totalorder %v1138_v37, 4  ;;  %vm876_vm15 = vmand %vm872_vm9, %vm874_vm8  ;;  %v1463_v48 = vadd.s32 1, %v1138_v37 }
  0x49   : > { %2062 = vmatprep.subr.bf16.mxu0 %v2307_v0  ;;  %2082 = vmatprep.subr.bf16.mxu1 %v2307_v0  ;;  %v2641_v43 = vadd.s32 1, %v2630_v38  ;;  %v1149_v44 = vadd.s32 1, %v1141_v40  ;;  %v1833_v49 = vsel %vm876_vm15, 1.0, %v2307_v0  ;;  %vm1146_vm2 = vmand %vm1142_vm10, %vm1144_vm11  ;;  %vm1471_vm15 = vcmp.ge.s32.totalorder %v2630_v38, 0  ;;  %v2293_v37 = vld [vmem:[%s2412_s24] sm:$0xfc]  }
  0x4a   : > { %2076 = vmatprep.mubr.msk.bf16.mxu0 %vm2308_vm0, %v2307_v0  ;;  %2096 = vmatprep.mubr.msk.bf16.mxu1 %vm2308_vm0, %v2307_v0  ;;  %v2188_v52 = vpack.i.bf16 %v1833_v49, %v1832_v47  ;;  %vm1147_vm4 = vmand %vm1143_vm13, %vm1145_vm14  ;;  %vm1465_vm9 = vcmp.ge.s32.totalorder %v1463_v48, 0  ;;  %vm1467_vm10 = vcmp.lt.s32.totalorder %v1463_v48, 4  ;;  %vm1468_vm13 = vcmp.lt.s32.totalorder %v1464_v50, 4  ;;  %v414_v50 = vld [vmem:[#allocation2 + $0x5] sm:$0xff] }
  0x4b   : > { %vm1150_vm1 = vcmp.ge.s32.totalorder %v2641_v43, 0  ;;  %vm1151_vm3 = vcmp.ge.s32.totalorder %v1149_v44, 0  ;;  %vm1154_vm5 = vcmp.lt.s32.totalorder %v2641_v43, 4  ;;  %vm1155_vm7 = vcmp.lt.s32.totalorder %v1149_v44, 4  ;;  %v2292_v44 = vld [vmem:[%s2810_s3 + $0x218] ss:$36 sps:$4 sm:$0xff]  }
  0x4c   : > { %2063 = vmatpush3.bf16.msra.mxu0 %v2251_v41  ;;  %2083 = vmatpush3.bf16.msra.mxu1 %v2252_v42  ;;  %v2269_v41 = vld [vmem:[%s2810_s3 + $0x60] ss:$36 sps:$4 sm:$0xff]   ;;  %v2183_v42 = vpack.i.bf16 %v1822_v36, %v1821_v34  ;;  %vm1152_vm6 = vmand %vm1146_vm2, %vm1150_vm1  ;;  %v1313_v63 = vadd.s32 4294967295, %v2630_v38  ;;  %v2287_v34 = vld [vmem:[%s2810_s3 + $0xb0] ss:$36 sps:$4 sm:$0xff]   ;;  %v1525_v39 = vshrl.u32 %v2293_v37, 16 }
  0x4d   : > { %2064 = vmatprep.subr.bf16.mxu0 %v2307_v0  ;;  %2084 = vmatprep.subr.bf16.mxu1 %v2307_v0  ;;  %vm1153_vm8 = vmand %vm1147_vm4, %vm1151_vm3  ;;  %v2289_v36 = vld [vmem:[%s2810_s3 + $0x140] ss:$36 sps:$4 sm:$0xff]   ;;  %v1528_v40 = vshll.u32 %v2293_v37, 16 }
  0x4e   : > { %2184 = vperm.xlu1 %2182, %v2183_v42   ;;  %vm1156_vm11 = vmand %vm1152_vm6, %vm1154_vm5  ;;  %vm1475_vm6 = vcmp.lt.s32.totalorder %v2630_v38, 4  ;;  %v2290_v38 = vld [vmem:[%s2810_s3 + $0x188] ss:$36 sps:$4 sm:$0xff]   ;;  %v1527_v42 = vrot.slane %v1525_v39, 2 }
  0x4f   : > { %vm1157_vm14 = vmand %vm1153_vm8, %vm1155_vm7  ;;  %v1852_v58 = vsel %vm1156_vm11, 1.0, %v2307_v0  ;;  %v1530_v43 = vrot.slane %v1528_v40, 3 }
  0x50   : > { %2065 = vmatpush3.bf16.msra.mxu0 %v2253_v51  ;;  %2085 = vmatpush3.bf16.msra.mxu1 %v2254_v53  ;;  %v2271_v51 = vld [vmem:[%s2810_s3 + $0xa8] ss:$36 sps:$4 sm:$0xff]   ;;  %v1853_v61 = vsel %vm1157_vm14, 1.0, %v2307_v0  ;;  %vm2690_vm2 = vmand %vm1465_vm9, %vm1467_vm10 }
  0x51   : > { %2066 = vmatprep.subr.bf16.mxu0 %v2307_v0  ;;  %2086 = vmatprep.subr.bf16.mxu1 %v2307_v0  ;;  %v2272_v53 = vld [vmem:[%s2810_s3 + $0xac] ss:$36 sps:$4 sm:$0xff]   ;;  %vm1470_vm4 = vmand %vm1466_vm12, %vm1468_vm13  ;;  %vm1315_vm13 = vcmp.ge.s32.totalorder %v1313_v63, 0 }
  0x52   : > { %2189 = vperm.xlu1 %2182, %v2188_v52   ;;  %vm1473_vm7 = vmand %vm2690_vm2, %vm1471_vm15  ;;  %vm1316_vm15 = vcmp.ge.s32.totalorder %v1314_v2, 0 }
  0x53   : > { %vm1477_vm12 = vmand %vm1473_vm7, %vm1475_vm6  ;;  %vm1320_vm7 = vcmp.lt.s32.totalorder %v1314_v2, 4 }
  0x54   : > { %2067 = vmatpush3.bf16.msra.mxu0 %v2255_v54  ;;  %2087 = vmatpush3.bf16.msra.mxu1 %v2256_v55  ;;  %v1302_v54 = vld [vmem:[%s2504_s26 + $0x8] sm:$0x1f]  ;;  %vm1317_vm6 = vmand %vm2690_vm2, %vm1315_vm13 }
  0x55   : > { %2068 = vmatprep.subr.bf16.mxu0 %v2307_v0  ;;  %2088 = vmatprep.subr.bf16.mxu1 %v2307_v0  ;;  %v1462_v55 = vld [vmem:[%s2514_s6 + $0x8] sm:$0xf]  ;;  %v1306_v59 = vadd.s32 1, %v1302_v54 }
  0x56   : > { %vm1472_vm3 = vcmp.ge.s32.totalorder %v1462_v55, 0  ;;  %vm1476_vm8 = vcmp.lt.s32.totalorder %v1462_v55, 4 }
  0x57   : > { %vm1474_vm9 = vmand %vm1470_vm4, %vm1472_vm3  ;;  %vm1308_vm10 = vcmp.ge.s32.totalorder %v1306_v59, 0  ;;  %vm1310_vm11 = vcmp.lt.s32.totalorder %v1306_v59, 4  ;;  %vm1319_vm4 = vcmp.lt.s32.totalorder %v1313_v63, 4 }
  0x58   : > { %2069 = vmatpush3.bf16.msra.mxu0 %v2257_v1  ;;  %2089 = vmatpush3.bf16.msra.mxu1 %v2258_v4  ;;  %v2193_v1 = vpack.i.bf16 %v1853_v61, %v1852_v58  ;;  %v2275_v4 = vld [vmem:[%s2810_s3 + $0x138] ss:$36 sps:$4 sm:$0xff]   ;;  %vm1478_vm14 = vmand %vm1474_vm9, %vm1476_vm8  ;;  %vm1629_vm9 = vcmp.ge.s32.totalorder %v1627_v7, 0 }
  0x59   : > { %2070 = vmatprep.subr.bf16.mxu0 %v2307_v0  ;;  %2090 = vmatprep.subr.bf16.mxu1 %v2307_v0  ;;  %vm1312_vm3 = vmand %vm1308_vm10, %vm1310_vm11  ;;  %vm1631_vm10 = vcmp.lt.s32.totalorder %v1627_v7, 4 }
  0x5a   : > { %2194 = vperm.xlu0 %2171, %v2193_v1   ;;  %vm1318_vm8 = vmand %vm1312_vm3, %vm1316_vm15 }
  0x5b   : > { %vm1321_vm11 = vmand %vm1317_vm6, %vm1319_vm4 }
  0x5c   : > { %2071 = vmatpush3.bf16.msra.mxu0 %v2259_v5  ;;  %2091 = vmatpush3.bf16.msra.mxu1 %v2260_v11  ;;  %v2708_v5 = vld [vmem:[#allocation2] sm:$0xff]  ;;  %vm1638_vm15 = vmand %vm2690_vm2, %vm1150_vm1 }
  0x5d   : > { %2072 = vmatprep.subr.bf16.mxu0 %v2307_v0  ;;  %2092 = vmatprep.subr.bf16.mxu1 %v2307_v0  ;;  %v1874_v8 = vsel %vm1477_vm12, 1.0, %v2708_v5  ;;  %v1875_v10 = vsel %vm1478_vm14, 1.0, %v2708_v5  ;;  %vm1322_vm12 = vmand %vm1318_vm8, %vm1320_vm7  ;;  %v1863_v17 = vsel %vm1321_vm11, 1.0, %v2708_v5 }
  0x5e   : > { %v1864_v19 = vsel %vm1322_vm12, 1.0, %v2708_v5  ;;  %vm1633_vm14 = vmand %vm1629_vm9, %vm1631_vm10 }
  0x5f   : > { %v2198_v21 = vpack.i.bf16 %v1864_v19, %v1863_v17  ;;  %vm1642_vm6 = vmand %vm1638_vm15, %vm1154_vm5 }
  0x60   : > { %2073 = vmatpush3.bf16.msra.mxu0 %v2261_v12  ;;  %2093 = vmatpush3.bf16.msra.mxu1 %v2262_v13  ;;  %v2277_v12 = vld [vmem:[%s2810_s3 + $0x180] ss:$36 sps:$4 sm:$0xff]   ;;  %v2203_v13 = vpack.i.bf16 %v1875_v10, %v1874_v8 }
  0x61   : > { %2074 = vmatprep.subr.bf16.mxu0 %v2307_v0  ;;  %2094 = vmatprep.subr.bf16.mxu1 %v2307_v0 }
  0x62   : > { %2204 = vperm.xlu0 %2171, %v2203_v13   ;;  %2199 = vperm.xlu1 %2182, %v2198_v21  }
  0x64   : > { %2075 = vmatpush3.bf16.msra.mxu0 %v2263_v16  ;;  %2095 = vmatpush3.bf16.msra.mxu1 %v2264_v24  ;;  %v1207_v16 = vshll.u32 %v2283_v9, 16  ;;  %v2281_v24 = vld [vmem:[%s2810_s3 + $0x210] ss:$36 sps:$4 sm:$0xff]  }
  0x65   : > { %2100 = vmatprep.subr.bf16.mxu0 %v2307_v0  ;;  %2120 = vmatprep.subr.bf16.mxu1 %v2307_v0 }
  0x66   : > { %v1209_v23 = vrot.slane %v1207_v16, 2 }
  0x67   : > { %2077 = vmatmul.mubr.bf16.vlgmr.msra.gmra.mrb[8].mxu0 %v2265_v29  ;;  %2097 = vmatmul.mubr.bf16.vlgmr.msra.gmra.mrb[8].mxu1 %v1047_v33  ;;  %v2286_v33 = vld [vmem:[%s2810_s3 + $0x68] ss:$36 sps:$4 sm:$0xff]  }
  0x68   : > { %2101 = vmatpush3.bf16.msra.mxu0 %v2267_v26  ;;  %2121 = vmatpush3.bf16.msra.mxu1 %v2268_v30  ;;  %v1885_v26 = vsel %vm1642_vm6, 1.0, %v2708_v5  ;;  %v1210_v30 = vor.u32 %v1209_v23, %v1206_v22 }
  0x69   : > { %2102 = vmatprep.subr.bf16.mxu0 %v2307_v0  ;;  %2122 = vmatprep.subr.bf16.mxu1 %v2307_v0 }
  0x6a   : > { %2116 = vmatprep.mubr.msk.bf16.mxu0 %vm2308_vm0, %v2307_v0  ;;  %2136 = vmatprep.mubr.msk.bf16.mxu1 %vm2308_vm0, %v2307_v0 }
  0x6c   : > { %2103 = vmatpush3.bf16.msra.mxu0 %v2269_v41  ;;  %2123 = vmatpush3.bf16.msra.mxu1 %v2270_v45  ;;  %v2291_v41 = vld [vmem:[%s2810_s3 + $0x1d0] ss:$36 sps:$4 sm:$0xff]   ;;  %v1531_v45 = vor.u32 %v1530_v43, %v1527_v42 }
  0x6d   : > { %2104 = vmatprep.subr.bf16.mxu0 %v2307_v0  ;;  %2124 = vmatprep.subr.bf16.mxu1 %v2307_v0 }
  0x70   : > { %2105 = vmatpush3.bf16.msra.mxu0 %v2271_v51  ;;  %2125 = vmatpush3.bf16.msra.mxu1 %v2272_v53 }
  0x71   : > { %2106 = vmatprep.subr.bf16.mxu0 %v2307_v0  ;;  %2126 = vmatprep.subr.bf16.mxu1 %v2307_v0  ;;  %v1625_v0 = vld [vmem:[%s2514_s6 + $0x8] sm:$0x7] }
  0x72   : > { %v1635_v11 = vadd.s32 1, %v1625_v0 }
  0x74   : > { %2107 = vmatpush3.bf16.msra.mxu0 %v2273_v57  ;;  %2127 = vmatpush3.bf16.msra.mxu1 %v2274_v60  ;;  %vm1637_vm13 = vcmp.ge.s32.totalorder %v1635_v11, 0  ;;  %vm1641_vm3 = vcmp.lt.s32.totalorder %v1635_v11, 4 }
  0x75   : > { %2108 = vmatprep.subr.bf16.mxu0 %v2708_v5  ;;  %2128 = vmatprep.subr.bf16.mxu1 %v2708_v5  ;;  %vm1639_vm4 = vmand %vm1633_vm14, %vm1637_vm13 }
  0x76   : > { %vm1643_vm7 = vmand %vm1639_vm4, %vm1641_vm3 }
  0x77   : > { %v1886_v28 = vsel %vm1643_vm7, 1.0, %v2708_v5 }
  0x78   : > { %2109 = vmatpush3.bf16.msra.mxu0 %v2275_v4  ;;  %2129 = vmatpush3.bf16.msra.mxu1 %v2276_v6  ;;  %v2208_v29 = vpack.i.bf16 %v1886_v28, %v1885_v26 }
  0x79   : > { %2110 = vmatprep.subr.bf16.mxu0 %v2708_v5  ;;  %2130 = vmatprep.subr.bf16.mxu1 %v2708_v5 }
  0x7a   : > { %2209 = vperm.xlu1 %2182, %v2208_v29  }
  0x7c   : > { %2111 = vmatpush3.bf16.msra.mxu0 %v2277_v12  ;;  %2131 = vmatpush3.bf16.msra.mxu1 %v2278_v14 }
  0x7d   : > { %2112 = vmatprep.subr.bf16.mxu0 %v2708_v5  ;;  %2132 = vmatprep.subr.bf16.mxu1 %v2708_v5 }
  0x80   : > { %2113 = vmatpush3.bf16.msra.mxu0 %v2279_v18  ;;  %2133 = vmatpush3.bf16.msra.mxu1 %v2280_v20 }
  0x81   : > { %2114 = vmatprep.subr.bf16.mxu0 %v2708_v5  ;;  %2134 = vmatprep.subr.bf16.mxu1 %v2708_v5 }
  0x84   : > { %2115 = vmatpush3.bf16.msra.mxu0 %v2281_v24  ;;  %2135 = vmatpush3.bf16.msra.mxu1 %v2282_v27 }
  0x85   : > { %2140 = vmatprep.subr.bf16.mxu0 %v2708_v5 }
  0x87   : > { %2117 = vmatmul.mubr.bf16.vlgmr.msra.gmra.mrb[12].mxu0 %v1210_v30  ;;  %2137 = vmatmul.mubr.bf16.vlgmr.msra.gmra.mrb[12].mxu1 %v1368_v31 }
  0x88   : > { %2141 = vmatpush3.bf16.msra.mxu0 %v2285_v32  ;;  %2156 = vmatprep.mubr.msk.bf16.mxu0 %vm2308_vm0, %v2708_v5 }
  0x89   : > { %2142 = vmatprep.subr.bf16.mxu0 %v2708_v5 }
  0x8c   : > { %2143 = vmatpush3.bf16.msra.mxu0 %v2286_v33 }
  0x8d   : > { %2144 = vmatprep.subr.bf16.mxu0 %v2708_v5 }
  0x90   : > { %2145 = vmatpush3.bf16.msra.mxu0 %v2287_v34 }
  0x91   : > { %2146 = vmatprep.subr.bf16.mxu0 %v2708_v5 }
  0x94   : > { %2147 = vmatpush3.bf16.msra.mxu0 %v2288_v35 }
  0x95   : > { %2148 = vmatprep.subr.bf16.mxu0 %v2708_v5 }
  0x98   : > { %2149 = vmatpush3.bf16.msra.mxu0 %v2289_v36 }
  0x99   : > { %2150 = vmatprep.subr.bf16.mxu0 %v2708_v5 }
  0x9c   : > { %2151 = vmatpush3.bf16.msra.mxu0 %v2290_v38 }
  0x9d   : > { %2152 = vmatprep.subr.bf16.mxu0 %v2708_v5 }
  0xa0   : > { %2153 = vmatpush3.bf16.msra.mxu0 %v2291_v41 }
  0xa1   : > { %2154 = vmatprep.subr.bf16.mxu0 %v2708_v5  ;;  %v2174_v46 = vpop.permute.xlu0 %2173 }
  0xa2   : > { %v2175_v47 = vunpack.i.l.bf16 %v2174_v46  ;;  %v2176_v48 = vunpack.i.h.bf16 %v2174_v46 }
  0xa4   : > { %2155 = vmatpush3.bf16.msra.mxu0 %v2292_v44 }
  0xa7   : > { %2157 = vmatmul.mubr.bf16.vlgmr.msra.gmra.mrb[16].mxu0 %v1531_v45 }
  0xaa   : > { %v2179_v51 = vpop.permute.xlu0 %2178 }
  0xab   : > { %v2180_v1 = vunpack.i.l.bf16 %v2179_v51  ;;  %v2181_v2 = vunpack.i.h.bf16 %v2179_v51 }
  0xcd   : > { %v2185_v8 = vpop.permute.xlu1 %2184 }
  0xce   : > { %v2186_v9 = vunpack.i.l.bf16 %v2185_v8  ;;  %v2187_v10 = vunpack.i.h.bf16 %v2185_v8 }
  0xd1   : > { %v2190_v12 = vpop.permute.xlu1 %2189 }
  0xd2   : > { %v2191_v26 = vunpack.i.l.bf16 %v2190_v12  ;;  %v2192_v27 = vunpack.i.h.bf16 %v2190_v12 }
  0xd9   : > { %v2195_v34 = vpop.permute.xlu0 %2194 }
  0xda   : > { %v2196_v35 = vunpack.i.l.bf16 %v2195_v34 }
  0xfa   : > { %v381_v49 = vpop.f32.mrb[0].mxu0  ;;  %v538_v54 = vpop.f32.mrb[0].mxu1 }
  0xfb   : > { %v426_v52 = vmul.f32 %v2175_v47, %v381_v49  ;;  %v1998_v53 = vpop.f32.mrb[1].mxu0  ;;  %v2018_v57 = vpop.f32.mrb[1].mxu1  ;;  %v581_v3 = vmul.f32 %v2180_v1, %v538_v54 }
  0xfc   : > { %v384_v55 = vpop.f32.mrb[2].mxu0  ;;  %v541_v61 = vpop.f32.mrb[2].mxu1 }
  0xfd   : > { %v428_v58 = vadd.f32 %v426_v52, %v414_v50  ;;  %v427_v59 = vmul.f32 %v2176_v48, %v384_v55  ;;  %v1999_v60 = vpop.f32.mrb[3].mxu0  ;;  %v2019_v62 = vpop.f32.mrb[3].mxu1  ;;  %v582_v4 = vmul.f32 %v2181_v2, %v541_v61  ;;  %v2197_v50 = vunpack.i.h.bf16 %v2195_v34 }
  0xfe   : > { %v2205_v54 = vpop.permute.xlu0 %2204  ;;  %v2200_v55 = vpop.permute.xlu1 %2199 }
  0xff   : > { %430 = vst [vmem:[#allocation2 + $0x5] sm:$0xff] %v428_v58  ;;  %v429_v63 = vadd.f32 %v427_v59, %v415_v56  ;;  %v2201_v56 = vunpack.i.l.bf16 %v2200_v55  ;;  %v2206_v58 = vunpack.i.l.bf16 %v2205_v54  ;;  %v2202_v59 = vunpack.i.h.bf16 %v2200_v55 }
 0x101   : > { %431 = vst [vmem:[#allocation2 + $0xd] sm:$0x7] %v429_v63 }
 0x106   : > { %v569_v0 = vld [vmem:[#allocation2 + $0x4] sm:$0xff] }
 0x107   : > { %v583_v5 = vadd.f32 %v581_v3, %v569_v0 }
 0x108   : > { %v570_v6 = vld [vmem:[#allocation2 + $0xc] sm:$0xf] }
 0x109   : > { %585 = vst [vmem:[#allocation2 + $0x4] sm:$0xff] %v583_v5  ;;  %v584_v7 = vadd.f32 %v582_v4, %v570_v6 }
 0x10b   : > { %586 = vst [vmem:[#allocation2 + $0xc] sm:$0xf] %v584_v7 }
 0x110   : > { %v726_v16 = vld [vmem:[#allocation2 + $0x3] sm:$0xff] }
 0x112   : > { %v727_v23 = vld [vmem:[#allocation2 + $0xb] sm:$0x1f] }
 0x11a   : > { %v693_v11 = vpop.f32.mrb[4].mxu0  ;;  %v850_v15 = vpop.f32.mrb[4].mxu1 }
 0x11b   : > { %v738_v13 = vmul.f32 %v2186_v9, %v693_v11  ;;  %v2038_v14 = vpop.f32.mrb[5].mxu0  ;;  %v2058_v18 = vpop.f32.mrb[5].mxu1  ;;  %v893_v28 = vmul.f32 %v2191_v26, %v850_v15 }
 0x11c   : > { %v696_v17 = vpop.f32.mrb[6].mxu0  ;;  %v853_v22 = vpop.f32.mrb[6].mxu1 }
 0x11d   : > { %v740_v19 = vadd.f32 %v738_v13, %v726_v16  ;;  %v739_v20 = vmul.f32 %v2187_v10, %v696_v17  ;;  %v2039_v21 = vpop.f32.mrb[7].mxu0  ;;  %v2059_v24 = vpop.f32.mrb[7].mxu1  ;;  %v894_v29 = vmul.f32 %v2192_v27, %v853_v22  ;;  %v2207_v10 = vunpack.i.h.bf16 %v2205_v54 }
 0x11e   : > { %v2210_v14 = vpop.permute.xlu1 %2209  ;;  %v1887_v24 = vld [vmem:[%s2811_s4] ss:$0 sm:$0xff] }
 0x11f   : > { %742 = vst [vmem:[#allocation2 + $0x3] sm:$0xff] %v740_v19  ;;  %v741_v25 = vadd.f32 %v739_v20, %v727_v23  ;;  %v2211_v15 = vunpack.i.l.bf16 %v2210_v14  ;;  %v2212_v17 = vunpack.i.h.bf16 %v2210_v14 }
 0x121   : > { %743 = vst [vmem:[#allocation2 + $0xb] sm:$0x1f] %v741_v25 }
 0x126   : > { %v881_v30 = vld [vmem:[#allocation2 + $0x1] sm:$0xff] }
 0x127   : > { %v895_v31 = vadd.f32 %v893_v28, %v881_v30 }
 0x128   : > { %v882_v32 = vld [vmem:[#allocation2 + $0x9] sm:$0x7f] }
 0x129   : > { %897 = vst [vmem:[#allocation2 + $0x1] sm:$0xff] %v895_v31  ;;  %v896_v33 = vadd.f32 %v894_v29, %v882_v32 }
 0x12b   : > { %898 = vst [vmem:[#allocation2 + $0x9] sm:$0x7f] %v896_v33 }
 0x130   : > { %v1012_v37 = vld [vmem:[#allocation2] sm:$0xff] }
 0x132   : > { %v1013_v44 = vld [vmem:[#allocation2 + $0x8] sm:$0xff] }
 0x13a   : > { %v1005_v36 = vpop.f32.mrb[8].mxu0  ;;  %v1131_v39 = vpop.f32.mrb[8].mxu1 }
 0x13b   : > { %v1014_v38 = vadd.f32 %v1012_v37, %v1005_v36  ;;  %v2078_v40 = vpop.f32.mrb[9].mxu0  ;;  %v1174_v41 = vmul.f32 %v2196_v35, %v1131_v39  ;;  %v2098_v42 = vpop.f32.mrb[9].mxu1 }
 0x13c   : > { %v1008_v43 = vpop.f32.mrb[10].mxu0  ;;  %v1134_v46 = vpop.f32.mrb[10].mxu1 }
 0x13d   : > { %v1015_v45 = vadd.f32 %v1013_v44, %v1008_v43  ;;  %v2079_v47 = vpop.f32.mrb[11].mxu0  ;;  %v1176_v48 = vadd.f32 %v1174_v41, %v1014_v38  ;;  %v2099_v49 = vpop.f32.mrb[11].mxu1  ;;  %v1175_v51 = vmul.f32 %v2197_v50, %v1134_v46 }
 0x13f   : > { %1017 = vst [vmem:[#allocation2 + $0x8] sm:$0xff] %v1015_v45 }
 0x146   : > { %v1163_v52 = vld [vmem:[#allocation2 + $0x8] sm:$0x7f] }
 0x147   : > { %v1177_v53 = vadd.f32 %v1175_v51, %v1163_v52 }
 0x149   : > { %1179 = vst [vmem:[#allocation2 + $0x8] sm:$0x7f] %v1177_v53 }
 0x150   : > { %v1328_v6 = vld [vmem:[#allocation2 + $0x8] sm:$0x1f] }
 0x15a   : > { %v1294_v57 = vpop.f32.mrb[12].mxu0  ;;  %v1452_v61 = vpop.f32.mrb[12].mxu1 }
 0x15b   : > { %v1339_v60 = vmul.f32 %v2201_v56, %v1294_v57  ;;  %v2118_v62 = vpop.f32.mrb[13].mxu0  ;;  %v2138_v63 = vpop.f32.mrb[13].mxu1  ;;  %v1495_v3 = vmul.f32 %v2206_v58, %v1452_v61 }
 0x15c   : > { %v1297_v1 = vpop.f32.mrb[14].mxu0  ;;  %v1455_v0 = vpop.f32.mrb[14].mxu1 }
 0x15d   : > { %v1341_v2 = vadd.f32 %v1339_v60, %v1176_v48  ;;  %v1340_v4 = vmul.f32 %v2202_v59, %v1297_v1  ;;  %v2119_v5 = vpop.f32.mrb[15].mxu0  ;;  %v2139_v7 = vpop.f32.mrb[15].mxu1  ;;  %v1496_v11 = vmul.f32 %v2207_v10, %v1455_v0 }
 0x15f   : > { %v1497_v8 = vadd.f32 %v1495_v3, %v1341_v2  ;;  %v1342_v9 = vadd.f32 %v1340_v4, %v1328_v6 }
 0x161   : > { %1344 = vst [vmem:[#allocation2 + $0x8] sm:$0x1f] %v1342_v9 }
 0x168   : > { %v1484_v12 = vld [vmem:[#allocation2 + $0x8] sm:$0xf] }
 0x169   : > { %v1498_v13 = vadd.f32 %v1496_v11, %v1484_v12 }
 0x16b   : > { %1500 = vst [vmem:[#allocation2 + $0x8] sm:$0xf] %v1498_v13 }
 0x172   : > { %v1649_v25 = vld [vmem:[#allocation2 + $0x8] sm:$0x7] }
 0x17a   : > { %v1615_v16 = vpop.f32.mrb[16].mxu0 }
 0x17b   : > { %v1660_v18 = vmul.f32 %v2211_v15, %v1615_v16  ;;  %v2158_v19 = vpop.f32.mrb[17].mxu0 }
 0x17c   : > { %v1618_v20 = vpop.f32.mrb[18].mxu0 }
 0x17d   : > { %v1662_v21 = vadd.f32 %v1660_v18, %v1497_v8  ;;  %v1661_v22 = vmul.f32 %v2212_v17, %v1618_v20  ;;  %v2159_v23 = vpop.f32.mrb[19].mxu0 }
 0x17f   : > { %1664 = vst [vmem:[#allocation2] sm:$0xff] %v1662_v21  ;;  %v1663_v26 = vadd.f32 %v1661_v22, %v1649_v25  ;;  %v1675_v27 = vadd.f32 %v1887_v24, %v1662_v21 }
 0x181   : > { %1665 = vst [vmem:[#allocation2 + $0x8] sm:$0x7] %v1663_v26  ;;  %v1679_v28 = vmul.f32 0.70710677, %v1675_v27  ;;  %v1677_v35 = vmul.f32 0.5, %v1675_v27 }
 0x183   : > { %2294 = verf.f32 %v1679_v28 }
 0x188   : > { %v1667_v29 = vld [vmem:[#allocation2 + $0x8] sm:$0xff] }
 0x189   : > { %v1676_v30 = vadd.f32 %v1887_v24, %v1667_v29 }
 0x18b   : > { %v1680_v31 = vmul.f32 0.70710677, %v1676_v30  ;;  %v1678_v36 = vmul.f32 0.5, %v1676_v30 }
 0x18d   : > { %2296 = verf.f32 %v1680_v31  ;;  %v2295_v32 = vpop.eup %2294 }
 0x18e   : > { %v1683_v33 = vadd.f32 1.0, %v2295_v32 }
 0x190   : > { %v1685_v38 = vmul.f32 %v1683_v33, %v1677_v35 }
 0x197   : > { %v2297_v34 = vpop.eup %2296 }
 0x198   : > { %v1684_v37 = vadd.f32 1.0, %v2297_v34 }
 0x19a   : > { %v1686_v39 = vmul.f32 %v1684_v37, %v1678_v36 }
 0x19c   : > { %v1897_v40 = vpack.c.bf16 %v1686_v39, %v1685_v38 }
 0x19e   : > { %1898 = vst [vmem:[%s270_s8] sm:$0xff] %v1897_v40  }
 0x19f PF: > { %s15_s18 = sadd.s32 1, %s2305_s18  }
 0x1a0   : > { %p12_p4 = scmp.ge.s32.totalorder %s15_s18, 4  }
 0x1a2   :  { %14 = sbr.rel (!%p12_p4) target bundleno = 1 (0x1), region = 76 }

// kernel: decoder_forward.10
= control target key start
LH: loop header
LB: loop body
LE: loop exit
PB: predicated region body
PF: predicated region fallthrough
CT: control target
= control target key end

     0   :  { %s4204_s18 = smov 0   ;;  %s5203_s0 = inlined_call_operand.vmem [shape: bf16[128,128], index: 0, kind: input, shape index: {}]   ;;  %s5204_s1 = inlined_call_operand.vmem [shape: s32[128,1], index: 1, kind: input, shape index: {}]   ;;  %s5205_s2 = inlined_call_operand.vmem [shape: s32[128,1], index: 2, kind: input, shape index: {}]   ;;  %s5206_s3 = inlined_call_operand.vmem [shape: bf16[128,1152], index: 3, kind: input, shape index: {}]   ;;  %s5207_s4 = inlined_call_operand.vmem [shape: f32[1,128], index: 4, kind: input, shape index: {}]   ;;  %s5208_s5 = inlined_call_operand.vmem [shape: bf16[128,128], index: 5, kind: output, shape index: {}]  }
   0x1 LB: > { %s3310_s19 = sadd.s32 4294967295, %s4170_s18   ;;  %p3314_p0 = scmp.ge.s32.totalorder %s4170_s18, 1  ;;  %s4170_s18 = sphi %s4204_s18, %s15_s18  }
   0x2   : > { %p210_p1 = scmp.lt.s32.totalorder %s4170_s18, 3 }
   0x4   : > { %p211_p2 = pnand %p3314_p0, %p210_p1 }
   0x5   : > { %v4035_v0 = vld [vmem:[%s5206_s3] ss:$36 sps:$4 sm:$0xff] (!%p211_p2)   ;;  %v4037_v2 = vld [vmem:[%s5206_s3 + $0x48] ss:$36 sps:$4 sm:$0xff] (!%p211_p2)   ;;  %v4039_v4 = vld [vmem:[%s5206_s3 + $0x90] ss:$36 sps:$4 sm:$0xff] (!%p211_p2)  }
   0x6   : > { %214 = sbr.rel (%p211_p2) target bundleno = 423 (0x1a7), region = 40  ;;  %v4036_v1 = vld [vmem:[%s5206_s3 + $0x4] ss:$36 sps:$4 sm:$0xff] (!%p211_p2)   ;;  %3641 = vmatprep.subr.bf16.mxu0 (!%p211_p2), %v4035_v0  ;;  %v4038_v3 = vld [vmem:[%s5206_s3 + $0x4c] ss:$36 sps:$4 sm:$0xff] (!%p211_p2)   ;;  %s3315_s17 = sshll.u32 (!%p211_p2), %s3310_s19, 3 }
   0x7   : > { %3665 = vmatprep.subr.bf16.mxu1 (!%p211_p2), %v4036_v1  ;;  %3642 = vmatpush3.bf16.msra.mxu0 (!%p211_p2), %v4035_v0  ;;  %v4040_v5 = vld [vmem:[%s5206_s3 + $0x94] ss:$36 sps:$4 sm:$0xff] (!%p211_p2)   ;;  %v4042_v7 = vld [vmem:[%s5206_s3 + $0xdc] ss:$36 sps:$4 sm:$0xff] (!%p211_p2)   ;;  %v4044_v9 = vld [vmem:[%s5206_s3 + $0x124] ss:$36 sps:$4 sm:$0xff] (!%p211_p2)  }
   0x8   : > { %3666 = vmatpush3.bf16.msra.mxu1 (!%p211_p2), %v4036_v1  ;;  %3643 = vmatprep.subr.bf16.mxu0 (!%p211_p2), %v4037_v2  ;;  %v4041_v6 = vld [vmem:[%s5206_s3 + $0xd8] ss:$36 sps:$4 sm:$0xff] (!%p211_p2)   ;;  %v4043_v8 = vld [vmem:[%s5206_s3 + $0x120] ss:$36 sps:$4 sm:$0xff] (!%p211_p2)   ;;  %v4045_v10 = vld [vmem:[%s5206_s3 + $0x168] ss:$36 sps:$4 sm:$0xff] (!%p211_p2)  }
   0x9   : > { %3667 = vmatprep.subr.bf16.mxu1 (!%p211_p2), %v4038_v3  ;;  %v4046_v11 = vld [vmem:[%s5206_s3 + $0x16c] ss:$36 sps:$4 sm:$0xff] (!%p211_p2)   ;;  %p249_p3 = scmp.lt.s32.totalorder (!%p211_p2), %s3315_s17, 15  ;;  %v4172_v12 = vmov (!%p211_p2), 0   ;;  %v4173_v13 = vmov (!%p211_p2), 0.0  }
   0xa   : > { %3894 = vset.pattern.permute.xlu1 (!%p211_p2), %v4172_v12  ;;  %3883 = vset.pattern.permute.xlu0 (!%p211_p2), %v4172_v12  ;;  %273 = vst [vmem:[#allocation2] sm:$0xff] (!%p211_p2), %v4173_v13  ;;  %274 = vst [vmem:[#allocation2 + $0x8] sm:$0xff] (!%p211_p2), %v4173_v13  ;;  %v4047_v14 = vld [vmem:[%s5206_s3 + $0x1b0] ss:$36 sps:$4 sm:$0xff] (!%p211_p2)   ;;  %v4049_v16 = vld [vmem:[%s5206_s3 + $0x1f8] ss:$36 sps:$4 sm:$0xff] (!%p211_p2)  }
   0xb   : > { %3644 = vmatpush3.bf16.msra.mxu0 (!%p211_p2), %v4037_v2  ;;  %275 = vst [vmem:[#allocation2 + $0x10] sm:$0xff] (!%p211_p2), %v4173_v13  ;;  %276 = vst [vmem:[#allocation2 + $0x18] sm:$0xff] (!%p211_p2), %v4173_v13  ;;  %v4048_v15 = vld [vmem:[%s5206_s3 + $0x1b4] ss:$36 sps:$4 sm:$0xff] (!%p211_p2)   ;;  %v4050_v19 = vld [vmem:[%s5206_s3 + $0x1fc] ss:$36 sps:$4 sm:$0xff] (!%p211_p2)  }
   0xc   : > { %3668 = vmatpush3.bf16.msra.mxu1 (!%p211_p2), %v4038_v3  ;;  %3645 = vmatprep.subr.bf16.mxu0 (!%p211_p2), %v4039_v4  ;;  %277 = vst [vmem:[#allocation2 + $0x20] sm:$0xff] (!%p211_p2), %v4173_v13  ;;  %278 = vst [vmem:[#allocation2 + $0x28] sm:$0xff] (!%p211_p2), %v4173_v13  ;;  %v4055_v20 = vld [vmem:[%s5206_s3 + $0x8] ss:$36 sps:$4 sm:$0xff] (!%p211_p2)   ;;  %v4057_v23 = vld [vmem:[%s5206_s3 + $0x50] ss:$36 sps:$4 sm:$0xff] (!%p211_p2)  }
   0xd   : > { %3669 = vmatprep.subr.bf16.mxu1 %v4040_v5  ;;  %279 = vst [vmem:[#allocation2 + $0x30] sm:$0xff] %v4173_v13  ;;  %280 = vst [vmem:[#allocation2 + $0x38] sm:$0xff] %v4173_v13  ;;  %s5297_s17 = smov (!%p249_p3, %s3315_s17), 15  ;;  %v4056_v21 = vld [vmem:[%s5206_s3 + $0xc] ss:$36 sps:$4 sm:$0xff]  }
   0xe   : > { %s3316_s25 = sshll.u32 %s5297_s17, 2  ;;  %v4058_v25 = vld [vmem:[%s5206_s3 + $0x54] ss:$36 sps:$4 sm:$0xff]   ;;  %v4062_v30 = vld [vmem:[%s5206_s3 + $0x9c] ss:$36 sps:$4 sm:$0xff]   ;;  %s3318_s10 = sshll.u32 %s5297_s17, 3 }
   0xf   : > { %3646 = vmatpush3.bf16.msra.mxu0 %v4039_v4  ;;  %s4276_s30 = scalar_lea.vmem %s5203_s0, %s3316_s25  ;;  %v4061_v28 = vld [vmem:[%s5206_s3 + $0x98] ss:$36 sps:$4 sm:$0xff]   ;;  %v4063_v31 = vld [vmem:[%s5206_s3 + $0xe0] ss:$36 sps:$4 sm:$0xff]   ;;  %v4065_v36 = vld [vmem:[%s5206_s3 + $0x128] ss:$36 sps:$4 sm:$0xff]   ;;  %s4383_s20 = scalar_lea.vmem %s5204_s1, %s3318_s10 }
  0x10   : > { %3670 = vmatpush3.bf16.msra.mxu1 %v4040_v5  ;;  %3647 = vmatprep.subr.bf16.mxu0 %v4041_v6  ;;  %v4051_v17 = vld [vmem:[%s4276_s30] sm:$0xff]   ;;  %v4053_v22 = vld [vmem:[%s4276_s30 + $0x8] sm:$0xff]   ;;  %v4059_v26 = vld [vmem:[%s4276_s30 + $0x10] sm:$0xff]   ;;  %vm5212_vm0 = vsmask.f32 7424  ;;  %s4394_s27 = scalar_lea.vmem %s5205_s2, %s3318_s10  ;;  %s270_s8 = scalar_lea.vmem %s5208_s5, %s3316_s25 }
  0x11   : > { %3671 = vmatprep.subr.bf16.mxu1 %v4042_v7  ;;  %v4052_v18 = vld [vmem:[%s4276_s30] sm:$0xff]   ;;  %3657 = vmatprep.mubr.bf16.mxu0 %v4051_v17  ;;  %v4054_v24 = vld [vmem:[%s4276_s30 + $0x8] sm:$0xff]   ;;  %v4067_v27 = vld [vmem:[%s4276_s30 + $0x10] sm:$0xff]  }
  0x12   : > { %3681 = vmatprep.mubr.bf16.mxu1 %v4052_v18  ;;  %v4060_v29 = vld [vmem:[%s4276_s30 + $0x18] ss:$0 sps:$4 sm:$0xff]   ;;  %v4064_v33 = vld [vmem:[%s5206_s3 + $0xe4] ss:$36 sps:$4 sm:$0xff]   ;;  %v4066_v37 = vld [vmem:[%s5206_s3 + $0x12c] ss:$36 sps:$4 sm:$0xff]  }
  0x13   : > { %3648 = vmatpush3.bf16.msra.mxu0 %v4041_v6  ;;  %v4068_v32 = vld [vmem:[%s4276_s30 + $0x18] ss:$0 sps:$4 sm:$0xff]   ;;  %v4075_v34 = vld [vmem:[%s4276_s30] sm:$0xff]   ;;  %v4069_v38 = vld [vmem:[%s5206_s3 + $0x170] ss:$36 sps:$4 sm:$0xff]  }
  0x14   : > { %3672 = vmatpush3.bf16.msra.mxu1 %v4042_v7  ;;  %3649 = vmatprep.subr.bf16.mxu0 %v4043_v8  ;;  %v4076_v35 = vld [vmem:[%s4276_s30] sm:$0xff]   ;;  %v4070_v39 = vld [vmem:[%s5206_s3 + $0x174] ss:$36 sps:$4 sm:$0xff]   ;;  %v4077_v44 = vld [vmem:[%s4276_s30 + $0x8] sm:$0xff]  }
  0x15   : > { %3673 = vmatprep.subr.bf16.mxu1 %v4044_v9  ;;  %v4071_v40 = vld [vmem:[%s5206_s3 + $0x1b8] ss:$36 sps:$4 sm:$0xff]   ;;  %v4073_v42 = vld [vmem:[%s5206_s3 + $0x200] ss:$36 sps:$4 sm:$0xff]   ;;  %v4079_v45 = vld [vmem:[%s5206_s3 + $0x10] ss:$36 sps:$4 sm:$0xff]  }
  0x16   : > { %v4072_v41 = vld [vmem:[%s5206_s3 + $0x1bc] ss:$36 sps:$4 sm:$0xff]   ;;  %v4074_v43 = vld [vmem:[%s5206_s3 + $0x204] ss:$36 sps:$4 sm:$0xff]   ;;  %v4080_v47 = vld [vmem:[%s5206_s3 + $0x14] ss:$36 sps:$4 sm:$0xff]  }
  0x17   : > { %3650 = vmatpush3.bf16.msra.mxu0 %v4043_v8  ;;  %v4078_v46 = vld [vmem:[%s4276_s30 + $0x8] sm:$0xff]   ;;  %v4081_v48 = vld [vmem:[%s5206_s3 + $0x58] ss:$36 sps:$4 sm:$0xff]   ;;  %v4083_v50 = vld [vmem:[%s4276_s30 + $0x10] sm:$0xff]  }
  0x18   : > { %3674 = vmatpush3.bf16.msra.mxu1 %v4044_v9  ;;  %3651 = vmatprep.subr.bf16.mxu0 %v4045_v10  ;;  %v4082_v49 = vld [vmem:[%s5206_s3 + $0x5c] ss:$36 sps:$4 sm:$0xff]   ;;  %v4087_v51 = vld [vmem:[%s4276_s30 + $0x10] sm:$0xff]   ;;  %v4360_v54 = vld [vmem:[%s4276_s30 + $0x8] sm:$0xff]  }
  0x19   : > { %3675 = vmatprep.subr.bf16.mxu1 %v4046_v11  ;;  %v4085_v52 = vld [vmem:[%s5206_s3 + $0xa0] ss:$36 sps:$4 sm:$0xff]   ;;  %v4084_v55 = vld [vmem:[%s4276_s30 + $0x18] sm:$0x1f]   ;;  %v1800_v59 = vshll.u32 %v4360_v54, 16  ;;  %v4397_v6 = vld [vmem:[%s4383_s20 + $0x29] sm:$0xff] }
  0x1a   : > { %v4100_v53 = vld [vmem:[%s4276_s30] sm:$0xff]   ;;  %v4088_v60 = vld [vmem:[%s4276_s30 + $0x18] sm:$0xff]   ;;  %v4089_v61 = vld [vmem:[%s5206_s3 + $0xe8] ss:$36 sps:$4 sm:$0xff]  }
  0x1b   : > { %3652 = vmatpush3.bf16.msra.mxu0 %v4045_v10  ;;  %v4086_v56 = vld [vmem:[%s5206_s3 + $0xa4] ss:$36 sps:$4 sm:$0xff]   ;;  %v1793_v57 = vshrl.u32 %v4100_v53, 16  ;;  %v1795_v58 = vshll.u32 %v4100_v53, 16  ;;  %v4372_v63 = vrot.slane %v1800_v59, 1  ;;  %v443_v9 = vld [vmem:[%s4383_s20 + $0x31] sm:$0xff] }
  0x1c   : > { %3676 = vmatpush3.bf16.msra.mxu1 %v4046_v11  ;;  %3653 = vmatprep.subr.bf16.mxu0 %v4047_v14  ;;  %v4090_v0 = vld [vmem:[%s5206_s3 + $0xec] ss:$36 sps:$4 sm:$0xff]   ;;  %v4099_v1 = vld [vmem:[%s4276_s30] sm:$0xff]   ;;  %v4092_v5 = vld [vmem:[%s5206_s3 + $0x134] ss:$36 sps:$4 sm:$0xff]   ;;  %v456_v11 = vadd.s32 4294967295, %v4397_v6 }
  0x1d   : > { %3677 = vmatprep.subr.bf16.mxu1 %v4048_v15  ;;  %v1797_v62 = vrot.slane %v1795_v58, 1  ;;  %v4091_v4 = vld [vmem:[%s5206_s3 + $0x130] ss:$36 sps:$4 sm:$0xff]   ;;  %v4093_v7 = vld [vmem:[%s5206_s3 + $0x178] ss:$36 sps:$4 sm:$0xff]  }
  0x1e   : > { %v4094_v8 = vld [vmem:[%s5206_s3 + $0x17c] ss:$36 sps:$4 sm:$0xff]   ;;  %v449_v10 = vld [vmem:[%s4394_s27 + $0x29] sm:$0xff]  ;;  %v4418_v18 = vld [vmem:[%s4383_s20 + $0x11] sm:$0xff]  ;;  %vm463_vm1 = vcmp.ge.s32.totalorder %v456_v11, 0  ;;  %vm470_vm2 = vcmp.lt.s32.totalorder %v456_v11, 8 }
  0x1f   : > { %3654 = vmatpush3.bf16.msra.mxu0 %v4047_v14  ;;  %v1798_v2 = vor.u32 %v1797_v62, %v1793_v57  ;;  %v4409_v12 = vld [vmem:[%s4276_s30 + $0x10] sm:$0xff]   ;;  %vm477_vm5 = vmand %vm463_vm1, %vm470_vm2  ;;  %v448_v57 = vld [vmem:[%s4394_s27 + $0x21] sm:$0xff] }
  0x20   : > { %3678 = vmatpush3.bf16.msra.mxu1 %v4048_v15  ;;  %3655 = vmatprep.subr.bf16.mxu0 %v4049_v16  ;;  %v450_v14 = vld [vmem:[%s4394_s27 + $0x31] sm:$0xff]  ;;  %v457_v15 = vadd.s32 4294967295, %v443_v9  ;;  %v4415_v17 = vld [vmem:[%s4383_s20 + $0x9] sm:$0xff]  ;;  %v4106_v62 = vld [vmem:[%s5206_s3 + $0x60] ss:$36 sps:$4 sm:$0xff]  }
  0x21   : > { %3679 = vmatprep.subr.bf16.mxu1 %v4050_v19  ;;  %v1803_v3 = vsel %vm5212_vm0, %v1798_v2, %v4372_v63  ;;  %v4107_v2 = vld [vmem:[%s5206_s3 + $0x64] ss:$36 sps:$4 sm:$0xff]   ;;  %v4112_v11 = vld [vmem:[%s5206_s3 + $0xac] ss:$36 sps:$4 sm:$0xff]  }
  0x22   : > { %vm464_vm3 = vcmp.ge.s32.totalorder %v457_v15, 0  ;;  %vm471_vm4 = vcmp.lt.s32.totalorder %v457_v15, 8  ;;  %v4111_v9 = vld [vmem:[%s5206_s3 + $0xa8] ss:$36 sps:$4 sm:$0xff]  }
  0x23   : > { %3656 = vmatpush3.bf16.msra.mxu0 %v4049_v16  ;;  %v4412_v16 = vadd.s32 4294967295, %v449_v10  ;;  %vm478_vm7 = vmand %vm464_vm3, %vm471_vm4 }
  0x24   : > { %3680 = vmatpush3.bf16.msra.mxu1 %v4050_v19  ;;  %3689 = vmatprep.subr.bf16.mxu0 %v4055_v20  ;;  %v4095_v19 = vld [vmem:[%s5206_s3 + $0x1c0] ss:$36 sps:$4 sm:$0xff]  }
  0x25   : > { %3713 = vmatprep.subr.bf16.mxu1 %v4056_v21  ;;  %vm5218_vm6 = vcmp.ge.s32.totalorder %v4412_v16, 0  ;;  %vm5216_vm9 = vcmp.lt.s32.totalorder %v4412_v16, 8 }
  0x26   : > { %3658 = vmatmul.mubr.bf16.vlgmr.msra.gmra.mrb[0].mxu0 %v4053_v22  ;;  %v446_v22 = vld [vmem:[%s4394_s27 + $0x11] sm:$0xff]  ;;  %vm498_vm10 = vmand %vm477_vm5, %vm5218_vm6 }
  0x27   : > { %3682 = vmatmul.mubr.bf16.vlgmr.msra.gmra.mrb[0].mxu1 %v4054_v24  ;;  %3690 = vmatpush3.bf16.msra.mxu0 %v4055_v20  ;;  %v4423_v20 = vadd.s32 4294967295, %v450_v14  ;;  %v4429_v24 = vld [vmem:[%s4276_s30 + $0x18] sm:$0xff]   ;;  %vm512_vm15 = vmand %vm498_vm10, %vm5216_vm9 }
  0x28   : > { %3714 = vmatpush3.bf16.msra.mxu1 %v4056_v21  ;;  %3691 = vmatprep.subr.bf16.mxu0 %v4057_v23  ;;  %v445_v21 = vld [vmem:[%s4394_s27 + $0x9] sm:$0xff]  ;;  %v4110_v14 = vld [vmem:[%s4276_s30 + $0x18] sm:$0xff]  }
  0x29   : > { %3715 = vmatprep.subr.bf16.mxu1 %v4058_v25  ;;  %3661 = vmatprep.mubr.bf16.mxu0 %v4059_v26  ;;  %vm5210_vm8 = vcmp.ge.s32.totalorder %v4423_v20, 0  ;;  %v4096_v26 = vld [vmem:[%s5206_s3 + $0x1c4] ss:$36 sps:$4 sm:$0xff]   ;;  %vm5209_vm11 = vcmp.lt.s32.totalorder %v4423_v20, 8 }
  0x2a   : > { %3685 = vmatprep.mubr.bf16.mxu1 %v4067_v27  ;;  %v1804_v27 = vshrl.u32 %v4360_v54, 16  ;;  %vm499_vm12 = vmand %vm478_vm7, %vm5210_vm8  ;;  %v447_v54 = vld [vmem:[%s4394_s27 + $0x19] sm:$0xff] }
  0x2b   : > { %3692 = vmatpush3.bf16.msra.mxu0 %v4057_v23  ;;  %v452_v23 = vadd.s32 4294967295, %v4415_v17  ;;  %vm513_vm3 = vmand %vm499_vm12, %vm5209_vm11 }
  0x2c   : > { %3716 = vmatpush3.bf16.msra.mxu1 %v4058_v25  ;;  %3693 = vmatprep.subr.bf16.mxu0 %v4061_v28  ;;  %v453_v25 = vadd.s32 4294967295, %v4418_v18 }
  0x2d   : > { %3717 = vmatprep.subr.bf16.mxu1 %v4062_v30  ;;  %vm459_vm13 = vcmp.ge.s32.totalorder %v452_v23, 0  ;;  %vm466_vm14 = vcmp.lt.s32.totalorder %v452_v23, 8  ;;  %v4571_v23 = vld [vmem:[%s4394_s27 + $0x20] sm:$0xff] }
  0x2e   : > { %3662 = vmatmul.mubr.bf16.gmra.mrb[4].mxu0 %v4060_v29  ;;  %v4444_v29 = vadd.s32 4294967295, %v446_v22  ;;  %vm460_vm1 = vcmp.ge.s32.totalorder %v453_v25, 0  ;;  %vm467_vm2 = vcmp.lt.s32.totalorder %v453_v25, 8  ;;  %vm473_vm5 = vmand %vm459_vm13, %vm466_vm14  ;;  %v4578_v25 = vld [vmem:[%s4383_s20 + $0x10] sm:$0xff] }
  0x2f   : > { %3694 = vmatpush3.bf16.msra.mxu0 %v4061_v28  ;;  %3686 = vmatmul.mubr.bf16.gmra.mrb[4].mxu1 %v4068_v32  ;;  %v4442_v28 = vadd.s32 4294967295, %v445_v21  ;;  %v1816_v32 = vshll.u32 %v4429_v24, 16  ;;  %vm474_vm10 = vmand %vm460_vm1, %vm467_vm2  ;;  %v4113_v21 = vld [vmem:[%s5206_s3 + $0xf0] ss:$36 sps:$4 sm:$0xff]  }
  0x30   : > { %3718 = vmatpush3.bf16.msra.mxu1 %v4062_v30  ;;  %3695 = vmatprep.subr.bf16.mxu0 %v4063_v31  ;;  %v4097_v30 = vld [vmem:[%s5206_s3 + $0x208] ss:$36 sps:$4 sm:$0xff]   ;;  %vm5211_vm7 = vcmp.ge.s32.totalorder %v4444_v29, 0  ;;  %vm5213_vm14 = vcmp.lt.s32.totalorder %v4444_v29, 8 }
  0x31   : > { %3719 = vmatprep.subr.bf16.mxu1 %v4064_v33  ;;  %3705 = vmatprep.mubr.bf16.mxu0 %v4075_v34  ;;  %v3339_v34 = vsel %vm512_vm15, 1.0, %v4173_v13  ;;  %vm5221_vm4 = vcmp.ge.s32.totalorder %v4442_v28, 0  ;;  %vm5220_vm12 = vcmp.lt.s32.totalorder %v4442_v28, 8  ;;  %vm495_vm15 = vmand %vm474_vm10, %vm5211_vm7  ;;  %v4502_v53 = vrot.slane %v1816_v32, 1  ;;  %v4115_v32 = vld [vmem:[%s5206_s3 + $0x138] ss:$36 sps:$4 sm:$0xff]  }
  0x32   : > { %3729 = vmatprep.mubr.bf16.mxu1 %v4076_v35  ;;  %v444_v35 = vld [vmem:[%s4383_s20 + $0x39] sm:$0x7f]  ;;  %vm4483_vm13 = vmand %vm473_vm5, %vm5221_vm4 }
  0x33   : > { %3696 = vmatpush3.bf16.msra.mxu0 %v4063_v31  ;;  %v1808_v31 = vshll.u32 %v4409_v12, 16  ;;  %vm509_vm10 = vmand %vm495_vm15, %vm5213_vm14 }
  0x34   : > { %3720 = vmatpush3.bf16.msra.mxu1 %v4064_v33  ;;  %3697 = vmatprep.subr.bf16.mxu0 %v4065_v36  ;;  %v4456_v33 = vld [vmem:[%s4383_s20 + $0x8] sm:$0xff]  ;;  %v3336_v59 = vsel %vm509_vm10, 1.0, %v4173_v13 }
  0x35   : > { %3721 = vmatprep.subr.bf16.mxu1 %v4066_v37 }
  0x37   : > { %3698 = vmatpush3.bf16.msra.mxu0 %v4065_v36  ;;  %v451_v36 = vld [vmem:[%s4394_s27 + $0x39] sm:$0x7f] }
  0x38   : > { %3722 = vmatpush3.bf16.msra.mxu1 %v4066_v37  ;;  %3699 = vmatprep.subr.bf16.mxu0 %v4069_v38  ;;  %v4098_v37 = vld [vmem:[%s5206_s3 + $0x20c] ss:$36 sps:$4 sm:$0xff]  }
  0x39   : > { %3723 = vmatprep.subr.bf16.mxu1 %v4070_v39 }
  0x3b   : > { %3700 = vmatpush3.bf16.msra.mxu0 %v4069_v38  ;;  %v3340_v38 = vsel %vm513_vm3, 1.0, %v4173_v13  ;;  %vm508_vm3 = vmand %vm4483_vm13, %vm5220_vm12 }
  0x3c   : > { %3724 = vmatpush3.bf16.msra.mxu1 %v4070_v39  ;;  %3701 = vmatprep.subr.bf16.mxu0 %v4071_v40  ;;  %v458_v39 = vadd.s32 4294967295, %v444_v35 }
  0x3d   : > { %3725 = vmatprep.subr.bf16.mxu1 %v4072_v41 }
  0x3e   : > { %vm465_vm1 = vcmp.ge.s32.totalorder %v458_v39, 0  ;;  %vm472_vm2 = vcmp.lt.s32.totalorder %v458_v39, 8 }
  0x3f   : > { %3702 = vmatpush3.bf16.msra.mxu0 %v4071_v40  ;;  %v486_v40 = vadd.s32 4294967295, %v451_v36  ;;  %vm479_vm8 = vmand %vm465_vm1, %vm472_vm2  ;;  %v4116_v36 = vld [vmem:[%s5206_s3 + $0x13c] ss:$36 sps:$4 sm:$0xff]  }
  0x40   : > { %3726 = vmatpush3.bf16.msra.mxu1 %v4072_v41  ;;  %3703 = vmatprep.subr.bf16.mxu0 %v4073_v42  ;;  %v4104_v41 = vld [vmem:[%s5206_s3 + $0x18] ss:$36 sps:$4 sm:$0xff]  }
  0x41   : > { %3727 = vmatprep.subr.bf16.mxu1 %v4074_v43  ;;  %vm493_vm5 = vcmp.ge.s32.totalorder %v486_v40, 0  ;;  %vm507_vm11 = vcmp.lt.s32.totalorder %v486_v40, 8  ;;  %v4616_v40 = vld [vmem:[%s4394_s27 + $0x18] sm:$0xff] }
  0x42   : > { %vm500_vm15 = vmand %vm479_vm8, %vm493_vm5 }
  0x43   : > { %3704 = vmatpush3.bf16.msra.mxu0 %v4073_v42  ;;  %v1812_v42 = vshrl.u32 %v4409_v12, 16  ;;  %vm514_vm2 = vmand %vm500_vm15, %vm507_vm11 }
  0x44   : > { %3728 = vmatpush3.bf16.msra.mxu1 %v4074_v43  ;;  %3737 = vmatprep.subr.bf16.mxu0 %v4079_v45  ;;  %v3895_v43 = vpack.i.bf16 %v3340_v38, %v3339_v34  ;;  %v3341_v10 = vsel %vm514_vm2, 1.0, %v4173_v13  ;;  %v764_v34 = vadd.s32 4294967295, %v4578_v25 }
  0x45   : > { %3761 = vmatprep.subr.bf16.mxu1 %v4080_v47 }
  0x46   : > { %3706 = vmatmul.mubr.bf16.vlgmr.msra.gmra.mrb[8].mxu0 %v4077_v44  ;;  %v4105_v44 = vld [vmem:[%s5206_s3 + $0x1c] ss:$36 sps:$4 sm:$0xff]   ;;  %3896 = vperm.xlu1 %3894, %v3895_v43   ;;  %vm771_vm9 = vcmp.ge.s32.totalorder %v764_v34, 0  ;;  %v1065_v43 = vld [vmem:[%s4394_s27 + $0x7] sm:$0xff] }
  0x47   : > { %3730 = vmatmul.mubr.bf16.vlgmr.msra.gmra.mrb[8].mxu1 %v4078_v46  ;;  %3738 = vmatpush3.bf16.msra.mxu0 %v4079_v45  ;;  %v4489_v46 = vld [vmem:[%s4394_s27 + $0x8] sm:$0xff] }
  0x48   : > { %3762 = vmatpush3.bf16.msra.mxu1 %v4080_v47  ;;  %3739 = vmatprep.subr.bf16.mxu0 %v4081_v48  ;;  %v763_v47 = vadd.s32 4294967295, %v4456_v33  ;;  %vm791_vm1 = vcmp.ge.s32.totalorder %v4489_v46, 0  ;;  %v1066_v45 = vld [vmem:[%s4394_s27 + $0xf] sm:$0xff] }
  0x49   : > { %3763 = vmatprep.subr.bf16.mxu1 %v4082_v49  ;;  %3709 = vmatprep.mubr.bf16.mxu0 %v4083_v50  ;;  %v4102_v50 = vld [vmem:[%s4276_s30 + $0x8] sm:$0xff]  }
  0x4a   : > { %3733 = vmatprep.mubr.bf16.mxu1 %v4087_v51  ;;  %v1810_v51 = vrot.slane %v1808_v31, 1  ;;  %vm770_vm13 = vcmp.ge.s32.totalorder %v763_v47, 0  ;;  %vm777_vm7 = vcmp.lt.s32.totalorder %v763_v47, 8 }
  0x4b   : > { %3740 = vmatpush3.bf16.msra.mxu0 %v4081_v48  ;;  %v4493_v48 = vld [vmem:[%s4383_s20 + $0x19] sm:$0xff]  ;;  %vm784_vm8 = vmand %vm770_vm13, %vm777_vm7 }
  0x4c   : > { %3764 = vmatpush3.bf16.msra.mxu1 %v4082_v49  ;;  %3741 = vmatprep.subr.bf16.mxu0 %v4085_v52  ;;  %v1806_v49 = vor.u32 %v1804_v27, %v4372_v63  ;;  %v454_v58 = vadd.s32 4294967295, %v4493_v48  ;;  %v4108_v63 = vld [vmem:[%s4276_s30 + $0x10] sm:$0xff]   ;;  %vm798_vm11 = vmand %vm784_vm8, %vm791_vm1  ;;  %v4586_v27 = vld [vmem:[%s4383_s20 + $0x18] sm:$0xff] }
  0x4d   : > { %3765 = vmatprep.subr.bf16.mxu1 %v4086_v56  ;;  %v765_v38 = vadd.s32 4294967295, %v4586_v27 }
  0x4e   : > { %3710 = vmatmul.mubr.bf16.gmra.mrb[12].mxu0 %v4084_v55  ;;  %v1814_v55 = vor.u32 %v1812_v42, %v1810_v51  ;;  %vm461_vm5 = vcmp.ge.s32.totalorder %v454_v58, 0  ;;  %vm468_vm10 = vcmp.lt.s32.totalorder %v454_v58, 8  ;;  %v1058_v42 = vld [vmem:[%s4383_s20 + $0xf] sm:$0xff]  ;;  %v1061_v58 = vld [vmem:[%s4383_s20 + $0x27] sm:$0xff] }
  0x4f   : > { %3742 = vmatpush3.bf16.msra.mxu0 %v4085_v52  ;;  %3734 = vmatmul.mubr.bf16.gmra.mrb[12].mxu1 %v4088_v60  ;;  %v4500_v52 = vld [vmem:[%s4383_s20 + $0x21] sm:$0xff]  ;;  %vm475_vm1 = vmand %vm461_vm5, %vm468_vm10  ;;  %vm779_vm6 = vcmp.lt.s32.totalorder %v765_v38, 8 }
  0x50   : > { %3766 = vmatpush3.bf16.msra.mxu1 %v4086_v56  ;;  %3743 = vmatprep.subr.bf16.mxu0 %v4089_v61  ;;  %v3335_v56 = vsel %vm508_vm3, 1.0, %v4173_v13  ;;  %v455_v60 = vadd.s32 4294967295, %v4500_v52  ;;  %vm805_vm3 = vcmp.lt.s32.totalorder %v4489_v46, 8 }
  0x51   : > { %3767 = vmatprep.subr.bf16.mxu1 %v4090_v0  ;;  %3753 = vmatprep.mubr.bf16.mxu0 %v4099_v1  ;;  %v4525_v1 = vadd.s32 4294967295, %v447_v54  ;;  %vm812_vm15 = vmand %vm798_vm11, %vm805_vm3 }
  0x52   : > { %3777 = vmatprep.mubr.bf16.mxu1 %v1803_v3  ;;  %v4532_v3 = vadd.s32 4294967295, %v448_v57  ;;  %vm462_vm7 = vcmp.ge.s32.totalorder %v455_v60, 0  ;;  %vm469_vm13 = vcmp.lt.s32.totalorder %v455_v60, 8  ;;  %v3354_v15 = vsel %vm812_vm15, 1.0, %v4173_v13  ;;  %v755_v57 = vld [vmem:[%s4383_s20 + $0x38] sm:$0xff] }
  0x53   : > { %3744 = vmatpush3.bf16.msra.mxu0 %v4089_v61  ;;  %v1811_v61 = vsel %vm5212_vm0, %v1806_v49, %v1810_v51  ;;  %v3900_v22 = vpack.i.bf16 %v3354_v15, %v3341_v10  ;;  %vm476_vm3 = vmand %vm462_vm7, %vm469_vm13  ;;  %vm5215_vm8 = vcmp.lt.s32.totalorder %v4525_v1, 8  ;;  %v4118_v51 = vld [vmem:[%s5206_s3 + $0x184] ss:$36 sps:$4 sm:$0xff]   ;;  %v4120_v60 = vld [vmem:[%s5206_s3 + $0x1cc] ss:$36 sps:$4 sm:$0xff]  }
  0x54   : > { %3768 = vmatpush3.bf16.msra.mxu1 %v4090_v0  ;;  %3745 = vmatprep.subr.bf16.mxu0 %v4091_v4  ;;  %v3884_v0 = vpack.i.bf16 %v3336_v59, %v3335_v56  ;;  %vm5219_vm2 = vcmp.ge.s32.totalorder %v4532_v3, 0  ;;  %vm5217_vm10 = vcmp.lt.s32.totalorder %v4532_v3, 8  ;;  %v1106_v56 = vadd.s32 1, %v1066_v45  ;;  %v4119_v59 = vld [vmem:[%s5206_s3 + $0x1c8] ss:$36 sps:$4 sm:$0xff]  }
  0x55   : > { %3769 = vmatprep.subr.bf16.mxu1 %v4092_v5  ;;  %vm497_vm11 = vmand %vm476_vm3, %vm5219_vm2  ;;  %3901 = vperm.xlu1 %3894, %v3900_v22   ;;  %v4122_v22 = vld [vmem:[%s5206_s3 + $0x214] ss:$36 sps:$4 sm:$0xff]   ;;  %v4123_v45 = vld [vmem:[%s4276_s30] sm:$0xf8]  }
  0x56   : > { %3885 = vperm.xlu0 %3883, %v3884_v0   ;;  %vm511_vm3 = vmand %vm497_vm11, %vm5217_vm10  ;;  %vm778_vm10 = vcmp.lt.s32.totalorder %v764_v34, 8  ;;  %v1062_v0 = vld [vmem:[%s4383_s20 + $0x2f] sm:$0xff]  ;;  %v1060_v34 = vld [vmem:[%s4383_s20 + $0x1f] sm:$0xff] }
  0x57   : > { %3746 = vmatpush3.bf16.msra.mxu0 %v4091_v4  ;;  %v4535_v4 = vld [vmem:[%s4383_s20 + $0x20] sm:$0xff]  ;;  %v3338_v35 = vsel %vm511_vm3, 1.0, %v4173_v13  ;;  %vm808_vm3 = vcmp.lt.s32.totalorder %v4571_v23, 8 }
  0x58   : > { %3770 = vmatpush3.bf16.msra.mxu1 %v4092_v5  ;;  %3747 = vmatprep.subr.bf16.mxu0 %v4093_v7  ;;  %v1820_v5 = vshrl.u32 %v4429_v24, 16  ;;  %v766_v12 = vadd.s32 4294967295, %v4535_v4 }
  0x59   : > { %3771 = vmatprep.subr.bf16.mxu1 %v4094_v8 }
  0x5a   : > { %v1822_v24 = vor.u32 %v1820_v5, %v4502_v53  ;;  %vm773_vm7 = vcmp.ge.s32.totalorder %v766_v12, 0  ;;  %vm780_vm13 = vcmp.lt.s32.totalorder %v766_v12, 8  ;;  %v1070_v12 = vld [vmem:[%s4394_s27 + $0x2f] sm:$0xff] }
  0x5b   : > { %3748 = vmatpush3.bf16.msra.mxu0 %v4093_v7  ;;  %v4541_v7 = vld [vmem:[%s4383_s20 + $0x28] sm:$0xff] }
  0x5c   : > { %3772 = vmatpush3.bf16.msra.mxu1 %v4094_v8  ;;  %3749 = vmatprep.subr.bf16.mxu0 %v4095_v19  ;;  %v1819_v8 = vsel %vm5212_vm0, %v1814_v55, %v4502_v53  ;;  %vm5214_vm0 = vcmp.ge.s32.totalorder %v4525_v1, 0  ;;  %v1074_v53 = vadd.s32 4294967295, %v1058_v42  ;;  %v1105_v55 = vadd.s32 1, %v1065_v43 }
  0x5d   : > { %3773 = vmatprep.subr.bf16.mxu1 %v4096_v26  ;;  %vm496_vm5 = vmand %vm475_vm1, %vm5214_vm0  ;;  %vm794_vm0 = vcmp.ge.s32.totalorder %v4571_v23, 0  ;;  %v4729_v42 = vadd.s32 4294967295, %v1060_v34 }
  0x5e   : > { %vm510_vm15 = vmand %vm496_vm5, %vm5215_vm8 }
  0x5f   : > { %3750 = vmatpush3.bf16.msra.mxu0 %v4095_v19  ;;  %v767_v19 = vadd.s32 4294967295, %v4541_v7  ;;  %v3337_v31 = vsel %vm510_vm15, 1.0, %v4173_v13  ;;  %vm787_vm5 = vmand %vm773_vm7, %vm780_vm13 }
  0x60   : > { %3774 = vmatpush3.bf16.msra.mxu1 %v4096_v26  ;;  %3751 = vmatprep.subr.bf16.mxu0 %v4097_v30  ;;  %v4583_v26 = vld [vmem:[%s4394_s27 + $0x28] sm:$0xff]  ;;  %v3889_v39 = vpack.i.bf16 %v3338_v35, %v3337_v31  ;;  %vm801_vm7 = vmand %vm787_vm5, %vm794_vm0  ;;  %vm793_vm5 = vcmp.ge.s32.totalorder %v4616_v40, 0  ;;  %v1067_v35 = vld [vmem:[%s4394_s27 + $0x17] sm:$0xff] }
  0x61   : > { %3775 = vmatprep.subr.bf16.mxu1 %v4098_v37  ;;  %vm774_vm1 = vcmp.ge.s32.totalorder %v767_v19, 0  ;;  %vm781_vm14 = vcmp.lt.s32.totalorder %v767_v19, 8  ;;  %vm795_vm11 = vcmp.ge.s32.totalorder %v4583_v26, 0  ;;  %vm809_vm13 = vcmp.lt.s32.totalorder %v4583_v26, 8 }
  0x62   : > { %vm788_vm15 = vmand %vm774_vm1, %vm781_vm14  ;;  %3890 = vperm.xlu0 %3883, %v3889_v39   ;;  %vm772_vm1 = vcmp.ge.s32.totalorder %v765_v38, 0  ;;  %v4689_v19 = vadd.s32 4294967295, %v1061_v58  ;;  %v4731_v43 = vadd.s32 1, %v1067_v35 }
  0x63   : > { %3752 = vmatpush3.bf16.msra.mxu0 %v4097_v30  ;;  %v4114_v30 = vld [vmem:[%s5206_s3 + $0xf4] ss:$36 sps:$4 sm:$0xff]   ;;  %vm802_vm8 = vmand %vm788_vm15, %vm795_vm11 }
  0x64   : > { %3776 = vmatpush3.bf16.msra.mxu1 %v4098_v37  ;;  %3785 = vmatprep.subr.bf16.mxu0 %v4104_v41  ;;  %v4609_v37 = vld [vmem:[%s4394_s27 + $0x10] sm:$0xff]  ;;  %vm815_vm14 = vmand %vm801_vm7, %vm808_vm3 }
  0x65   : > { %3809 = vmatprep.subr.bf16.mxu1 %v4105_v44  ;;  %vm792_vm2 = vcmp.ge.s32.totalorder %v4609_v37, 0  ;;  %vm816_vm0 = vmand %vm802_vm8, %vm809_vm13  ;;  %vm806_vm15 = vcmp.lt.s32.totalorder %v4609_v37, 8  ;;  %vm1082_vm13 = vcmp.ge.s32.totalorder %v1074_v53, 0 }
  0x66   : > { %3754 = vmatmul.mubr.bf16.vlgmr.msra.gmra.mrb[16].mxu0 %v4102_v50  ;;  %v3358_v49 = vsel %vm816_vm0, 1.0, %v4173_v13  ;;  %vm785_vm11 = vmand %vm771_vm9, %vm778_vm10  ;;  %v4117_v50 = vld [vmem:[%s5206_s3 + $0x180] ss:$36 sps:$4 sm:$0xff]   ;;  %vm807_vm10 = vcmp.lt.s32.totalorder %v4616_v40, 8  ;;  %vm1113_vm0 = vcmp.ge.s32.totalorder %v1105_v55, 0 }
  0x67   : > { %3778 = vmatmul.mubr.bf16.vlgmr.msra.gmra.mrb[16].mxu1 %v1811_v61  ;;  %3786 = vmatpush3.bf16.msra.mxu0 %v4104_v41  ;;  %v1057_v41 = vld [vmem:[%s4383_s20 + $0x7] sm:$0xff]  ;;  %vm786_vm8 = vmand %vm772_vm1, %vm779_vm6 }
  0x68   : > { %3810 = vmatpush3.bf16.msra.mxu1 %v4105_v44  ;;  %3787 = vmatprep.subr.bf16.mxu0 %v4106_v62  ;;  %v3357_v44 = vsel %vm815_vm14, 1.0, %v4173_v13  ;;  %v1073_v47 = vadd.s32 4294967295, %v1057_v41  ;;  %v4643_v13 = vld [vmem:[%s4383_s20 + $0x30] sm:$0xff]  ;;  %vm799_vm9 = vmand %vm785_vm11, %vm792_vm2  ;;  %vm1090_vm14 = vcmp.lt.s32.totalorder %v1074_v53, 8  ;;  %vm1114_vm11 = vcmp.ge.s32.totalorder %v1106_v56, 0 }
  0x69   : > { %3811 = vmatprep.subr.bf16.mxu1 %v4107_v2  ;;  %3757 = vmatprep.mubr.bf16.mxu0 %v4108_v63  ;;  %v3910_v54 = vpack.i.bf16 %v3358_v49, %v3357_v44  ;;  %vm800_vm6 = vmand %vm786_vm8, %vm793_vm5  ;;  %v4668_v63 = vld [vmem:[%s4394_s27 + $0x38] sm:$0xff]  ;;  %v4124_v44 = vld [vmem:[%s4276_s30 + $0x8] sm:$0xff]   ;;  %v2154_v53 = vshrl.u32 %v4123_v45, 16 }
  0x6a   : > { %3781 = vmatprep.mubr.bf16.mxu1 %v1819_v8  ;;  %vm1081_vm3 = vcmp.ge.s32.totalorder %v1073_v47, 0  ;;  %vm1089_vm7 = vcmp.lt.s32.totalorder %v1073_v47, 8  ;;  %vm4660_vm2 = vmand %vm799_vm9, %vm806_vm15  ;;  %v768_v8 = vadd.s32 4294967295, %v4643_v13  ;;  %vm1129_vm15 = vcmp.lt.s32.totalorder %v1105_v55, 8  ;;  %v1068_v47 = vld [vmem:[%s4394_s27 + $0x1f] sm:$0xff] }
  0x6b   : > { %3788 = vmatpush3.bf16.msra.mxu0 %v4106_v62  ;;  %3911 = vperm.xlu1 %3894, %v3910_v54   ;;  %v4665_v62 = vld [vmem:[%s4394_s27 + $0x30] sm:$0xff]  ;;  %vm814_vm1 = vmand %vm800_vm6, %vm807_vm10  ;;  %vm1130_vm10 = vcmp.lt.s32.totalorder %v1106_v56, 8  ;;  %v2162_v49 = vshrl.u32 %v4124_v44, 16  ;;  %v2157_v54 = vshll.u32 %v4123_v45, 16  ;;  %v4125_v55 = vld [vmem:[%s4276_s30 + $0x4] sm:$0xff]   ;;  %v2156_v61 = vrot.slane %v2154_v53, 3 }
  0x6c   : > { %3812 = vmatpush3.bf16.msra.mxu1 %v4107_v2  ;;  %3789 = vmatprep.subr.bf16.mxu0 %v4111_v9  ;;  %v4673_v2 = vld [vmem:[#allocation2] sm:$0xff]  ;;  %vm1097_vm5 = vmand %vm1081_vm3, %vm1089_vm7  ;;  %vm775_vm3 = vcmp.ge.s32.totalorder %v768_v8, 0  ;;  %vm782_vm7 = vcmp.lt.s32.totalorder %v768_v8, 8 }
  0x6d   : > { %3813 = vmatprep.subr.bf16.mxu1 %v4112_v11  ;;  %v3355_v5 = vsel %vm4660_vm2, 1.0, %v4673_v2  ;;  %v3356_v10 = vsel %vm814_vm1, 1.0, %v4673_v2  ;;  %vm1098_vm8 = vmand %vm1082_vm13, %vm1090_vm14  ;;  %vm796_vm2 = vcmp.ge.s32.totalorder %v4665_v62, 0  ;;  %vm797_vm13 = vcmp.ge.s32.totalorder %v4668_v63, 0 }
  0x6e   : > { %3758 = vmatmul.mubr.bf16.gmra.mrb[20].mxu0 %v4110_v14  ;;  %v4121_v14 = vld [vmem:[%s5206_s3 + $0x210] ss:$36 sps:$4 sm:$0xff]   ;;  %v3905_v15 = vpack.i.bf16 %v3356_v10, %v3355_v5  ;;  %vm1121_vm9 = vmand %vm1097_vm5, %vm1113_vm0 }
  0x6f   : > { %3782 = vmatmul.mubr.bf16.gmra.mrb[20].mxu1 %v1822_v24  ;;  %3790 = vmatpush3.bf16.msra.mxu0 %v4111_v9  ;;  %v1069_v9 = vld [vmem:[%s4394_s27 + $0x27] sm:$0xff]  ;;  %vm1122_vm6 = vmand %vm1098_vm8, %vm1114_vm11  ;;  %v1059_v24 = vld [vmem:[%s4383_s20 + $0x17] sm:$0xff]  ;;  %vm810_vm11 = vcmp.lt.s32.totalorder %v4665_v62, 8  ;;  %vm811_vm8 = vcmp.lt.s32.totalorder %v4668_v63, 8 }
  0x70   : > { %3814 = vmatpush3.bf16.msra.mxu1 %v4112_v11  ;;  %3791 = vmatprep.subr.bf16.mxu0 %v4113_v21  ;;  %v769_v11 = vadd.s32 4294967295, %v755_v57  ;;  %vm4702_vm14 = vmand %vm1121_vm9, %vm1129_vm15  ;;  %v4706_v31 = vadd.s32 1, %v1069_v9  ;;  %vm1085_vm15 = vcmp.ge.s32.totalorder %v4689_v19, 0  ;;  %v4724_v39 = vadd.s32 4294967295, %v1059_v24  ;;  %v4127_v63 = vld [vmem:[%s4276_s30 + $0xc] sm:$0xff]  }
  0x71   : > { %3815 = vmatprep.subr.bf16.mxu1 %v4114_v30  ;;  %3906 = vperm.xlu0 %3883, %v3905_v15   ;;  %vm1138_vm5 = vmand %vm1122_vm6, %vm1130_vm10  ;;  %v2164_v57 = vrot.slane %v2162_v49, 3 }
  0x72   : > { %vm776_vm1 = vcmp.ge.s32.totalorder %v769_v11, 0  ;;  %vm783_vm0 = vcmp.lt.s32.totalorder %v769_v11, 8  ;;  %v3374_v38 = vsel %vm1138_vm5, 1.0, %v4673_v2  ;;  %vm789_vm10 = vmand %vm775_vm3, %vm782_vm7  ;;  %vm1117_vm7 = vcmp.ge.s32.totalorder %v4706_v31, 0  ;;  %3825 = vmatprep.mubr.bf16.mxu1 %v4125_v55  ;;  %v4131_v55 = vld [vmem:[%s4276_s30 + $0x14] sm:$0xff]  }
  0x73   : > { %3792 = vmatpush3.bf16.msra.mxu0 %v4113_v21  ;;  %v4692_v21 = vadd.s32 4294967295, %v1062_v0  ;;  %vm790_vm12 = vmand %vm776_vm1, %vm783_vm0  ;;  %vm1133_vm0 = vcmp.lt.s32.totalorder %v4706_v31, 8  ;;  %v2159_v0 = vrot.slane %v2157_v54, 4  ;;  %v1108_v11 = vadd.s32 1, %v1068_v47  ;;  %v4130_v47 = vld [vmem:[%s4276_s30 + $0x18] sm:$0xff]  }
  0x74   : > { %3816 = vmatpush3.bf16.msra.mxu1 %v4114_v30  ;;  %3793 = vmatprep.subr.bf16.mxu0 %v4115_v32  ;;  %vm803_vm3 = vmand %vm789_vm10, %vm796_vm2  ;;  %vm1083_vm10 = vcmp.ge.s32.totalorder %v4724_v39, 0  ;;  %v4129_v30 = vld [vmem:[%s5206_s3 + $0x68] ss:$36 sps:$4 sm:$0xff]   ;;  %v2180_v53 = vshrl.u32 %v4130_v47, 16  ;;  %v2183_v54 = vshll.u32 %v4130_v47, 16 }
  0x75   : > { %3817 = vmatprep.subr.bf16.mxu1 %v4116_v36  ;;  %vm1086_vm6 = vcmp.ge.s32.totalorder %v4692_v21, 0  ;;  %vm1094_vm4 = vcmp.lt.s32.totalorder %v4692_v21, 8  ;;  %vm804_vm1 = vmand %vm790_vm12, %vm797_vm13  ;;  %v4128_v21 = vld [vmem:[%s5206_s3 + $0x20] ss:$36 sps:$4 sm:$0xff]  }
  0x76   : > { %vm4746_vm2 = vmand %vm803_vm3, %vm810_vm11  ;;  %vm1091_vm3 = vcmp.lt.s32.totalorder %v4724_v39, 8 }
  0x77   : > { %3794 = vmatpush3.bf16.msra.mxu0 %v4115_v32  ;;  %v4708_v32 = vadd.s32 1, %v1070_v12  ;;  %vm818_vm12 = vmand %vm804_vm1, %vm811_vm8  ;;  %v3359_v56 = vsel %vm4746_vm2, 1.0, %v4673_v2  ;;  %v1402_v12 = vld [vmem:[%s4394_s27 + $0x1] sm:$0xff]  ;;  %vm1115_vm1 = vcmp.ge.s32.totalorder %v4731_v43, 0  ;;  %vm1116_vm2 = vcmp.ge.s32.totalorder %v1108_v11, 0 }
  0x78   : > { %3818 = vmatpush3.bf16.msra.mxu1 %v4116_v36  ;;  %3795 = vmatprep.subr.bf16.mxu0 %v4117_v50  ;;  %v3373_v36 = vsel %vm4702_vm14, 1.0, %v4673_v2  ;;  %vm1093_vm14 = vcmp.lt.s32.totalorder %v4689_v19, 8  ;;  %vm1102_vm11 = vmand %vm1086_vm6, %vm1094_vm4  ;;  %vm1084_vm6 = vcmp.ge.s32.totalorder %v4729_v42, 0  ;;  %v1434_v39 = vadd.s32 4294967295, %v1402_v12 }
  0x79   : > { %3819 = vmatprep.subr.bf16.mxu1 %v4118_v51  ;;  %v3920_v41 = vpack.i.bf16 %v3374_v38, %v3373_v36  ;;  %vm1118_vm5 = vcmp.ge.s32.totalorder %v4708_v32, 0  ;;  %vm1134_vm9 = vcmp.lt.s32.totalorder %v4708_v32, 8  ;;  %vm1101_vm13 = vmand %vm1085_vm15, %vm1093_vm14  ;;  %vm1092_vm14 = vcmp.lt.s32.totalorder %v4729_v42, 8  ;;  %v1394_v32 = vld [vmem:[%s4383_s20 + $0x1] sm:$0xff]  ;;  %v1063_v36 = vld [vmem:[%s4383_s20 + $0x37] sm:$0xff] }
  0x7a   : > { %vm1125_vm8 = vmand %vm1101_vm13, %vm1117_vm7  ;;  %vm5242_vm7 = vsmask.f32 4352  ;;  %v1071_v42 = vld [vmem:[%s4394_s27 + $0x37] sm:$0xff] }
  0x7b   : > { %3796 = vmatpush3.bf16.msra.mxu0 %v4117_v50  ;;  %3921 = vperm.xlu1 %3894, %v3920_v41   ;;  %v2165_v50 = vshll.u32 %v4124_v44, 16  ;;  %vm1126_vm15 = vmand %vm1102_vm11, %vm1118_vm5  ;;  %v1064_v44 = vld [vmem:[%s4383_s20 + $0x3f] sm:$0x1]  ;;  %v4160_v41 = vld [vmem:[%s4383_s20 + $0x31] sm:$0xff] }
  0x7c   : > { %3820 = vmatpush3.bf16.msra.mxu1 %v4118_v51  ;;  %3797 = vmatprep.subr.bf16.mxu0 %v4119_v59  ;;  %vm4779_vm4 = vmand %vm1125_vm8, %vm1133_vm0  ;;  %v1079_v51 = vadd.s32 4294967295, %v1063_v36 }
  0x7d   : > { %3821 = vmatprep.subr.bf16.mxu1 %v4120_v60  ;;  %v2167_v58 = vrot.slane %v2165_v50, 4  ;;  %vm1142_vm5 = vmand %vm1126_vm15, %vm1134_vm9  ;;  %v3377_v31 = vsel %vm4779_vm4, 1.0, %v4673_v2  ;;  %vm1415_vm9 = vcmp.ge.s32.totalorder %v4397_v6, 0  ;;  %vm1411_vm15 = vcmp.ge.s32.totalorder %v4415_v17, 0  ;;  %v1072_v50 = vld [vmem:[%s4394_s27 + $0x3f] sm:$0x1] }
  0x7e   : > { %v3378_v35 = vsel %vm1142_vm5, 1.0, %v4673_v2  ;;  %vm1099_vm0 = vmand %vm1083_vm10, %vm1091_vm3  ;;  %vm1131_vm10 = vcmp.lt.s32.totalorder %v4731_v43, 8  ;;  %vm1132_vm3 = vcmp.lt.s32.totalorder %v1108_v11, 8  ;;  %vm1419_vm4 = vcmp.lt.s32.totalorder %v4415_v17, 8 }
  0x7f   : > { %3798 = vmatpush3.bf16.msra.mxu0 %v4119_v59  ;;  %v4126_v59 = vld [vmem:[%s4276_s30 + $0x10] sm:$0xff]   ;;  %v2168_v8 = vor.u32 %v2167_v58, %v2164_v57  ;;  %v3930_v38 = vpack.i.bf16 %v3378_v35, %v3377_v31  ;;  %vm4810_vm13 = vmand %vm1084_vm6, %vm1092_vm14  ;;  %vm1410_vm14 = vcmp.ge.s32.totalorder %v1394_v32, 0  ;;  %v4132_v57 = vld [vmem:[%s4276_s30 + $0x1c] ss:$0 sps:$4 sm:$0xff]   ;;  %v1080_v58 = vadd.s32 4294967295, %v1064_v44 }
  0x80   : > { %3822 = vmatpush3.bf16.msra.mxu1 %v4120_v60  ;;  %3799 = vmatprep.subr.bf16.mxu0 %v4121_v14  ;;  %v3360_v60 = vsel %vm818_vm12, 1.0, %v4673_v2  ;;  %v2171_v9 = vshrl.u32 %v4126_v59, 16  ;;  %v2174_v10 = vshll.u32 %v4126_v59, 16  ;;  %vm1423_vm12 = vcmp.lt.s32.totalorder %v4397_v6, 8  ;;  %vm5245_vm11 = vmmov %vm5242_vm7 }
  0x81   : > { %3823 = vmatprep.subr.bf16.mxu1 %v4122_v22  ;;  %v3915_v5 = vpack.i.bf16 %v3360_v60, %v3359_v56  ;;  %vm1123_vm8 = vmand %vm1099_vm0, %vm1115_vm1  ;;  %3931 = vperm.xlu1 %3894, %v3930_v38   ;;  %vm1442_vm0 = vcmp.ge.s32.totalorder %v1434_v39, 0  ;;  %v2182_v59 = vrot.slane %v2180_v53, 3  ;;  %v2185_v60 = vrot.slane %v2183_v54, 4  ;;  %v4140_v38 = vld [vmem:[%s4276_s30 + $0xc] sm:$0xff]   ;;  %v4141_v54 = vld [vmem:[%s4276_s30 + $0x14] sm:$0xff]  }
  0x82   : > { %v2173_v15 = vrot.slane %v2171_v9, 3  ;;  %v2176_v19 = vrot.slane %v2174_v10, 4  ;;  %vm1124_vm6 = vmand %vm4810_vm13, %vm1116_vm2  ;;  %v4134_v9 = vld [vmem:[%s5206_s3 + $0xf8] ss:$36 sps:$4 sm:$0xff]   ;;  %v1984_v44 = vadd.s32 1, %v4571_v23  ;;  %v2838_v53 = vshrl.u32 %v4140_v38, 16 }
  0x83   : > { %3800 = vmatpush3.bf16.msra.mxu0 %v4121_v14  ;;  %v2160_v14 = vor.u32 %v2159_v0, %v2156_v61  ;;  %3916 = vperm.xlu0 %3883, %v3915_v5   ;;  %vm4829_vm5 = vmand %vm1123_vm8, %vm1131_vm10  ;;  %vm1458_vm10 = vcmp.lt.s32.totalorder %v1434_v39, 8  ;;  %v1111_v0 = vadd.s32 1, %v1071_v42  ;;  %v1112_v5 = vadd.s32 1, %v1072_v50 }
  0x84   : > { %3824 = vmatpush3.bf16.msra.mxu1 %v4122_v22  ;;  %v4795_v34 = vor.u32 %v2176_v19, %v2173_v15  ;;  %3833 = vmatprep.subr.bf16.mxu0 %v4128_v21  ;;  %vm1140_vm1 = vmand %vm1124_vm6, %vm1132_vm3  ;;  %v3375_v56 = vsel %vm4829_vm5, 1.0, %v4673_v2  ;;  %vm5248_vm8 = vcmp.ge.s32.totalorder %v4442_v28, 0  ;;  %vm1087_vm6 = vcmp.ge.s32.totalorder %v1079_v51, 0  ;;  %v4136_v19 = vld [vmem:[%s5206_s3 + $0x188] ss:$36 sps:$4 sm:$0xff]  }
  0x85   : > { %v2169_v24 = vsel %vm5242_vm7, %v2160_v14, %v2168_v8  ;;  %3857 = vmatprep.subr.bf16.mxu1 %v4128_v21  ;;  %vm1418_vm7 = vcmp.lt.s32.totalorder %v1394_v32, 8  ;;  %v3376_v43 = vsel %vm1140_vm1, 1.0, %v4673_v2  ;;  %vm1427_vm13 = vmand %vm1411_vm15, %vm1419_vm4  ;;  %vm1096_vm5 = vcmp.lt.s32.totalorder %v1080_v58, 8  ;;  %v4139_v32 = vld [vmem:[%s4276_s30 + $0x4] sm:$0xff]  }
  0x86   : > { %3801 = vmatprep.mubr.bf16.mxu0 %v2169_v24  ;;  %v2178_v45 = vsel %vm5245_vm11, %v2168_v8, %v4795_v34  ;;  %vm1426_vm2 = vmand %vm1410_vm14, %vm1418_vm7  ;;  %v3925_v61 = vpack.i.bf16 %v3376_v43, %v3375_v56  ;;  %v2186_v8 = vor.u32 %v2185_v60, %v2182_v59  ;;  %vm1095_vm14 = vcmp.lt.s32.totalorder %v1079_v51, 8 }
  0x87   : > { %3826 = vmatmul.mubr.bf16.vlgmr.msra.gmra.mrb[24].mxu1 %v4127_v63  ;;  %3802 = vmatmul.mubr.bf16.vlgmr.msra.gmra.mrb[24].mxu0 %v2178_v45  ;;  %v4133_v63 = vld [vmem:[%s5206_s3 + $0xb0] ss:$36 sps:$4 sm:$0xff]   ;;  %vm1450_vm11 = vmand %vm1426_vm2, %vm1442_vm0  ;;  %vm1088_vm7 = vcmp.ge.s32.totalorder %v1080_v58, 0  ;;  %vm5253_vm1 = vsmask.f32 4352  ;;  %vm1119_vm0 = vcmp.ge.s32.totalorder %v1111_v0, 0 }
  0x88   : > { %3865 = vmatpush3.bf16.msra.mxu1 %v4128_v21  ;;  %3834 = vmatpush3.bf16.msra.mxu0 %v4128_v21  ;;  %vm1451_vm3 = vmand %vm1427_vm13, %vm5248_vm8  ;;  %v2187_v11 = vsel %vm5253_vm1, %v4795_v34, %v2186_v8  ;;  %vm1120_vm13 = vcmp.ge.s32.totalorder %v1112_v5, 0  ;;  %v1409_v34 = vld [vmem:[%s4394_s27 + $0x39] sm:$0x7f]  ;;  %v2827_v42 = vshrl.u32 %v4139_v32, 16  ;;  %v2829_v47 = vshll.u32 %v4139_v32, 16 }
  0x89   : > { %3858 = vmatprep.subr.bf16.mxu1 %v4129_v30  ;;  %3835 = vmatprep.subr.bf16.mxu0 %v4129_v30  ;;  %vm4857_vm15 = vmand %vm1415_vm9, %vm1423_vm12  ;;  %vm5254_vm9 = vcmp.lt.s32.totalorder %v4442_v28, 8  ;;  %v4135_v28 = vld [vmem:[%s5206_s3 + $0x140] ss:$36 sps:$4 sm:$0xff]   ;;  %v1441_v36 = vadd.s32 4294967295, %v1409_v34  ;;  %v1985_v50 = vadd.s32 1, %v4583_v26  ;;  %v2834_v51 = vshll.u32 %v4140_v38, 16 }
  0x8a   : > { %3829 = vmatprep.mubr.bf16.mxu1 %v4131_v55  ;;  %3926 = vperm.xlu0 %3883, %v3925_v61   ;;  %vm4865_vm4 = vmand %vm1450_vm11, %vm1458_vm10  ;;  %vm1135_vm11 = vcmp.lt.s32.totalorder %v1111_v0, 8  ;;  %v2831_v23 = vrot.slane %v2829_v47, 1  ;;  %v4142_v55 = vld [vmem:[%s4276_s30 + $0x1c] ss:$0 sps:$4 sm:$0xff]   ;;  %v2842_v26 = vshll.u32 %v4141_v54, 16  ;;  %v1982_v17 = vadd.s32 1, %v4609_v37 }
  0x8b   : > { %vm1467_vm12 = vmand %vm1451_vm3, %vm5254_vm9  ;;  %v3393_v6 = vsel %vm4865_vm4, 1.0, %v4673_v2  ;;  %3805 = vmatprep.mubr.bf16.mxu0 %v2187_v11  ;;  %vm1136_vm3 = vcmp.lt.s32.totalorder %v1112_v5, 8  ;;  %v2836_v56 = vrot.slane %v2834_v51, 1  ;;  %v2850_v58 = vshll.u32 %v4142_v55, 16 }
  0x8c   : > { %3866 = vmatpush3.bf16.msra.mxu1 %v4129_v30  ;;  %3836 = vmatpush3.bf16.msra.mxu0 %v4129_v30  ;;  %v3394_v12 = vsel %vm1467_vm12, 1.0, %v4673_v2  ;;  %vm1103_vm2 = vmand %vm1087_vm6, %vm1095_vm14  ;;  %vm1414_vm6 = vcmp.ge.s32.totalorder %v4500_v52, 0  ;;  %vm1422_vm14 = vcmp.lt.s32.totalorder %v4500_v52, 8  ;;  %v4904_v52 = vld [vmem:[%s4394_s27] sm:$0xff]  ;;  %v2832_v43 = vor.u32 %v2831_v23, %v2827_v42 }
  0x8d   : > { %3837 = vmatprep.subr.bf16.mxu0 %v4133_v63  ;;  %3859 = vmatprep.subr.bf16.mxu1 %v4133_v63  ;;  %v3940_v14 = vpack.i.bf16 %v3394_v12, %v3393_v6  ;;  %vm1104_vm10 = vmand %vm1088_vm7, %vm1096_vm5  ;;  %vm5255_vm5 = vcmp.ge.s32.totalorder %v4532_v3, 0  ;;  %v4911_v30 = vld [vmem:[%s4383_s20] sm:$0xff]  ;;  %v4914_v31 = vadd.s32 1, %v4904_v52  ;;  %v2854_v59 = vshrl.u32 %v4142_v55, 16  ;;  %v4161_v6 = vld [vmem:[%s4383_s20 + $0x8] sm:$0xff] }
  0x8e   : > { %vm1127_vm8 = vmand %vm1103_vm2, %vm1119_vm0  ;;  %vm5256_vm0 = vcmp.ge.s32.totalorder %v4412_v16, 0  ;;  %v2840_v61 = vor.u32 %v2838_v53, %v2836_v56  ;;  %v2844_v0 = vrot.slane %v2842_v26, 1  ;;  %v2852_v5 = vrot.slane %v2850_v58, 1  ;;  %v2639_v53 = vld [vmem:[%s4383_s20 + $0x8] sm:$0xff] }
  0x8f   : > { %3830 = vmatmul.mubr.bf16.gmra.mrb[28].mxu1 %v4132_v57  ;;  %3806 = vmatmul.mubr.bf16.gmra.mrb[28].mxu0 %v2186_v8  ;;  %vm1128_vm4 = vmand %vm1104_vm10, %vm1120_vm13  ;;  %vm1412_vm13 = vcmp.ge.s32.totalorder %v4418_v18, 0  ;;  %vm1420_vm10 = vcmp.lt.s32.totalorder %v4418_v18, 8  ;;  %v2846_v57 = vshrl.u32 %v4141_v54, 16  ;;  %v2322_v12 = vadd.s32 1, %v4161_v6  ;;  %v2640_v54 = vld [vmem:[%s4383_s20 + $0x10] sm:$0xff] }
  0x90   : > { %3838 = vmatpush3.bf16.msra.mxu0 %v4133_v63  ;;  %3867 = vmatpush3.bf16.msra.mxu1 %v4133_v63  ;;  %vm1143_vm1 = vmand %vm1127_vm8, %vm1135_vm11  ;;  %vm5257_vm11 = vcmp.lt.s32.totalorder %v4532_v3, 8  ;;  %v2856_v11 = vor.u32 %v2854_v59, %v2852_v5  ;;  %v2359_v32 = vadd.s32 4294967295, %v4665_v62  ;;  %v5272_v42 = vmov 0  ;;  %v2646_v59 = vld [vmem:[%s4394_s27 + $0x8] sm:$0xff]  ;;  %v2651_v6 = vld [vmem:[%s4394_s27 + $0x30] sm:$0xff] }
  0x91   : > { %3839 = vmatprep.subr.bf16.mxu0 %v4134_v9  ;;  %3860 = vmatprep.subr.bf16.mxu1 %v4134_v9  ;;  %vm1144_vm9 = vmand %vm1128_vm4, %vm1136_vm3  ;;  %v3379_v15 = vsel %vm1143_vm1, 1.0, %v4673_v2  ;;  %vm1413_vm3 = vcmp.ge.s32.totalorder %v4493_v48, 0  ;;  %vm1421_vm4 = vcmp.lt.s32.totalorder %v4493_v48, 8  ;;  %v4137_v48 = vld [vmem:[%s5206_s3 + $0x1d0] ss:$36 sps:$4 sm:$0xff]   ;;  %v2653_v55 = vadd.s32 1, %v2639_v53 }
  0x92   : > { %3941 = vperm.xlu1 %3894, %v3940_v14   ;;  %v3380_v21 = vsel %vm1144_vm9, 1.0, %v4673_v2  ;;  %vm1430_vm7 = vmand %vm1414_vm6, %vm1422_vm14  ;;  %vm5258_vm6 = vcmp.lt.s32.totalorder %v4412_v16, 8  ;;  %vm5259_vm9 = vcmp.ge.s32.totalorder %v4444_v29, 0  ;;  %v1981_v16 = vadd.s32 1, %v4489_v46 }
  0x93   : > { %v3935_v22 = vpack.i.bf16 %v3380_v21, %v3379_v15  ;;  %vm1454_vm12 = vmand %vm1430_vm7, %vm5255_vm5  ;;  %vm5260_vm5 = vcmp.ge.s32.totalorder %v4525_v1, 0  ;;  %v2323_v14 = vadd.s32 1, %v4578_v25  ;;  %v5274_v26 = vmov 0 }
  0x94   : > { %3840 = vmatpush3.bf16.msra.mxu0 %v4134_v9  ;;  %3868 = vmatpush3.bf16.msra.mxu1 %v4134_v9  ;;  %vm1455_vm2 = vmand %vm4857_vm15, %vm5256_vm0  ;;  %vm1956_vm0 = vcmp.ge.s32.totalorder %v4911_v30, 0  ;;  %v2848_v9 = vor.u32 %v2846_v57, %v2844_v0  ;;  %v2654_v57 = vadd.s32 1, %v2640_v54  ;;  %v5276_v58 = vmov 0  ;;  %v531_v54 = vld [vmem:[#allocation2 + $0x19] sm:$0xff] }
  0x95   : > { %3841 = vmatprep.subr.bf16.mxu0 %v4135_v28  ;;  %3861 = vmatprep.subr.bf16.mxu1 %v4135_v28  ;;  %vm1470_vm8 = vmand %vm1454_vm12, %vm5257_vm11  ;;  %vm1957_vm11 = vcmp.ge.s32.totalorder %v4456_v33, 0 }
  0x96   : > { %3936 = vperm.xlu0 %3883, %v3935_v22   ;;  %vm1471_vm15 = vmand %vm1455_vm2, %vm5258_vm6  ;;  %v3397_v24 = vsel %vm1470_vm8, 1.0, %v4673_v2  ;;  %vm1964_vm2 = vcmp.lt.s32.totalorder %v4911_v30, 8  ;;  %vm1965_vm8 = vcmp.lt.s32.totalorder %v4456_v33, 8  ;;  %vm5223_vm6 = vcmp.ge.s32.totalorder %v4914_v31, 0 }
  0x97   : > { %v3398_v18 = vsel %vm1471_vm15, 1.0, %v4673_v2  ;;  %vm1428_vm14 = vmand %vm1412_vm13, %vm1420_vm10  ;;  %vm5261_vm13 = vcmp.lt.s32.totalorder %v4444_v29, 8  ;;  %v4138_v29 = vld [vmem:[%s5206_s3 + $0x218] ss:$36 sps:$4 sm:$0xff]  }
  0x98   : > { %3842 = vmatpush3.bf16.msra.mxu0 %v4135_v28  ;;  %3869 = vmatpush3.bf16.msra.mxu1 %v4135_v28  ;;  %v3950_v3 = vpack.i.bf16 %v3398_v18, %v3397_v24  ;;  %vm1429_vm1 = vmand %vm1413_vm3, %vm1421_vm4  ;;  %vm5262_vm3 = vcmp.lt.s32.totalorder %v4525_v1, 8  ;;  %v1401_v1 = vld [vmem:[%s4383_s20 + $0x39] sm:$0x7f]  ;;  %v1986_v24 = vadd.s32 1, %v4665_v62  ;;  %v2321_v18 = vadd.s32 1, %v4911_v30  ;;  %v5029_v62 = vld [vmem:[%s4394_s27 + $0x20] sm:$0xff] }
  0x99   : > { %3843 = vmatprep.subr.bf16.mxu0 %v4136_v19  ;;  %3862 = vmatprep.subr.bf16.mxu1 %v4136_v19  ;;  %vm1452_vm7 = vmand %vm1428_vm14, %vm5259_vm9  ;;  %vm1989_vm14 = vcmp.ge.s32.totalorder %v1981_v16, 0  ;;  %vm5222_vm9 = vcmp.lt.s32.totalorder %v4914_v31, 8  ;;  %v2357_v51 = vadd.s32 4294967295, %v5029_v62 }
  0x9a   : > { %3951 = vperm.xlu1 %3894, %v3950_v3   ;;  %vm1453_vm12 = vmand %vm1429_vm1, %vm5260_vm5  ;;  %vm2005_vm5 = vcmp.lt.s32.totalorder %v1981_v16, 8  ;;  %v2310_v3 = vld [vmem:[%s4383_s20 + $0x28] sm:$0xff] }
  0x9b   : > { %vm1468_vm10 = vmand %vm1452_vm7, %vm5261_vm13  ;;  %v5003_v16 = vld [vmem:[%s4394_s27 + $0x28] sm:$0xff]  ;;  %v2326_v34 = vadd.s32 1, %v2310_v3  ;;  %v2979_v3 = vld [vmem:[%s4383_s20 + $0x30] sm:$0x7f] }
  0x9c   : > { %3844 = vmatpush3.bf16.msra.mxu0 %v4136_v19  ;;  %3870 = vmatpush3.bf16.msra.mxu1 %v4136_v19  ;;  %vm1469_vm4 = vmand %vm1453_vm12, %vm5262_vm3  ;;  %v3395_v46 = vsel %vm1468_vm10, 1.0, %v4673_v2  ;;  %vm1417_vm10 = vcmp.ge.s32.totalorder %v1401_v1, 0  ;;  %vm1960_vm3 = vcmp.ge.s32.totalorder %v4535_v4, 0  ;;  %v4162_v19 = vld [vmem:[%s4394_s27 + $0x8] sm:$0xff] }
  0x9d   : > { %3845 = vmatprep.subr.bf16.mxu0 %v4137_v48  ;;  %3863 = vmatprep.subr.bf16.mxu1 %v4137_v48  ;;  %v3396_v35 = vsel %vm1469_vm4, 1.0, %v4673_v2  ;;  %vm1972_vm15 = vmand %vm1956_vm0, %vm1964_vm2  ;;  %vm1416_vm0 = vcmp.ge.s32.totalorder %v4160_v41, 0  ;;  %vm1424_vm2 = vcmp.lt.s32.totalorder %v4160_v41, 8  ;;  %v2354_v21 = vadd.s32 4294967295, %v4162_v19  ;;  %v2312_v19 = vld [vmem:[%s4383_s20 + $0x38] sm:$0x1] }
  0x9e   : > { %v3945_v33 = vpack.i.bf16 %v3396_v35, %v3395_v46  ;;  %vm1973_vm1 = vmand %vm1957_vm11, %vm1965_vm8  ;;  %vm1425_vm11 = vcmp.lt.s32.totalorder %v1401_v1, 8 }
  0x9f   : > { %vm1996_vm7 = vmand %vm1972_vm15, %vm5223_vm6  ;;  %vm1449_vm15 = vcmp.ge.s32.totalorder %v1441_v36, 0 }
  0xa0   : > { %3846 = vmatpush3.bf16.msra.mxu0 %v4137_v48  ;;  %3871 = vmatpush3.bf16.msra.mxu1 %v4137_v48  ;;  %vm1997_vm12 = vmand %vm1973_vm1, %vm1989_vm14  ;;  %vm5263_vm1 = vcmp.ge.s32.totalorder %v4423_v20, 0  ;;  %v2353_v48 = vadd.s32 4294967295, %v4904_v52 }
  0xa1   : > { %3847 = vmatprep.subr.bf16.mxu0 %v4138_v29  ;;  %3864 = vmatprep.subr.bf16.mxu1 %v4138_v29  ;;  %vm2012_vm13 = vmand %vm1996_vm7, %vm5222_vm9 }
  0xa2   : > { %3946 = vperm.xlu0 %3883, %v3945_v33   ;;  %vm2013_vm8 = vmand %vm1997_vm12, %vm2005_vm5  ;;  %v3425_v39 = vsel %vm2012_vm13, 1.0, %v4673_v2  ;;  %vm1465_vm5 = vcmp.lt.s32.totalorder %v1441_v36, 8  ;;  %vm1961_vm12 = vcmp.ge.s32.totalorder %v4541_v7, 0  ;;  %vm1968_vm13 = vcmp.lt.s32.totalorder %v4535_v4, 8  ;;  %v2308_v36 = vld [vmem:[%s4383_s20 + $0x18] sm:$0xff] }
  0xa3   : > { %v3426_v45 = vsel %vm2013_vm8, 1.0, %v4673_v2  ;;  %vm1432_vm4 = vmand %vm1416_vm0, %vm1424_vm2  ;;  %vm1969_vm2 = vcmp.lt.s32.totalorder %v4541_v7, 8  ;;  %vm1992_vm8 = vcmp.ge.s32.totalorder %v1984_v44, 0  ;;  %v1983_v4 = vadd.s32 1, %v4616_v40 }
  0xa4   : > { %3848 = vmatpush3.bf16.msra.mxu0 %v4138_v29  ;;  %3872 = vmatpush3.bf16.msra.mxu1 %v4138_v29  ;;  %v3960_v49 = vpack.i.bf16 %v3426_v45, %v3425_v39  ;;  %vm1433_vm14 = vmand %vm1417_vm10, %vm1425_vm11  ;;  %vm5264_vm10 = vcmp.lt.s32.totalorder %v4423_v20, 8  ;;  %v2327_v29 = vadd.s32 1, %v4643_v13  ;;  %v2358_v33 = vadd.s32 4294967295, %v5003_v16  ;;  %v5026_v39 = vld [vmem:[%s4394_s27 + $0x18] sm:$0xff] }
  0xa5   : > { %vm1456_vm7 = vmand %vm1432_vm4, %vm5263_vm1  ;;  %vm1993_vm1 = vcmp.ge.s32.totalorder %v1985_v50, 0  ;;  %vm2007_vm9 = vcmp.lt.s32.totalorder %v1983_v4, 8 }
  0xa6   : > { %3961 = vperm.xlu1 %3894, %v3960_v49   ;;  %vm1457_vm0 = vmand %vm1433_vm14, %vm1449_vm15  ;;  %vm2008_vm14 = vcmp.lt.s32.totalorder %v1984_v44, 8  ;;  %v2324_v44 = vadd.s32 1, %v2308_v36 }
  0xa7   : > { %vm1472_vm11 = vmand %vm1456_vm7, %vm5264_vm10  ;;  %vm5265_vm7 = vsmask.f32 7424 }
  0xa8   : > { %vm1473_vm4 = vmand %vm1457_vm0, %vm1465_vm5  ;;  %v3399_v60 = vsel %vm1472_vm11, 1.0, %v4673_v2  ;;  %v2837_v20 = vsel %vm5265_vm7, %v2832_v43, %v2836_v56  ;;  %vm2009_vm11 = vcmp.lt.s32.totalorder %v1985_v50, 8  ;;  %v2356_v50 = vadd.s32 4294967295, %v5026_v39 }
  0xa9   : > { %v3400_v63 = vsel %vm1473_vm4, 1.0, %v4673_v2  ;;  %vm1976_vm15 = vmand %vm1960_vm3, %vm1968_vm13  ;;  %3849 = vmatprep.mubr.bf16.mxu0 %v2837_v20  ;;  %vm1958_vm13 = vcmp.ge.s32.totalorder %v4578_v25, 0  ;;  %v5278_v20 = vmov 0 }
  0xaa   : > { %v3955_v8 = vpack.i.bf16 %v3400_v63, %v3399_v60  ;;  %vm1977_vm5 = vmand %vm1961_vm12, %vm1969_vm2  ;;  %vm1966_vm12 = vcmp.lt.s32.totalorder %v4578_v25, 8  ;;  %v2647_v60 = vld [vmem:[%s4394_s27 + $0x10] sm:$0xff] }
  0xab   : > { %vm5266_vm0 = vmmov %vm5265_vm7  ;;  %vm1959_vm7 = vcmp.ge.s32.totalorder %v4586_v27, 0 }
  0xac   : > { %v2845_v10 = vsel %vm5266_vm0, %v2840_v61, %v2844_v0  ;;  %vm2000_vm10 = vmand %vm1976_vm15, %vm1992_vm8  ;;  %3956 = vperm.xlu0 %3883, %v3955_v8   ;;  %vm1967_vm8 = vcmp.lt.s32.totalorder %v4586_v27, 8  ;;  %v2355_v27 = vadd.s32 4294967295, %v4609_v37  ;;  %v1955_v61 = vld [vmem:[%s4394_s27 + $0x38] sm:$0x7f] }
  0xad   : > { %3850 = vmatmul.mubr.bf16.vlgmr.msra.gmra.mrb[32].mxu0 %v2845_v10  ;;  %vm2001_vm3 = vmand %vm1977_vm5, %vm1993_vm1  ;;  %vm1991_vm5 = vcmp.ge.s32.totalorder %v1983_v4, 0  ;;  %v1987_v8 = vadd.s32 1, %v1955_v61  ;;  %v2644_v10 = vld [vmem:[%s4383_s20 + $0x30] sm:$0xff]  ;;  %v5075_v4 = vld [vmem:[#allocation2] sm:$0xff] }
  0xae   : > { %vm5267_vm2 = vmmov %vm5266_vm0  ;;  %vm1990_vm0 = vcmp.ge.s32.totalorder %v1982_v17, 0 }
  0xaf   : > { %v2853_v7 = vsel %vm5267_vm2, %v2848_v9, %v2852_v5  ;;  %vm2016_vm4 = vmand %vm2000_vm10, %vm2008_vm14  ;;  %vm2006_vm10 = vcmp.lt.s32.totalorder %v1982_v17, 8  ;;  %v1947_v5 = vld [vmem:[%s4383_s20 + $0x38] sm:$0x7f]  ;;  %v5280_v9 = vmov 0 }
  0xb0   : > { %3853 = vmatprep.mubr.bf16.mxu1 %v2853_v7  ;;  %vm2017_vm15 = vmand %vm2001_vm3, %vm2009_vm11  ;;  %v3429_v40 = vsel %vm2016_vm4, 1.0, %v4673_v2  ;;  %vm2330_vm3 = vcmp.ge.s32.totalorder %v2322_v12, 0  ;;  %vm2338_vm4 = vcmp.lt.s32.totalorder %v2322_v12, 8 }
  0xb1   : > { %3854 = vmatmul.mubr.bf16.vlgmr.msra.gmra.mrb[32].mxu1 %v2856_v11  ;;  %v3430_v28 = vsel %vm2017_vm15, 1.0, %v4673_v2  ;;  %vm1974_vm1 = vmand %vm1958_vm13, %vm1966_vm12  ;;  %vm2331_vm15 = vcmp.ge.s32.totalorder %v2323_v14, 0  ;;  %vm2339_vm13 = vcmp.lt.s32.totalorder %v2323_v14, 8  ;;  %v3016_v14 = vadd.s32 1, %v2646_v59 }
  0xb2   : > { %v3970_v15 = vpack.i.bf16 %v3430_v28, %v3429_v40  ;;  %vm1975_vm14 = vmand %vm1959_vm7, %vm1967_vm8  ;;  %vm2362_vm7 = vcmp.ge.s32.totalorder %v2354_v21, 0 }
  0xb3   : > { %vm1998_vm2 = vmand %vm1974_vm1, %vm1990_vm0  ;;  %vm2363_vm0 = vcmp.ge.s32.totalorder %v2355_v27, 0 }
  0xb4   : > { %3971 = vperm.xlu1 %3894, %v3970_v15   ;;  %vm1999_vm11 = vmand %vm1975_vm14, %vm1991_vm5  ;;  %vm2378_vm5 = vcmp.lt.s32.totalorder %v2354_v21, 8  ;;  %v3017_v15 = vadd.s32 1, %v2647_v60 }
  0xb5   : > { %vm2014_vm6 = vmand %vm1998_vm2, %vm2006_vm10  ;;  %vm2379_vm2 = vcmp.lt.s32.totalorder %v2355_v27, 8  ;;  %vm1970_vm10 = vcmp.lt.s32.totalorder %v4643_v13, 8  ;;  %v2320_v27 = vld [vmem:[%s4394_s27 + $0x38] sm:$0x1] }
  0xb6   : > { %vm2015_vm12 = vmand %vm1999_vm11, %vm2007_vm9  ;;  %v3427_v25 = vsel %vm2014_vm6, 1.0, %v4673_v2  ;;  %vm1962_vm6 = vcmp.ge.s32.totalorder %v4643_v13, 0  ;;  %v2309_v13 = vld [vmem:[%s4383_s20 + $0x20] sm:$0xff] }
  0xb7   : > { %v3428_v22 = vsel %vm2015_vm12, 1.0, %v4673_v2  ;;  %vm2346_vm8 = vmand %vm2330_vm3, %vm2338_vm4  ;;  %vm1994_vm3 = vcmp.ge.s32.totalorder %v1986_v24, 0  ;;  %vm2329_vm12 = vcmp.ge.s32.totalorder %v2321_v18, 0  ;;  %v2325_v47 = vadd.s32 1, %v2309_v13 }
  0xb8   : > { %v3965_v37 = vpack.i.bf16 %v3428_v22, %v3427_v25  ;;  %vm2347_vm1 = vmand %vm2331_vm15, %vm2339_vm13  ;;  %vm2010_vm15 = vcmp.lt.s32.totalorder %v1986_v24, 8  ;;  %v2328_v24 = vadd.s32 1, %v2312_v19 }
  0xb9   : > { %vm2370_vm14 = vmand %vm2346_vm8, %vm2362_vm7  ;;  %vm2337_vm7 = vcmp.lt.s32.totalorder %v2321_v18, 8 }
  0xba   : > { %3966 = vperm.xlu0 %3883, %v3965_v37   ;;  %vm2371_vm9 = vmand %vm2347_vm1, %vm2363_vm0  ;;  %vm2361_vm0 = vcmp.ge.s32.totalorder %v2353_v48, 0  ;;  %v2360_v37 = vadd.s32 4294967295, %v2320_v27 }
  0xbb   : > { %vm2386_vm11 = vmand %vm2370_vm14, %vm2378_vm5  ;;  %vm2377_vm5 = vcmp.lt.s32.totalorder %v2353_v48, 8 }
  0xbc   : > { %vm2387_vm4 = vmand %vm2371_vm9, %vm2379_vm2  ;;  %v3446_v46 = vsel %vm2386_vm11, 1.0, %v4673_v2  ;;  %vm2334_vm2 = vcmp.ge.s32.totalorder %v2326_v34, 0  ;;  %vm2342_vm9 = vcmp.lt.s32.totalorder %v2326_v34, 8  ;;  %vm2343_vm11 = vcmp.lt.s32.totalorder %v2327_v29, 8  ;;  %v2986_v34 = vld [vmem:[%s4394_s27 + $0x30] sm:$0x7f] }
  0xbd   : > { %v3447_v30 = vsel %vm2387_vm4, 1.0, %v4673_v2  ;;  %vm1978_vm13 = vmand %vm1962_vm6, %vm1970_vm10  ;;  %vm2335_vm10 = vcmp.ge.s32.totalorder %v2327_v29, 0  ;;  %vm2366_vm4 = vcmp.ge.s32.totalorder %v2358_v33, 0  ;;  %v2993_v29 = vadd.s32 1, %v2979_v3 }
  0xbe   : > { %v3980_v35 = vpack.i.bf16 %v3447_v30, %v3446_v46  ;;  %vm2002_vm8 = vmand %vm1978_vm13, %vm1994_vm3  ;;  %vm2367_vm13 = vcmp.ge.s32.totalorder %v2359_v32, 0 }
  0xbf   : > { %vm5009_vm1 = vmand %vm2002_vm8, %vm2010_vm15 }
  0xc0   : > { %3981 = vperm.xlu1 %3894, %v3980_v35   ;;  %vm5015_vm14 = vmand %vm2329_vm12, %vm2337_vm7  ;;  %v3431_v41 = vsel %vm5009_vm1, 1.0, %v4673_v2  ;;  %vm2382_vm7 = vcmp.lt.s32.totalorder %v2358_v33, 8  ;;  %v3020_v33 = vadd.s32 1, %v5003_v16 }
  0xc1   : > { %vm2369_vm6 = vmand %vm5015_vm14, %vm2361_vm0  ;;  %vm2383_vm0 = vcmp.lt.s32.totalorder %v2359_v32, 8  ;;  %v3021_v32 = vadd.s32 1, %v2986_v34 }
  0xc2   : > { %vm2385_vm3 = vmand %vm2369_vm6, %vm2377_vm5  ;;  %vm2332_vm5 = vcmp.ge.s32.totalorder %v2324_v44, 0  ;;  %vm2333_vm6 = vcmp.ge.s32.totalorder %v2325_v47, 0 }
  0xc3   : > { %v3445_v45 = vsel %vm2385_vm3, 1.0, %v4673_v2  ;;  %vm5032_vm15 = vmand %vm2334_vm2, %vm2342_vm9  ;;  %vm2340_vm2 = vcmp.lt.s32.totalorder %v2324_v44, 8  ;;  %vm2341_vm3 = vcmp.lt.s32.totalorder %v2325_v47, 8  ;;  %v3019_v47 = vadd.s32 1, %v5029_v62 }
  0xc4   : > { %v5273_v42 = vsel %vm5032_vm15, 4294967295, %v5272_v42  ;;  %v3975_v49 = vpack.i.bf16 %v3445_v45, %v3431_v41  ;;  %vm2351_vm12 = vmand %vm2335_vm10, %vm2343_vm11  ;;  %vm2364_vm11 = vcmp.ge.s32.totalorder %v2356_v50, 0 }
  0xc5   : > { %vm2374_vm8 = vmand %vm5032_vm15, %vm2366_vm4  ;;  %vm2681_vm15 = vcmp.ge.s32.totalorder %v2646_v59, 0  ;;  %v5115_v13 = vpop.permute.xlu1 %3896 }
  0xc6   : > { %3976 = vperm.xlu0 %3883, %v3975_v49   ;;  %vm2375_vm1 = vmand %vm2351_vm12, %vm2367_vm13  ;;  %vm2365_vm13 = vcmp.ge.s32.totalorder %v2357_v51, 0  ;;  %v3899_v19 = vunpack.i.h.bf16 %v5115_v13 }
  0xc7   : > { %vm2390_vm9 = vmand %vm2374_vm8, %vm2382_vm7  ;;  %vm2380_vm7 = vcmp.lt.s32.totalorder %v2356_v50, 8 }
  0xc8   : > { %vm2391_vm10 = vmand %vm2375_vm1, %vm2383_vm0  ;;  %v3450_v23 = vsel %vm2390_vm9, 1.0, %v4673_v2  ;;  %vm2381_vm0 = vcmp.lt.s32.totalorder %v2357_v51, 8 }
  0xc9   : > { %v3451_v56 = vsel %vm2391_vm10, 1.0, %v4673_v2  ;;  %vm5044_vm4 = vmand %vm2332_vm5, %vm2340_vm2  ;;  %vm2660_vm5 = vcmp.ge.s32.totalorder %v2653_v55, 0  ;;  %vm2667_vm2 = vcmp.lt.s32.totalorder %v2653_v55, 8 }
  0xca   : > { %v5275_v26 = vsel %vm5044_vm4, 4294967295, %v5274_v26  ;;  %v3990_v43 = vpack.i.bf16 %v3451_v56, %v3450_v23  ;;  %vm5048_vm12 = vmand %vm2333_vm6, %vm2341_vm3  ;;  %vm2661_vm6 = vcmp.ge.s32.totalorder %v2654_v57, 0  ;;  %vm2668_vm3 = vcmp.lt.s32.totalorder %v2654_v57, 8  ;;  %v529_v57 = vld [vmem:[#allocation2 + $0x9] sm:$0xff] }
  0xcb   : > { %v5277_v58 = vsel %vm5048_vm12, 4294967295, %v5276_v58  ;;  %vm2372_vm8 = vmand %vm5044_vm4, %vm2364_vm11  ;;  %vm2682_vm4 = vcmp.ge.s32.totalorder %v2647_v60, 0 }
  0xcc   : > { %3991 = vperm.xlu1 %3894, %v3990_v43   ;;  %vm2373_vm1 = vmand %vm5048_vm12, %vm2365_vm13 }
  0xcd   : > { %vm2388_vm9 = vmand %vm2372_vm8, %vm2380_vm7  ;;  %vm2695_vm7 = vcmp.lt.s32.totalorder %v2646_v59, 8 }
  0xce   : > { %vm2389_vm10 = vmand %vm2373_vm1, %vm2381_vm0  ;;  %v3448_v0 = vsel %vm2388_vm9, 1.0, %v4673_v2  ;;  %vm2696_vm0 = vcmp.lt.s32.totalorder %v2647_v60, 8 }
  0xcf   : > { %v3449_v63 = vsel %vm2389_vm10, 1.0, %v4673_v2  ;;  %vm5061_vm11 = vmand %vm2660_vm5, %vm2667_vm2  ;;  %vm1963_vm5 = vcmp.ge.s32.totalorder %v1947_v5, 0  ;;  %vm1971_vm2 = vcmp.lt.s32.totalorder %v1947_v5, 8  ;;  %vm1995_vm10 = vcmp.ge.s32.totalorder %v1987_v8, 0 }
  0xd0   : > { %v5279_v20 = vsel %vm5061_vm11, 4294967295, %v5278_v20  ;;  %v3985_v17 = vpack.i.bf16 %v3449_v63, %v3448_v0  ;;  %vm5066_vm13 = vmand %vm2661_vm6, %vm2668_vm3  ;;  %v2658_v2 = vadd.s32 1, %v2644_v10  ;;  %vm2011_vm3 = vcmp.lt.s32.totalorder %v1987_v8, 8  ;;  %v532_v0 = vld [vmem:[#allocation2 + $0x21] sm:$0xff] }
  0xd1   : > { %v5281_v9 = vsel %vm5066_vm13, 4294967295, %v5280_v9  ;;  %vm2688_vm8 = vmand %vm5061_vm11, %vm2681_vm15  ;;  %vm2680_vm11 = vcmp.ge.s32.totalorder %v4904_v52, 0 }
  0xd2   : > { %3986 = vperm.xlu0 %3883, %v3985_v17   ;;  %vm2689_vm1 = vmand %vm5066_vm13, %vm2682_vm4  ;;  %vm2694_vm4 = vcmp.lt.s32.totalorder %v4904_v52, 8 }
  0xd3   : > { %vm2702_vm9 = vmand %vm2688_vm8, %vm2695_vm7  ;;  %vm2665_vm7 = vcmp.ge.s32.totalorder %v2658_v2, 0  ;;  %vm2672_vm8 = vcmp.lt.s32.totalorder %v2658_v2, 8 }
  0xd4   : > { %vm2703_vm6 = vmand %vm2689_vm1, %vm2696_vm0  ;;  %v3466_v11 = vsel %vm2702_vm9, 1.0, %v5075_v4  ;;  %vm2685_vm1 = vcmp.ge.s32.totalorder %v5003_v16, 0 }
  0xd5   : > { %v3467_v7 = vsel %vm2703_vm6, 1.0, %v5075_v4  ;;  %vm1979_vm15 = vmand %vm1963_vm5, %vm1971_vm2  ;;  %vm2686_vm2 = vcmp.ge.s32.totalorder %v2651_v6, 0  ;;  %v5110_v30 = vpop.permute.xlu0 %3885 }
  0xd6   : > { %v4000_v40 = vpack.i.bf16 %v3467_v7, %v3466_v11  ;;  %vm2003_vm12 = vmand %vm1979_vm15, %vm1995_vm10  ;;  %vm2699_vm10 = vcmp.lt.s32.totalorder %v5003_v16, 8  ;;  %vm2683_vm15 = vcmp.ge.s32.totalorder %v5026_v39, 0  ;;  %v3018_v16 = vadd.s32 1, %v5026_v39 }
  0xd7   : > { %vm2019_vm13 = vmand %vm2003_vm12, %vm2011_vm3  ;;  %vm5282_vm12 = vnez %v5273_v42  ;;  %vm2700_vm3 = vcmp.lt.s32.totalorder %v2651_v6, 8  ;;  %v3887_v51 = vunpack.i.l.bf16 %v5110_v30 }
  0xd8   : > { %4001 = vperm.xlu1 %3894, %v4000_v40   ;;  %v3432_v12 = vsel %vm2019_vm13, 1.0, %v5075_v4  ;;  %vm2687_vm0 = vmand %vm5015_vm14, %vm2680_vm11 }
  0xd9   : > { %vm2701_vm5 = vmand %vm2687_vm0, %vm2694_vm4  ;;  %vm2684_vm4 = vcmp.ge.s32.totalorder %v5029_v62, 0 }
  0xda   : > { %v3465_v28 = vsel %vm2701_vm5, 1.0, %v5075_v4  ;;  %vm2679_vm9 = vmand %vm2665_vm7, %vm2672_vm8  ;;  %vm2697_vm7 = vcmp.lt.s32.totalorder %v5026_v39, 8  ;;  %vm5283_vm8 = vnez %v5275_v26  ;;  %vm2698_vm5 = vcmp.lt.s32.totalorder %v5029_v62, 8  ;;  %v5137_v39 = vpop.permute.xlu1 %3901 }
  0xdb   : > { %v3995_v52 = vpack.i.bf16 %v3465_v28, %v3432_v12  ;;  %vm2692_vm6 = vmand %vm5282_vm12, %vm2685_vm1  ;;  %vm2336_vm12 = vcmp.ge.s32.totalorder %v2328_v24, 0  ;;  %v3903_v40 = vunpack.i.l.bf16 %v5137_v39  ;;  %v3898_v12 = vunpack.i.l.bf16 %v5115_v13 }
  0xdc   : > { %vm2693_vm13 = vmand %vm2679_vm9, %vm2686_vm2  ;;  %vm5284_vm2 = vnez %v5277_v58 }
  0xdd   : > { %3996 = vperm.xlu0 %3883, %v3995_v52   ;;  %vm2706_vm11 = vmand %vm2692_vm6, %vm2699_vm10  ;;  %vm3023_vm10 = vcmp.ge.s32.totalorder %v3016_v14, 0 }
  0xde   : > { %vm2707_vm0 = vmand %vm2693_vm13, %vm2700_vm3  ;;  %v3470_v21 = vsel %vm2706_vm11, 1.0, %v5075_v4  ;;  %vm3024_vm3 = vcmp.ge.s32.totalorder %v3017_v15, 0  ;;  %vm3037_vm11 = vcmp.lt.s32.totalorder %v3016_v14, 8 }
  0xdf   : > { %v3471_v25 = vsel %vm2707_vm0, 1.0, %v5075_v4  ;;  %vm2690_vm1 = vmand %vm5283_vm8, %vm2683_vm15  ;;  %vm5285_vm15 = vnez %v5279_v20  ;;  %vm3038_vm8 = vcmp.lt.s32.totalorder %v3017_v15, 8 }
  0xe0   : > { %v4010_v22 = vpack.i.bf16 %v3471_v25, %v3470_v21  ;;  %vm2691_vm9 = vmand %vm5284_vm2, %vm2684_vm4  ;;  %vm5286_vm4 = vnez %v5281_v9  ;;  %v530_v9 = vld [vmem:[#allocation2 + $0x11] sm:$0xff]  ;;  %v3904_v21 = vunpack.i.h.bf16 %v5137_v39  ;;  %v535_v25 = vld [vmem:[#allocation2 + $0x39] sm:$0x7f] }
  0xe1   : > { %vm2704_vm6 = vmand %vm2690_vm1, %vm2697_vm7  ;;  %vm2344_vm7 = vcmp.lt.s32.totalorder %v2328_v24, 8  ;;  %v3891_v45 = vpop.permute.xlu0 %3890 }
  0xe2   : > { %4011 = vperm.xlu1 %3894, %v4010_v22   ;;  %vm2705_vm13 = vmand %vm2691_vm9, %vm2698_vm5  ;;  %v3468_v18 = vsel %vm2704_vm6, 1.0, %v5075_v4  ;;  %vm2368_vm5 = vcmp.ge.s32.totalorder %v2360_v37, 0  ;;  %vm2384_vm6 = vcmp.lt.s32.totalorder %v2360_v37, 8  ;;  %v3892_v49 = vunpack.i.l.bf16 %v3891_v45 }
  0xe3   : > { %v3469_v48 = vsel %vm2705_vm13, 1.0, %v5075_v4  ;;  %vm3030_vm0 = vmand %vm5285_vm15, %vm3023_vm10  ;;  %vm3007_vm15 = vcmp.lt.s32.totalorder %v2993_v29, 8  ;;  %v3893_v38 = vunpack.i.h.bf16 %v3891_v45 }
  0xe4   : > { %v4005_v46 = vpack.i.bf16 %v3469_v48, %v3468_v18  ;;  %vm3031_vm2 = vmand %vm5286_vm4, %vm3024_vm3  ;;  %v533_v18 = vld [vmem:[#allocation2 + $0x29] sm:$0xff] }
  0xe5   : > { %vm3044_vm1 = vmand %vm3030_vm0, %vm3037_vm11  ;;  %vm3000_vm11 = vcmp.ge.s32.totalorder %v2993_v29, 0  ;;  %vm5290_vm0 = vcmp.lt.s32.totalorder %v4914_v31, 8 }
  0xe6   : > { %4006 = vperm.xlu0 %3883, %v4005_v46   ;;  %vm3045_vm9 = vmand %vm3031_vm2, %vm3038_vm8  ;;  %v3485_v35 = vsel %vm3044_vm1, 1.0, %v5075_v4  ;;  %vm5289_vm8 = vcmp.ge.s32.totalorder %v4914_v31, 0  ;;  %vm3027_vm2 = vcmp.ge.s32.totalorder %v3020_v33, 0  ;;  %v3888_v31 = vunpack.i.h.bf16 %v5110_v30 }
  0xe7   : > { %v3486_v1 = vsel %vm3045_vm9, 1.0, %v5075_v4  ;;  %vm2352_vm10 = vmand %vm2336_vm12, %vm2344_vm7  ;;  %vm3028_vm7 = vcmp.ge.s32.totalorder %v3021_v32, 0 }
  0xe8   : > { %v4020_v36 = vpack.i.bf16 %v3486_v1, %v3485_v35  ;;  %vm2376_vm3 = vmand %vm2352_vm10, %vm2368_vm5  ;;  %vm3041_vm5 = vcmp.lt.s32.totalorder %v3020_v33, 8  ;;  %v534_v35 = vld [vmem:[#allocation2 + $0x31] sm:$0xff] }
  0xe9   : > { %vm5117_vm13 = vmand %vm2376_vm3, %vm2384_vm6  ;;  %vm3042_vm6 = vcmp.lt.s32.totalorder %v3021_v32, 8  ;;  %vm3025_vm3 = vcmp.ge.s32.totalorder %v3018_v16, 0 }
  0xea   : > { %4021 = vperm.xlu1 %3894, %v4020_v36   ;;  %v3452_v44 = vsel %vm5117_vm13, 1.0, %v5075_v4  ;;  %vm3029_vm12 = vmand %vm5015_vm14, %vm5289_vm8  ;;  %vm5291_vm14 = vnez %v5273_v42  ;;  %vm3039_vm8 = vcmp.lt.s32.totalorder %v3018_v16, 8  ;;  %v3912_v28 = vpop.permute.xlu1 %3911 }
  0xeb   : > { %vm3043_vm4 = vmand %vm3029_vm12, %vm5290_vm0  ;;  %vm5294_vm12 = vnez %v5275_v26  ;;  %vm3040_vm0 = vcmp.lt.s32.totalorder %v3019_v47, 8  ;;  %v3913_v22 = vunpack.i.l.bf16 %v3912_v28  ;;  %v3914_v41 = vunpack.i.h.bf16 %v3912_v28 }
  0xec   : > { %v3484_v50 = vsel %vm3043_vm4, 1.0, %v5075_v4  ;;  %vm3014_vm1 = vmand %vm3000_vm11, %vm3007_vm15  ;;  %vm3026_vm11 = vcmp.ge.s32.totalorder %v3019_v47, 0  ;;  %vm5295_vm4 = vnez %v5277_v58 }
  0xed   : > { %v4015_v53 = vpack.i.bf16 %v3484_v50, %v3452_v44  ;;  %vm3034_vm9 = vmand %vm5291_vm14, %vm3027_vm2 }
  0xee   : > { %vm3035_vm10 = vmand %vm3014_vm1, %vm3028_vm7 }
  0xef   : > { %4016 = vperm.xlu0 %3883, %v4015_v53   ;;  %vm5139_vm13 = vmand %vm3034_vm9, %vm3041_vm5 }
  0xf0   : > { %vm3049_vm15 = vmand %vm3035_vm10, %vm3042_vm6  ;;  %v3489_v43 = vsel %vm5139_vm13, 1.0, %v5075_v4  ;;  %v3907_v14 = vpop.permute.xlu0 %3906 }
  0xf1   : > { %v3490_v63 = vsel %vm3049_vm15, 1.0, %v5075_v4  ;;  %vm3032_vm2 = vmand %vm5294_vm12, %vm3025_vm3  ;;  %v3909_v48 = vunpack.i.h.bf16 %v3907_v14  ;;  %v3908_v46 = vunpack.i.l.bf16 %v3907_v14 }
  0xf2   : > { %v4030_v10 = vpack.i.bf16 %v3490_v63, %v3489_v43  ;;  %vm3033_vm7 = vmand %vm5295_vm4, %vm3026_vm11 }
  0xf3   : > { %vm3046_vm1 = vmand %vm3032_vm2, %vm3039_vm8 }
  0xf4   : > { %4031 = vperm.xlu1 %3894, %v4030_v10   ;;  %vm3047_vm5 = vmand %vm3033_vm7, %vm3040_vm0  ;;  %v3487_v6 = vsel %vm3046_vm1, 1.0, %v5075_v4 }
  0xf5   : > { %v3488_v52 = vsel %vm3047_vm5, 1.0, %v5075_v4 }
  0xf6   : > { %v4025_v15 = vpack.i.bf16 %v3488_v52, %v3487_v6 }
  0xf8   : > { %4026 = vperm.xlu0 %3883, %v4025_v15  }
  0xf9   : > { %v3659_v62 = vpop.f32.mrb[0].mxu0 }
  0xfa   : > { %v573_v55 = vmul.f32 %v3892_v49, %v3659_v62  ;;  %v5143_v56 = vpop.f32.mrb[0].mxu1  ;;  %v408_v42 = vpop.f32.mrb[1].mxu0 }
  0xfb   : > { %v571_v59 = vmul.f32 %v3887_v51, %v408_v42  ;;  %v719_v60 = vpop.f32.mrb[1].mxu1  ;;  %v3660_v61 = vpop.f32.mrb[2].mxu0  ;;  %v877_v47 = vmul.f32 %v3909_v48, %v5143_v56 }
  0xfc   : > { %v580_v20 = vadd.f32 %v573_v55, %v531_v54  ;;  %v574_v5 = vmul.f32 %v3893_v38, %v3660_v61  ;;  %v3684_v8 = vpop.f32.mrb[2].mxu1  ;;  %v411_v17 = vpop.f32.mrb[3].mxu0  ;;  %v875_v1 = vmul.f32 %v3904_v21, %v719_v60 }
  0xfd   : > { %v578_v2 = vadd.f32 %v571_v59, %v529_v57  ;;  %v572_v11 = vmul.f32 %v3888_v31, %v411_v17  ;;  %v722_v7 = vpop.f32.mrb[3].mxu1  ;;  %v878_v16 = vmul.f32 %v3913_v22, %v3684_v8 }
  0xfe   : > { %587 = vst [vmem:[#allocation2 + $0x19] sm:$0xff] %v580_v20  ;;  %v581_v26 = vadd.f32 %v574_v5, %v532_v0  ;;  %v876_v51 = vmul.f32 %v3908_v46, %v722_v7  ;;  %v3922_v5 = vpop.permute.xlu1 %3921 }
  0xff   : > { %585 = vst [vmem:[#allocation2 + $0x9] sm:$0xff] %v578_v2  ;;  %v579_v58 = vadd.f32 %v572_v11, %v530_v9  ;;  %v3923_v9 = vunpack.i.l.bf16 %v3922_v5  ;;  %v3924_v7 = vunpack.i.h.bf16 %v3922_v5 }
 0x100   : > { %588 = vst [vmem:[#allocation2 + $0x21] sm:$0xff] %v581_v26 }
 0x101   : > { %586 = vst [vmem:[#allocation2 + $0x11] sm:$0xff] %v579_v58  ;;  %v3663_v27 = vpop.f32.mrb[4].mxu0 }
 0x102   : > { %v577_v24 = vmul.f32 %v3903_v40, %v3663_v27  ;;  %v424_v37 = vpop.f32.mrb[5].mxu0  ;;  %v3687_v3 = vpop.f32.mrb[4].mxu1 }
 0x103   : > { %v575_v34 = vmul.f32 %v3898_v12, %v424_v37  ;;  %v3664_v4 = vpop.f32.mrb[6].mxu0  ;;  %v735_v33 = vpop.f32.mrb[5].mxu1 }
 0x104   : > { %v584_v30 = vadd.f32 %v577_v24, %v535_v25  ;;  %v427_v29 = vpop.f32.mrb[7].mxu0  ;;  %v3688_v13 = vpop.f32.mrb[6].mxu1  ;;  %v879_v57 = vmul.f32 %v3914_v41, %v735_v33 }
 0x105   : > { %v582_v32 = vadd.f32 %v575_v34, %v533_v18  ;;  %v576_v36 = vmul.f32 %v3899_v19, %v427_v29  ;;  %v738_v45 = vpop.f32.mrb[7].mxu1  ;;  %v3917_v62 = vpop.permute.xlu0 %3916 }
 0x106   : > { %v833_v44 = vld [vmem:[#allocation2 + $0x8] sm:$0xff]  ;;  %591 = vst [vmem:[#allocation2 + $0x39] sm:$0x7f] %v584_v30  ;;  %v3919_v55 = vunpack.i.h.bf16 %v3917_v62  ;;  %v3918_v42 = vunpack.i.l.bf16 %v3917_v62  ;;  %v3932_v10 = vpop.permute.xlu1 %3931 }
 0x107   : > { %v882_v49 = vadd.f32 %v875_v1, %v833_v44  ;;  %v836_v50 = vld [vmem:[#allocation2 + $0x20] sm:$0xff]  ;;  %589 = vst [vmem:[#allocation2 + $0x29] sm:$0xff] %v582_v32  ;;  %v583_v53 = vadd.f32 %v576_v36, %v534_v35  ;;  %v3933_v18 = vunpack.i.l.bf16 %v3932_v10  ;;  %v3934_v4 = vunpack.i.h.bf16 %v3932_v10 }
 0x108   : > { %v885_v38 = vadd.f32 %v878_v16, %v836_v50  ;;  %v834_v31 = vld [vmem:[#allocation2 + $0x10] sm:$0xff]  ;;  %v835_v39 = vld [vmem:[#allocation2 + $0x18] sm:$0xff]  ;;  %v881_v56 = vmul.f32 %v3919_v55, %v3687_v3  ;;  %v880_v43 = vmul.f32 %v3918_v42, %v738_v45 }
 0x109   : > { %889 = vst [vmem:[#allocation2 + $0x8] sm:$0xff] %v882_v49  ;;  %v883_v54 = vadd.f32 %v876_v51, %v834_v31  ;;  %590 = vst [vmem:[#allocation2 + $0x31] sm:$0xff] %v583_v53  ;;  %v884_v23 = vadd.f32 %v877_v47, %v835_v39  ;;  %v3927_v8 = vpop.permute.xlu0 %3926 }
 0x10a   : > { %892 = vst [vmem:[#allocation2 + $0x20] sm:$0xff] %v885_v38  ;;  %v3928_v17 = vunpack.i.l.bf16 %v3927_v8  ;;  %v3929_v2 = vunpack.i.h.bf16 %v3927_v8 }
 0x10b   : > { %890 = vst [vmem:[#allocation2 + $0x10] sm:$0xff] %v883_v54  ;;  %891 = vst [vmem:[#allocation2 + $0x18] sm:$0xff] %v884_v23 }
 0x10e   : > { %v837_v59 = vld [vmem:[#allocation2 + $0x28] sm:$0xff] }
 0x10f   : > { %v886_v60 = vadd.f32 %v879_v57, %v837_v59 }
 0x110   : > { %v839_v61 = vld [vmem:[#allocation2 + $0x38] sm:$0xff]  ;;  %v838_v0 = vld [vmem:[#allocation2 + $0x30] sm:$0xff]  ;;  %v1161_v14 = vld [vmem:[#allocation2 + $0x7] sm:$0xff] }
 0x111   : > { %v888_v63 = vadd.f32 %v881_v56, %v839_v61  ;;  %893 = vst [vmem:[#allocation2 + $0x28] sm:$0xff] %v886_v60  ;;  %v887_v20 = vadd.f32 %v880_v43, %v838_v0  ;;  %v3942_v46 = vpop.permute.xlu1 %3941 }
 0x112   : > { %v1163_v12 = vld [vmem:[#allocation2 + $0x17] sm:$0xff]  ;;  %v1164_v24 = vld [vmem:[#allocation2 + $0x1f] sm:$0xff]  ;;  %v1162_v48 = vld [vmem:[#allocation2 + $0xf] sm:$0xff]  ;;  %v3943_v30 = vunpack.i.l.bf16 %v3942_v46  ;;  %v3944_v16 = vunpack.i.h.bf16 %v3942_v46 }
 0x113   : > { %895 = vst [vmem:[#allocation2 + $0x38] sm:$0xff] %v888_v63  ;;  %894 = vst [vmem:[#allocation2 + $0x30] sm:$0xff] %v887_v20 }
 0x115   : > { %v3937_v29 = vpop.permute.xlu0 %3936 }
 0x116   : > { %v3939_v33 = vunpack.i.h.bf16 %v3937_v29  ;;  %v3938_v1 = vunpack.i.l.bf16 %v3937_v29 }
 0x118   : > { %v1165_v47 = vld [vmem:[#allocation2 + $0x27] sm:$0xff] }
 0x119   : > { %v3707_v11 = vpop.f32.mrb[8].mxu0  ;;  %v3952_v23 = vpop.permute.xlu1 %3951 }
 0x11a   : > { %v1211_v40 = vmul.f32 %v3928_v17, %v3707_v11  ;;  %v5165_v26 = vpop.f32.mrb[8].mxu1  ;;  %v1026_v6 = vpop.f32.mrb[9].mxu0  ;;  %v1167_v38 = vld [vmem:[#allocation2 + $0x37] sm:$0xff]  ;;  %v1168_v39 = vld [vmem:[#allocation2 + $0x3f] sm:$0x1]  ;;  %v1166_v56 = vld [vmem:[#allocation2 + $0x2f] sm:$0xff]  ;;  %v3953_v43 = vunpack.i.l.bf16 %v3952_v23  ;;  %v3954_v0 = vunpack.i.h.bf16 %v3952_v23 }
 0x11b   : > { %v1209_v28 = vmul.f32 %v3923_v9, %v1026_v6  ;;  %v1363_v58 = vpop.f32.mrb[9].mxu1  ;;  %v3708_v15 = vpop.f32.mrb[10].mxu0 }
 0x11c   : > { %v1219_v52 = vadd.f32 %v1211_v40, %v1163_v12  ;;  %v5167_v19 = vpop.f32.mrb[10].mxu1  ;;  %v1212_v27 = vmul.f32 %v3929_v2, %v3708_v15  ;;  %v1029_v25 = vpop.f32.mrb[11].mxu0  ;;  %v1538_v53 = vmul.f32 %v3943_v30, %v1363_v58 }
 0x11d   : > { %v1217_v21 = vadd.f32 %v1209_v28, %v1161_v14  ;;  %v1366_v22 = vpop.f32.mrb[11].mxu1  ;;  %v1210_v37 = vmul.f32 %v3924_v7, %v1029_v25 }
 0x11e   : > { %1227 = vst [vmem:[#allocation2 + $0x17] sm:$0xff] %v1219_v52  ;;  %v1220_v3 = vadd.f32 %v1212_v27, %v1164_v24  ;;  %v1539_v61 = vmul.f32 %v3944_v16, %v1366_v22 }
 0x11f   : > { %1225 = vst [vmem:[#allocation2 + $0x7] sm:$0xff] %v1217_v21  ;;  %v1218_v34 = vadd.f32 %v1210_v37, %v1162_v48 }
 0x120   : > { %1228 = vst [vmem:[#allocation2 + $0x1f] sm:$0xff] %v1220_v3 }
 0x121   : > { %v3711_v35 = vpop.f32.mrb[12].mxu0  ;;  %1226 = vst [vmem:[#allocation2 + $0xf] sm:$0xff] %v1218_v34  ;;  %v3947_v8 = vpop.permute.xlu0 %3946 }
 0x122   : > { %v1042_v32 = vpop.f32.mrb[13].mxu0  ;;  %v5169_v36 = vpop.f32.mrb[12].mxu1  ;;  %v1215_v45 = vmul.f32 %v3938_v1, %v3711_v35  ;;  %v3949_v17 = vunpack.i.h.bf16 %v3947_v8  ;;  %v3948_v9 = vunpack.i.l.bf16 %v3947_v8 }
 0x123   : > { %v1213_v13 = vmul.f32 %v3933_v18, %v1042_v32  ;;  %v3712_v41 = vpop.f32.mrb[14].mxu0  ;;  %v1379_v44 = vpop.f32.mrb[13].mxu1 }
 0x124   : > { %v1216_v49 = vmul.f32 %v3939_v33, %v3712_v41  ;;  %v1045_v50 = vpop.f32.mrb[15].mxu0  ;;  %v3736_v51 = vpop.f32.mrb[14].mxu1  ;;  %v1223_v42 = vadd.f32 %v1215_v45, %v1167_v38  ;;  %v1542_v5 = vmul.f32 %v3953_v43, %v1379_v44  ;;  %v1540_v40 = vmul.f32 %v3948_v9, %v5165_v26 }
 0x125   : > { %v1221_v31 = vadd.f32 %v1213_v13, %v1165_v47  ;;  %v1214_v62 = vmul.f32 %v3934_v4, %v1045_v50  ;;  %v1382_v54 = vpop.f32.mrb[15].mxu1  ;;  %v1541_v6 = vmul.f32 %v3949_v17, %v5167_v19  ;;  %v3962_v15 = vpop.permute.xlu1 %3961 }
 0x126   : > { %v1490_v55 = vld [vmem:[#allocation2 + $0x1] sm:$0xff]  ;;  %v1224_v57 = vadd.f32 %v1216_v49, %v1168_v39  ;;  %1231 = vst [vmem:[#allocation2 + $0x37] sm:$0xff] %v1223_v42  ;;  %v1543_v10 = vmul.f32 %v3954_v0, %v1382_v54  ;;  %v3963_v21 = vunpack.i.l.bf16 %v3962_v15  ;;  %v3964_v29 = vunpack.i.h.bf16 %v3962_v15 }
 0x127   : > { %v1546_v59 = vadd.f32 %v1538_v53, %v1490_v55  ;;  %1229 = vst [vmem:[#allocation2 + $0x27] sm:$0xff] %v1221_v31  ;;  %v1222_v60 = vadd.f32 %v1214_v62, %v1166_v56  ;;  %v1493_v2 = vld [vmem:[#allocation2 + $0x19] sm:$0xff] }
 0x128   : > { %1232 = vst [vmem:[#allocation2 + $0x3f] sm:$0x1] %v1224_v57  ;;  %v1491_v63 = vld [vmem:[#allocation2 + $0x9] sm:$0xff]  ;;  %v1492_v7 = vld [vmem:[#allocation2 + $0x11] sm:$0xff]  ;;  %v1549_v58 = vadd.f32 %v1541_v6, %v1493_v2 }
 0x129   : > { %1554 = vst [vmem:[#allocation2 + $0x1] sm:$0xff] %v1546_v59  ;;  %1230 = vst [vmem:[#allocation2 + $0x2f] sm:$0xff] %v1222_v60  ;;  %v1547_v20 = vadd.f32 %v1539_v61, %v1491_v63  ;;  %v1548_v14 = vadd.f32 %v1540_v40, %v1492_v7 }
 0x12a   : > { %1557 = vst [vmem:[#allocation2 + $0x19] sm:$0xff] %v1549_v58 }
 0x12b   : > { %1555 = vst [vmem:[#allocation2 + $0x9] sm:$0xff] %v1547_v20  ;;  %1556 = vst [vmem:[#allocation2 + $0x11] sm:$0xff] %v1548_v14  ;;  %v3957_v27 = vpop.permute.xlu0 %3956 }
 0x12c   : > { %v3959_v25 = vunpack.i.h.bf16 %v3957_v27  ;;  %v3958_v22 = vunpack.i.l.bf16 %v3957_v27 }
 0x12e   : > { %v1494_v11 = vld [vmem:[#allocation2 + $0x21] sm:$0xff]  ;;  %v1544_v48 = vmul.f32 %v3958_v22, %v5169_v36  ;;  %v1545_v46 = vmul.f32 %v3959_v25, %v3736_v51 }
 0x12f   : > { %v1550_v12 = vadd.f32 %v1542_v5, %v1494_v11  ;;  %v1497_v18 = vld [vmem:[#allocation2 + $0x39] sm:$0x7f] }
 0x130   : > { %v1495_v28 = vld [vmem:[#allocation2 + $0x29] sm:$0xff]  ;;  %v1496_v37 = vld [vmem:[#allocation2 + $0x31] sm:$0xff]  ;;  %v1723_v19 = vld [vmem:[#allocation2] sm:$0xff]  ;;  %v1553_v41 = vadd.f32 %v1545_v46, %v1497_v18 }
 0x131   : > { %1558 = vst [vmem:[#allocation2 + $0x21] sm:$0xff] %v1550_v12  ;;  %v1551_v52 = vadd.f32 %v1543_v10, %v1495_v28  ;;  %v1552_v13 = vadd.f32 %v1544_v48, %v1496_v37 }
 0x132   : > { %v1724_v32 = vld [vmem:[#allocation2 + $0x8] sm:$0xff]  ;;  %1561 = vst [vmem:[#allocation2 + $0x39] sm:$0x7f] %v1553_v41  ;;  %v1725_v42 = vld [vmem:[#allocation2 + $0x10] sm:$0xff]  ;;  %v1726_v57 = vld [vmem:[#allocation2 + $0x18] sm:$0xff] }
 0x133   : > { %1559 = vst [vmem:[#allocation2 + $0x29] sm:$0xff] %v1551_v52  ;;  %1560 = vst [vmem:[#allocation2 + $0x31] sm:$0xff] %v1552_v13  ;;  %v3972_v36 = vpop.permute.xlu1 %3971 }
 0x134   : > { %v3973_v51 = vunpack.i.l.bf16 %v3972_v36  ;;  %v3974_v23 = vunpack.i.h.bf16 %v3972_v36 }
 0x138   : > { %v1727_v31 = vld [vmem:[#allocation2 + $0x20] sm:$0xff] }
 0x139   : > { %v3755_v24 = vpop.f32.mrb[16].mxu0  ;;  %v3967_v55 = vpop.permute.xlu0 %3966 }
 0x13a   : > { %v3779_v26 = vpop.f32.mrb[16].mxu1  ;;  %v1692_v3 = vpop.f32.mrb[17].mxu0  ;;  %v3969_v59 = vunpack.i.h.bf16 %v3967_v55  ;;  %v3968_v60 = vunpack.i.l.bf16 %v3967_v55  ;;  %v1733_v61 = vadd.f32 %v3755_v24, %v1725_v42  ;;  %v1728_v20 = vld [vmem:[#allocation2 + $0x28] sm:$0xff]  ;;  %v1730_v17 = vld [vmem:[#allocation2 + $0x38] sm:$0xff]  ;;  %v1729_v58 = vld [vmem:[#allocation2 + $0x30] sm:$0xff] }
 0x13b   : > { %v1731_v34 = vadd.f32 %v1723_v19, %v1692_v3  ;;  %v1909_v4 = vpop.f32.mrb[17].mxu1  ;;  %v3756_v30 = vpop.f32.mrb[18].mxu0 }
 0x13c   : > { %v2084_v35 = vmul.f32 %v3963_v21, %v1909_v4  ;;  %v3780_v33 = vpop.f32.mrb[18].mxu1  ;;  %v1695_v1 = vpop.f32.mrb[19].mxu0  ;;  %v1734_v0 = vadd.f32 %v3756_v30, %v1726_v57  ;;  %v2086_v2 = vmul.f32 %v3968_v60, %v3779_v26 }
 0x13d   : > { %v1732_v44 = vadd.f32 %v1724_v32, %v1695_v1  ;;  %v1912_v16 = vpop.f32.mrb[19].mxu1  ;;  %v2087_v11 = vmul.f32 %v3969_v59, %v3780_v33 }
 0x13e   : > { %v5174_v45 = vadd.f32 %v2084_v35, %v1731_v34  ;;  %v2085_v47 = vmul.f32 %v3964_v29, %v1912_v16  ;;  %v2094_v6 = vadd.f32 %v2086_v2, %v1733_v61 }
 0x13f   : > { %v2095_v12 = vadd.f32 %v2087_v11, %v1734_v0  ;;  %v3982_v27 = vpop.permute.xlu1 %3981 }
 0x140   : > { %v5176_v49 = vadd.f32 %v2085_v47, %v1732_v44  ;;  %v3984_v26 = vunpack.i.h.bf16 %v3982_v27  ;;  %v3983_v35 = vunpack.i.l.bf16 %v3982_v27 }
 0x141   : > { %v3759_v50 = vpop.f32.mrb[20].mxu0 }
 0x142   : > { %v3783_v53 = vpop.f32.mrb[20].mxu1  ;;  %v1708_v38 = vpop.f32.mrb[21].mxu0  ;;  %v1737_v14 = vadd.f32 %v3759_v50, %v1729_v58 }
 0x143   : > { %v1735_v39 = vadd.f32 %v1727_v31, %v1708_v38  ;;  %v1925_v62 = vpop.f32.mrb[21].mxu1  ;;  %v3760_v54 = vpop.f32.mrb[22].mxu0 }
 0x144   : > { %v2088_v56 = vmul.f32 %v3973_v51, %v1925_v62  ;;  %v3784_v43 = vpop.f32.mrb[22].mxu1  ;;  %v1711_v63 = vpop.f32.mrb[23].mxu0  ;;  %v1738_v7 = vadd.f32 %v3760_v54, %v1730_v17 }
 0x145   : > { %v1928_v5 = vpop.f32.mrb[23].mxu1  ;;  %v1736_v9 = vadd.f32 %v1728_v20, %v1711_v63  ;;  %v3977_v28 = vpop.permute.xlu0 %3976 }
 0x146   : > { %v5178_v8 = vadd.f32 %v2088_v56, %v1735_v39  ;;  %v2089_v10 = vmul.f32 %v3974_v23, %v1928_v5  ;;  %1746 = vst [vmem:[#allocation2 + $0x38] sm:$0xff] %v1738_v7  ;;  %v3978_v52 = vunpack.i.l.bf16 %v3977_v28  ;;  %v3979_v19 = vunpack.i.h.bf16 %v3977_v28 }
 0x148   : > { %v5180_v40 = vadd.f32 %v2089_v10, %v1736_v9  ;;  %v2090_v15 = vmul.f32 %v3978_v52, %v3783_v53 }
 0x14a   : > { %v2098_v21 = vadd.f32 %v2090_v15, %v1737_v14 }
 0x14b   : > { %v3992_v25 = vpop.permute.xlu1 %3991 }
 0x14c   : > { %v3993_v2 = vunpack.i.l.bf16 %v3992_v25 }
 0x14d   : > { %v2043_v55 = vld [vmem:[#allocation2 + $0x38] sm:$0x7f] }
 0x151   : > { %v3987_v3 = vpop.permute.xlu0 %3986 }
 0x152   : > { %v3988_v34 = vunpack.i.l.bf16 %v3987_v3  ;;  %v3989_v61 = vunpack.i.h.bf16 %v3987_v3 }
 0x157   : > { %v4002_v48 = vpop.permute.xlu1 %4001 }
 0x158   : > { %v4004_v4 = vunpack.i.h.bf16 %v4002_v48  ;;  %v4003_v16 = vunpack.i.l.bf16 %v4002_v48 }
 0x15a   : > { %v3827_v22 = vpop.f32.mrb[24].mxu1  ;;  %v3803_v46 = vpop.f32.mrb[24].mxu0 }
 0x15b   : > { %v2608_v24 = vpop.f32.mrb[25].mxu1  ;;  %v2459_v30 = vmul.f32 %v3984_v26, %v3803_v46  ;;  %v2274_v29 = vpop.f32.mrb[25].mxu0  ;;  %v2766_v13 = vmul.f32 %v4004_v4, %v3827_v22 }
 0x15c   : > { %v3828_v37 = vpop.f32.mrb[26].mxu1  ;;  %v2457_v33 = vmul.f32 %v3979_v19, %v2274_v29  ;;  %v3804_v1 = vpop.f32.mrb[26].mxu0 }
 0x15d   : > { %v2611_v18 = vpop.f32.mrb[27].mxu1  ;;  %v2467_v32 = vadd.f32 %v2459_v30, %v2094_v6  ;;  %v2460_v41 = vmul.f32 %v3988_v34, %v3804_v1  ;;  %v2277_v44 = vpop.f32.mrb[27].mxu0 }
 0x15e   : > { %v2465_v47 = vadd.f32 %v2457_v33, %v5174_v45  ;;  %v2458_v36 = vmul.f32 %v3983_v35, %v2277_v44  ;;  %v3997_v50 = vpop.permute.xlu0 %3996  ;;  %v2765_v54 = vmul.f32 %v4003_v16, %v2611_v18  ;;  %v3994_v45 = vunpack.i.h.bf16 %v3992_v25 }
 0x15f   : > { %v5183_v51 = vadd.f32 %v2766_v13, %v2467_v32  ;;  %v2468_v53 = vadd.f32 %v2460_v41, %v2095_v12  ;;  %v3999_v31 = vunpack.i.h.bf16 %v3997_v50  ;;  %v3998_v39 = vunpack.i.l.bf16 %v3997_v50 }
 0x160   : > { %v2466_v62 = vadd.f32 %v2458_v36, %v5176_v49 }
 0x161   : > { %v2091_v57 = vmul.f32 %v3998_v39, %v3784_v43  ;;  %v2764_v56 = vmul.f32 %v3999_v31, %v2608_v24  ;;  %v4012_v0 = vpop.permute.xlu1 %4011  ;;  %v3491_v39 = vld [vmem:[%s5207_s4] ss:$0 sm:$0xff] }
 0x162   : > { %v3831_v38 = vpop.f32.mrb[28].mxu1  ;;  %v5186_v59 = vadd.f32 %v2765_v54, %v2466_v62  ;;  %v3807_v5 = vpop.f32.mrb[28].mxu0  ;;  %v4014_v17 = vunpack.i.h.bf16 %v4012_v0  ;;  %v4013_v12 = vunpack.i.l.bf16 %v4012_v0 }
 0x163   : > { %v2624_v23 = vpop.f32.mrb[29].mxu1  ;;  %v2099_v63 = vadd.f32 %v2091_v57, %v2043_v55  ;;  %v2771_v20 = vadd.f32 %v2764_v56, %v2465_v47  ;;  %v2463_v9 = vmul.f32 %v3994_v45, %v3807_v5  ;;  %v2290_v10 = vpop.f32.mrb[29].mxu0 }
 0x164   : > { %v3832_v42 = vpop.f32.mrb[30].mxu1  ;;  %v2461_v49 = vmul.f32 %v3989_v61, %v2290_v10  ;;  %v3808_v11 = vpop.f32.mrb[30].mxu0  ;;  %v2770_v6 = vmul.f32 %v4014_v17, %v3831_v38 }
 0x165   : > { %v2627_v60 = vpop.f32.mrb[31].mxu1  ;;  %2107 = vst [vmem:[#allocation2 + $0x38] sm:$0x7f] %v2099_v63  ;;  %v2471_v7 = vadd.f32 %v2463_v9, %v2098_v21  ;;  %v2293_v43 = vpop.f32.mrb[31].mxu0 }
 0x166   : > { %v4007_v28 = vpop.permute.xlu0 %4006  ;;  %v2469_v58 = vadd.f32 %v2461_v49, %v5178_v8  ;;  %v2462_v52 = vmul.f32 %v3993_v2, %v2293_v43  ;;  %v2769_v24 = vmul.f32 %v4013_v12, %v2627_v60 }
 0x167   : > { %v4009_v14 = vunpack.i.h.bf16 %v4007_v28  ;;  %v4008_v15 = vunpack.i.l.bf16 %v4007_v28  ;;  %v2777_v27 = vadd.f32 %v2770_v6, %v2471_v7 }
 0x168   : > { %v2470_v22 = vadd.f32 %v2462_v52, %v5180_v40 }
 0x169   : > { %v2767_v18 = vmul.f32 %v4008_v15, %v3828_v37  ;;  %2784 = vst [vmem:[#allocation2 + $0x30] sm:$0xff] %v2777_v27  ;;  %v2768_v25 = vmul.f32 %v4009_v14, %v2624_v23  ;;  %v4022_v8 = vpop.permute.xlu1 %4021 }
 0x16a   : > { %v2776_v26 = vadd.f32 %v2769_v24, %v2470_v22  ;;  %v4024_v29 = vunpack.i.h.bf16 %v4022_v8  ;;  %v4023_v13 = vunpack.i.l.bf16 %v4022_v8 }
 0x16b   : > { %v2774_v3 = vadd.f32 %v2767_v18, %v2468_v53  ;;  %v2775_v19 = vadd.f32 %v2768_v25, %v2469_v58 }
 0x16c   : > { %v2416_v34 = vld [vmem:[#allocation2 + $0x38] sm:$0x1] }
 0x16e   : > { %v4017_v21 = vpop.permute.xlu0 %4016 }
 0x16f   : > { %v4018_v48 = vunpack.i.l.bf16 %v4017_v21  ;;  %v4019_v33 = vunpack.i.h.bf16 %v4017_v21 }
 0x170   : > { %v3070_v57 = vld [vmem:[#allocation2 + $0x30] sm:$0x7f] }
 0x171   : > { %v2464_v46 = vmul.f32 %v4018_v48, %v3808_v11 }
 0x173   : > { %v2472_v4 = vadd.f32 %v2464_v46, %v2416_v34  ;;  %v4032_v35 = vpop.permute.xlu1 %4031 }
 0x174   : > { %v4034_v41 = vunpack.i.h.bf16 %v4032_v35  ;;  %v4033_v61 = vunpack.i.l.bf16 %v4032_v35 }
 0x175   : > { %2480 = vst [vmem:[#allocation2 + $0x38] sm:$0x1] %v2472_v4 }
 0x177   : > { %v4027_v30 = vpop.permute.xlu0 %4026 }
 0x178   : > { %v4028_v40 = vunpack.i.l.bf16 %v4027_v30  ;;  %v4029_v47 = vunpack.i.h.bf16 %v4027_v30 }
 0x17c   : > { %v3134_v31 = vld [vmem:[#allocation2 + $0x38] sm:$0xff] }
 0x17d   : > { %v3149_v17 = vadd.f32 %v3491_v39, %v3134_v31 }
 0x17f   : > { %v3165_v28 = vmul.f32 0.70710677, %v3149_v17 }
 0x180   : > { %v3851_v1 = vpop.f32.mrb[32].mxu0 }
 0x181   : > { %v3108_v32 = vmul.f32 %v4024_v29, %v3851_v1  ;;  %v2943_v37 = vpop.f32.mrb[33].mxu0 }
 0x182   : > { %v3106_v44 = vmul.f32 %v4019_v33, %v2943_v37  ;;  %v3852_v16 = vpop.f32.mrb[34].mxu0 }
 0x183   : > { %v3115_v36 = vadd.f32 %v3108_v32, %v5183_v51  ;;  %v3109_v53 = vmul.f32 %v4028_v40, %v3852_v16  ;;  %v2946_v38 = vpop.f32.mrb[35].mxu0 }
 0x184   : > { %v3855_v50 = vpop.f32.mrb[32].mxu1  ;;  %v3113_v54 = vadd.f32 %v3106_v44, %v2771_v20  ;;  %v3107_v55 = vmul.f32 %v4023_v13, %v2946_v38  ;;  %v3157_v38 = vmul.f32 0.5, %v3149_v17 }
 0x185   : > { %v3112_v62 = vmul.f32 %v4034_v41, %v3855_v50  ;;  %v2959_v23 = vpop.f32.mrb[33].mxu1  ;;  %3122 = vst [vmem:[#allocation2 + $0x10] sm:$0xff] %v3115_v36  ;;  %v3144_v42 = vadd.f32 %v3491_v39, %v3115_v36  ;;  %v3116_v60 = vadd.f32 %v3109_v53, %v2774_v3 }
 0x186   : > { %v3110_v56 = vmul.f32 %v4029_v47, %v2959_v23  ;;  %v3856_v45 = vpop.f32.mrb[34].mxu1  ;;  %3120 = vst [vmem:[#allocation2] sm:$0xff] %v3113_v54  ;;  %v3142_v0 = vadd.f32 %v3491_v39, %v3113_v54  ;;  %v3114_v63 = vadd.f32 %v3107_v55, %v5186_v59 }
 0x187   : > { %v3119_v51 = vadd.f32 %v3112_v62, %v3070_v57  ;;  %v2962_v5 = vpop.f32.mrb[35].mxu1  ;;  %v3160_v9 = vmul.f32 0.70710677, %v3144_v42  ;;  %3123 = vst [vmem:[#allocation2 + $0x18] sm:$0xff] %v3116_v60  ;;  %v3145_v20 = vadd.f32 %v3491_v39, %v3116_v60 }
 0x188   : > { %v3117_v10 = vadd.f32 %v3110_v56, %v2775_v19  ;;  %v3158_v2 = vmul.f32 0.70710677, %v3142_v0  ;;  %3121 = vst [vmem:[#allocation2 + $0x8] sm:$0xff] %v3114_v63  ;;  %v3143_v49 = vadd.f32 %v3491_v39, %v3114_v63  ;;  %v3111_v11 = vmul.f32 %v4033_v61, %v2962_v5 }
 0x189   : > { %3126 = vst [vmem:[#allocation2 + $0x30] sm:$0x7f] %v3119_v51  ;;  %4143 = verf.f32 %v3160_v9  ;;  %v3161_v6 = vmul.f32 0.70710677, %v3145_v20  ;;  %v3152_v19 = vmul.f32 0.5, %v3144_v42  ;;  %v3153_v21 = vmul.f32 0.5, %v3145_v20 }
 0x18a   : > { %3124 = vst [vmem:[#allocation2 + $0x20] sm:$0xff] %v3117_v10  ;;  %v3146_v7 = vadd.f32 %v3491_v39, %v3117_v10  ;;  %4145 = verf.f32 %v3158_v2  ;;  %v3159_v43 = vmul.f32 0.70710677, %v3143_v49  ;;  %v3118_v12 = vadd.f32 %v3111_v11, %v2776_v26 }
 0x18b   : > { %4147 = verf.f32 %v3161_v6  ;;  %v3150_v34 = vmul.f32 0.5, %v3142_v0  ;;  %v3151_v4 = vmul.f32 0.5, %v3143_v49 }
 0x18c   : > { %v3162_v59 = vmul.f32 0.70710677, %v3146_v7  ;;  %4149 = verf.f32 %v3159_v43  ;;  %3125 = vst [vmem:[#allocation2 + $0x28] sm:$0xff] %v3118_v12  ;;  %v3147_v58 = vadd.f32 %v3491_v39, %v3118_v12  ;;  %v3154_v13 = vmul.f32 0.5, %v3146_v7 }
 0x18e   : > { %4151 = verf.f32 %v3162_v59  ;;  %v3163_v52 = vmul.f32 0.70710677, %v3147_v58  ;;  %v3155_v44 = vmul.f32 0.5, %v3147_v58 }
 0x18f   : > { %4153 = verf.f32 %v3165_v28 }
 0x190   : > { %v3133_v14 = vld [vmem:[#allocation2 + $0x30] sm:$0xff]  ;;  %4155 = verf.f32 %v3163_v52 }
 0x191   : > { %v3148_v15 = vadd.f32 %v3491_v39, %v3133_v14 }
 0x193   : > { %v3164_v27 = vmul.f32 0.70710677, %v3148_v15  ;;  %v4144_v22 = vpop.eup %4143  ;;  %v3156_v31 = vmul.f32 0.5, %v3148_v15 }
 0x194   : > { %v4146_v24 = vpop.eup %4145  ;;  %v3176_v18 = vadd.f32 1.0, %v4144_v22 }
 0x195   : > { %4157 = verf.f32 %v3164_v27  ;;  %v4148_v25 = vpop.eup %4147  ;;  %v3174_v26 = vadd.f32 1.0, %v4146_v24 }
 0x196   : > { %v4150_v3 = vpop.eup %4149  ;;  %v3177_v48 = vadd.f32 1.0, %v4148_v25  ;;  %v3184_v30 = vmul.f32 %v3176_v18, %v3152_v19 }
 0x197   : > { %v3175_v8 = vadd.f32 1.0, %v4150_v3  ;;  %v3182_v33 = vmul.f32 %v3174_v26, %v3150_v34 }
 0x198   : > { %v4152_v46 = vpop.eup %4151  ;;  %v3185_v29 = vmul.f32 %v3177_v48, %v3153_v21 }
 0x199   : > { %v4154_v35 = vpop.eup %4153  ;;  %v3178_v1 = vadd.f32 1.0, %v4152_v46  ;;  %v3183_v40 = vmul.f32 %v3175_v8, %v3151_v4 }
 0x19a   : > { %v4156_v32 = vpop.eup %4155  ;;  %v3518_v37 = vpack.c.bf16 %v3185_v29, %v3184_v30  ;;  %v3181_v47 = vadd.f32 1.0, %v4154_v35 }
 0x19b   : > { %v3513_v41 = vpack.c.bf16 %v3183_v40, %v3182_v33  ;;  %v3179_v16 = vadd.f32 1.0, %v4156_v32  ;;  %v3186_v36 = vmul.f32 %v3178_v1, %v3154_v13 }
 0x19c   : > { %3530 = vst [vmem:[%s270_s8 + $0x8] sm:$0xff] %v3518_v37   ;;  %v3189_v54 = vmul.f32 %v3181_v47, %v3157_v38 }
 0x19d   : > { %3514 = vst [vmem:[%s270_s8] sm:$0xff] %v3513_v41   ;;  %v3187_v50 = vmul.f32 %v3179_v16, %v3155_v44 }
 0x19f   : > { %v4158_v53 = vpop.eup %4157  ;;  %v3523_v62 = vpack.c.bf16 %v3187_v50, %v3186_v36 }
 0x1a0   : > { %v3180_v39 = vadd.f32 1.0, %v4158_v53 }
 0x1a1   : > { %3531 = vst [vmem:[%s270_s8 + $0x10] sm:$0xff] %v3523_v62  }
 0x1a2   : > { %v3188_v23 = vmul.f32 %v3180_v39, %v3156_v31 }
 0x1a4   : > { %v3528_v55 = vpack.c.bf16 %v3189_v54, %v3188_v23 }
 0x1a6   : > { %3532 = vst [vmem:[%s270_s8 + $0x18] sm:$0xff] %v3528_v55  }
 0x1a7 PF: > { %s15_s18 = sadd.s32 1, %s4170_s18  }
 0x1a8   : > { %p12_p4 = scmp.ge.s32.totalorder %s15_s18, 4  }
 0x1aa   :  { %14 = sbr.rel (!%p12_p4) target bundleno = 1 (0x1), region = 76 }

// kernel: decoder_forward.11
= control target key start
LH: loop header
LB: loop body
LE: loop exit
PB: predicated region body
PF: predicated region fallthrough
CT: control target
= control target key end

     0   :  { %s3730_s18 = smov 0   ;;  %s4551_s0 = inlined_call_operand.vmem [shape: bf16[128,128], index: 0, kind: input, shape index: {}]   ;;  %s4552_s1 = inlined_call_operand.vmem [shape: s32[128,1], index: 1, kind: input, shape index: {}]   ;;  %s4553_s2 = inlined_call_operand.vmem [shape: s32[128,1], index: 2, kind: input, shape index: {}]   ;;  %s4554_s3 = inlined_call_operand.vmem [shape: bf16[128,1152], index: 3, kind: input, shape index: {}]   ;;  %s4555_s4 = inlined_call_operand.vmem [shape: f32[1,512], index: 4, kind: input, shape index: {}]   ;;  %s4556_s5 = inlined_call_operand.vmem [shape: bf16[128,512], index: 5, kind: output, shape index: {}]  }
   0x1 LB: > { %s2882_s19 = sadd.s32 4294967295, %s3696_s18   ;;  %p2886_p0 = scmp.ge.s32.totalorder %s3696_s18, 1  ;;  %s3696_s18 = sphi %s3730_s18, %s15_s18  }
   0x2   : > { %p210_p1 = scmp.lt.s32.totalorder %s3696_s18, 3 }
   0x4   : > { %p211_p2 = pnand %p2886_p0, %p210_p1 }
   0x5   : > { %v3518_v0 = vld [vmem:[%s4554_s3] ss:$36 sps:$4 sm:$0xff] (!%p211_p2)   ;;  %v3520_v2 = vld [vmem:[%s4554_s3 + $0x48] ss:$36 sps:$4 sm:$0xff] (!%p211_p2)   ;;  %v3522_v4 = vld [vmem:[%s4554_s3 + $0x90] ss:$36 sps:$4 sm:$0xff] (!%p211_p2)  }
   0x6   : > { %214 = sbr.rel (%p211_p2) target bundleno = 407 (0x197), region = 40  ;;  %v3519_v1 = vld [vmem:[%s4554_s3 + $0x4] ss:$36 sps:$4 sm:$0xff] (!%p211_p2)   ;;  %3184 = vmatprep.subr.bf16.mxu0 (!%p211_p2), %v3518_v0  ;;  %v3521_v3 = vld [vmem:[%s4554_s3 + $0x4c] ss:$36 sps:$4 sm:$0xff] (!%p211_p2)   ;;  %s2887_s17 = sshll.u32 (!%p211_p2), %s2882_s19, 3 }
   0x7   : > { %3208 = vmatprep.subr.bf16.mxu1 (!%p211_p2), %v3519_v1  ;;  %3185 = vmatpush3.bf16.msra.mxu0 (!%p211_p2), %v3518_v0  ;;  %v3523_v5 = vld [vmem:[%s4554_s3 + $0x94] ss:$36 sps:$4 sm:$0xff] (!%p211_p2)   ;;  %v3525_v7 = vld [vmem:[%s4554_s3 + $0xdc] ss:$36 sps:$4 sm:$0xff] (!%p211_p2)   ;;  %v3527_v9 = vld [vmem:[%s4554_s3 + $0x124] ss:$36 sps:$4 sm:$0xff] (!%p211_p2)  }
   0x8   : > { %3209 = vmatpush3.bf16.msra.mxu1 (!%p211_p2), %v3519_v1  ;;  %3186 = vmatprep.subr.bf16.mxu0 (!%p211_p2), %v3520_v2  ;;  %v3524_v6 = vld [vmem:[%s4554_s3 + $0xd8] ss:$36 sps:$4 sm:$0xff] (!%p211_p2)   ;;  %v3526_v8 = vld [vmem:[%s4554_s3 + $0x120] ss:$36 sps:$4 sm:$0xff] (!%p211_p2)   ;;  %v3528_v10 = vld [vmem:[%s4554_s3 + $0x168] ss:$36 sps:$4 sm:$0xff] (!%p211_p2)  }
   0x9   : > { %3210 = vmatprep.subr.bf16.mxu1 (!%p211_p2), %v3521_v3  ;;  %v3529_v11 = vld [vmem:[%s4554_s3 + $0x16c] ss:$36 sps:$4 sm:$0xff] (!%p211_p2)   ;;  %p250_p3 = scmp.lt.s32.totalorder (!%p211_p2), %s2887_s17, 15  ;;  %v3531_v13 = vld [vmem:[%s4554_s3 + $0x1b4] ss:$36 sps:$4 sm:$0xff] (!%p211_p2)   ;;  %v3698_v29 = vmov (!%p211_p2), 0  }
   0xa   : > { %v3530_v12 = vld [vmem:[%s4554_s3 + $0x1b0] ss:$36 sps:$4 sm:$0xff] (!%p211_p2)   ;;  %v3532_v14 = vld [vmem:[%s4554_s3 + $0x1f8] ss:$36 sps:$4 sm:$0xff] (!%p211_p2)   ;;  %v3538_v18 = vld [vmem:[%s4554_s3 + $0x8] ss:$36 sps:$4 sm:$0xff] (!%p211_p2)   ;;  %3437 = vset.pattern.permute.xlu1 (!%p211_p2), %v3698_v29  ;;  %3426 = vset.pattern.permute.xlu0 (!%p211_p2), %v3698_v29 }
   0xb   : > { %3187 = vmatpush3.bf16.msra.mxu0 (!%p211_p2), %v3520_v2  ;;  %v3533_v17 = vld [vmem:[%s4554_s3 + $0x1fc] ss:$36 sps:$4 sm:$0xff] (!%p211_p2)   ;;  %v3539_v19 = vld [vmem:[%s4554_s3 + $0xc] ss:$36 sps:$4 sm:$0xff] (!%p211_p2)   ;;  %v3541_v23 = vld [vmem:[%s4554_s3 + $0x54] ss:$36 sps:$4 sm:$0xff] (!%p211_p2)  }
   0xc   : > { %3211 = vmatpush3.bf16.msra.mxu1 (!%p211_p2), %v3521_v3  ;;  %3188 = vmatprep.subr.bf16.mxu0 (!%p211_p2), %v3522_v4  ;;  %v3540_v22 = vld [vmem:[%s4554_s3 + $0x50] ss:$36 sps:$4 sm:$0xff] (!%p211_p2)   ;;  %v3542_v26 = vld [vmem:[%s4554_s3 + $0x98] ss:$36 sps:$4 sm:$0xff] (!%p211_p2)   ;;  %v3544_v31 = vld [vmem:[%s4554_s3 + $0xe0] ss:$36 sps:$4 sm:$0xff] (!%p211_p2)  }
   0xd   : > { %3212 = vmatprep.subr.bf16.mxu1 %v3523_v5  ;;  %s4578_s17 = smov (!%p250_p3, %s2887_s17), 15  ;;  %v3543_v27 = vld [vmem:[%s4554_s3 + $0x9c] ss:$36 sps:$4 sm:$0xff]   ;;  %v3545_v32 = vld [vmem:[%s4554_s3 + $0xe4] ss:$36 sps:$4 sm:$0xff]  }
   0xe   : > { %s2888_s19 = sshll.u32 %s4578_s17, 2  ;;  %v3546_v35 = vld [vmem:[%s4554_s3 + $0x128] ss:$36 sps:$4 sm:$0xff]   ;;  %v3548_v37 = vld [vmem:[%s4554_s3 + $0x170] ss:$36 sps:$4 sm:$0xff]   ;;  %s2890_s25 = sshll.u32 %s4578_s17, 3 }
   0xf   : > { %3189 = vmatpush3.bf16.msra.mxu0 %v3522_v4  ;;  %s3791_s30 = scalar_lea.vmem %s4551_s0, %s2888_s19  ;;  %v3547_v36 = vld [vmem:[%s4554_s3 + $0x12c] ss:$36 sps:$4 sm:$0xff]   ;;  %v3549_v38 = vld [vmem:[%s4554_s3 + $0x174] ss:$36 sps:$4 sm:$0xff]   ;;  %v3555_v40 = vld [vmem:[%s4554_s3 + $0x1bc] ss:$36 sps:$4 sm:$0xff]   ;;  %s3966_s7 = scalar_lea.vmem %s4552_s1, %s2890_s25 }
  0x10   : > { %3213 = vmatpush3.bf16.msra.mxu1 %v3523_v5  ;;  %3190 = vmatprep.subr.bf16.mxu0 %v3524_v6  ;;  %v3534_v15 = vld [vmem:[%s3791_s30] sm:$0xff]   ;;  %v3536_v20 = vld [vmem:[%s3791_s30 + $0x8] sm:$0xff]   ;;  %v3550_v24 = vld [vmem:[%s3791_s30 + $0x10] sm:$0xff]   ;;  %vm1091_vm0 = vsmask.f32 7424  ;;  %s3971_s10 = scalar_lea.vmem %s4553_s2, %s2890_s25  ;;  %s3059_s21 = sshll.u32 %s4578_s17, 4 }
  0x11   : > { %3214 = vmatprep.subr.bf16.mxu1 %v3525_v7  ;;  %v3535_v16 = vld [vmem:[%s3791_s30] sm:$0xff]   ;;  %3200 = vmatprep.mubr.bf16.mxu0 %v3534_v15  ;;  %v3537_v21 = vld [vmem:[%s3791_s30 + $0x8] sm:$0xff]   ;;  %v3551_v25 = vld [vmem:[%s3791_s30 + $0x10] sm:$0xff]   ;;  %s4461_s23 = scalar_lea.vmem %s4556_s5, %s3059_s21 }
  0x12   : > { %3224 = vmatprep.mubr.bf16.mxu1 %v3535_v16  ;;  %v3552_v28 = vld [vmem:[%s3791_s30 + $0x18] sm:$0xff]   ;;  %v3558_v33 = vld [vmem:[%s3791_s30] sm:$0xff]   ;;  %v3560_v43 = vld [vmem:[%s3791_s30 + $0x8] sm:$0xff]  }
  0x13   : > { %3191 = vmatpush3.bf16.msra.mxu0 %v3524_v6  ;;  %v3553_v30 = vld [vmem:[%s3791_s30 + $0x18] sm:$0xff]   ;;  %v3559_v34 = vld [vmem:[%s3791_s30] sm:$0xff]   ;;  %v3562_v44 = vld [vmem:[%s4554_s3 + $0x10] ss:$36 sps:$4 sm:$0xff]  }
  0x14   : > { %3215 = vmatpush3.bf16.msra.mxu1 %v3525_v7  ;;  %3192 = vmatprep.subr.bf16.mxu0 %v3526_v8  ;;  %v3554_v39 = vld [vmem:[%s4554_s3 + $0x1b8] ss:$36 sps:$4 sm:$0xff]   ;;  %v3556_v41 = vld [vmem:[%s4554_s3 + $0x200] ss:$36 sps:$4 sm:$0xff]   ;;  %v3561_v45 = vld [vmem:[%s3791_s30 + $0x8] sm:$0xff]  }
  0x15   : > { %3216 = vmatprep.subr.bf16.mxu1 %v3527_v9  ;;  %v3557_v42 = vld [vmem:[%s4554_s3 + $0x204] ss:$36 sps:$4 sm:$0xff]   ;;  %v3563_v46 = vld [vmem:[%s4554_s3 + $0x14] ss:$36 sps:$4 sm:$0xff]   ;;  %v3565_v48 = vld [vmem:[%s4554_s3 + $0x5c] ss:$36 sps:$4 sm:$0xff]  }
  0x16   : > { %v3564_v47 = vld [vmem:[%s4554_s3 + $0x58] ss:$36 sps:$4 sm:$0xff]   ;;  %v3574_v49 = vld [vmem:[%s3791_s30 + $0x10] sm:$0xff]   ;;  %v3566_v51 = vld [vmem:[%s4554_s3 + $0xa0] ss:$36 sps:$4 sm:$0xff]  }
  0x17   : > { %3193 = vmatpush3.bf16.msra.mxu0 %v3526_v8  ;;  %v3575_v50 = vld [vmem:[%s3791_s30 + $0x10] sm:$0xff]   ;;  %v3582_v52 = vld [vmem:[%s3791_s30] sm:$0xff]   ;;  %v3878_v54 = vld [vmem:[%s3791_s30 + $0x8] sm:$0xff]  }
  0x18   : > { %3217 = vmatpush3.bf16.msra.mxu1 %v3527_v9  ;;  %3194 = vmatprep.subr.bf16.mxu0 %v3528_v10  ;;  %v3567_v53 = vld [vmem:[%s4554_s3 + $0xa4] ss:$36 sps:$4 sm:$0xff]   ;;  %v3576_v56 = vld [vmem:[%s3791_s30 + $0x18] sm:$0xff]   ;;  %v1093_v57 = vshrl.u32 %v3582_v52, 16  ;;  %v1095_v58 = vshll.u32 %v3582_v52, 16  ;;  %v1100_v60 = vshll.u32 %v3878_v54, 16 }
  0x19   : > { %3218 = vmatprep.subr.bf16.mxu1 %v3529_v11  ;;  %v3584_v55 = vld [vmem:[%s3791_s30] sm:$0xff]   ;;  %v3577_v59 = vld [vmem:[%s3791_s30 + $0x18] sm:$0xff]   ;;  %v3885_v61 = vld [vmem:[%s3791_s30 + $0x8] sm:$0xff]  }
  0x1a   : > { %v1421_v62 = vshrl.u32 %v3584_v55, 16  ;;  %v3568_v63 = vld [vmem:[%s4554_s3 + $0xe8] ss:$36 sps:$4 sm:$0xff]   ;;  %v1097_v0 = vrot.slane %v1095_v58, 1  ;;  %v1423_v1 = vshll.u32 %v3584_v55, 16  ;;  %v1102_v2 = vrot.slane %v1100_v60, 1 }
  0x1b   : > { %3195 = vmatpush3.bf16.msra.mxu0 %v3528_v10  ;;  %v1428_v3 = vshll.u32 %v3885_v61, 16  ;;  %v3569_v6 = vld [vmem:[%s4554_s3 + $0xec] ss:$36 sps:$4 sm:$0xff]   ;;  %v3578_v16 = vld [vmem:[%s4554_s3 + $0x1c0] ss:$36 sps:$4 sm:$0xff]  }
  0x1c   : > { %3219 = vmatpush3.bf16.msra.mxu1 %v3529_v11  ;;  %3196 = vmatprep.subr.bf16.mxu0 %v3530_v12  ;;  %v1098_v4 = vor.u32 %v1097_v0, %v1093_v57  ;;  %v1425_v5 = vrot.slane %v1423_v1, 1  ;;  %v3570_v10 = vld [vmem:[%s4554_s3 + $0x130] ss:$36 sps:$4 sm:$0xff]   ;;  %v3598_v57 = vld [vmem:[%s4554_s3 + $0x138] ss:$36 sps:$4 sm:$0xff]   ;;  %v3977_v60 = vld [vmem:[%s3966_s7 + $0x20] sm:$0xff] }
  0x1d   : > { %3220 = vmatprep.subr.bf16.mxu1 %v3531_v13  ;;  %v1430_v7 = vrot.slane %v1428_v3, 1  ;;  %v3586_v15 = vld [vmem:[%s3791_s30 + $0x10] sm:$0xff]   ;;  %v3599_v58 = vld [vmem:[%s4554_s3 + $0x13c] ss:$36 sps:$4 sm:$0xff]   ;;  %v3989_v0 = vld [vmem:[%s3971_s10 + $0x28] sm:$0xff]  ;;  %vm1260_vm1 = vcmp.lt.s32.totalorder %v3977_v60, 8 }
  0x1e   : > { %v1103_v8 = vsel %vm1091_vm0, %v1098_v4, %v1102_v2  ;;  %v1426_v9 = vor.u32 %v1425_v5, %v1421_v62  ;;  %v1112_v29 = vshrl.u32 %v3586_v15, 16  ;;  %v3597_v55 = vld [vmem:[%s4554_s3 + $0xf4] ss:$36 sps:$4 sm:$0xff]   ;;  %v3983_v62 = vld [vmem:[%s3971_s10 + $0x20] sm:$0xff]  ;;  %v3602_v1 = vld [vmem:[%s4554_s3 + $0x1c8] ss:$36 sps:$4 sm:$0xff]  }
  0x1f   : > { %3197 = vmatpush3.bf16.msra.mxu0 %v3530_v12  ;;  %v3571_v12 = vld [vmem:[%s4554_s3 + $0x134] ss:$36 sps:$4 sm:$0xff]   ;;  %v3603_v3 = vld [vmem:[%s4554_s3 + $0x1cc] ss:$36 sps:$4 sm:$0xff]   ;;  %v4003_v4 = vadd.s32 1, %v3989_v0  ;;  %v1240_v5 = vld [vmem:[%s3966_s7] sm:$0xff] }
  0x20   : > { %3221 = vmatpush3.bf16.msra.mxu1 %v3531_v13  ;;  %3198 = vmatprep.subr.bf16.mxu0 %v3532_v14  ;;  %v1431_v11 = vsel %vm1091_vm0, %v1426_v9, %v1430_v7  ;;  %v3572_v13 = vld [vmem:[%s4554_s3 + $0x178] ss:$36 sps:$4 sm:$0xff]   ;;  %v4017_v9 = vld [vmem:[%s3966_s7 + $0x30] sm:$0xff]  ;;  %vm1256_vm7 = vcmp.lt.s32.totalorder %v1240_v5, 8 }
  0x21   : > { %3222 = vmatprep.subr.bf16.mxu1 %v3533_v17  ;;  %vm4560_vm4 = vcmp.lt.s32.totalorder %v4003_v4, 8  ;;  %vm1262_vm9 = vcmp.lt.s32.totalorder %v4017_v9, 8 }
  0x23   : > { %3199 = vmatpush3.bf16.msra.mxu0 %v3532_v14  ;;  %v3573_v14 = vld [vmem:[%s4554_s3 + $0x17c] ss:$36 sps:$4 sm:$0xff]  }
  0x24   : > { %3223 = vmatpush3.bf16.msra.mxu1 %v3533_v17  ;;  %3232 = vmatprep.subr.bf16.mxu0 %v3538_v18  ;;  %v3579_v17 = vld [vmem:[%s4554_s3 + $0x1c4] ss:$36 sps:$4 sm:$0xff]  }
  0x25   : > { %3256 = vmatprep.subr.bf16.mxu1 %v3539_v19 }
  0x26   : > { %3201 = vmatmul.mubr.bf16.vlgmr.msra.gmra.mrb[0].mxu0 %v3536_v20  ;;  %v3580_v20 = vld [vmem:[%s4554_s3 + $0x208] ss:$36 sps:$4 sm:$0xff]  }
  0x27   : > { %3225 = vmatmul.mubr.bf16.vlgmr.msra.gmra.mrb[0].mxu1 %v3537_v21  ;;  %3233 = vmatpush3.bf16.msra.mxu0 %v3538_v18  ;;  %v3587_v18 = vld [vmem:[%s3791_s30 + $0x10] sm:$0xff]   ;;  %v3592_v21 = vld [vmem:[%s3791_s30 + $0x18] sm:$0xff]  }
  0x28   : > { %3257 = vmatpush3.bf16.msra.mxu1 %v3539_v19  ;;  %3234 = vmatprep.subr.bf16.mxu0 %v3540_v22  ;;  %v1108_v19 = vshll.u32 %v3586_v15, 16 }
  0x29   : > { %3258 = vmatprep.subr.bf16.mxu1 %v3541_v23  ;;  %3204 = vmatprep.mubr.bf16.mxu0 %v3550_v24  ;;  %v3593_v24 = vld [vmem:[%s3791_s30 + $0x18] sm:$0xff]  }
  0x2a   : > { %3228 = vmatprep.mubr.bf16.mxu1 %v3551_v25  ;;  %v1432_v25 = vshrl.u32 %v3885_v61, 16  ;;  %v3980_v61 = vld [vmem:[%s3966_s7 + $0x28] sm:$0xff] }
  0x2b   : > { %3235 = vmatpush3.bf16.msra.mxu0 %v3540_v22  ;;  %v3581_v22 = vld [vmem:[%s4554_s3 + $0x20c] ss:$36 sps:$4 sm:$0xff]   ;;  %vm1261_vm2 = vcmp.lt.s32.totalorder %v3980_v61, 8 }
  0x2c   : > { %3259 = vmatpush3.bf16.msra.mxu1 %v3541_v23  ;;  %3236 = vmatprep.subr.bf16.mxu0 %v3542_v26  ;;  %v1104_v23 = vshrl.u32 %v3878_v54, 16  ;;  %v3596_v54 = vld [vmem:[%s4554_s3 + $0xf0] ss:$36 sps:$4 sm:$0xff]   ;;  %vm1285_vm6 = vmand %vm1261_vm2, %vm4560_vm4 }
  0x2d   : > { %3260 = vmatprep.subr.bf16.mxu1 %v3543_v27 }
  0x2e   : > { %3205 = vmatmul.mubr.bf16.gmra.mrb[4].mxu0 %v3552_v28  ;;  %v3588_v28 = vld [vmem:[%s4554_s3 + $0x18] ss:$36 sps:$4 sm:$0xff]  }
  0x2f   : > { %3237 = vmatpush3.bf16.msra.mxu0 %v3542_v26  ;;  %3229 = vmatmul.mubr.bf16.gmra.mrb[4].mxu1 %v3553_v30  ;;  %v1436_v26 = vshll.u32 %v3587_v18, 16  ;;  %v1116_v30 = vshll.u32 %v3592_v21, 16 }
  0x30   : > { %3261 = vmatpush3.bf16.msra.mxu1 %v3543_v27  ;;  %3238 = vmatprep.subr.bf16.mxu0 %v3544_v31  ;;  %v1110_v27 = vrot.slane %v1108_v19, 1  ;;  %v4047_v19 = vld [vmem:[%s3791_s30 + $0x4] sm:$0xff]  }
  0x31   : > { %3262 = vmatprep.subr.bf16.mxu1 %v3545_v32  ;;  %3248 = vmatprep.mubr.bf16.mxu0 %v3558_v33  ;;  %v1440_v33 = vshrl.u32 %v3587_v18, 16  ;;  %v4044_v18 = vld [vmem:[%s3971_s10 + $0x10] sm:$0xff] }
  0x32   : > { %3272 = vmatprep.mubr.bf16.mxu1 %v3559_v34  ;;  %v1444_v34 = vshll.u32 %v3593_v24, 16 }
  0x33   : > { %3239 = vmatpush3.bf16.msra.mxu0 %v3544_v31  ;;  %v1106_v31 = vor.u32 %v1104_v23, %v1102_v2  ;;  %v3996_v2 = vadd.s32 1, %v3983_v62  ;;  %v3604_v23 = vld [vmem:[%s4554_s3 + $0x210] ss:$36 sps:$4 sm:$0xff]  }
  0x34   : > { %3263 = vmatpush3.bf16.msra.mxu1 %v3545_v32  ;;  %3240 = vmatprep.subr.bf16.mxu0 %v3546_v35  ;;  %v3589_v32 = vld [vmem:[%s4554_s3 + $0x1c] ss:$36 sps:$4 sm:$0xff]  }
  0x35   : > { %3264 = vmatprep.subr.bf16.mxu1 %v3547_v36  ;;  %vm1276_vm3 = vcmp.lt.s32.totalorder %v3996_v2, 8  ;;  %v2450_v2 = vld [vmem:[%s3966_s7 + $0x30] sm:$0x7f] }
  0x36   : > { %vm1284_vm5 = vmand %vm1260_vm1, %vm1276_vm3 }
  0x37   : > { %3241 = vmatpush3.bf16.msra.mxu0 %v3546_v35  ;;  %v1434_v35 = vor.u32 %v1432_v25, %v1430_v7  ;;  %v4010_v7 = vld [vmem:[%s3971_s10 + $0x8] sm:$0xff] }
  0x38   : > { %3265 = vmatpush3.bf16.msra.mxu1 %v3547_v36  ;;  %3242 = vmatprep.subr.bf16.mxu0 %v3548_v37  ;;  %v1438_v36 = vrot.slane %v1436_v26, 1  ;;  %v1243_v26 = vld [vmem:[%s3966_s7 + $0x18] sm:$0xff] }
  0x39   : > { %3266 = vmatprep.subr.bf16.mxu1 %v3549_v38 }
  0x3b   : > { %3243 = vmatpush3.bf16.msra.mxu0 %v3548_v37  ;;  %v1114_v37 = vor.u32 %v1112_v29, %v1110_v27 }
  0x3c   : > { %3267 = vmatpush3.bf16.msra.mxu1 %v3549_v38  ;;  %3244 = vmatprep.subr.bf16.mxu0 %v3554_v39  ;;  %v1118_v38 = vrot.slane %v1116_v30, 1 }
  0x3d   : > { %3268 = vmatprep.subr.bf16.mxu1 %v3555_v40 }
  0x3f   : > { %3245 = vmatpush3.bf16.msra.mxu0 %v3554_v39  ;;  %v1111_v39 = vsel %vm1091_vm0, %v1106_v31, %v1110_v27  ;;  %v3605_v27 = vld [vmem:[%s4554_s3 + $0x214] ss:$36 sps:$4 sm:$0xff]   ;;  %v4083_v31 = vadd.s32 1, %v1240_v5 }
  0x40   : > { %3269 = vmatpush3.bf16.msra.mxu1 %v3555_v40  ;;  %3246 = vmatprep.subr.bf16.mxu0 %v3556_v41  ;;  %v1442_v40 = vor.u32 %v1440_v33, %v1438_v36  ;;  %v2300_v33 = vshll.u32 %v4047_v19, 16 }
  0x41   : > { %3270 = vmatprep.subr.bf16.mxu1 %v3557_v42 }
  0x43   : > { %3247 = vmatpush3.bf16.msra.mxu0 %v3556_v41  ;;  %v1446_v41 = vrot.slane %v1444_v34, 1  ;;  %v4090_v34 = vld [vmem:[%s3791_s30 + $0x14] sm:$0xff]  }
  0x44   : > { %3271 = vmatpush3.bf16.msra.mxu1 %v3557_v42  ;;  %3280 = vmatprep.subr.bf16.mxu0 %v3562_v44  ;;  %v1439_v42 = vsel %vm1091_vm0, %v1434_v35, %v1438_v36  ;;  %v3610_v36 = vld [vmem:[%s4554_s3 + $0x20] ss:$36 sps:$4 sm:$0xff]  }
  0x45   : > { %3304 = vmatprep.subr.bf16.mxu1 %v3563_v46 }
  0x46   : > { %3249 = vmatmul.mubr.bf16.vlgmr.msra.gmra.mrb[8].mxu0 %v3560_v43  ;;  %v3590_v43 = vld [vmem:[%s4554_s3 + $0x60] ss:$36 sps:$4 sm:$0xff]  }
  0x47   : > { %3273 = vmatmul.mubr.bf16.vlgmr.msra.gmra.mrb[8].mxu1 %v3561_v45  ;;  %3281 = vmatpush3.bf16.msra.mxu0 %v3562_v44  ;;  %v3591_v44 = vld [vmem:[%s4554_s3 + $0x64] ss:$36 sps:$4 sm:$0xff]   ;;  %v1119_v45 = vsel %vm1091_vm0, %v1114_v37, %v1118_v38 }
  0x48   : > { %3305 = vmatpush3.bf16.msra.mxu1 %v3563_v46  ;;  %3282 = vmatprep.subr.bf16.mxu0 %v3564_v47  ;;  %v1120_v46 = vshrl.u32 %v3592_v21, 16 }
  0x49   : > { %3306 = vmatprep.subr.bf16.mxu1 %v3565_v48  ;;  %3252 = vmatprep.mubr.bf16.mxu0 %v3574_v49  ;;  %v3594_v49 = vld [vmem:[%s4554_s3 + $0xa8] ss:$36 sps:$4 sm:$0xff]  }
  0x4a   : > { %3276 = vmatprep.mubr.bf16.mxu1 %v3575_v50  ;;  %v3595_v50 = vld [vmem:[%s4554_s3 + $0xac] ss:$36 sps:$4 sm:$0xff]  }
  0x4b   : > { %3283 = vmatpush3.bf16.msra.mxu0 %v3564_v47  ;;  %v1447_v47 = vsel %vm1091_vm0, %v1442_v40, %v1446_v41 }
  0x4c   : > { %3307 = vmatpush3.bf16.msra.mxu1 %v3565_v48  ;;  %3284 = vmatprep.subr.bf16.mxu0 %v3566_v51  ;;  %v1448_v48 = vshrl.u32 %v3593_v24, 16 }
  0x4d   : > { %3308 = vmatprep.subr.bf16.mxu1 %v3567_v53 }
  0x4e   : > { %3253 = vmatmul.mubr.bf16.gmra.mrb[12].mxu0 %v3576_v56  ;;  %v1450_v52 = vor.u32 %v1448_v48, %v1446_v41  ;;  %v3607_v56 = vld [vmem:[%s3791_s30 + $0x4] sm:$0xff]   ;;  %v4117_v41 = vadd.s32 1, %v3977_v60  ;;  %v3613_v60 = vld [vmem:[%s3791_s30 + $0x14] sm:$0xff]  }
  0x4f   : > { %3285 = vmatpush3.bf16.msra.mxu0 %v3566_v51  ;;  %3277 = vmatmul.mubr.bf16.gmra.mrb[12].mxu1 %v3577_v59  ;;  %v1122_v51 = vor.u32 %v1120_v46, %v1118_v38  ;;  %v3600_v59 = vld [vmem:[%s4554_s3 + $0x180] ss:$36 sps:$4 sm:$0xff]  }
  0x50   : > { %3309 = vmatpush3.bf16.msra.mxu1 %v3567_v53  ;;  %3286 = vmatprep.subr.bf16.mxu0 %v3568_v63  ;;  %v3606_v53 = vld [vmem:[%s3791_s30 + $0x4] sm:$0xff]  }
  0x51   : > { %3310 = vmatprep.subr.bf16.mxu1 %v3569_v6  ;;  %3296 = vmatprep.mubr.bf16.mxu0 %v1103_v8  ;;  %v4014_v8 = vld [vmem:[%s3966_s7 + $0x8] sm:$0xff] }
  0x52   : > { %3320 = vmatprep.mubr.bf16.mxu1 %v1431_v11  ;;  %v1247_v11 = vld [vmem:[%s3966_s7 + $0x38] sm:$0x7f]  ;;  %vm1257_vm8 = vcmp.lt.s32.totalorder %v4014_v8, 8 }
  0x53   : > { %3287 = vmatpush3.bf16.msra.mxu0 %v3568_v63  ;;  %v3601_v63 = vld [vmem:[%s4554_s3 + $0x184] ss:$36 sps:$4 sm:$0xff]   ;;  %vm1263_vm13 = vcmp.lt.s32.totalorder %v1247_v11, 8  ;;  %v3616_v11 = vld [vmem:[%s4554_s3 + $0xb0] ss:$36 sps:$4 sm:$0xff]  }
  0x54   : > { %3311 = vmatpush3.bf16.msra.mxu1 %v3569_v6  ;;  %3288 = vmatprep.subr.bf16.mxu0 %v3570_v10  ;;  %v4007_v6 = vld [vmem:[%s3971_s10] sm:$0xff] }
  0x55   : > { %3312 = vmatprep.subr.bf16.mxu1 %v3571_v12  ;;  %v4035_v15 = vadd.s32 1, %v4007_v6 }
  0x57   : > { %3289 = vmatpush3.bf16.msra.mxu0 %v3570_v10  ;;  %v4020_v10 = vld [vmem:[%s3971_s10 + $0x30] sm:$0xff]  ;;  %vm1272_vm10 = vcmp.lt.s32.totalorder %v4035_v15, 8 }
  0x58   : > { %3313 = vmatpush3.bf16.msra.mxu1 %v3571_v12  ;;  %3290 = vmatprep.subr.bf16.mxu0 %v3572_v13  ;;  %v1255_v12 = vld [vmem:[%s3971_s10 + $0x38] sm:$0x7f]  ;;  %v1270_v21 = vadd.s32 1, %v4020_v10  ;;  %vm1280_vm12 = vmand %vm1256_vm7, %vm1272_vm10  ;;  %vm2171_vm4 = vcmp.lt.s32.totalorder %v4020_v10, 8 }
  0x59   : > { %3314 = vmatprep.subr.bf16.mxu1 %v3573_v14  ;;  %v1271_v25 = vadd.s32 1, %v1255_v12 }
  0x5a   : > { %vm1278_vm14 = vcmp.lt.s32.totalorder %v1270_v21, 8  ;;  %v2157_v21 = vadd.s32 1, %v4017_v9 }
  0x5b   : > { %3291 = vmatpush3.bf16.msra.mxu0 %v3572_v13  ;;  %v3699_v13 = vmov 0.0   ;;  %vm1279_vm2 = vcmp.lt.s32.totalorder %v1271_v25, 8 }
  0x5c   : > { %3315 = vmatpush3.bf16.msra.mxu1 %v3573_v14  ;;  %3292 = vmatprep.subr.bf16.mxu0 %v3578_v16  ;;  %v2960_v14 = vsel %vm1284_vm5, 1.0, %v3699_v13  ;;  %v2956_v29 = vsel %vm1280_vm12, 1.0, %v3699_v13  ;;  %vm1286_vm5 = vmand %vm1262_vm9, %vm1278_vm14  ;;  %vm2158_vm14 = vcmp.lt.s32.totalorder %v4083_v31, 8 }
  0x5d   : > { %3316 = vmatprep.subr.bf16.mxu1 %v3579_v17  ;;  %v4104_v38 = vsel %vm1286_vm5, 1.0, %v3699_v13 }
  0x5f   : > { %3293 = vmatpush3.bf16.msra.mxu0 %v3578_v16  ;;  %v4038_v16 = vadd.s32 1, %v4010_v7 }
  0x60   : > { %3317 = vmatpush3.bf16.msra.mxu1 %v3579_v17  ;;  %3294 = vmatprep.subr.bf16.mxu0 %v3580_v20  ;;  %v4041_v17 = vld [vmem:[%s3966_s7 + $0x10] sm:$0xff] }
  0x61   : > { %3318 = vmatprep.subr.bf16.mxu1 %v3581_v22  ;;  %vm1273_vm11 = vcmp.lt.s32.totalorder %v4038_v16, 8  ;;  %vm1258_vm15 = vcmp.lt.s32.totalorder %v4041_v17, 8  ;;  %v3620_v16 = vld [vmem:[%s4554_s3 + $0x1d0] ss:$36 sps:$4 sm:$0xff]  }
  0x62   : > { %vm1281_vm1 = vmand %vm1257_vm8, %vm1273_vm11 }
  0x63   : > { %3295 = vmatpush3.bf16.msra.mxu0 %v3580_v20  ;;  %v2961_v20 = vsel %vm1285_vm6, 1.0, %v3699_v13  ;;  %v2957_v35 = vsel %vm1281_vm1, 1.0, %v3699_v13  ;;  %vm1259_vm6 = vcmp.lt.s32.totalorder %v1243_v26, 8  ;;  %vm1287_vm8 = vmand %vm1263_vm13, %vm1279_vm2  ;;  %vm2165_vm13 = vcmp.lt.s32.totalorder %v4007_v6, 8 }
  0x64   : > { %3319 = vmatpush3.bf16.msra.mxu1 %v3581_v22  ;;  %3328 = vmatprep.subr.bf16.mxu0 %v3588_v28  ;;  %v4054_v22 = vld [vmem:[%s3971_s10 + $0x18] sm:$0xff]  ;;  %v4059_v24 = vpack.i.bf16 %v2961_v20, %v2960_v14  ;;  %v4099_v37 = vpack.i.bf16 %v2957_v35, %v2956_v29  ;;  %v2963_v40 = vsel %vm1287_vm8, 1.0, %v3699_v13  ;;  %vm2169_vm8 = vcmp.lt.s32.totalorder %v3983_v62, 8 }
  0x65   : > { %3352 = vmatprep.subr.bf16.mxu1 %v3589_v32  ;;  %v4081_v30 = vadd.s32 1, %v4054_v22  ;;  %vm2168_vm5 = vcmp.lt.s32.totalorder %v4054_v22, 8  ;;  %v3614_v62 = vld [vmem:[%s3791_s30 + $0x1c] ss:$0 sps:$4 sm:$0xff]  }
  0x66   : > { %3297 = vmatmul.mubr.bf16.vlgmr.msra.gmra.mrb[16].mxu0 %v1111_v39  ;;  %3439 = vperm.xlu1 %3437, %v4059_v24   ;;  %v4107_v39 = vadd.s32 1, %v1243_v26  ;;  %v3615_v22 = vld [vmem:[%s3791_s30 + $0x1c] ss:$0 sps:$4 sm:$0xff]  }
  0x67   : > { %3321 = vmatmul.mubr.bf16.vlgmr.msra.gmra.mrb[16].mxu1 %v1439_v42  ;;  %3329 = vmatpush3.bf16.msra.mxu0 %v3588_v28  ;;  %v4072_v28 = vadd.s32 1, %v4044_v18  ;;  %vm4558_vm9 = vcmp.lt.s32.totalorder %v4081_v30, 8  ;;  %v1583_v42 = vld [vmem:[%s3971_s10 + $0x38] sm:$0x7f] }
  0x68   : > { %3353 = vmatpush3.bf16.msra.mxu1 %v3589_v32  ;;  %3330 = vmatprep.subr.bf16.mxu0 %v3590_v43  ;;  %v4086_v32 = vld [vmem:[%s3791_s30 + $0xc] sm:$0xff]   ;;  %vm1283_vm1 = vmand %vm1259_vm6, %vm4558_vm9  ;;  %vm4557_vm2 = vcmp.lt.s32.totalorder %v4107_v39, 8  ;;  %vm2162_vm6 = vcmp.lt.s32.totalorder %v4117_v41, 8  ;;  %vm2167_vm9 = vcmp.lt.s32.totalorder %v4044_v18, 8 }
  0x69   : > { %3354 = vmatprep.subr.bf16.mxu1 %v3591_v44  ;;  %3300 = vmatprep.mubr.bf16.mxu0 %v1119_v45  ;;  %vm4559_vm7 = vcmp.lt.s32.totalorder %v4072_v28, 8  ;;  %v3443_v45 = vpack.i.bf16 %v2963_v40, %v4104_v38  ;;  %v2305_v48 = vshll.u32 %v4086_v32, 16  ;;  %v2457_v41 = vld [vmem:[%s3971_s10 + $0x30] sm:$0x7f] }
  0x6a   : > { %3324 = vmatprep.mubr.bf16.mxu1 %v1447_v47  ;;  %vm1282_vm12 = vmand %vm1258_vm15, %vm4559_vm7  ;;  %3428 = vperm.xlu0 %3426, %v4099_v37   ;;  %v2298_v47 = vshrl.u32 %v4047_v19, 16  ;;  %v4192_v19 = vadd.s32 1, %v3980_v61 }
  0x6b   : > { %3331 = vmatpush3.bf16.msra.mxu0 %v3590_v43  ;;  %v3608_v43 = vld [vmem:[%s3791_s30 + $0xc] sm:$0xff]   ;;  %v2958_v46 = vsel %vm1282_vm12, 1.0, %v3699_v13  ;;  %vm4143_vm15 = vmand %vm2158_vm14, %vm2165_vm13  ;;  %3444 = vperm.xlu1 %3437, %v3443_v45   ;;  %v4179_v12 = vrot.slane %v2305_v48, 1  ;;  %v2478_v48 = vadd.s32 1, %v2457_v41 }
  0x6c   : > { %3355 = vmatpush3.bf16.msra.mxu1 %v3591_v44  ;;  %3332 = vmatprep.subr.bf16.mxu0 %v3594_v49  ;;  %v3609_v44 = vld [vmem:[%s3791_s30 + $0xc] sm:$0xff]   ;;  %v4166_v6 = vsel %vm4143_vm15, 1.0, %v3699_v13  ;;  %vm4172_vm12 = vmand %vm4557_vm2, %vm2168_vm5  ;;  %vm2166_vm2 = vcmp.lt.s32.totalorder %v4010_v7, 8 }
  0x6d   : > { %3356 = vmatprep.subr.bf16.mxu1 %v3595_v50  ;;  %vm4185_vm13 = vmand %vm2162_vm6, %vm2169_vm8  ;;  %v3463_v20 = vpack.i.bf16 %v4166_v6, %v4104_v38  ;;  %v3018_v61 = vsel %vm4172_vm12, 1.0, %v3699_v13 }
  0x6e   : > { %3301 = vmatmul.mubr.bf16.gmra.mrb[20].mxu0 %v1122_v51  ;;  %v2959_v51 = vsel %vm1283_vm1, 1.0, %v3699_v13  ;;  %v3019_v26 = vsel %vm4185_vm13, 1.0, %v3699_v13 }
  0x6f   : > { %3325 = vmatmul.mubr.bf16.gmra.mrb[20].mxu1 %v1450_v52  ;;  %3333 = vmatpush3.bf16.msra.mxu0 %v3594_v49  ;;  %v4131_v49 = vld [vmem:[%s3791_s30 + $0x1c] ss:$0 sps:$4 sm:$0xff]   ;;  %v3611_v52 = vld [vmem:[%s4554_s3 + $0x68] ss:$36 sps:$4 sm:$0xff]  }
  0x70   : > { %3357 = vmatpush3.bf16.msra.mxu1 %v3595_v50  ;;  %3334 = vmatprep.subr.bf16.mxu0 %v3596_v54  ;;  %v2313_v50 = vshll.u32 %v4090_v34, 16  ;;  %v2321_v5 = vshll.u32 %v4131_v49, 16 }
  0x71   : > { %3358 = vmatprep.subr.bf16.mxu1 %v3597_v55  ;;  %3344 = vmatprep.mubr.bf16.mxu0 %v3606_v53  ;;  %v3612_v53 = vld [vmem:[%s3791_s30 + $0x14] sm:$0xff]  }
  0x72   : > { %3368 = vmatprep.mubr.bf16.mxu1 %v3607_v56  ;;  %v1599_v56 = vadd.s32 1, %v1583_v42  ;;  %v4202_v25 = vrot.slane %v2321_v5, 1 }
  0x73   : > { %3335 = vmatpush3.bf16.msra.mxu0 %v3596_v54  ;;  %v3432_v54 = vpack.i.bf16 %v2959_v51, %v2958_v46 }
  0x74   : > { %3359 = vmatpush3.bf16.msra.mxu1 %v3597_v55  ;;  %3336 = vmatprep.subr.bf16.mxu0 %v3598_v57  ;;  %vm1607_vm15 = vcmp.lt.s32.totalorder %v1599_v56, 8 }
  0x75   : > { %3360 = vmatprep.subr.bf16.mxu1 %v3599_v58  ;;  %3433 = vperm.xlu0 %3426, %v3432_v54  }
  0x76   : > { %3454 = vperm.xlu1 %3437, %v3432_v54  }
  0x77   : > { %3337 = vmatpush3.bf16.msra.mxu0 %v3598_v57  ;;  %v2302_v57 = vrot.slane %v2300_v33, 1 }
  0x78   : > { %3361 = vmatpush3.bf16.msra.mxu1 %v3599_v58  ;;  %3338 = vmatprep.subr.bf16.mxu0 %v3600_v59  ;;  %v1575_v58 = vld [vmem:[%s3966_s7 + $0x38] sm:$0x7f] }
  0x79   : > { %3362 = vmatprep.subr.bf16.mxu1 %v3601_v63  ;;  %vm1591_vm1 = vcmp.lt.s32.totalorder %v1575_v58, 8  ;;  %3449 = vperm.xlu0 %3426, %v4099_v37  }
  0x7a   : > { %vm4213_vm7 = vmand %vm1591_vm1, %vm1607_vm15  ;;  %vm2163_vm1 = vcmp.lt.s32.totalorder %v4192_v19, 8  ;;  %vm2170_vm15 = vcmp.lt.s32.totalorder %v3989_v0, 8  ;;  %3464 = vperm.xlu1 %3437, %v3463_v20   ;;  %v3619_v0 = vld [vmem:[%s4554_s3 + $0x188] ss:$36 sps:$4 sm:$0xff]  }
  0x7b   : > { %3339 = vmatpush3.bf16.msra.mxu0 %v3600_v59  ;;  %v4153_v59 = vadd.s32 1, %v4014_v8  ;;  %v2983_v35 = vsel %vm4213_vm7, 1.0, %v3699_v13 }
  0x7c   : > { %3363 = vmatpush3.bf16.msra.mxu1 %v3601_v63  ;;  %3340 = vmatprep.subr.bf16.mxu0 %v3602_v1  ;;  %v4157_v63 = vadd.s32 1, %v4041_v17  ;;  %v2303_v17 = vor.u32 %v2302_v57, %v2298_v47  ;;  %v3483_v38 = vpack.i.bf16 %v4166_v6, %v2983_v35 }
  0x7d   : > { %3364 = vmatprep.subr.bf16.mxu1 %v3603_v3  ;;  %vm2159_vm5 = vcmp.lt.s32.totalorder %v4153_v59, 8  ;;  %3459 = vperm.xlu0 %3426, %v4059_v24  }
  0x7e   : > { %vm2160_vm8 = vcmp.lt.s32.totalorder %v4157_v63, 8  ;;  %vm4224_vm12 = vmand %vm2159_vm5, %vm2166_vm2  ;;  %v2308_v7 = vsel %vm1091_vm0, %v2303_v17, %v4179_v12  ;;  %vm2164_vm2 = vcmp.lt.s32.totalorder %v2157_v21, 8 }
  0x7f   : > { %3341 = vmatpush3.bf16.msra.mxu0 %v3602_v1  ;;  %v4159_v1 = vrot.slane %v2313_v50, 1  ;;  %vm4232_vm13 = vmand %vm2160_vm8, %vm2167_vm9  ;;  %v3016_v37 = vsel %vm4224_vm12, 1.0, %v3699_v13 }
  0x80   : > { %3365 = vmatpush3.bf16.msra.mxu1 %v3603_v3  ;;  %3342 = vmatprep.subr.bf16.mxu0 %v3604_v23  ;;  %v2317_v3 = vshrl.u32 %v4090_v34, 16  ;;  %v3473_v34 = vpack.i.bf16 %v3019_v26, %v3018_v61  ;;  %v3017_v10 = vsel %vm4232_vm13, 1.0, %v3699_v13  ;;  %vm2177_vm9 = vmand %vm2163_vm1, %vm2170_vm15  ;;  %vm4576_vm13 = vcmp.lt.s32.totalorder %v4107_v39, 8 }
  0x81   : > { %3366 = vmatprep.subr.bf16.mxu1 %v3605_v27  ;;  %vm2178_vm7 = vmand %vm2164_vm2, %vm2171_vm4  ;;  %v3468_v40 = vpack.i.bf16 %v3017_v10, %v3016_v37  ;;  %v3020_v42 = vsel %vm2177_vm9, 1.0, %v3699_v13  ;;  %vm2485_vm15 = vcmp.lt.s32.totalorder %v2478_v48, 8  ;;  %v2604_v61 = vlaneseq }
  0x82   : > { %3474 = vperm.xlu1 %3437, %v3473_v34   ;;  %vm2486_vm12 = vmand %vm2158_vm14, %vm1272_vm10 }
  0x83   : > { %3343 = vmatpush3.bf16.msra.mxu0 %v3604_v23  ;;  %v2319_v23 = vor.u32 %v2317_v3, %v4159_v1  ;;  %vm2487_vm4 = vmand %vm2159_vm5, %vm1273_vm11  ;;  %3469 = vperm.xlu0 %3426, %v3468_v40   ;;  %v3034_v24 = vsel %vm2486_vm12, 1.0, %v3699_v13  ;;  %vm4573_vm11 = vcmp.lt.s32.totalorder %v4003_v4, 8  ;;  %v3621_v4 = vld [vmem:[%s4554_s3 + $0x218] ss:$36 sps:$4 sm:$0xff]   ;;  %vm4575_vm5 = vcmp.lt.s32.totalorder %v4081_v30, 8 }
  0x84   : > { %3367 = vmatpush3.bf16.msra.mxu1 %v3605_v27  ;;  %3376 = vmatprep.subr.bf16.mxu0 %v3610_v36  ;;  %v3617_v27 = vld [vmem:[%s4554_s3 + $0xf8] ss:$36 sps:$4 sm:$0xff]   ;;  %v3035_v31 = vsel %vm2487_vm4, 1.0, %v3699_v13  ;;  %vm2490_vm10 = vmand %vm2162_vm6, %vm1276_vm3  ;;  %vm4574_vm3 = vcmp.lt.s32.totalorder %v4072_v28, 8  ;;  %v4353_v33 = vshrl.u32 %v2604_v61, 7 }
  0x85   : > { %3400 = vmatprep.subr.bf16.mxu1 %v3610_v36  ;;  %v2324_v18 = vsel %vm1091_vm0, %v2319_v23, %v4202_v25  ;;  %vm2491_vm14 = vmand %vm2163_vm1, %vm4573_vm11  ;;  %v3503_v45 = vpack.i.bf16 %v3035_v31, %v3034_v24  ;;  %v3038_v46 = vsel %vm2490_vm10, 1.0, %v3699_v13 }
  0x86   : > { %3345 = vmatmul.mubr.bf16.vlgmr.msra.gmra.mrb[24].mxu0 %v3608_v43  ;;  %v3021_v43 = vsel %vm2178_vm7, 1.0, %v3699_v13  ;;  %3484 = vperm.xlu1 %3437, %v3483_v38   ;;  %v3039_v47 = vsel %vm2491_vm14, 1.0, %v3699_v13  ;;  %vm2488_vm6 = vmand %vm2160_vm8, %vm4574_vm3  ;;  %v2606_v10 = vsub.s32 0, %v4353_v33  ;;  %v4369_v38 = vld [vmem:[%s4555_s4] sm:$0xf]  ;;  %v2610_v31 = vsub.s32 1, %v4353_v33 }
  0x87   : > { %3369 = vmatmul.mubr.bf16.vlgmr.msra.gmra.mrb[24].mxu1 %v3609_v44  ;;  %3377 = vmatpush3.bf16.msra.mxu0 %v3610_v36  ;;  %v3478_v15 = vpack.i.bf16 %v3021_v43, %v3020_v42  ;;  %v2309_v44 = vshrl.u32 %v4086_v32, 16  ;;  %vm2489_vm1 = vmand %vm4576_vm13, %vm4575_vm5  ;;  %v2464_v32 = vadd.s32 1, %v2450_v2  ;;  %v3513_v50 = vpack.i.bf16 %v3039_v47, %v3038_v46 }
  0x88   : > { %3408 = vmatpush3.bf16.msra.mxu1 %v3610_v36  ;;  %3378 = vmatprep.subr.bf16.mxu0 %v3611_v52  ;;  %v3618_v36 = vld [vmem:[%s4554_s3 + $0x140] ss:$36 sps:$4 sm:$0xff]   ;;  %v3036_v28 = vsel %vm2488_vm6, 1.0, %v3699_v13  ;;  %v2614_v2 = vsub.s32 2, %v4353_v33  ;;  %v4383_v41 = vrot.slane %v4369_v38, %v2610_v31 }
  0x89   : > { %3401 = vmatprep.subr.bf16.mxu1 %v3611_v52  ;;  %3348 = vmatprep.mubr.bf16.mxu0 %v3612_v53  ;;  %v2311_v51 = vor.u32 %v2309_v44, %v4179_v12  ;;  %v3037_v53 = vsel %vm2489_vm1, 1.0, %v3699_v13  ;;  %vm2471_vm8 = vcmp.lt.s32.totalorder %v2464_v32, 8 }
  0x8a   : > { %3372 = vmatprep.mubr.bf16.mxu1 %v3613_v60  ;;  %3494 = vperm.xlu1 %3437, %v3473_v34   ;;  %v3508_v54 = vpack.i.bf16 %v3037_v53, %v3036_v28  ;;  %vm2492_vm2 = vmand %vm2471_vm8, %vm2485_vm15 }
  0x8b   : > { %3379 = vmatpush3.bf16.msra.mxu0 %v3611_v52  ;;  %3479 = vperm.xlu0 %3426, %v3478_v15   ;;  %v2316_v39 = vsel %vm1091_vm0, %v2311_v51, %v4159_v1 }
  0x8c   : > { %3409 = vmatpush3.bf16.msra.mxu1 %v3611_v52  ;;  %3380 = vmatprep.subr.bf16.mxu0 %v3616_v11  ;;  %v2325_v52 = vshrl.u32 %v4131_v49, 16  ;;  %v3040_v49 = vsel %vm2492_vm2, 1.0, %v3699_v13 }
  0x8d   : > { %3402 = vmatprep.subr.bf16.mxu1 %v3616_v11 }
  0x8e   : > { %3349 = vmatmul.mubr.bf16.gmra.mrb[28].mxu0 %v3614_v62  ;;  %3504 = vperm.xlu1 %3437, %v3503_v45   ;;  %v2327_v30 = vor.u32 %v2325_v52, %v4202_v25 }
  0x8f   : > { %3373 = vmatmul.mubr.bf16.gmra.mrb[28].mxu1 %v3615_v22  ;;  %3381 = vmatpush3.bf16.msra.mxu0 %v3616_v11 }
  0x90   : > { %3410 = vmatpush3.bf16.msra.mxu1 %v3616_v11  ;;  %3382 = vmatprep.subr.bf16.mxu0 %v3617_v27 }
  0x91   : > { %3403 = vmatprep.subr.bf16.mxu1 %v3617_v27  ;;  %3392 = vmatprep.mubr.bf16.mxu0 %v2308_v7 }
  0x92   : > { %3396 = vmatprep.mubr.bf16.mxu1 %v2324_v18  ;;  %3489 = vperm.xlu0 %3426, %v3468_v40  }
  0x93   : > { %3383 = vmatpush3.bf16.msra.mxu0 %v3617_v27  ;;  %3514 = vperm.xlu1 %3437, %v3513_v50  }
  0x94   : > { %3411 = vmatpush3.bf16.msra.mxu1 %v3617_v27  ;;  %3384 = vmatprep.subr.bf16.mxu0 %v3618_v36 }
  0x95   : > { %3404 = vmatprep.subr.bf16.mxu1 %v3618_v36 }
  0x96   : > { %3499 = vperm.xlu0 %3426, %v3478_v15  }
  0x97   : > { %3385 = vmatpush3.bf16.msra.mxu0 %v3618_v36 }
  0x98   : > { %3412 = vmatpush3.bf16.msra.mxu1 %v3618_v36  ;;  %3386 = vmatprep.subr.bf16.mxu0 %v3619_v0 }
  0x99   : > { %3405 = vmatprep.subr.bf16.mxu1 %v3619_v0 }
  0x9a   : > { %3509 = vperm.xlu0 %3426, %v3508_v54  }
  0x9b   : > { %3387 = vmatpush3.bf16.msra.mxu0 %v3619_v0 }
  0x9c   : > { %3413 = vmatpush3.bf16.msra.mxu1 %v3619_v0  ;;  %3388 = vmatprep.subr.bf16.mxu0 %v3620_v16  ;;  %v4372_v0 = vrot.slane %v4369_v38, %v2606_v10 }
  0x9d   : > { %3406 = vmatprep.subr.bf16.mxu1 %v3620_v16 }
  0x9e   : > { %2546 = vperm.xlu0 %3426, %v3040_v49  }
  0x9f   : > { %3389 = vmatpush3.bf16.msra.mxu0 %v3620_v16 }
  0xa0   : > { %3414 = vmatpush3.bf16.msra.mxu1 %v3620_v16  ;;  %3390 = vmatprep.subr.bf16.mxu0 %v3621_v4 }
  0xa1   : > { %3407 = vmatprep.subr.bf16.mxu1 %v3621_v4 }
  0xa3   : > { %3391 = vmatpush3.bf16.msra.mxu0 %v3621_v4 }
  0xa4   : > { %3415 = vmatpush3.bf16.msra.mxu1 %v3621_v4 }
  0xa6   : > { %3393 = vmatmul.mubr.bf16.vlgmr.msra.gmra.mrb[32].mxu0 %v2316_v39 }
  0xa7   : > { %3397 = vmatmul.mubr.bf16.vlgmr.msra.gmra.mrb[32].mxu1 %v2327_v30 }
  0xe5   : > { %v4345_v26 = vpop.permute.xlu1 %3439 }
  0xe6   : > { %v3442_v4 = vunpack.i.h.bf16 %v4345_v26  ;;  %v3441_v32 = vunpack.i.l.bf16 %v4345_v26 }
  0xe9   : > { %v3429_v40 = vpop.permute.xlu0 %3428 }
  0xea   : > { %v4363_v37 = vpop.permute.xlu1 %3444  ;;  %v3431_v50 = vunpack.i.h.bf16 %v3429_v40  ;;  %v3430_v51 = vunpack.i.l.bf16 %v3429_v40 }
  0xeb   : > { %v3447_v54 = vunpack.i.h.bf16 %v4363_v37 }
  0xf4   : > { %v3434_v15 = vpop.permute.xlu0 %3433 }
  0xf5   : > { %v3455_v42 = vpop.permute.xlu1 %3454  ;;  %v3435_v48 = vunpack.i.l.bf16 %v3434_v15  ;;  %v3436_v53 = vunpack.i.h.bf16 %v3434_v15 }
  0xf6   : > { %v3456_v52 = vunpack.i.l.bf16 %v3455_v42  ;;  %v3457_v49 = vunpack.i.h.bf16 %v3455_v42 }
  0xf8   : > { %v3450_v47 = vpop.permute.xlu0 %3449 }
  0xf9   : > { %v3202_v55 = vpop.f32.mrb[0].mxu0  ;;  %v4379_v45 = vpop.permute.xlu1 %3464  ;;  %v3451_v30 = vunpack.i.l.bf16 %v3450_v47 }
  0xfa   : > { %v4311_v56 = vpop.f32.mrb[0].mxu1  ;;  %v437_v57 = vpop.f32.mrb[1].mxu0  ;;  %v2632_v43 = vadd.f32 %v3202_v55, %v4372_v0 }
  0xfb   : > { %v4313_v58 = vpop.f32.mrb[1].mxu1  ;;  %v3203_v59 = vpop.f32.mrb[2].mxu0  ;;  %v2624_v24 = vadd.f32 %v4372_v0, %v437_v57  ;;  %v3446_v57 = vunpack.i.l.bf16 %v4363_v37 }
  0xfc   : > { %v4315_v60 = vpop.f32.mrb[2].mxu1  ;;  %v440_v63 = vpop.f32.mrb[3].mxu0  ;;  %v2636_v16 = vadd.f32 %v3203_v59, %v4372_v0  ;;  %3626 = vtanh.f32 %v2632_v43  ;;  %v3452_v59 = vunpack.i.h.bf16 %v3450_v47 }
  0xfd   : > { %v4317_v1 = vpop.f32.mrb[3].mxu1  ;;  %v2628_v44 = vadd.f32 %v4372_v0, %v440_v63  ;;  %3628 = vtanh.f32 %v2624_v24 }
  0xfe   : > { %3630 = vtanh.f32 %v2636_v16 }
  0xff   : > { %3632 = vtanh.f32 %v2628_v44 }
 0x101   : > { %v3206_v3 = vpop.f32.mrb[4].mxu0  ;;  %v4391_v39 = vpop.permute.xlu1 %3474 }
 0x102   : > { %v4319_v5 = vpop.f32.mrb[4].mxu1  ;;  %v453_v6 = vpop.f32.mrb[5].mxu0  ;;  %v2648_v46 = vadd.f32 %v3206_v3, %v4372_v0 }
 0x103   : > { %v4321_v8 = vpop.f32.mrb[5].mxu1  ;;  %v4323_v13 = vpop.f32.mrb[6].mxu0  ;;  %v4389_v28 = vadd.f32 %v4372_v0, %v453_v6 }
 0x104   : > { %v3231_v11 = vpop.f32.mrb[6].mxu1  ;;  %v4325_v12 = vpop.f32.mrb[7].mxu0  ;;  %3634 = vtanh.f32 %v2648_v46 }
 0x105   : > { %v4327_v14 = vpop.f32.mrb[7].mxu1  ;;  %676 = vst [vmem:[#allocation2 + $0xe8] sm:$0xff] %v3231_v11 }
 0x106   : > { %v4396_v16 = vpop.eup %3626 }
 0x119   : > { %v4329_v17 = vpop.f32.mrb[8].mxu0 }
 0x11a   : > { %v4331_v19 = vpop.f32.mrb[8].mxu1  ;;  %v4333_v62 = vpop.f32.mrb[9].mxu0 }
 0x11b   : > { %v4335_v20 = vpop.f32.mrb[9].mxu1  ;;  %v4337_v21 = vpop.f32.mrb[10].mxu0 }
 0x11c   : > { %v4339_v22 = vpop.f32.mrb[10].mxu1  ;;  %v4341_v23 = vpop.f32.mrb[11].mxu0 }
 0x11d   : > { %v4343_v25 = vpop.f32.mrb[11].mxu1 }
 0x121   : > { %v4347_v9 = vpop.f32.mrb[12].mxu0 }
 0x122   : > { %v4349_v27 = vpop.f32.mrb[12].mxu1  ;;  %v4351_v29 = vpop.f32.mrb[13].mxu0 }
 0x123   : > { %v4355_v7 = vpop.f32.mrb[13].mxu1  ;;  %v4357_v34 = vpop.f32.mrb[14].mxu0 }
 0x124   : > { %v3279_v18 = vpop.f32.mrb[14].mxu1  ;;  %v4359_v35 = vpop.f32.mrb[15].mxu0 }
 0x125   : > { %v4361_v36 = vpop.f32.mrb[15].mxu1  ;;  %1046 = vst [vmem:[#allocation2 + $0xf8] sm:$0xff] %v3279_v18 }
 0x139   : > { %v3298_v55 = vpop.f32.mrb[16].mxu0 }
 0x13a   : > { %v1354_v63 = vmul.f32 %v3435_v48, %v3298_v55  ;;  %v3322_v3 = vpop.f32.mrb[16].mxu1  ;;  %v1209_v11 = vpop.f32.mrb[17].mxu0 }
 0x13b   : > { %v1682_v61 = vmul.f32 %v3456_v52, %v3322_v3  ;;  %v1352_v18 = vmul.f32 %v3430_v51, %v1209_v11  ;;  %v1537_v10 = vpop.f32.mrb[17].mxu1  ;;  %v3299_v6 = vpop.f32.mrb[18].mxu0  ;;  %v2644_v11 = vadd.f32 %v4372_v0, %v4325_v12 }
 0x13c   : > { %v1362_v40 = vadd.f32 %v4311_v56, %v1354_v63  ;;  %v1680_v43 = vmul.f32 %v3451_v30, %v1537_v10  ;;  %v1355_v15 = vmul.f32 %v3436_v53, %v3299_v6  ;;  %v3323_v24 = vpop.f32.mrb[18].mxu1  ;;  %v1212_v31 = vpop.f32.mrb[19].mxu0 }
 0x13d   : > { %v4399_v42 = vadd.f32 %v4331_v19, %v1682_v61  ;;  %v1360_v37 = vadd.f32 %v1352_v18, %v4313_v58  ;;  %v1683_v44 = vmul.f32 %v3457_v49, %v3323_v24  ;;  %v1353_v46 = vmul.f32 %v3431_v50, %v1212_v31  ;;  %v1540_v47 = vpop.f32.mrb[19].mxu1  ;;  %v4402_v48 = vpop.eup %3628 }
 0x13e   : > { %v2633_v51 = vadd.f32 %v4383_v41, %v1362_v40  ;;  %v4406_v56 = vadd.f32 %v1680_v43, %v4335_v20  ;;  %v1363_v52 = vadd.f32 %v4315_v60, %v1355_v15  ;;  %v1681_v53 = vmul.f32 %v3452_v59, %v1540_v47  ;;  %v4409_v30 = vpop.permute.xlu1 %3484  ;;  %v4411_v55 = vpop.eup %3630 }
 0x13f   : > { %v3466_v19 = vunpack.i.l.bf16 %v4379_v45  ;;  %v2625_v58 = vadd.f32 %v4383_v41, %v1360_v37  ;;  %v4416_v50 = vadd.f32 %v4339_v22, %v1683_v44  ;;  %v1361_v49 = vadd.f32 %v1353_v46, %v4317_v1  ;;  %v3460_v63 = vpop.permute.xlu0 %3459  ;;  %v4419_v3 = vpop.eup %3632 }
 0x140   : > { %3636 = vtanh.f32 %v2633_v51  ;;  %v2637_v60 = vadd.f32 %v4383_v41, %v1363_v52  ;;  %v4423_v20 = vadd.f32 %v1681_v53, %v4343_v25  ;;  %v3461_v59 = vunpack.i.l.bf16 %v3460_v63  ;;  %v4429_v43 = vpop.eup %3634  ;;  %v1311_v52 = vld [vmem:[#allocation2 + $0xe8] sm:$0x7f] }
 0x141   : > { %3638 = vtanh.f32 %v2625_v58  ;;  %v2629_v61 = vadd.f32 %v4383_v41, %v1361_v49  ;;  %v3486_v22 = vunpack.i.l.bf16 %v4409_v30  ;;  %v3302_v18 = vpop.f32.mrb[20].mxu0  ;;  %v3462_v1 = vunpack.i.h.bf16 %v3460_v63 }
 0x142   : > { %3640 = vtanh.f32 %v2637_v60  ;;  %v1358_v10 = vmul.f32 %v3446_v57, %v3302_v18  ;;  %v3326_v6 = vpop.f32.mrb[20].mxu1  ;;  %v1225_v40 = vpop.f32.mrb[21].mxu0 }
 0x143   : > { %3642 = vtanh.f32 %v2629_v61  ;;  %v1686_v25 = vmul.f32 %v3466_v19, %v3326_v6  ;;  %v1356_v15 = vmul.f32 %v3441_v32, %v1225_v40  ;;  %v1553_v24 = vpop.f32.mrb[21].mxu1  ;;  %v3303_v12 = vpop.f32.mrb[22].mxu0  ;;  %v2652_v61 = vadd.f32 %v4323_v13, %v4372_v0 }
 0x144   : > { %v1366_v31 = vadd.f32 %v4319_v5, %v1358_v10  ;;  %v1684_v37 = vmul.f32 %v3461_v59, %v1553_v24  ;;  %v1359_v44 = vmul.f32 %v3447_v54, %v3303_v12  ;;  %v3327_v46 = vpop.f32.mrb[22].mxu1  ;;  %v1228_v47 = vpop.f32.mrb[23].mxu0  ;;  %v1639_v54 = vld [vmem:[#allocation2 + $0xf8] sm:$0x7f]  ;;  %3644 = vtanh.f32 %v4389_v28 }
 0x145   : > { %v4435_v57 = vadd.f32 %v4349_v27, %v1686_v25  ;;  %v1364_v51 = vadd.f32 %v1356_v15, %v4321_v8  ;;  %v1687_v53 = vmul.f32 %v3486_v22, %v3327_v46  ;;  %v1357_v19 = vmul.f32 %v3442_v4, %v1228_v47  ;;  %v1556_v32 = vpop.f32.mrb[23].mxu1 }
 0x146   : > { %v2649_v58 = vadd.f32 %v4383_v41, %v1366_v31  ;;  %v4442_v5 = vadd.f32 %v1684_v37, %v4355_v7  ;;  %v1367_v49 = vadd.f32 %v1359_v44, %v1311_v52  ;;  %v1685_v63 = vmul.f32 %v3462_v1, %v1556_v32  ;;  %v3495_v37 = vpop.permute.xlu1 %3494 }
 0x147   : > { %v2641_v27 = vadd.f32 %v4383_v41, %v1364_v51  ;;  %v1695_v8 = vadd.f32 %v1687_v53, %v1639_v54  ;;  %v1365_v60 = vadd.f32 %v1357_v19, %v4327_v14  ;;  %v4454_v7 = vrot.slane %v4369_v38, %v2614_v2  ;;  %v4464_v2 = vpop.permute.xlu0 %3469 }
 0x148   : > { %3646 = vtanh.f32 %v2649_v58  ;;  %1375 = vst [vmem:[#allocation2 + $0xe8] sm:$0x7f] %v1367_v49  ;;  %v4449_v26 = vadd.f32 %v1685_v63, %v4361_v36  ;;  %v2618_v4 = vsub.s32 3, %v4353_v33  ;;  %v3487_v12 = vunpack.i.h.bf16 %v4409_v30 }
 0x149   : > { %3648 = vtanh.f32 %v2641_v27  ;;  %1703 = vst [vmem:[#allocation2 + $0xf8] sm:$0x7f] %v1695_v8  ;;  %v2645_v28 = vadd.f32 %v4383_v41, %v1365_v60  ;;  %v2654_v18 = vadd.f32 %v4357_v34, %v4454_v7  ;;  %v3467_v44 = vunpack.i.h.bf16 %v4379_v45 }
 0x14a   : > { %v3637_v59 = vpop.eup %3636  ;;  %3650 = vtanh.f32 %v2644_v11  ;;  %v4474_v10 = vrot.slane %v4369_v38, %v2618_v4  ;;  %v3496_v47 = vunpack.i.l.bf16 %v3495_v37  ;;  %v3476_v51 = vunpack.i.l.bf16 %v4391_v39 }
 0x14b   : > { %v3639_v14 = vpop.eup %3638  ;;  %v3064_v36 = vpack.c.bf16 %v3637_v59, %v4396_v16  ;;  %3652 = vtanh.f32 %v2645_v28  ;;  %v3471_v19 = vunpack.i.l.bf16 %v4464_v2 }
 0x14c   : > { %v3641_v33 = vpop.eup %3640  ;;  %v3060_v11 = vpack.c.bf16 %v3639_v14, %v4402_v48  ;;  %3654 = vtanh.f32 %v2652_v61 }
 0x14d   : > { %v3643_v22 = vpop.eup %3642  ;;  %2788 = vst [vmem:[%s4461_s23 + $0x20] sm:$0xff] %v3064_v36  ;;  %v3066_v1 = vpack.c.bf16 %v3641_v33, %v4411_v55  ;;  %3656 = vtanh.f32 %v2654_v18  ;;  %v4482_v55 = vpop.permute.xlu0 %3479 }
 0x14e   : > { %2784 = vst [vmem:[%s4461_s23] sm:$0xff] %v3060_v11  ;;  %v3062_v16 = vpack.c.bf16 %v3643_v22, %v4419_v3  ;;  %v3645_v48 = vpop.eup %3644 }
 0x14f   : > { %2790 = vst [vmem:[%s4461_s23 + $0x30] sm:$0xff] %v3066_v1  ;;  %v2599_v6 = vld [vmem:[#allocation2 + $0xe8] sm:$0xff] }
 0x150   : > { %2786 = vst [vmem:[%s4461_s23 + $0x10] sm:$0xff] %v3062_v16  ;;  %v2653_v13 = vadd.f32 %v4383_v41, %v2599_v6  ;;  %v2601_v0 = vld [vmem:[#allocation2 + $0xf8] sm:$0xff]  ;;  %v3497_v16 = vunpack.i.h.bf16 %v3495_v37 }
 0x151   : > { %v2655_v34 = vadd.f32 %v4474_v10, %v2601_v0  ;;  %v3490_v31 = vpop.permute.xlu0 %3489 }
 0x152   : > { %v3647_v38 = vpop.eup %3646  ;;  %3658 = vtanh.f32 %v2653_v13  ;;  %v3492_v46 = vunpack.i.h.bf16 %v3490_v31  ;;  %v3491_v60 = vunpack.i.l.bf16 %v3490_v31 }
 0x153   : > { %v3649_v40 = vpop.eup %3648  ;;  %v3072_v3 = vpack.c.bf16 %v3647_v38, %v4429_v43  ;;  %3660 = vtanh.f32 %v2655_v34  ;;  %v3472_v43 = vunpack.i.h.bf16 %v4464_v2  ;;  %v3482_v38 = vunpack.i.h.bf16 %v4482_v55 }
 0x154   : > { %v3651_v25 = vpop.eup %3650  ;;  %v3068_v15 = vpack.c.bf16 %v3649_v40, %v3645_v48 }
 0x155   : > { %v3653_v24 = vpop.eup %3652  ;;  %2796 = vst [vmem:[%s4461_s23 + $0x60] sm:$0xff] %v3072_v3  ;;  %v3500_v13 = vpop.permute.xlu0 %3499 }
 0x156   : > { %2792 = vst [vmem:[%s4461_s23 + $0x40] sm:$0xff] %v3068_v15  ;;  %v3070_v41 = vpack.c.bf16 %v3653_v24, %v3651_v25  ;;  %v3655_v53 = vpop.eup %3654  ;;  %v3501_v24 = vunpack.i.l.bf16 %v3500_v13 }
 0x157   : > { %v3657_v54 = vpop.eup %3656 }
 0x158   : > { %2794 = vst [vmem:[%s4461_s23 + $0x50] sm:$0xff] %v3070_v41 }
 0x159   : > { %v3346_v52 = vpop.f32.mrb[24].mxu0 }
 0x15a   : > { %v1961_v32 = vmul.f32 %v3492_v46, %v3346_v52  ;;  %v3370_v58 = vpop.f32.mrb[24].mxu1  ;;  %v1831_v49 = vpop.f32.mrb[25].mxu0 }
 0x15b   : > { %v2237_v30 = vmul.f32 %v3472_v43, %v3370_v58  ;;  %v1959_v63 = vmul.f32 %v3487_v12, %v1831_v49  ;;  %v2107_v27 = vpop.f32.mrb[25].mxu1  ;;  %v3347_v8 = vpop.f32.mrb[26].mxu0 }
 0x15c   : > { %v3659_v45 = vpop.eup %3658  ;;  %v1968_v4 = vadd.f32 %v4329_v17, %v1961_v32  ;;  %v2235_v28 = vmul.f32 %v3467_v44, %v2107_v27  ;;  %v1962_v59 = vmul.f32 %v3496_v47, %v3347_v8  ;;  %v3371_v14 = vpop.f32.mrb[26].mxu1 }
 0x15d   : > { %v1834_v36 = vpop.f32.mrb[27].mxu0  ;;  %v3661_v33 = vpop.eup %3660  ;;  %v3074_v2 = vpack.c.bf16 %v3659_v45, %v3655_v53  ;;  %v4495_v61 = vadd.f32 %v2237_v30, %v4399_v42  ;;  %v1966_v11 = vadd.f32 %v1959_v63, %v4333_v62  ;;  %v2238_v22 = vmul.f32 %v3476_v51, %v3371_v14 }
 0x15e   : > { %v2110_v18 = vpop.f32.mrb[27].mxu1  ;;  %v3075_v1 = vpack.c.bf16 %v3661_v33, %v3657_v54  ;;  %v4499_v6 = vadd.f32 %v2235_v28, %v4406_v56  ;;  %v1969_v17 = vadd.f32 %v4337_v21, %v1962_v59  ;;  %v1960_v48 = vmul.f32 %v3491_v60, %v1834_v36  ;;  %v3505_v32 = vpop.permute.xlu1 %3504 }
 0x15f   : > { %2798 = vst [vmem:[%s4461_s23 + $0x70] sm:$0xff] %v3074_v2  ;;  %v4504_v0 = vadd.f32 %v2238_v22, %v4416_v50  ;;  %v2236_v34 = vmul.f32 %v3471_v19, %v2110_v18  ;;  %v3477_v42 = vunpack.i.h.bf16 %v4391_v39  ;;  %v3502_v62 = vunpack.i.h.bf16 %v3500_v13 }
 0x160   : > { %2799 = vst [vmem:[%s4461_s23 + $0x78] sm:$0xff] %v3075_v1  ;;  %v1967_v40 = vadd.f32 %v1960_v48, %v4341_v23  ;;  %v3481_v39 = vunpack.i.l.bf16 %v4482_v55  ;;  %v2634_v58 = vadd.f32 %v4454_v7, %v1968_v4  ;;  %v2626_v54 = vadd.f32 %v4454_v7, %v1966_v11 }
 0x161   : > { %v4511_v56 = vadd.f32 %v2236_v34, %v4423_v20  ;;  %v3350_v3 = vpop.f32.mrb[28].mxu0  ;;  %v3507_v30 = vunpack.i.h.bf16 %v3505_v32 }
 0x162   : > { %v1965_v21 = vmul.f32 %v3502_v62, %v3350_v3  ;;  %v3374_v25 = vpop.f32.mrb[28].mxu1  ;;  %v1847_v15 = vpop.f32.mrb[29].mxu0  ;;  %v2630_v63 = vadd.f32 %v4454_v7, %v1967_v40  ;;  %3662 = vtanh.f32 %v2634_v58 }
 0x163   : > { %v2241_v50 = vmul.f32 %v3482_v38, %v3374_v25  ;;  %v1963_v41 = vmul.f32 %v3497_v16, %v1847_v15  ;;  %v2123_v12 = vpop.f32.mrb[29].mxu1  ;;  %v3351_v31 = vpop.f32.mrb[30].mxu0  ;;  %3664 = vtanh.f32 %v2626_v54 }
 0x164   : > { %v4515_v37 = vadd.f32 %v4347_v9, %v1965_v21  ;;  %v2239_v44 = vmul.f32 %v3477_v42, %v2123_v12  ;;  %v3375_v46 = vpop.f32.mrb[30].mxu1  ;;  %v1850_v23 = vpop.f32.mrb[31].mxu0 }
 0x165   : > { %v2248_v20 = vadd.f32 %v2241_v50, %v4435_v57  ;;  %v1970_v47 = vadd.f32 %v1963_v41, %v4351_v29  ;;  %v1964_v51 = vmul.f32 %v3501_v24, %v1850_v23  ;;  %v2126_v43 = vpop.f32.mrb[31].mxu1  ;;  %v3510_v9 = vpop.permute.xlu0 %3509  ;;  %v2638_v57 = vadd.f32 %v4454_v7, %v1969_v17 }
 0x166   : > { %v2246_v52 = vadd.f32 %v2239_v44, %v4442_v5  ;;  %v2240_v53 = vmul.f32 %v3481_v39, %v2126_v43  ;;  %v3515_v49 = vpop.permute.xlu1 %3514  ;;  %v3511_v29 = vunpack.i.l.bf16 %v3510_v9  ;;  %v3506_v5 = vunpack.i.l.bf16 %v3505_v32 }
 0x167   : > { %2255 = vst [vmem:[#allocation2 + $0xd8] sm:$0xff] %v2248_v20  ;;  %v1971_v19 = vadd.f32 %v1964_v51, %v4359_v35  ;;  %v3517_v8 = vunpack.i.h.bf16 %v3515_v49  ;;  %v2642_v35 = vadd.f32 %v4454_v7, %v1970_v47  ;;  %v3512_v45 = vunpack.i.h.bf16 %v3510_v9 }
 0x168   : > { %v2247_v55 = vadd.f32 %v2240_v53, %v4449_v26  ;;  %v3516_v60 = vunpack.i.l.bf16 %v3515_v49  ;;  %3666 = vtanh.f32 %v2638_v57  ;;  %v2650_v31 = vadd.f32 %v4454_v7, %v4515_v37 }
 0x169   : > { %v2547_v27 = vpop.permute.xlu0 %2546  ;;  %v2646_v14 = vadd.f32 %v4454_v7, %v1971_v19  ;;  %3668 = vtanh.f32 %v2630_v63 }
 0x16a   : > { %3670 = vtanh.f32 %v2642_v35 }
 0x16b   : > { %3672 = vtanh.f32 %v2646_v14 }
 0x16e   : > { %v2513_v18 = vld [vmem:[#allocation2 + $0xd8] sm:$0x7f] }
 0x179   : > { %v3394_v26 = vpop.f32.mrb[32].mxu0 }
 0x17a   : > { %v2551_v4 = vmul.f32 %v3511_v29, %v3394_v26  ;;  %v3398_v28 = vpop.f32.mrb[32].mxu1  ;;  %v2414_v59 = vpop.f32.mrb[33].mxu0 }
 0x17b   : > { %v2555_v36 = vmul.f32 %v3398_v28, %v2547_v27  ;;  %v2549_v33 = vmul.f32 %v3506_v5, %v2414_v59  ;;  %v2430_v2 = vpop.f32.mrb[33].mxu1  ;;  %v3395_v11 = vpop.f32.mrb[34].mxu0 }
 0x17c   : > { %v2558_v22 = vadd.f32 %v2551_v4, %v4495_v61  ;;  %v2553_v1 = vmul.f32 %v3516_v60, %v2430_v2  ;;  %v2552_v16 = vmul.f32 %v3512_v45, %v3395_v11  ;;  %v3399_v17 = vpop.f32.mrb[34].mxu1  ;;  %v2417_v13 = vpop.f32.mrb[35].mxu0 }
 0x17d   : > { %v2562_v48 = vadd.f32 %v2555_v36, %v2513_v18  ;;  %v2556_v34 = vadd.f32 %v2549_v33, %v4499_v6  ;;  %v2550_v42 = vmul.f32 %v3507_v30, %v2417_v13  ;;  %v2433_v62 = vpop.f32.mrb[35].mxu1 }
 0x17e   : > { %v2635_v38 = vadd.f32 %v4474_v10, %v2558_v22  ;;  %v2560_v40 = vadd.f32 %v2553_v1, %v2246_v52  ;;  %v2559_v3 = vadd.f32 %v2552_v16, %v4504_v0  ;;  %v2554_v21 = vmul.f32 %v3517_v8, %v2433_v62  ;;  %v3663_v0 = vpop.eup %3662 }
 0x17f   : > { %2569 = vst [vmem:[#allocation2 + $0xd8] sm:$0x7f] %v2562_v48  ;;  %v2627_v61 = vadd.f32 %v4474_v10, %v2556_v34  ;;  %v2557_v25 = vadd.f32 %v2550_v42, %v4511_v56  ;;  %v3665_v12 = vpop.eup %3664 }
 0x180   : > { %3674 = vtanh.f32 %v2635_v38  ;;  %v2643_v15 = vadd.f32 %v4474_v10, %v2560_v40  ;;  %v2639_v24 = vadd.f32 %v4474_v10, %v2559_v3  ;;  %v2561_v6 = vadd.f32 %v2554_v21, %v2247_v55  ;;  %v3667_v56 = vpop.eup %3666 }
 0x181   : > { %3676 = vtanh.f32 %v2627_v61  ;;  %v2631_v50 = vadd.f32 %v4474_v10, %v2557_v25  ;;  %v3669_v39 = vpop.eup %3668 }
 0x182   : > { %3678 = vtanh.f32 %v2643_v15  ;;  %v2647_v41 = vadd.f32 %v4474_v10, %v2561_v6  ;;  %v3671_v46 = vpop.eup %3670 }
 0x183   : > { %3680 = vtanh.f32 %v2639_v24  ;;  %v3673_v20 = vpop.eup %3672 }
 0x184   : > { %3682 = vtanh.f32 %v2631_v50 }
 0x185   : > { %3684 = vtanh.f32 %v2647_v41 }
 0x186   : > { %v2597_v44 = vld [vmem:[#allocation2 + $0xd8] sm:$0xff]  ;;  %3686 = vtanh.f32 %v2650_v31 }
 0x187   : > { %v2651_v23 = vadd.f32 %v4474_v10, %v2597_v44 }
 0x189   : > { %3688 = vtanh.f32 %v2651_v23 }
 0x18a   : > { %v3675_v47 = vpop.eup %3674 }
 0x18b   : > { %v3677_v51 = vpop.eup %3676  ;;  %v3065_v43 = vpack.c.bf16 %v3675_v47, %v3663_v0 }
 0x18c   : > { %v3679_v7 = vpop.eup %3678  ;;  %v3061_v37 = vpack.c.bf16 %v3677_v51, %v3665_v12 }
 0x18d   : > { %v3681_v52 = vpop.eup %3680  ;;  %2789 = vst [vmem:[%s4461_s23 + $0x28] sm:$0xff] %v3065_v43  ;;  %v3069_v53 = vpack.c.bf16 %v3679_v7, %v3671_v46 }
 0x18e   : > { %v3683_v19 = vpop.eup %3682  ;;  %2785 = vst [vmem:[%s4461_s23 + $0x8] sm:$0xff] %v3061_v37  ;;  %v3067_v55 = vpack.c.bf16 %v3681_v52, %v3667_v56 }
 0x18f   : > { %v3685_v10 = vpop.eup %3684  ;;  %2793 = vst [vmem:[%s4461_s23 + $0x48] sm:$0xff] %v3069_v53  ;;  %v3063_v32 = vpack.c.bf16 %v3683_v19, %v3669_v39 }
 0x190   : > { %2791 = vst [vmem:[%s4461_s23 + $0x38] sm:$0xff] %v3067_v55  ;;  %v3071_v9 = vpack.c.bf16 %v3685_v10, %v3673_v20  ;;  %v3687_v58 = vpop.eup %3686 }
 0x191   : > { %2787 = vst [vmem:[%s4461_s23 + $0x18] sm:$0xff] %v3063_v32 }
 0x192   : > { %2795 = vst [vmem:[%s4461_s23 + $0x58] sm:$0xff] %v3071_v9 }
 0x193   : > { %v3689_v49 = vpop.eup %3688 }
 0x194   : > { %v3073_v54 = vpack.c.bf16 %v3689_v49, %v3687_v58 }
 0x196   : > { %2797 = vst [vmem:[%s4461_s23 + $0x68] sm:$0xff] %v3073_v54 }
 0x197 PF: > { %s15_s18 = sadd.s32 1, %s3696_s18  }
 0x198   : > { %p12_p4 = scmp.ge.s32.totalorder %s15_s18, 4  }
 0x19a   :  { %14 = sbr.rel (!%p12_p4) target bundleno = 1 (0x1), region = 76 }

</bundles_post_ra>
